<compile_context>
chip_gen: v6e
topology: v6e:2x2x1
jax: 0.10.0
libtpu: 0.0.40
codegen_flags: <defaults>
</compile_context>

<pallas_src>
import functools

import jax
import jax.numpy as jnp
from jax.experimental import pallas as pl
from jax.experimental.pallas import tpu as pltpu


def _relu_dilconv_kernel(x_ref, w_ref, o_ref, acc_ref, *,
                         rows_per_step, w_out, wp, c_out, kh, kw, dil):
    # x_ref:   (1, Hp, Wp, Cin)    full padded image (bf16), resident in VMEM
    # w_ref:   (KH, KW, Cin, Cout) full weight (bf16), resident in VMEM
    # o_ref:   (1, T, W, Cout)     T output rows for this grid step
    # acc_ref: (T*Wp, Cout) f32    per-column-tap matmul accumulator (VMEM scratch)
    T = rows_per_step
    row0 = pl.program_id(0) * T

    # ReLU once per row tap (ih).  Keep the full padded width so the (T, Wp) -> (T*Wp)
    # flatten is a free, layout-preserving reshape (Wp is a multiple of 8).
    slabs = []
    for ih in range(kh):
        s = x_ref[0, pl.ds(row0 + ih * dil, T), :, :]          # (T, Wp, Cin)
        s = jnp.maximum(s, 0)                                   # fused ReLU
        slabs.append(s.reshape(T * wp, s.shape[-1]))            # (T*Wp, Cin)

    out_acc = None
    for iw in range(kw):
        # Fat MXU matmuls: M = T*Wp rows per tap, f32 accumulation in VMEM scratch.
        acc_ref[...] = jnp.dot(slabs[0], w_ref[0, iw],
                               preferred_element_type=jnp.float32)
        for ih in range(1, kh):
            acc_ref[...] += jnp.dot(slabs[ih], w_ref[ih, iw],
                                    preferred_element_type=jnp.float32)
        # Select the valid output columns for this column tap (one sliced read per
        # tap, amortized over all T rows of the block).
        part = acc_ref[...].reshape(T, wp, c_out)[:, iw * dil: iw * dil + w_out, :]
        out_acc = part if out_acc is None else out_acc + part

    o_ref[...] = out_acc.reshape(1, T, w_out, c_out).astype(o_ref.dtype)


def relu_dilated_conv2d(x_nchw, w_oihw, *, dilation=2, padding=2,
                        compute_dtype=jnp.bfloat16):
    """ReLU followed by a dilated 3x3 conv (stride 1, no bias), PyTorch semantics."""
    n, c_in, h, w = x_nchw.shape
    c_out, c_in_w, kh, kw = w_oihw.shape
    assert c_in == c_in_w
    assert n == 1  # module operates on batch 1

    h_out = h + 2 * padding - dilation * (kh - 1)   # = h for these params
    w_out = w + 2 * padding - dilation * (kw - 1)   # = w
    hp, wp = h + 2 * padding, w + 2 * padding

    # NCHW -> NHWC, zero-pad spatial dims (pad commutes with ReLU since relu(0)=0),
    # cast to bf16 for the MXU.
    x_nhwc = jnp.transpose(x_nchw.astype(compute_dtype), (0, 2, 3, 1))
    x_pad = jnp.pad(x_nhwc, ((0, 0), (padding, padding), (padding, padding), (0, 0)))

    # (Cout, Cin, KH, KW) -> (KH, KW, Cin, Cout), bf16.
    w_hwio = jnp.transpose(w_oihw.astype(compute_dtype), (2, 3, 1, 0))

    # A couple of parallel row-blocks: negligible grid overhead, and v7x can shard
    # the two blocks across its 2 TensorCores.
    n_steps = 2 if h_out % 2 == 0 else 1
    t_rows = h_out // n_steps

    kernel = functools.partial(
        _relu_dilconv_kernel,
        rows_per_step=t_rows, w_out=w_out, wp=wp, c_out=c_out,
        kh=kh, kw=kw, dil=dilation)

    flops = 2 * kh * kw * h_out * w_out * c_in * c_out * n
    bytes_accessed = (x_pad.size * x_pad.dtype.itemsize
                      + w_hwio.size * w_hwio.dtype.itemsize
                      + n * h_out * w_out * c_out * jnp.dtype(x_nchw.dtype).itemsize)

    out_nhwc = pl.pallas_call(
        kernel,
        out_shape=jax.ShapeDtypeStruct((n, h_out, w_out, c_out), x_nchw.dtype),
        grid_spec=pltpu.PrefetchScalarGridSpec(
            num_scalar_prefetch=0,
            grid=(n_steps,),
            in_specs=[
                # full padded image, resident in VMEM across all grid steps
                pl.BlockSpec((n, hp, wp, c_in), lambda i: (0, 0, 0, 0)),
                # full weight, resident in VMEM
                pl.BlockSpec((kh, kw, c_in, c_out), lambda i: (0, 0, 0, 0)),
            ],
            out_specs=pl.BlockSpec((n, t_rows, w_out, c_out), lambda i: (0, i, 0, 0)),
            scratch_shapes=[pltpu.VMEM((t_rows * wp, c_out), jnp.float32)],
        ),
        compiler_params=pltpu.CompilerParams(
            dimension_semantics=("parallel",),
        ),
        cost_estimate=pl.CostEstimate(
            flops=flops, transcendentals=0, bytes_accessed=bytes_accessed),
    )(x_pad, w_hwio)

    # NHWC -> NCHW
    return jnp.transpose(out_nhwc, (0, 3, 1, 2))


if __name__ == "__main__":
    # Shapes implied by the module: x104 ~ [1, 256, 28, 28], weight [256, 256, 3, 3]
    key = jax.random.PRNGKey(0)
    kx, kw_key = jax.random.split(key)

    N, C, H, W = 1, 256, 28, 28
    COUT, KH, KW = 256, 3, 3

    x = jax.random.normal(kx, (N, C, H, W), dtype=jnp.float32)
    # deterministic kaiming-style init for the conv weight (bias=False)
    fan_in = C * KH * KW
    w = jax.random.normal(kw_key, (COUT, C, KH, KW), dtype=jnp.float32) * jnp.sqrt(2.0 / fan_in)

    out = jax.jit(relu_dilated_conv2d)(x, w)
    out = jax.block_until_ready(out)
    assert out.shape == (N, COUT, H, W), out.shape

    # Reference: same bf16 rounding of the operands as the kernel's MXU path,
    # f32 accumulation (matches kernel numerics apples-to-apples).
    ref = jax.lax.conv_general_dilated(
        jnp.maximum(x, 0.0).astype(jnp.bfloat16), w.astype(jnp.bfloat16),
        window_strides=(1, 1), padding=((2, 2), (2, 2)),
        rhs_dilation=(2, 2),
        dimension_numbers=("NCHW", "OIHW", "NCHW"),
        preferred_element_type=jnp.float32,
    )
    max_err = float(jnp.max(jnp.abs(out - ref)))
    assert jnp.allclose(out, ref, rtol=1e-2, atol=1e-2), max_err

    print("KERNEL_OK")
</pallas_src>

<mosaic_0001>
module attributes {stable_mosaic.version = 11 : i64} {
  func.func @_relu_dilconv_kernel(%arg0: i32, %arg1: memref<1x32x32x256xbf16, #tpu.memory_space<vmem>>, %arg2: memref<3x3x256x256xbf16, #tpu.memory_space<vmem>>, %arg3: memref<1x14x28x256xf32, #tpu.memory_space<vmem>>, %arg4: memref<448x256xf32, #tpu.memory_space<vmem>>) attributes {dimension_semantics = [#tpu.dimension_semantics<parallel>], iteration_bounds = array<i64: 2>, scalar_prefetch = 0 : i64, scratch_operands = 1 : i64, tpu.core_type = #tpu.core_type<tc>, window_params = [{pipeline_mode = #tpu.pipeline_mode<synchronous>, transform_indices = @transform_0, window_bounds = array<i64: 1, 32, 32, 256>}, {pipeline_mode = #tpu.pipeline_mode<synchronous>, transform_indices = @transform_1, window_bounds = array<i64: 3, 3, 256, 256>}, {transform_indices = @transform_2, window_bounds = array<i64: 1, 14, 28, 256>}]} {
    %c14_i32 = arith.constant 14 : i32
    %0 = arith.muli %arg0, %c14_i32 : i32
    %c0_i32 = arith.constant 0 : i32
    %1 = arith.addi %0, %c0_i32 : i32
    %c0 = arith.constant 0 : index
    %2 = arith.index_cast %1 : i32 to index
    %c0_0 = arith.constant 0 : index
    %c0_1 = arith.constant 0 : index
    %3 = vector.load %arg1[%c0, %2, %c0_0, %c0_1] : memref<1x32x32x256xbf16, #tpu.memory_space<vmem>>, vector<1x14x32x256xbf16>
    %4 = vector.shape_cast %3 : vector<1x14x32x256xbf16> to vector<14x32x256xbf16>
    %cst = arith.constant 0.000000e+00 : bf16
    %5 = vector.broadcast %cst : bf16 to vector<14x32x256xbf16>
    %6 = arith.maximumf %4, %5 : vector<14x32x256xbf16>
    %7 = vector.shape_cast %6 : vector<14x32x256xbf16> to vector<448x256xbf16>
    %c2_i32 = arith.constant 2 : i32
    %8 = arith.addi %0, %c2_i32 : i32
    %c0_2 = arith.constant 0 : index
    %9 = arith.index_cast %8 : i32 to index
    %c0_3 = arith.constant 0 : index
    %c0_4 = arith.constant 0 : index
    %10 = vector.load %arg1[%c0_2, %9, %c0_3, %c0_4] : memref<1x32x32x256xbf16, #tpu.memory_space<vmem>>, vector<1x14x32x256xbf16>
    %11 = vector.shape_cast %10 : vector<1x14x32x256xbf16> to vector<14x32x256xbf16>
    %cst_5 = arith.constant 0.000000e+00 : bf16
    %12 = vector.broadcast %cst_5 : bf16 to vector<14x32x256xbf16>
    %13 = arith.maximumf %11, %12 : vector<14x32x256xbf16>
    %14 = vector.shape_cast %13 : vector<14x32x256xbf16> to vector<448x256xbf16>
    %c4_i32 = arith.constant 4 : i32
    %15 = arith.addi %0, %c4_i32 : i32
    %c0_6 = arith.constant 0 : index
    %16 = arith.index_cast %15 : i32 to index
    %c0_7 = arith.constant 0 : index
    %c0_8 = arith.constant 0 : index
    %17 = vector.load %arg1[%c0_6, %16, %c0_7, %c0_8] : memref<1x32x32x256xbf16, #tpu.memory_space<vmem>>, vector<1x14x32x256xbf16>
    %18 = vector.shape_cast %17 : vector<1x14x32x256xbf16> to vector<14x32x256xbf16>
    %cst_9 = arith.constant 0.000000e+00 : bf16
    %19 = vector.broadcast %cst_9 : bf16 to vector<14x32x256xbf16>
    %20 = arith.maximumf %18, %19 : vector<14x32x256xbf16>
    %21 = vector.shape_cast %20 : vector<14x32x256xbf16> to vector<448x256xbf16>
    %c0_10 = arith.constant 0 : index
    %c0_11 = arith.constant 0 : index
    %c0_12 = arith.constant 0 : index
    %c0_13 = arith.constant 0 : index
    %22 = vector.load %arg2[%c0_10, %c0_11, %c0_12, %c0_13] : memref<3x3x256x256xbf16, #tpu.memory_space<vmem>>, vector<1x1x256x256xbf16>
    %23 = vector.shape_cast %22 : vector<1x1x256x256xbf16> to vector<256x256xbf16>
    %cst_14 = arith.constant dense<0.000000e+00> : vector<448x256xf32>
    %24 = tpu.matmul %7, %23, %cst_14 {dimension_numbers = #tpu.dot_dimension_numbers<[1], [0], [0], [1], [0, 0, 1, 1], [], []>} : vector<448x256xbf16>, vector<256x256xbf16>, vector<448x256xf32> -> vector<448x256xf32>
    %c0_15 = arith.constant 0 : index
    %c0_16 = arith.constant 0 : index
    %25 = vector.load %arg4[%c0_15, %c0_16] : memref<448x256xf32, #tpu.memory_space<vmem>>, vector<448x256xf32>
    tpu.vector_store %arg4[%c0_15, %c0_16], %24 {strides = array<i32>} : memref<448x256xf32, #tpu.memory_space<vmem>>, vector<448x256xf32>,
    %c0_17 = arith.constant 0 : index
    %c0_18 = arith.constant 0 : index
    %26 = vector.load %arg4[%c0_17, %c0_18] : memref<448x256xf32, #tpu.memory_space<vmem>>, vector<448x256xf32>
    %c1 = arith.constant 1 : index
    %c0_19 = arith.constant 0 : index
    %c0_20 = arith.constant 0 : index
    %c0_21 = arith.constant 0 : index
    %27 = vector.load %arg2[%c1, %c0_19, %c0_20, %c0_21] : memref<3x3x256x256xbf16, #tpu.memory_space<vmem>>, vector<1x1x256x256xbf16>
    %28 = vector.shape_cast %27 : vector<1x1x256x256xbf16> to vector<256x256xbf16>
    %cst_22 = arith.constant dense<0.000000e+00> : vector<448x256xf32>
    %29 = tpu.matmul %14, %28, %cst_22 {dimension_numbers = #tpu.dot_dimension_numbers<[1], [0], [0], [1], [0, 0, 1, 1], [], []>} : vector<448x256xbf16>, vector<256x256xbf16>, vector<448x256xf32> -> vector<448x256xf32>
    %30 = arith.addf %26, %29 : vector<448x256xf32>
    %c0_23 = arith.constant 0 : index
    %c0_24 = arith.constant 0 : index
    %31 = vector.load %arg4[%c0_23, %c0_24] : memref<448x256xf32, #tpu.memory_space<vmem>>, vector<448x256xf32>
    tpu.vector_store %arg4[%c0_23, %c0_24], %30 {strides = array<i32>} : memref<448x256xf32, #tpu.memory_space<vmem>>, vector<448x256xf32>,
    %c0_25 = arith.constant 0 : index
    %c0_26 = arith.constant 0 : index
    %32 = vector.load %arg4[%c0_25, %c0_26] : memref<448x256xf32, #tpu.memory_space<vmem>>, vector<448x256xf32>
    %c2 = arith.constant 2 : index
    %c0_27 = arith.constant 0 : index
    %c0_28 = arith.constant 0 : index
    %c0_29 = arith.constant 0 : index
    %33 = vector.load %arg2[%c2, %c0_27, %c0_28, %c0_29] : memref<3x3x256x256xbf16, #tpu.memory_space<vmem>>, vector<1x1x256x256xbf16>
    %34 = vector.shape_cast %33 : vector<1x1x256x256xbf16> to vector<256x256xbf16>
    %cst_30 = arith.constant dense<0.000000e+00> : vector<448x256xf32>
    %35 = tpu.matmul %21, %34, %cst_30 {dimension_numbers = #tpu.dot_dimension_numbers<[1], [0], [0], [1], [0, 0, 1, 1], [], []>} : vector<448x256xbf16>, vector<256x256xbf16>, vector<448x256xf32> -> vector<448x256xf32>
    %36 = arith.addf %32, %35 : vector<448x256xf32>
    %c0_31 = arith.constant 0 : index
    %c0_32 = arith.constant 0 : index
    %37 = vector.load %arg4[%c0_31, %c0_32] : memref<448x256xf32, #tpu.memory_space<vmem>>, vector<448x256xf32>
    tpu.vector_store %arg4[%c0_31, %c0_32], %36 {strides = array<i32>} : memref<448x256xf32, #tpu.memory_space<vmem>>, vector<448x256xf32>,
    %c0_33 = arith.constant 0 : index
    %c0_34 = arith.constant 0 : index
    %38 = vector.load %arg4[%c0_33, %c0_34] : memref<448x256xf32, #tpu.memory_space<vmem>>, vector<448x256xf32>
    %39 = vector.shape_cast %38 : vector<448x256xf32> to vector<14x32x256xf32>
    %40 = vector.extract_strided_slice %39 {offsets = [0, 0, 0], sizes = [14, 28, 256], strides = [1, 1, 1]} : vector<14x32x256xf32> to vector<14x28x256xf32>
    %c0_35 = arith.constant 0 : index
    %c1_36 = arith.constant 1 : index
    %c0_37 = arith.constant 0 : index
    %c0_38 = arith.constant 0 : index
    %41 = vector.load %arg2[%c0_35, %c1_36, %c0_37, %c0_38] : memref<3x3x256x256xbf16, #tpu.memory_space<vmem>>, vector<1x1x256x256xbf16>
    %42 = vector.shape_cast %41 : vector<1x1x256x256xbf16> to vector<256x256xbf16>
    %cst_39 = arith.constant dense<0.000000e+00> : vector<448x256xf32>
    %43 = tpu.matmul %7, %42, %cst_39 {dimension_numbers = #tpu.dot_dimension_numbers<[1], [0], [0], [1], [0, 0, 1, 1], [], []>} : vector<448x256xbf16>, vector<256x256xbf16>, vector<448x256xf32> -> vector<448x256xf32>
    %c0_40 = arith.constant 0 : index
    %c0_41 = arith.constant 0 : index
    %44 = vector.load %arg4[%c0_40, %c0_41] : memref<448x256xf32, #tpu.memory_space<vmem>>, vector<448x256xf32>
    tpu.vector_store %arg4[%c0_40, %c0_41], %43 {strides = array<i32>} : memref<448x256xf32, #tpu.memory_space<vmem>>, vector<448x256xf32>,
    %c0_42 = arith.constant 0 : index
    %c0_43 = arith.constant 0 : index
    %45 = vector.load %arg4[%c0_42, %c0_43] : memref<448x256xf32, #tpu.memory_space<vmem>>, vector<448x256xf32>
    %c1_44 = arith.constant 1 : index
    %c1_45 = arith.constant 1 : index
    %c0_46 = arith.constant 0 : index
    %c0_47 = arith.constant 0 : index
    %46 = vector.load %arg2[%c1_44, %c1_45, %c0_46, %c0_47] : memref<3x3x256x256xbf16, #tpu.memory_space<vmem>>, vector<1x1x256x256xbf16>
    %47 = vector.shape_cast %46 : vector<1x1x256x256xbf16> to vector<256x256xbf16>
    %cst_48 = arith.constant dense<0.000000e+00> : vector<448x256xf32>
    %48 = tpu.matmul %14, %47, %cst_48 {dimension_numbers = #tpu.dot_dimension_numbers<[1], [0], [0], [1], [0, 0, 1, 1], [], []>} : vector<448x256xbf16>, vector<256x256xbf16>, vector<448x256xf32> -> vector<448x256xf32>
    %49 = arith.addf %45, %48 : vector<448x256xf32>
    %c0_49 = arith.constant 0 : index
    %c0_50 = arith.constant 0 : index
    %50 = vector.load %arg4[%c0_49, %c0_50] : memref<448x256xf32, #tpu.memory_space<vmem>>, vector<448x256xf32>
    tpu.vector_store %arg4[%c0_49, %c0_50], %49 {strides = array<i32>} : memref<448x256xf32, #tpu.memory_space<vmem>>, vector<448x256xf32>,
    %c0_51 = arith.constant 0 : index
    %c0_52 = arith.constant 0 : index
    %51 = vector.load %arg4[%c0_51, %c0_52] : memref<448x256xf32, #tpu.memory_space<vmem>>, vector<448x256xf32>
    %c2_53 = arith.constant 2 : index
    %c1_54 = arith.constant 1 : index
    %c0_55 = arith.constant 0 : index
    %c0_56 = arith.constant 0 : index
    %52 = vector.load %arg2[%c2_53, %c1_54, %c0_55, %c0_56] : memref<3x3x256x256xbf16, #tpu.memory_space<vmem>>, vector<1x1x256x256xbf16>
    %53 = vector.shape_cast %52 : vector<1x1x256x256xbf16> to vector<256x256xbf16>
    %cst_57 = arith.constant dense<0.000000e+00> : vector<448x256xf32>
    %54 = tpu.matmul %21, %53, %cst_57 {dimension_numbers = #tpu.dot_dimension_numbers<[1], [0], [0], [1], [0, 0, 1, 1], [], []>} : vector<448x256xbf16>, vector<256x256xbf16>, vector<448x256xf32> -> vector<448x256xf32>
    %55 = arith.addf %51, %54 : vector<448x256xf32>
    %c0_58 = arith.constant 0 : index
    %c0_59 = arith.constant 0 : index
    %56 = vector.load %arg4[%c0_58, %c0_59] : memref<448x256xf32, #tpu.memory_space<vmem>>, vector<448x256xf32>
    tpu.vector_store %arg4[%c0_58, %c0_59], %55 {strides = array<i32>} : memref<448x256xf32, #tpu.memory_space<vmem>>, vector<448x256xf32>,
    %c0_60 = arith.constant 0 : index
    %c0_61 = arith.constant 0 : index
    %57 = vector.load %arg4[%c0_60, %c0_61] : memref<448x256xf32, #tpu.memory_space<vmem>>, vector<448x256xf32>
    %58 = vector.shape_cast %57 : vector<448x256xf32> to vector<14x32x256xf32>
    %59 = vector.extract_strided_slice %58 {offsets = [0, 2, 0], sizes = [14, 28, 256], strides = [1, 1, 1]} : vector<14x32x256xf32> to vector<14x28x256xf32>
    %60 = arith.addf %40, %59 : vector<14x28x256xf32>
    %c0_62 = arith.constant 0 : index
    %c2_63 = arith.constant 2 : index
    %c0_64 = arith.constant 0 : index
    %c0_65 = arith.constant 0 : index
    %61 = vector.load %arg2[%c0_62, %c2_63, %c0_64, %c0_65] : memref<3x3x256x256xbf16, #tpu.memory_space<vmem>>, vector<1x1x256x256xbf16>
    %62 = vector.shape_cast %61 : vector<1x1x256x256xbf16> to vector<256x256xbf16>
    %cst_66 = arith.constant dense<0.000000e+00> : vector<448x256xf32>
    %63 = tpu.matmul %7, %62, %cst_66 {dimension_numbers = #tpu.dot_dimension_numbers<[1], [0], [0], [1], [0, 0, 1, 1], [], []>} : vector<448x256xbf16>, vector<256x256xbf16>, vector<448x256xf32> -> vector<448x256xf32>
    %c0_67 = arith.constant 0 : index
    %c0_68 = arith.constant 0 : index
    %64 = vector.load %arg4[%c0_67, %c0_68] : memref<448x256xf32, #tpu.memory_space<vmem>>, vector<448x256xf32>
    tpu.vector_store %arg4[%c0_67, %c0_68], %63 {strides = array<i32>} : memref<448x256xf32, #tpu.memory_space<vmem>>, vector<448x256xf32>,
    %c0_69 = arith.constant 0 : index
    %c0_70 = arith.constant 0 : index
    %65 = vector.load %arg4[%c0_69, %c0_70] : memref<448x256xf32, #tpu.memory_space<vmem>>, vector<448x256xf32>
    %c1_71 = arith.constant 1 : index
    %c2_72 = arith.constant 2 : index
    %c0_73 = arith.constant 0 : index
    %c0_74 = arith.constant 0 : index
    %66 = vector.load %arg2[%c1_71, %c2_72, %c0_73, %c0_74] : memref<3x3x256x256xbf16, #tpu.memory_space<vmem>>, vector<1x1x256x256xbf16>
    %67 = vector.shape_cast %66 : vector<1x1x256x256xbf16> to vector<256x256xbf16>
    %cst_75 = arith.constant dense<0.000000e+00> : vector<448x256xf32>
    %68 = tpu.matmul %14, %67, %cst_75 {dimension_numbers = #tpu.dot_dimension_numbers<[1], [0], [0], [1], [0, 0, 1, 1], [], []>} : vector<448x256xbf16>, vector<256x256xbf16>, vector<448x256xf32> -> vector<448x256xf32>
    %69 = arith.addf %65, %68 : vector<448x256xf32>
    %c0_76 = arith.constant 0 : index
    %c0_77 = arith.constant 0 : index
    %70 = vector.load %arg4[%c0_76, %c0_77] : memref<448x256xf32, #tpu.memory_space<vmem>>, vector<448x256xf32>
    tpu.vector_store %arg4[%c0_76, %c0_77], %69 {strides = array<i32>} : memref<448x256xf32, #tpu.memory_space<vmem>>, vector<448x256xf32>,
    %c0_78 = arith.constant 0 : index
    %c0_79 = arith.constant 0 : index
    %71 = vector.load %arg4[%c0_78, %c0_79] : memref<448x256xf32, #tpu.memory_space<vmem>>, vector<448x256xf32>
    %c2_80 = arith.constant 2 : index
    %c2_81 = arith.constant 2 : index
    %c0_82 = arith.constant 0 : index
    %c0_83 = arith.constant 0 : index
    %72 = vector.load %arg2[%c2_80, %c2_81, %c0_82, %c0_83] : memref<3x3x256x256xbf16, #tpu.memory_space<vmem>>, vector<1x1x256x256xbf16>
    %73 = vector.shape_cast %72 : vector<1x1x256x256xbf16> to vector<256x256xbf16>
    %cst_84 = arith.constant dense<0.000000e+00> : vector<448x256xf32>
    %74 = tpu.matmul %21, %73, %cst_84 {dimension_numbers = #tpu.dot_dimension_numbers<[1], [0], [0], [1], [0, 0, 1, 1], [], []>} : vector<448x256xbf16>, vector<256x256xbf16>, vector<448x256xf32> -> vector<448x256xf32>
    %75 = arith.addf %71, %74 : vector<448x256xf32>
    %c0_85 = arith.constant 0 : index
    %c0_86 = arith.constant 0 : index
    %76 = vector.load %arg4[%c0_85, %c0_86] : memref<448x256xf32, #tpu.memory_space<vmem>>, vector<448x256xf32>
    tpu.vector_store %arg4[%c0_85, %c0_86], %75 {strides = array<i32>} : memref<448x256xf32, #tpu.memory_space<vmem>>, vector<448x256xf32>,
    %c0_87 = arith.constant 0 : index
    %c0_88 = arith.constant 0 : index
    %77 = vector.load %arg4[%c0_87, %c0_88] : memref<448x256xf32, #tpu.memory_space<vmem>>, vector<448x256xf32>
    %78 = vector.shape_cast %77 : vector<448x256xf32> to vector<14x32x256xf32>
    %79 = vector.extract_strided_slice %78 {offsets = [0, 4, 0], sizes = [14, 28, 256], strides = [1, 1, 1]} : vector<14x32x256xf32> to vector<14x28x256xf32>
    %80 = arith.addf %60, %79 : vector<14x28x256xf32>
    %81 = vector.shape_cast %80 : vector<14x28x256xf32> to vector<1x14x28x256xf32>
    %c0_89 = arith.constant 0 : index
    %c0_90 = arith.constant 0 : index
    %c0_91 = arith.constant 0 : index
    %c0_92 = arith.constant 0 : index
    %82 = vector.load %arg3[%c0_89, %c0_90, %c0_91, %c0_92] : memref<1x14x28x256xf32, #tpu.memory_space<vmem>>, vector<1x14x28x256xf32>
    tpu.vector_store %arg3[%c0_89, %c0_90, %c0_91, %c0_92], %81 {strides = array<i32>} : memref<1x14x28x256xf32, #tpu.memory_space<vmem>>, vector<1x14x28x256xf32>,
    return
  }
  func.func @transform_0(%arg0: i32) -> (i32, i32, i32, i32) {
    %c0_i32 = arith.constant 0 : i32
    %c0_i32_0 = arith.constant 0 : i32
    %c0_i32_1 = arith.constant 0 : i32
    %c0_i32_2 = arith.constant 0 : i32
    %c0_i32_3 = arith.constant 0 : i32
    return %c0_i32, %c0_i32_0, %c0_i32_1, %c0_i32_2 : i32, i32, i32, i32
  }
  func.func @transform_1(%arg0: i32) -> (i32, i32, i32, i32) {
    %c0_i32 = arith.constant 0 : i32
    %c0_i32_0 = arith.constant 0 : i32
    %c0_i32_1 = arith.constant 0 : i32
    %c0_i32_2 = arith.constant 0 : i32
    %c0_i32_3 = arith.constant 0 : i32
    return %c0_i32, %c0_i32_0, %c0_i32_1, %c0_i32_2 : i32, i32, i32, i32
  }
  func.func @transform_2(%arg0: i32) -> (i32, i32, i32, i32) {
    %c0_i32 = arith.constant 0 : i32
    %c0_i32_0 = arith.constant 0 : i32
    %c0_i32_1 = arith.constant 0 : i32
    %c0_i32_2 = arith.constant 0 : i32
    return %c0_i32, %arg0, %c0_i32_0, %c0_i32_1 : i32, i32, i32, i32
  }
}

</mosaic_0001>

<bundles_post_ra>
// kernel: relu_dilated_conv2d.1
= control target key start
LH: loop header
LB: loop body
LE: loop exit
PB: predicated region body
PF: predicated region fallthrough
CT: control target
= control target key end

     0   :  { %s11126_s9 = smov 0   ;;  %s14901_s0 = inlined_call_operand.vmem [shape: bf16[1,32,32,256], index: 0, kind: input, shape index: {}]   ;;  %s14902_s1 = inlined_call_operand.vmem [shape: bf16[3,3,256,256], index: 1, kind: input, shape index: {}]   ;;  %s14903_s2 = inlined_call_operand.vmem [shape: f32[1,28,28,256], index: 2, kind: output, shape index: {}]  }
   0x1 LB: > { %s9791_s10 = sadd.s32 4294967295, %s11108_s9   ;;  %p9794_p0 = scmp.ge.s32.totalorder %s11108_s9, 1  ;;  %s11108_s9 = sphi %s11126_s9, %s12_s9  }
   0x2   : > { %p102_p1 = scmp.lt.s32.totalorder %s11108_s9, 3 }
   0x4   : > { %p103_p2 = pnand %p9794_p0, %p102_p1 }
   0x6   : > { %106 = sbr.rel (%p103_p2) target bundleno = 1285 (0x505), region = 28 }
   0xb   : > { %v10670_v0 = vld [vmem:[%s14902_s1 + $0x74] ss:$8 sps:$4 sm:$0xff]   ;;  %v10672_v1 = vld [vmem:[%s14902_s1 + $0x70] ss:$8 sps:$4 sm:$0xff]   ;;  %v10673_v2 = vld [vmem:[%s14902_s1 + $0x64] ss:$8 sps:$4 sm:$0xff]  }
   0xc   : > { %948 = vmatprep.subr.bf16.mxu0 %v10670_v0  ;;  %10629 = vmatprep.subr.bf16.mxu1 %v10670_v0  ;;  %v10675_v3 = vld [vmem:[%s14902_s1 + $0x60] ss:$8 sps:$4 sm:$0xff]   ;;  %v10676_v4 = vld [vmem:[%s14902_s1 + $0x54] ss:$8 sps:$4 sm:$0xff]   ;;  %v10678_v5 = vld [vmem:[%s14902_s1 + $0x50] ss:$8 sps:$4 sm:$0xff]  }
   0xd   : > { %949 = vmatpush1.bf16.msra.mxu0 %v10672_v1  ;;  %10645 = vmatpush1.bf16.msra.mxu1 %v10672_v1  ;;  %v10679_v6 = vld [vmem:[%s14902_s1 + $0x44] ss:$8 sps:$4 sm:$0xff]   ;;  %v10681_v7 = vld [vmem:[%s14902_s1 + $0x40] ss:$8 sps:$4 sm:$0xff]   ;;  %v10682_v8 = vld [vmem:[%s14902_s1 + $0x34] ss:$8 sps:$4 sm:$0xff]  }
   0xe   : > { %950 = vmatprep.subr.bf16.mxu0 %v10673_v2  ;;  %10630 = vmatprep.subr.bf16.mxu1 %v10673_v2  ;;  %s10628_s29 = smul.u32 448, %s9791_s10  ;;  %v10684_v9 = vld [vmem:[%s14902_s1 + $0x30] ss:$8 sps:$4 sm:$0xff]   ;;  %v10685_v10 = vld [vmem:[%s14902_s1 + $0x24] ss:$8 sps:$4 sm:$0xff]   ;;  %v14912_v15 = vmov 0  }
   0xf   : > { %v10687_v11 = vld [vmem:[%s14902_s1 + $0x20] ss:$8 sps:$4 sm:$0xff]   ;;  %v10688_v12 = vld [vmem:[%s14902_s1 + $0x14] ss:$8 sps:$4 sm:$0xff]   ;;  %v10690_v20 = vld [vmem:[%s14902_s1 + $0x10] ss:$8 sps:$4 sm:$0xff]  }
  0x10   : > { %s11172_s8 = scalar_lea.vmem %s14901_s0, %s10628_s29  ;;  %v10691_v23 = vld [vmem:[%s14902_s1 + $0x4] ss:$8 sps:$4 sm:$0xff]   ;;  %v10693_v26 = vld [vmem:[%s14902_s1] ss:$8 sps:$4 sm:$0xff]   ;;  %v10694_v27 = vld [vmem:[%s14902_s1 + $0xf4] ss:$8 sps:$4 sm:$0xff]  }
  0x11   : > { %951 = vmatpush1.bf16.msra.mxu0 %v10675_v3  ;;  %10646 = vmatpush1.bf16.msra.mxu1 %v10675_v3  ;;  %v132_v13 = vld [vmem:[%s11172_s8] sm:$0xff]  ;;  %v133_v14 = vld [vmem:[%s11172_s8 + $0x8] sm:$0xff]  ;;  %v10696_v28 = vld [vmem:[%s14902_s1 + $0xf0] ss:$8 sps:$4 sm:$0xff]   ;;  %vm6255_vm0 = vcmask 1045504   ;;  %s14427_s30 = smul.u32 14, %s9791_s10 }
  0x12   : > { %952 = vmatprep.subr.bf16.mxu0 %v10676_v4  ;;  %10631 = vmatprep.subr.bf16.mxu1 %v10676_v4  ;;  %v11183_v16 = vmax.bf16 %v14912_v15, %v132_v13  ;;  %v11186_v17 = vmax.bf16 %v14912_v15, %v133_v14  ;;  %v160_v18 = vld [vmem:[%s11172_s8 + $0xe0] sm:$0xff]  ;;  %v161_v19 = vld [vmem:[%s11172_s8 + $0xe8] sm:$0xff]  ;;  %v10700_v31 = vld [vmem:[%s14902_s1 + $0xd4] ss:$8 sps:$4 sm:$0xff]   ;;  %vm9202_vm1 = vcmask 1043456  }
  0x13   : > { %v11194_v21 = vmax.bf16 %v14912_v15, %v160_v18  ;;  %v11197_v22 = vmax.bf16 %v14912_v15, %v161_v19  ;;  %v10697_v29 = vld [vmem:[%s14902_s1 + $0xe4] ss:$8 sps:$4 sm:$0xff]   ;;  %v10699_v30 = vld [vmem:[%s14902_s1 + $0xe0] ss:$8 sps:$4 sm:$0xff]   ;;  %v10702_v32 = vld [vmem:[%s14902_s1 + $0xd0] ss:$8 sps:$4 sm:$0xff]  }
  0x14   : > { %v11204_v24 = vcombine.high %v11183_v16, %v11186_v17  ;;  %v10703_v33 = vld [vmem:[%s14902_s1 + $0xc4] ss:$8 sps:$4 sm:$0xff]   ;;  %v10705_v34 = vld [vmem:[%s14902_s1 + $0xc0] ss:$8 sps:$4 sm:$0xff]   ;;  %v10706_v35 = vld [vmem:[%s14902_s1 + $0xb4] ss:$8 sps:$4 sm:$0xff]   ;;  %v11282_v54 = vcombine.low %v11183_v16, %v11186_v17 }
  0x15   : > { %953 = vmatpush1.bf16.msra.mxu0 %v10678_v5  ;;  %10647 = vmatpush1.bf16.msra.mxu1 %v10678_v5  ;;  %v11208_v25 = vcombine.high %v11194_v21, %v11197_v22  ;;  %v10708_v36 = vld [vmem:[%s14902_s1 + $0xb0] ss:$8 sps:$4 sm:$0xff]   ;;  %v10709_v37 = vld [vmem:[%s14902_s1 + $0xa4] ss:$8 sps:$4 sm:$0xff]   ;;  %v10711_v38 = vld [vmem:[%s14902_s1 + $0xa0] ss:$8 sps:$4 sm:$0xff]   ;;  %v11286_v55 = vcombine.low %v11194_v21, %v11197_v22 }
  0x16   : > { %954 = vmatprep.subr.bf16.mxu0 %v10679_v6  ;;  %10632 = vmatprep.subr.bf16.mxu1 %v10679_v6  ;;  %v10712_v39 = vld [vmem:[%s14902_s1 + $0x94] ss:$8 sps:$4 sm:$0xff]   ;;  %v10714_v40 = vld [vmem:[%s14902_s1 + $0x90] ss:$8 sps:$4 sm:$0xff]   ;;  %v10715_v41 = vld [vmem:[%s14902_s1 + $0x84] ss:$8 sps:$4 sm:$0xff]  }
  0x17   : > { %15090 = vst [vmem:[#allocation3_spill] sm:$0xff] %v11208_v25  ;;  %980 = vmatprep.mubr.bf16.mxu0 %v11204_v24  ;;  %1120 = vmatprep.mubr.bf16.mxu1 %v11208_v25  ;;  %v134_v42 = vld [vmem:[%s11172_s8 + $0x10] sm:$0xff]  ;;  %v135_v43 = vld [vmem:[%s11172_s8 + $0x18] sm:$0xff]  ;;  %v10717_v46 = vld [vmem:[%s14902_s1 + $0x80] ss:$8 sps:$4 sm:$0xff]   ;;  %p121_p3 = scmp.lt.s32.totalorder %s14427_s30, 27 }
  0x18   : > { %v162_v44 = vld [vmem:[%s11172_s8 + $0xf0] sm:$0xff]  ;;  %v163_v45 = vld [vmem:[%s11172_s8 + $0xf8] sm:$0xff]  ;;  %v190_v48 = vmax.bf16 %v14912_v15, %v134_v42  ;;  %v191_v50 = vmax.bf16 %v14912_v15, %v135_v43  ;;  %15091 = vst [vmem:[#allocation4_spill] sm:$0xff] %v11286_v55  ;;  %v136_v57 = vld [vmem:[%s11172_s8 + $0x20] sm:$0xff] }
  0x19   : > { %955 = vmatpush1.bf16.msra.mxu0 %v10681_v7  ;;  %10648 = vmatpush1.bf16.msra.mxu1 %v10681_v7  ;;  %v10720_v47 = vld [vmem:[%s14902_s1 + $0x374] ss:$8 sps:$4 sm:$0xff]   ;;  %v218_v51 = vmax.bf16 %v14912_v15, %v162_v44  ;;  %v219_v52 = vmax.bf16 %v14912_v15, %v163_v45  ;;  %v10718_v53 = vld [vmem:[%s14902_s1 + $0x370] ss:$8 sps:$4 sm:$0xff]   ;;  %v137_v58 = vld [vmem:[%s11172_s8 + $0x28] sm:$0xff]  ;;  %v192_v2 = vmax.bf16 %v14912_v15, %v136_v57  ;;  %s16305_s30 = smov (!%p121_p3, %s14427_s30), 27 }
  0x1a   : > { %956 = vmatprep.subr.bf16.mxu0 %v10682_v8  ;;  %10633 = vmatprep.subr.bf16.mxu1 %v10682_v8  ;;  %v10723_v49 = vld [vmem:[%s14902_s1 + $0x674] ss:$8 sps:$4 sm:$0xff]   ;;  %v10721_v56 = vld [vmem:[%s14902_s1 + $0x670] ss:$8 sps:$4 sm:$0xff]   ;;  %v164_v59 = vld [vmem:[%s11172_s8 + $0x100] sm:$0xff]  ;;  %v11294_v60 = vcombine.high %v190_v48, %v191_v50  ;;  %v193_v5 = vmax.bf16 %v14912_v15, %v137_v58  ;;  %s10627_s10 = sshll.u32 %s16305_s30, 6 }
  0x1b   : > { %v11296_v61 = vcombine.high %v218_v51, %v219_v52  ;;  %v165_v62 = vld [vmem:[%s11172_s8 + $0x108] sm:$0xff]  ;;  %v10732_v4 = vld [vmem:[%s14902_s1 + $0x354] ss:$8 sps:$4 sm:$0xff]   ;;  %v220_v6 = vmax.bf16 %v14912_v15, %v164_v59  ;;  %s14475_s5 = scalar_lea.vmem %s14903_s2, %s10627_s10 }
  0x1c   : > { %v10726_v63 = vld [vmem:[%s14902_s1 + $0x364] ss:$8 sps:$4 sm:$0xff]   ;;  %v10724_v1 = vld [vmem:[%s14902_s1 + $0x360] ss:$8 sps:$4 sm:$0xff]   ;;  %v221_v7 = vmax.bf16 %v14912_v15, %v165_v62  ;;  %v10735_v8 = vld [vmem:[%s14902_s1 + $0x654] ss:$8 sps:$4 sm:$0xff]   ;;  %v11335_v13 = vcombine.high %v192_v2, %v193_v5 }
  0x1d   : > { %957 = vmatpush1.bf16.msra.mxu0 %v10684_v9  ;;  %10649 = vmatpush1.bf16.msra.mxu1 %v10684_v9  ;;  %15092 = vst [vmem:[#allocation5_spill] sm:$0xff] %v11296_v61  ;;  %v10729_v0 = vld [vmem:[%s14902_s1 + $0x664] ss:$8 sps:$4 sm:$0xff]   ;;  %v10727_v3 = vld [vmem:[%s14902_s1 + $0x660] ss:$8 sps:$4 sm:$0xff]   ;;  %v11325_v9 = vcombine.low %v190_v48, %v191_v50  ;;  %v138_v17 = vld [vmem:[%s11172_s8 + $0x30] sm:$0xff] }
  0x1e   : > { %958 = vmatprep.subr.bf16.mxu0 %v10685_v10  ;;  %10634 = vmatprep.subr.bf16.mxu1 %v10685_v10  ;;  %v11327_v10 = vcombine.low %v218_v51, %v219_v52  ;;  %v11337_v14 = vcombine.high %v220_v6, %v221_v7  ;;  %v10738_v16 = vld [vmem:[%s14902_s1 + $0x344] ss:$8 sps:$4 sm:$0xff]   ;;  %v139_v18 = vld [vmem:[%s11172_s8 + $0x38] sm:$0xff]  ;;  %v166_v19 = vld [vmem:[%s11172_s8 + $0x110] sm:$0xff]  ;;  %v194_v22 = vmax.bf16 %v14912_v15, %v138_v17 }
  0x1f   : > { %v10741_v21 = vld [vmem:[%s14902_s1 + $0x644] ss:$8 sps:$4 sm:$0xff]   ;;  %v10748_v48 = vld [vmem:[%s14902_s1 + $0x320] ss:$8 sps:$4 sm:$0xff]   ;;  %v10756_v50 = vld [vmem:[%s14902_s1 + $0x314] ss:$8 sps:$4 sm:$0xff]  }
  0x20   : > { %15093 = vst [vmem:[#allocation6_spill] sm:$0xff] %v11327_v10  ;;  %15094 = vst [vmem:[#allocation7_spill] sm:$0xff] %v11337_v14  ;;  %v10750_v42 = vld [vmem:[%s14902_s1 + $0x324] ss:$8 sps:$4 sm:$0xff]   ;;  %v142_v51 = vld [vmem:[%s11172_s8 + $0x50] sm:$0xff] }
  0x21   : > { %959 = vmatpush1.bf16.msra.mxu0 %v10687_v11  ;;  %10650 = vmatpush1.bf16.msra.mxu1 %v10687_v11  ;;  %v10730_v11 = vld [vmem:[%s14902_s1 + $0x350] ss:$8 sps:$4 sm:$0xff]   ;;  %v10753_v43 = vld [vmem:[%s14902_s1 + $0x624] ss:$8 sps:$4 sm:$0xff]   ;;  %v10759_v52 = vld [vmem:[%s14902_s1 + $0x614] ss:$8 sps:$4 sm:$0xff]  }
  0x22   : > { %960 = vmatprep.subr.bf16.mxu0 %v10688_v12  ;;  %10635 = vmatprep.subr.bf16.mxu1 %v10688_v12  ;;  %v10733_v12 = vld [vmem:[%s14902_s1 + $0x650] ss:$8 sps:$4 sm:$0xff]   ;;  %v10771_v17 = vld [vmem:[%s14902_s1 + $0x6f4] ss:$8 sps:$4 sm:$0xff]  }
  0x23   : > { %v143_v57 = vld [vmem:[%s11172_s8 + $0x58] sm:$0xff]  ;;  %v170_v58 = vld [vmem:[%s11172_s8 + $0x130] sm:$0xff] }
  0x24   : > { %v171_v59 = vld [vmem:[%s11172_s8 + $0x138] sm:$0xff] }
  0x25   : > { %961 = vmatpush1.bf16.msra.mxu0 %v10690_v20  ;;  %10651 = vmatpush1.bf16.msra.mxu1 %v10690_v20  ;;  %v167_v20 = vld [vmem:[%s11172_s8 + $0x118] sm:$0xff] }
  0x26   : > { %962 = vmatprep.subr.bf16.mxu0 %v10691_v23  ;;  %10636 = vmatprep.subr.bf16.mxu1 %v10691_v23  ;;  %v10736_v23 = vld [vmem:[%s14902_s1 + $0x340] ss:$8 sps:$4 sm:$0xff]  }
  0x29   : > { %963 = vmatpush1.bf16.msra.mxu0 %v10693_v26  ;;  %10652 = vmatpush1.bf16.msra.mxu1 %v10693_v26  ;;  %v195_v26 = vmax.bf16 %v14912_v15, %v139_v18 }
  0x2a   : > { %964 = vmatprep.subr.bf16.mxu0 %v10694_v27  ;;  %10637 = vmatprep.subr.bf16.mxu1 %v10694_v27  ;;  %v222_v27 = vmax.bf16 %v14912_v15, %v166_v19 }
  0x2d   : > { %965 = vmatpush2.bf16.msra.mxu0 %v10696_v28  ;;  %10653 = vmatpush2.bf16.msra.mxu1 %v10696_v28  ;;  %v223_v28 = vmax.bf16 %v14912_v15, %v167_v20  ;;  %v145_v20 = vld [vmem:[%s11172_s8 + $0x68] sm:$0xff] }
  0x2e   : > { %966 = vmatprep.subr.bf16.mxu0 %v10697_v29  ;;  %10638 = vmatprep.subr.bf16.mxu1 %v10697_v29  ;;  %v10739_v29 = vld [vmem:[%s14902_s1 + $0x640] ss:$8 sps:$4 sm:$0xff]  }
  0x31   : > { %967 = vmatpush2.bf16.msra.mxu0 %v10699_v30  ;;  %10654 = vmatpush2.bf16.msra.mxu1 %v10699_v30  ;;  %v10744_v30 = vld [vmem:[%s14902_s1 + $0x334] ss:$8 sps:$4 sm:$0xff]  }
  0x32   : > { %968 = vmatprep.subr.bf16.mxu0 %v10700_v31  ;;  %10639 = vmatprep.subr.bf16.mxu1 %v10700_v31  ;;  %v10747_v31 = vld [vmem:[%s14902_s1 + $0x634] ss:$8 sps:$4 sm:$0xff]  }
  0x35   : > { %969 = vmatpush2.bf16.msra.mxu0 %v10702_v32  ;;  %10655 = vmatpush2.bf16.msra.mxu1 %v10702_v32  ;;  %v11369_v32 = vcombine.low %v192_v2, %v193_v5  ;;  %v10762_v2 = vld [vmem:[%s14902_s1 + $0x304] ss:$8 sps:$4 sm:$0xff]   ;;  %v199_v5 = vmax.bf16 %v14912_v15, %v143_v57 }
  0x36   : > { %970 = vmatprep.subr.bf16.mxu0 %v10703_v33  ;;  %10640 = vmatprep.subr.bf16.mxu1 %v10703_v33  ;;  %v11371_v33 = vcombine.low %v220_v6, %v221_v7  ;;  %v226_v6 = vmax.bf16 %v14912_v15, %v170_v58  ;;  %v227_v7 = vmax.bf16 %v14912_v15, %v171_v59  ;;  %v10786_v57 = vld [vmem:[%s14902_s1 + $0x3c4] ss:$8 sps:$4 sm:$0xff]  }
  0x37   : > { %v10789_v58 = vld [vmem:[%s14902_s1 + $0x6c4] ss:$8 sps:$4 sm:$0xff]  }
  0x38   : > { %15095 = vst [vmem:[#allocation8_spill] sm:$0xff] %v11371_v33 }
  0x39   : > { %971 = vmatpush2.bf16.msra.mxu0 %v10705_v34  ;;  %10656 = vmatpush2.bf16.msra.mxu1 %v10705_v34  ;;  %v10742_v34 = vld [vmem:[%s14902_s1 + $0x330] ss:$8 sps:$4 sm:$0xff]  }
  0x3a   : > { %972 = vmatprep.subr.bf16.mxu0 %v10706_v35  ;;  %10641 = vmatprep.subr.bf16.mxu1 %v10706_v35  ;;  %v10745_v35 = vld [vmem:[%s14902_s1 + $0x630] ss:$8 sps:$4 sm:$0xff]  }
  0x3d   : > { %973 = vmatpush2.bf16.msra.mxu0 %v10708_v36  ;;  %10657 = vmatpush2.bf16.msra.mxu1 %v10708_v36  ;;  %v140_v36 = vld [vmem:[%s11172_s8 + $0x40] sm:$0xff] }
  0x3e   : > { %974 = vmatprep.subr.bf16.mxu0 %v10709_v37  ;;  %10642 = vmatprep.subr.bf16.mxu1 %v10709_v37  ;;  %v11380_v37 = vcombine.high %v194_v22, %v195_v26  ;;  %v196_v44 = vmax.bf16 %v14912_v15, %v140_v36  ;;  %v201_v36 = vmax.bf16 %v14912_v15, %v145_v20  ;;  %v10790_v20 = vld [vmem:[%s14902_s1 + $0x3b0] ss:$8 sps:$4 sm:$0xff]  }
  0x41   : > { %975 = vmatpush2.bf16.msra.mxu0 %v10711_v38  ;;  %10658 = vmatpush2.bf16.msra.mxu1 %v10711_v38  ;;  %v11382_v38 = vcombine.high %v222_v27, %v223_v28 }
  0x42   : > { %976 = vmatprep.subr.bf16.mxu0 %v10712_v39  ;;  %10643 = vmatprep.subr.bf16.mxu1 %v10712_v39  ;;  %v141_v39 = vld [vmem:[%s11172_s8 + $0x48] sm:$0xff] }
  0x43   : > { %15096 = vst [vmem:[#allocation9_spill] sm:$0xff] %v11382_v38  ;;  %v197_v45 = vmax.bf16 %v14912_v15, %v141_v39 }
  0x45   : > { %977 = vmatpush2.bf16.msra.mxu0 %v10714_v40  ;;  %10659 = vmatpush2.bf16.msra.mxu1 %v10714_v40  ;;  %v168_v40 = vld [vmem:[%s11172_s8 + $0x120] sm:$0xff]  ;;  %v11421_v62 = vcombine.high %v196_v44, %v197_v45  ;;  %v11458_v18 = vcombine.low %v196_v44, %v197_v45  ;;  %v11504_v45 = vcombine.low %v226_v6, %v227_v7 }
  0x46   : > { %978 = vmatprep.subr.bf16.mxu0 %v10715_v41  ;;  %10644 = vmatprep.subr.bf16.mxu1 %v10715_v41  ;;  %v169_v41 = vld [vmem:[%s11172_s8 + $0x128] sm:$0xff] }
  0x47   : > { %15102 = vst [vmem:[#allocation15_spill] sm:$0xff] %v11504_v45 }
  0x49   : > { %979 = vmatpush2.bf16.msra.mxu0 %v10717_v46  ;;  %10660 = vmatpush2.bf16.msra.mxu1 %v10717_v46  ;;  %v224_v46 = vmax.bf16 %v14912_v15, %v168_v40 }
  0x4a   : > { %1958 = vmatprep.subr.bf16.mxu1 %v10720_v47  ;;  %3080 = vmatprep.subr.bf16.mxu0 %v10723_v49  ;;  %v225_v47 = vmax.bf16 %v14912_v15, %v169_v41  ;;  %v10751_v49 = vld [vmem:[%s14902_s1 + $0x620] ss:$8 sps:$4 sm:$0xff]   ;;  %v10780_v41 = vld [vmem:[%s14902_s1 + $0x3d4] ss:$8 sps:$4 sm:$0xff]  }
  0x4c   : > { %981 = vmatmul.mubr.bf16.vlgmr.msra.gmra.mxu0 %v11282_v54  ;;  %1121 = vmatmul.mubr.bf16.vlgmr.msra.gmra.mxu1 %v11286_v55  ;;  %v11460_v19 = vcombine.low %v224_v46, %v225_v47 }
  0x4d   : > { %1959 = vmatpush1.bf16.msra.mxu1 %v10718_v53  ;;  %3081 = vmatpush1.bf16.msra.mxu0 %v10721_v56  ;;  %v11414_v53 = vcombine.low %v194_v22, %v195_v26  ;;  %v11416_v56 = vcombine.low %v222_v27, %v223_v28  ;;  %v173_v22 = vld [vmem:[%s11172_s8 + $0x148] sm:$0xff]  ;;  %v10769_v26 = vld [vmem:[%s14902_s1 + $0x6f0] ss:$8 sps:$4 sm:$0xff]   ;;  %v11473_v28 = vcombine.high %v226_v6, %v227_v7  ;;  %v10795_v6 = vld [vmem:[%s14902_s1 + $0x6b4] ss:$8 sps:$4 sm:$0xff]  }
  0x4e   : > { %990 = vmatprep.mubr.bf16.mxu0 %v11294_v60  ;;  %1130 = vmatprep.mubr.bf16.mxu1 %v11296_v61  ;;  %15100 = vst [vmem:[#allocation13_spill] sm:$0xff] %v11460_v19  ;;  %v229_v40 = vmax.bf16 %v14912_v15, %v173_v22  ;;  %v148_v7 = vld [vmem:[%s11172_s8 + $0x80] sm:$0xff] }
  0x4f   : > { %1960 = vmatprep.subr.bf16.mxu1 %v10726_v63  ;;  %3082 = vmatprep.subr.bf16.mxu0 %v10729_v0  ;;  %15097 = vst [vmem:[#allocation10_spill] sm:$0xff] %v11414_v53  ;;  %15098 = vst [vmem:[#allocation11_spill] sm:$0xff] %v11416_v56  ;;  %v11423_v63 = vcombine.high %v224_v46, %v225_v47  ;;  %v10754_v0 = vld [vmem:[%s14902_s1 + $0x310] ss:$8 sps:$4 sm:$0xff]  }
  0x50   : > { %15101 = vst [vmem:[#allocation14_spill] sm:$0xff] %v11473_v28  ;;  %v147_v46 = vld [vmem:[%s11172_s8 + $0x78] sm:$0xff]  ;;  %v174_v47 = vld [vmem:[%s11172_s8 + $0x150] sm:$0xff] }
  0x51   : > { %1961 = vmatpush1.bf16.msra.mxu1 %v10724_v1  ;;  %3083 = vmatpush1.bf16.msra.mxu0 %v10727_v3  ;;  %15099 = vst [vmem:[#allocation12_spill] sm:$0xff] %v11423_v63  ;;  %v10757_v1 = vld [vmem:[%s14902_s1 + $0x610] ss:$8 sps:$4 sm:$0xff]   ;;  %v10765_v3 = vld [vmem:[%s14902_s1 + $0x604] ss:$8 sps:$4 sm:$0xff]  }
  0x52   : > { %1962 = vmatprep.subr.bf16.mxu1 %v10732_v4  ;;  %3084 = vmatprep.subr.bf16.mxu0 %v10735_v8  ;;  %v198_v4 = vmax.bf16 %v14912_v15, %v142_v51  ;;  %v10760_v8 = vld [vmem:[%s14902_s1 + $0x300] ss:$8 sps:$4 sm:$0xff]  }
  0x54   : > { %991 = vmatmul.mubr.bf16.gmra.mxu0 %v11325_v9  ;;  %1131 = vmatmul.mubr.bf16.gmra.mxu1 %v11327_v10  ;;  %v11471_v27 = vcombine.high %v198_v4, %v199_v5  ;;  %v11502_v44 = vcombine.low %v198_v4, %v199_v5  ;;  %v10787_v4 = vld [vmem:[%s14902_s1 + $0x6c0] ss:$8 sps:$4 sm:$0xff]   ;;  %v10792_v5 = vld [vmem:[%s14902_s1 + $0x3b4] ss:$8 sps:$4 sm:$0xff]  }
  0x55   : > { %1000 = vmatprep.mubr.bf16.mxu0 %v11335_v13  ;;  %1140 = vmatprep.mubr.bf16.mxu1 %v11337_v14 }
  0x56   : > { %1963 = vmatpush1.bf16.msra.mxu1 %v10730_v11  ;;  %3085 = vmatpush1.bf16.msra.mxu0 %v10733_v12  ;;  %v10763_v11 = vld [vmem:[%s14902_s1 + $0x600] ss:$8 sps:$4 sm:$0xff]  }
  0x57   : > { %1964 = vmatprep.subr.bf16.mxu1 %v10738_v16  ;;  %3086 = vmatprep.subr.bf16.mxu0 %v10741_v21  ;;  %v144_v12 = vld [vmem:[%s11172_s8 + $0x60] sm:$0xff]  ;;  %v10768_v16 = vld [vmem:[%s14902_s1 + $0x3f4] ss:$8 sps:$4 sm:$0xff]  }
  0x58   : > { %v172_v21 = vld [vmem:[%s11172_s8 + $0x140] sm:$0xff] }
  0x59   : > { %v228_v39 = vmax.bf16 %v14912_v15, %v172_v21  ;;  %v10793_v21 = vld [vmem:[%s14902_s1 + $0x6b0] ss:$8 sps:$4 sm:$0xff]  }
  0x5a   : > { %1965 = vmatpush1.bf16.msra.mxu1 %v10736_v23  ;;  %3087 = vmatpush1.bf16.msra.mxu0 %v10739_v29  ;;  %v10766_v23 = vld [vmem:[%s14902_s1 + $0x3f0] ss:$8 sps:$4 sm:$0xff]   ;;  %v10774_v29 = vld [vmem:[%s14902_s1 + $0x3e4] ss:$8 sps:$4 sm:$0xff]  }
  0x5b   : > { %1966 = vmatprep.subr.bf16.mxu1 %v10744_v30  ;;  %3088 = vmatprep.subr.bf16.mxu0 %v10747_v31  ;;  %v10777_v30 = vld [vmem:[%s14902_s1 + $0x6e4] ss:$8 sps:$4 sm:$0xff]   ;;  %v200_v31 = vmax.bf16 %v14912_v15, %v144_v12 }
  0x5c   : > { %1001 = vmatmul.mubr.bf16.gmra.mxu0 %v11369_v32  ;;  %1141 = vmatmul.mubr.bf16.gmra.mxu1 %v11371_v33  ;;  %v149_v12 = vld [vmem:[%s11172_s8 + $0x88] sm:$0xff] }
  0x5d   : > { %1010 = vmatprep.mubr.bf16.mxu0 %v11380_v37  ;;  %1150 = vmatprep.mubr.bf16.mxu1 %v11382_v38  ;;  %v11515_v51 = vcombine.high %v200_v31, %v201_v36  ;;  %v10904_v38 = vld [vmem:[%s14902_s1 + $0x180] ss:$8 sps:$4 sm:$0xff]  }
  0x5e   : > { %1967 = vmatpush1.bf16.msra.mxu1 %v10742_v34  ;;  %3089 = vmatpush1.bf16.msra.mxu0 %v10745_v35  ;;  %v10772_v34 = vld [vmem:[%s14902_s1 + $0x3e0] ss:$8 sps:$4 sm:$0xff]  }
  0x5f   : > { %1968 = vmatprep.subr.bf16.mxu1 %v10750_v42  ;;  %3090 = vmatprep.subr.bf16.mxu0 %v10753_v43  ;;  %v10775_v35 = vld [vmem:[%s14902_s1 + $0x6e0] ss:$8 sps:$4 sm:$0xff]   ;;  %v10783_v42 = vld [vmem:[%s14902_s1 + $0x6d4] ss:$8 sps:$4 sm:$0xff]  }
  0x60   : > { %v146_v43 = vld [vmem:[%s11172_s8 + $0x70] sm:$0xff] }
  0x61   : > { %v202_v59 = vmax.bf16 %v14912_v15, %v146_v43 }
  0x62   : > { %1969 = vmatpush1.bf16.msra.mxu1 %v10748_v48  ;;  %3091 = vmatpush1.bf16.msra.mxu0 %v10751_v49  ;;  %v175_v48 = vld [vmem:[%s11172_s8 + $0x158] sm:$0xff] }
  0x63   : > { %1970 = vmatprep.subr.bf16.mxu1 %v10756_v50  ;;  %3092 = vmatprep.subr.bf16.mxu0 %v10759_v52  ;;  %v10778_v49 = vld [vmem:[%s14902_s1 + $0x3d0] ss:$8 sps:$4 sm:$0xff]   ;;  %v11517_v52 = vcombine.high %v228_v39, %v229_v40 }
  0x64   : > { %1011 = vmatmul.mubr.bf16.gmra.mxu0 %v11414_v53  ;;  %1151 = vmatmul.mubr.bf16.gmra.mxu1 %v11416_v56  ;;  %v10781_v50 = vld [vmem:[%s14902_s1 + $0x6d0] ss:$8 sps:$4 sm:$0xff]  }
  0x65   : > { %1020 = vmatprep.mubr.bf16.mxu0 %v11421_v62  ;;  %1160 = vmatprep.mubr.bf16.mxu1 %v11423_v63  ;;  %15103 = vst [vmem:[#allocation16_spill] sm:$0xff] %v11517_v52  ;;  %v9884_v56 = vld [vmem:[%s11172_s8 + $0x158] sm:$0xff] }
  0x66   : > { %1971 = vmatpush1.bf16.msra.mxu1 %v10754_v0  ;;  %3093 = vmatpush1.bf16.msra.mxu0 %v10757_v1  ;;  %v10784_v0 = vld [vmem:[%s14902_s1 + $0x3c0] ss:$8 sps:$4 sm:$0xff]   ;;  %v203_v1 = vmax.bf16 %v14912_v15, %v147_v46 }
  0x67   : > { %1972 = vmatprep.subr.bf16.mxu1 %v10762_v2  ;;  %3094 = vmatprep.subr.bf16.mxu0 %v10765_v3  ;;  %v230_v2 = vmax.bf16 %v14912_v15, %v174_v47  ;;  %v231_v3 = vmax.bf16 %v14912_v15, %v175_v48  ;;  %v151_v47 = vld [vmem:[%s11172_s8 + $0x98] sm:$0xff]  ;;  %v178_v48 = vld [vmem:[%s11172_s8 + $0x170] sm:$0xff] }
  0x68   : > { %v11559_v22 = vcombine.high %v202_v59, %v203_v1  ;;  %v11590_v43 = vcombine.low %v202_v59, %v203_v1  ;;  %v10810_v59 = vld [vmem:[%s14902_s1 + $0x384] ss:$8 sps:$4 sm:$0xff]  }
  0x69   : > { %v11592_v46 = vcombine.low %v230_v2, %v231_v3  ;;  %v10813_v1 = vld [vmem:[%s14902_s1 + $0x684] ss:$8 sps:$4 sm:$0xff]  }
  0x6a   : > { %1973 = vmatpush1.bf16.msra.mxu1 %v10760_v8  ;;  %3095 = vmatpush1.bf16.msra.mxu0 %v10763_v11  ;;  %v11546_v8 = vcombine.low %v200_v31, %v201_v36  ;;  %v11548_v11 = vcombine.low %v228_v39, %v229_v40  ;;  %15105 = vst [vmem:[#allocation18_spill] sm:$0xff] %v11559_v22  ;;  %v10796_v31 = vld [vmem:[%s14902_s1 + $0x3a0] ss:$8 sps:$4 sm:$0xff]   ;;  %v10804_v40 = vld [vmem:[%s14902_s1 + $0x394] ss:$8 sps:$4 sm:$0xff]   ;;  %15107 = vst [vmem:[#allocation20_spill] sm:$0xff] %v11590_v43 }
  0x6b   : > { %1974 = vmatprep.subr.bf16.mxu1 %v10768_v16  ;;  %3096 = vmatprep.subr.bf16.mxu0 %v10771_v17  ;;  %v176_v16 = vld [vmem:[%s11172_s8 + $0x160] sm:$0xff]  ;;  %v177_v17 = vld [vmem:[%s11172_s8 + $0x168] sm:$0xff]  ;;  %15108 = vst [vmem:[#allocation21_spill] sm:$0xff] %v11592_v46 }
  0x6c   : > { %1021 = vmatmul.mubr.bf16.gmra.mxu0 %v11458_v18  ;;  %1161 = vmatmul.mubr.bf16.gmra.mxu1 %v11460_v19  ;;  %15104 = vst [vmem:[#allocation17_spill] sm:$0xff] %v11548_v11  ;;  %v232_v36 = vmax.bf16 %v14912_v15, %v176_v16  ;;  %v233_v39 = vmax.bf16 %v14912_v15, %v177_v17  ;;  %v10819_v16 = vld [vmem:[%s14902_s1 + $0x474] ss:$8 sps:$4 sm:$0xff]   ;;  %v152_v17 = vld [vmem:[%s11172_s8 + $0xa0] sm:$0xff] }
  0x6d   : > { %1030 = vmatprep.mubr.bf16.mxu0 %v11471_v27  ;;  %1170 = vmatprep.mubr.bf16.mxu1 %v11473_v28  ;;  %v10906_v19 = vld [vmem:[%s14902_s1 + $0x184] ss:$8 sps:$4 sm:$0xff]  }
  0x6e   : > { %1975 = vmatpush2.bf16.msra.mxu1 %v10766_v23  ;;  %3097 = vmatpush2.bf16.msra.mxu0 %v10769_v26  ;;  %v11561_v23 = vcombine.high %v230_v2, %v231_v3  ;;  %v10798_v26 = vld [vmem:[%s14902_s1 + $0x3a4] ss:$8 sps:$4 sm:$0xff]   ;;  %v10808_v3 = vld [vmem:[%s14902_s1 + $0x380] ss:$8 sps:$4 sm:$0xff]  }
  0x6f   : > { %1976 = vmatprep.subr.bf16.mxu1 %v10774_v29  ;;  %3098 = vmatprep.subr.bf16.mxu0 %v10777_v30  ;;  %v10801_v29 = vld [vmem:[%s14902_s1 + $0x6a4] ss:$8 sps:$4 sm:$0xff]   ;;  %v204_v30 = vmax.bf16 %v14912_v15, %v148_v7 }
  0x70   : > { %15106 = vst [vmem:[#allocation19_spill] sm:$0xff] %v11561_v23 }
  0x72   : > { %1977 = vmatpush2.bf16.msra.mxu1 %v10772_v34  ;;  %3099 = vmatpush2.bf16.msra.mxu0 %v10775_v35  ;;  %v10799_v34 = vld [vmem:[%s14902_s1 + $0x6a0] ss:$8 sps:$4 sm:$0xff]   ;;  %v205_v35 = vmax.bf16 %v14912_v15, %v149_v12  ;;  %v10816_v12 = vld [vmem:[%s14902_s1 + $0x174] ss:$8 sps:$4 sm:$0xff]  }
  0x73   : > { %1978 = vmatprep.subr.bf16.mxu1 %v10780_v41  ;;  %3100 = vmatprep.subr.bf16.mxu0 %v10783_v42  ;;  %v10807_v41 = vld [vmem:[%s14902_s1 + $0x694] ss:$8 sps:$4 sm:$0xff]  }
  0x74   : > { %1031 = vmatmul.mubr.bf16.gmra.mxu0 %v11502_v44  ;;  %1171 = vmatmul.mubr.bf16.gmra.mxu1 %v11504_v45  ;;  %v150_v42 = vld [vmem:[%s11172_s8 + $0x90] sm:$0xff] }
  0x75   : > { %1040 = vmatprep.mubr.bf16.mxu0 %v11515_v51  ;;  %1180 = vmatprep.mubr.bf16.mxu1 %v11517_v52  ;;  %v206_v2 = vmax.bf16 %v14912_v15, %v150_v42 }
  0x76   : > { %1979 = vmatpush2.bf16.msra.mxu1 %v10778_v49  ;;  %3101 = vmatpush2.bf16.msra.mxu0 %v10781_v50  ;;  %v179_v49 = vld [vmem:[%s11172_s8 + $0x178] sm:$0xff] }
  0x77   : > { %1980 = vmatprep.subr.bf16.mxu1 %v10786_v57  ;;  %3102 = vmatprep.subr.bf16.mxu0 %v10789_v58  ;;  %v10802_v50 = vld [vmem:[%s14902_s1 + $0x390] ss:$8 sps:$4 sm:$0xff]   ;;  %v11603_v58 = vcombine.high %v204_v30, %v205_v35  ;;  %v235_v7 = vmax.bf16 %v14912_v15, %v179_v49 }
  0x78   : > { %v10805_v57 = vld [vmem:[%s14902_s1 + $0x690] ss:$8 sps:$4 sm:$0xff]  }
  0x79   : > { %15109 = vst [vmem:[#allocation22_spill] sm:$0xff] %v11603_v58 }
  0x7a   : > { %1981 = vmatpush2.bf16.msra.mxu1 %v10784_v0  ;;  %3103 = vmatpush2.bf16.msra.mxu0 %v10787_v4  ;;  %v11605_v0 = vcombine.high %v232_v36, %v233_v39  ;;  %v10811_v4 = vld [vmem:[%s14902_s1 + $0x680] ss:$8 sps:$4 sm:$0xff]  }
  0x7b   : > { %1982 = vmatprep.subr.bf16.mxu1 %v10792_v5  ;;  %3104 = vmatprep.subr.bf16.mxu0 %v10795_v6  ;;  %v207_v5 = vmax.bf16 %v14912_v15, %v151_v47  ;;  %v234_v6 = vmax.bf16 %v14912_v15, %v178_v48  ;;  %v154_v47 = vld [vmem:[%s11172_s8 + $0xb0] sm:$0xff]  ;;  %v155_v48 = vld [vmem:[%s11172_s8 + $0xb8] sm:$0xff] }
  0x7c   : > { %1041 = vmatmul.mubr.bf16.gmra.mxu0 %v11546_v8  ;;  %1181 = vmatmul.mubr.bf16.gmra.mxu1 %v11548_v11  ;;  %15110 = vst [vmem:[#allocation23_spill] sm:$0xff] %v11605_v0  ;;  %v9881_v11 = vld [vmem:[%s11172_s8 + $0x140] sm:$0xff] }
  0x7d   : > { %1050 = vmatprep.mubr.bf16.mxu0 %v11559_v22  ;;  %1190 = vmatprep.mubr.bf16.mxu1 %v11561_v23  ;;  %v11655_v42 = vcombine.low %v234_v6, %v235_v7 }
  0x7e   : > { %1983 = vmatpush2.bf16.msra.mxu1 %v10790_v20  ;;  %3105 = vmatpush2.bf16.msra.mxu0 %v10793_v21  ;;  %v11634_v20 = vcombine.low %v204_v30, %v205_v35  ;;  %v11636_v21 = vcombine.low %v232_v36, %v233_v39  ;;  %v208_v30 = vmax.bf16 %v14912_v15, %v152_v17  ;;  %v185_v17 = vld [vmem:[%s11172_s8 + $0x1a8] sm:$0xff] }
  0x7f   : > { %1984 = vmatprep.subr.bf16.mxu1 %v10798_v26  ;;  %3106 = vmatprep.subr.bf16.mxu0 %v10801_v29  ;;  %v153_v26 = vld [vmem:[%s11172_s8 + $0xa8] sm:$0xff]  ;;  %v180_v29 = vld [vmem:[%s11172_s8 + $0x180] sm:$0xff]  ;;  %15116 = vst [vmem:[#allocation29_spill] sm:$0xff] %v11655_v42 }
  0x80   : > { %15111 = vst [vmem:[#allocation24_spill] sm:$0xff] %v11634_v20  ;;  %15112 = vst [vmem:[#allocation25_spill] sm:$0xff] %v11636_v21  ;;  %v209_v35 = vmax.bf16 %v14912_v15, %v153_v26  ;;  %v236_v36 = vmax.bf16 %v14912_v15, %v180_v29 }
  0x82   : > { %1985 = vmatpush2.bf16.msra.mxu1 %v10796_v31  ;;  %3107 = vmatpush2.bf16.msra.mxu0 %v10799_v34  ;;  %v181_v31 = vld [vmem:[%s11172_s8 + $0x188] sm:$0xff]  ;;  %v11641_v34 = vcombine.high %v206_v2, %v207_v5  ;;  %v11659_v49 = vcombine.high %v208_v30, %v209_v35 }
  0x83   : > { %1986 = vmatprep.subr.bf16.mxu1 %v10804_v40  ;;  %3108 = vmatprep.subr.bf16.mxu0 %v10807_v41  ;;  %v11643_v40 = vcombine.high %v234_v6, %v235_v7  ;;  %v237_v39 = vmax.bf16 %v14912_v15, %v181_v31  ;;  %v11653_v41 = vcombine.low %v206_v2, %v207_v5  ;;  %v156_v5 = vld [vmem:[%s11172_s8 + $0xc0] sm:$0xff] }
  0x84   : > { %1051 = vmatmul.mubr.bf16.gmra.mxu0 %v11590_v43  ;;  %1191 = vmatmul.mubr.bf16.gmra.mxu1 %v11592_v46  ;;  %15113 = vst [vmem:[#allocation26_spill] sm:$0xff] %v11641_v34  ;;  %15117 = vst [vmem:[#allocation30_spill] sm:$0xff] %v11659_v49  ;;  %v211_v2 = vmax.bf16 %v14912_v15, %v155_v48  ;;  %v11674_v6 = vcombine.low %v208_v30, %v209_v35 }
  0x85   : > { %1060 = vmatprep.mubr.bf16.mxu0 %v11603_v58  ;;  %1200 = vmatprep.mubr.bf16.mxu1 %v11605_v0  ;;  %15114 = vst [vmem:[#allocation27_spill] sm:$0xff] %v11643_v40  ;;  %15115 = vst [vmem:[#allocation28_spill] sm:$0xff] %v11653_v41  ;;  %v11676_v7 = vcombine.low %v236_v36, %v237_v39  ;;  %v212_v31 = vmax.bf16 %v14912_v15, %v156_v5  ;;  %v9878_v0 = vld [vmem:[%s11172_s8 + $0x128] sm:$0xff] }
  0x86   : > { %1987 = vmatpush2.bf16.msra.mxu1 %v10802_v50  ;;  %3109 = vmatpush2.bf16.msra.mxu0 %v10805_v57  ;;  %v11661_v50 = vcombine.high %v236_v36, %v237_v39  ;;  %v182_v57 = vld [vmem:[%s11172_s8 + $0x190] sm:$0xff]  ;;  %15119 = vst [vmem:[#allocation32_spill] sm:$0xff] %v11674_v6  ;;  %v241_v36 = vmax.bf16 %v14912_v15, %v185_v17 }
  0x87   : > { %1988 = vmatprep.subr.bf16.mxu1 %v10810_v59  ;;  %3110 = vmatprep.subr.bf16.mxu0 %v10813_v1  ;;  %v183_v59 = vld [vmem:[%s11172_s8 + $0x198] sm:$0xff]  ;;  %v210_v1 = vmax.bf16 %v14912_v15, %v154_v47  ;;  %15120 = vst [vmem:[#allocation33_spill] sm:$0xff] %v11676_v7  ;;  %v158_v39 = vld [vmem:[%s11172_s8 + $0xd0] sm:$0xff] }
  0x88   : > { %15118 = vst [vmem:[#allocation31_spill] sm:$0xff] %v11661_v50 }
  0x89   : > { %v11681_v26 = vcombine.high %v210_v1, %v211_v2  ;;  %v11694_v47 = vcombine.low %v210_v1, %v211_v2 }
  0x8a   : > { %1989 = vmatpush2.bf16.msra.mxu1 %v10808_v3  ;;  %3111 = vmatpush2.bf16.msra.mxu0 %v10811_v4  ;;  %v238_v3 = vmax.bf16 %v14912_v15, %v182_v57  ;;  %v239_v4 = vmax.bf16 %v14912_v15, %v183_v59  ;;  %v159_v57 = vld [vmem:[%s11172_s8 + $0xd8] sm:$0xff]  ;;  %v186_v59 = vld [vmem:[%s11172_s8 + $0x1b0] sm:$0xff] }
  0x8b   : > { %3922 = vmatprep.subr.bf16.mxu1 %v10816_v12  ;;  %4652 = vmatprep.subr.bf16.mxu0 %v10819_v16  ;;  %v157_v12 = vld [vmem:[%s11172_s8 + $0xc8] sm:$0xff]  ;;  %v184_v16 = vld [vmem:[%s11172_s8 + $0x1a0] sm:$0xff]  ;;  %15121 = vst [vmem:[#allocation34_spill] sm:$0xff] %v11681_v26  ;;  %15123 = vst [vmem:[#allocation36_spill] sm:$0xff] %v11694_v47  ;;  %v215_v1 = vmax.bf16 %v14912_v15, %v159_v57  ;;  %v242_v2 = vmax.bf16 %v14912_v15, %v186_v59 }
  0x8c   : > { %1061 = vmatmul.mubr.bf16.gmra.mxu0 %v11634_v20  ;;  %1201 = vmatmul.mubr.bf16.gmra.mxu1 %v11636_v21  ;;  %v11683_v29 = vcombine.high %v238_v3, %v239_v4  ;;  %v213_v30 = vmax.bf16 %v14912_v15, %v157_v12  ;;  %v240_v35 = vmax.bf16 %v14912_v15, %v184_v16  ;;  %v10823_v59 = vld [vmem:[%s14902_s1 + $0x460] ss:$8 sps:$4 sm:$0xff]  }
  0x8d   : > { %1070 = vmatprep.mubr.bf16.mxu0 %v11641_v34  ;;  %1210 = vmatprep.mubr.bf16.mxu1 %v11643_v40  ;;  %v11696_v48 = vcombine.low %v238_v3, %v239_v4  ;;  %v214_v12 = vmax.bf16 %v14912_v15, %v158_v39  ;;  %v10892_v40 = vld [vmem:[%s14902_s1 + $0x1a0] ss:$8 sps:$4 sm:$0xff]  }
  0x8e   : > { %15122 = vst [vmem:[#allocation35_spill] sm:$0xff] %v11683_v29  ;;  %v11703_v5 = vcombine.high %v240_v35, %v241_v36  ;;  %v11713_v4 = vcombine.low %v212_v31, %v213_v30  ;;  %v11715_v16 = vcombine.low %v240_v35, %v241_v36  ;;  %v10825_v35 = vld [vmem:[%s14902_s1 + $0x464] ss:$8 sps:$4 sm:$0xff]   ;;  %v10820_v36 = vld [vmem:[%s14902_s1 + $0x160] ss:$8 sps:$4 sm:$0xff]  }
  0x8f   : > { %15124 = vst [vmem:[#allocation37_spill] sm:$0xff] %v11696_v48  ;;  %v11717_v17 = vcombine.high %v214_v12, %v215_v1  ;;  %v11725_v39 = vcombine.low %v214_v12, %v215_v1  ;;  %v10828_v12 = vld [vmem:[%s14902_s1 + $0x154] ss:$8 sps:$4 sm:$0xff]   ;;  %v9877_v21 = vld [vmem:[%s11172_s8 + $0x120] sm:$0xff] }
  0x90   : > { %15126 = vst [vmem:[#allocation39_spill] sm:$0xff] %v11703_v5  ;;  %15127 = vst [vmem:[#allocation40_spill] sm:$0xff] %v11713_v4  ;;  %v10831_v1 = vld [vmem:[%s14902_s1 + $0x454] ss:$8 sps:$4 sm:$0xff]  }
  0x91   : > { %15128 = vst [vmem:[#allocation41_spill] sm:$0xff] %v11715_v16  ;;  %15129 = vst [vmem:[#allocation42_spill] sm:$0xff] %v11717_v17 }
  0x92   : > { %15131 = vst [vmem:[#allocation44_spill] sm:$0xff] %v11725_v39 }
  0x94   : > { %1071 = vmatmul.mubr.bf16.gmra.mxu0 %v11653_v41  ;;  %1211 = vmatmul.mubr.bf16.gmra.mxu1 %v11655_v42  ;;  %v10894_v42 = vld [vmem:[%s14902_s1 + $0x1a4] ss:$8 sps:$4 sm:$0xff]  }
  0x95   : > { %1080 = vmatprep.mubr.bf16.mxu0 %v11659_v49  ;;  %1220 = vmatprep.mubr.bf16.mxu1 %v11661_v50  ;;  %v11701_v50 = vcombine.high %v212_v31, %v213_v30  ;;  %v10817_v31 = vld [vmem:[%s14902_s1 + $0x470] ss:$8 sps:$4 sm:$0xff]   ;;  %v10822_v30 = vld [vmem:[%s14902_s1 + $0x164] ss:$8 sps:$4 sm:$0xff]  }
  0x97   : > { %15125 = vst [vmem:[#allocation38_spill] sm:$0xff] %v11701_v50 }
  0x9c   : > { %1081 = vmatmul.mubr.bf16.gmra.mxu0 %v11674_v6  ;;  %1221 = vmatmul.mubr.bf16.gmra.mxu1 %v11676_v7  ;;  %v187_v7 = vld [vmem:[%s11172_s8 + $0x1b8] sm:$0xff] }
  0x9d   : > { %1090 = vmatprep.mubr.bf16.mxu0 %v11681_v26  ;;  %1230 = vmatprep.mubr.bf16.mxu1 %v11683_v29  ;;  %v243_v3 = vmax.bf16 %v14912_v15, %v187_v7  ;;  %v10814_v7 = vld [vmem:[%s14902_s1 + $0x170] ss:$8 sps:$4 sm:$0xff]  }
  0x9f   : > { %v11719_v29 = vcombine.high %v242_v2, %v243_v3  ;;  %v11727_v57 = vcombine.low %v242_v2, %v243_v3  ;;  %v10826_v2 = vld [vmem:[%s14902_s1 + $0x150] ss:$8 sps:$4 sm:$0xff]  }
  0xa0   : > { %v10829_v3 = vld [vmem:[%s14902_s1 + $0x450] ss:$8 sps:$4 sm:$0xff]  }
  0xa1   : > { %15130 = vst [vmem:[#allocation43_spill] sm:$0xff] %v11719_v29  ;;  %15132 = vst [vmem:[#allocation45_spill] sm:$0xff] %v11727_v57 }
  0xa4   : > { %1091 = vmatmul.mubr.bf16.gmra.mxu0 %v11694_v47  ;;  %1231 = vmatmul.mubr.bf16.gmra.mxu1 %v11696_v48  ;;  %v9874_v48 = vld [vmem:[%s11172_s8 + $0x108] sm:$0xff] }
  0xa5   : > { %1100 = vmatprep.mubr.bf16.mxu0 %v11701_v50  ;;  %1240 = vmatprep.mubr.bf16.mxu1 %v11703_v5  ;;  %v10888_v5 = vld [vmem:[%s14902_s1 + $0x1b4] ss:$8 sps:$4 sm:$0xff]  }
  0xac   : > { %1101 = vmatmul.mubr.bf16.gmra.mxu0 %v11713_v4  ;;  %1241 = vmatmul.mubr.bf16.gmra.mxu1 %v11715_v16  ;;  %v10883_v16 = vld [vmem:[%s14902_s1 + $0x4c0] ss:$8 sps:$4 sm:$0xff]  }
  0xad   : > { %1110 = vmatprep.mubr.bf16.mxu0 %v11717_v17  ;;  %1250 = vmatprep.mubr.bf16.mxu1 %v11719_v29  ;;  %v10885_v29 = vld [vmem:[%s14902_s1 + $0x4c4] ss:$8 sps:$4 sm:$0xff]  }
  0xb4   : > { %1111 = vmatmul.mubr.bf16.gmra.mxu0 %v11725_v39  ;;  %1251 = vmatmul.mubr.bf16.gmra.mxu1 %v11727_v57  ;;  %v10876_v57 = vld [vmem:[%s14902_s1 + $0x1d4] ss:$8 sps:$4 sm:$0xff]  }
  0xb5   : > { %1990 = vmatprep.mubr.bf16.mxu1 %v11421_v62  ;;  %3112 = vmatprep.mubr.bf16.mxu0 %v11603_v58 }
  0xbc   : > { %1991 = vmatmul.mubr.bf16.vlgmr.msra.gmra.mxu1 %v11458_v18  ;;  %3113 = vmatmul.mubr.bf16.vlgmr.msra.gmra.mxu0 %v11634_v20 }
  0xbd   : > { %3923 = vmatpush1.bf16.msra.mxu1 %v10814_v7  ;;  %4653 = vmatpush1.bf16.msra.mxu0 %v10817_v31  ;;  %v10834_v7 = vld [vmem:[%s14902_s1 + $0x144] ss:$8 sps:$4 sm:$0xff]  }
  0xbe   : > { %2000 = vmatprep.mubr.bf16.mxu1 %v11471_v27  ;;  %3122 = vmatprep.mubr.bf16.mxu0 %v11641_v34  ;;  %v10837_v31 = vld [vmem:[%s14902_s1 + $0x444] ss:$8 sps:$4 sm:$0xff]  }
  0xbf   : > { %3924 = vmatprep.subr.bf16.mxu1 %v10822_v30  ;;  %4654 = vmatprep.subr.bf16.mxu0 %v10825_v35  ;;  %v10832_v30 = vld [vmem:[%s14902_s1 + $0x140] ss:$8 sps:$4 sm:$0xff]  }
  0xc0   : > { %v10835_v35 = vld [vmem:[%s14902_s1 + $0x440] ss:$8 sps:$4 sm:$0xff]  }
  0xc1   : > { %3925 = vmatpush1.bf16.msra.mxu1 %v10820_v36  ;;  %4655 = vmatpush1.bf16.msra.mxu0 %v10823_v59  ;;  %v10840_v36 = vld [vmem:[%s14902_s1 + $0x134] ss:$8 sps:$4 sm:$0xff]  }
  0xc2   : > { %3926 = vmatprep.subr.bf16.mxu1 %v10828_v12  ;;  %4656 = vmatprep.subr.bf16.mxu0 %v10831_v1  ;;  %v10843_v59 = vld [vmem:[%s14902_s1 + $0x434] ss:$8 sps:$4 sm:$0xff]   ;;  %v10838_v12 = vld [vmem:[%s14902_s1 + $0x130] ss:$8 sps:$4 sm:$0xff]  }
  0xc3   : > { %v10841_v1 = vld [vmem:[%s14902_s1 + $0x430] ss:$8 sps:$4 sm:$0xff]  }
  0xc4   : > { %2001 = vmatmul.mubr.bf16.gmra.mxu1 %v11502_v44  ;;  %3123 = vmatmul.mubr.bf16.gmra.mxu0 %v11653_v41 }
  0xc5   : > { %2010 = vmatprep.mubr.bf16.mxu1 %v11515_v51  ;;  %3132 = vmatprep.mubr.bf16.mxu0 %v11659_v49 }
  0xc6   : > { %3927 = vmatpush1.bf16.msra.mxu1 %v10826_v2  ;;  %4657 = vmatpush1.bf16.msra.mxu0 %v10829_v3  ;;  %v10846_v2 = vld [vmem:[%s14902_s1 + $0x124] ss:$8 sps:$4 sm:$0xff]  }
  0xc7   : > { %3928 = vmatprep.subr.bf16.mxu1 %v10834_v7  ;;  %4658 = vmatprep.subr.bf16.mxu0 %v10837_v31  ;;  %v10849_v3 = vld [vmem:[%s14902_s1 + $0x424] ss:$8 sps:$4 sm:$0xff]   ;;  %v10844_v7 = vld [vmem:[%s14902_s1 + $0x120] ss:$8 sps:$4 sm:$0xff]  }
  0xc8   : > { %v10847_v31 = vld [vmem:[%s14902_s1 + $0x420] ss:$8 sps:$4 sm:$0xff]  }
  0xca   : > { %3929 = vmatpush1.bf16.msra.mxu1 %v10832_v30  ;;  %4659 = vmatpush1.bf16.msra.mxu0 %v10835_v35  ;;  %v10852_v30 = vld [vmem:[%s14902_s1 + $0x114] ss:$8 sps:$4 sm:$0xff]  }
  0xcb   : > { %3930 = vmatprep.subr.bf16.mxu1 %v10840_v36  ;;  %4660 = vmatprep.subr.bf16.mxu0 %v10843_v59  ;;  %v10855_v35 = vld [vmem:[%s14902_s1 + $0x414] ss:$8 sps:$4 sm:$0xff]   ;;  %v10850_v36 = vld [vmem:[%s14902_s1 + $0x110] ss:$8 sps:$4 sm:$0xff]  }
  0xcc   : > { %2011 = vmatmul.mubr.bf16.gmra.mxu1 %v11546_v8  ;;  %3133 = vmatmul.mubr.bf16.gmra.mxu0 %v11674_v6  ;;  %v10853_v59 = vld [vmem:[%s14902_s1 + $0x410] ss:$8 sps:$4 sm:$0xff]  }
  0xcd   : > { %2020 = vmatprep.mubr.bf16.mxu1 %v11559_v22  ;;  %3142 = vmatprep.mubr.bf16.mxu0 %v11681_v26 }
  0xce   : > { %3931 = vmatpush1.bf16.msra.mxu1 %v10838_v12  ;;  %4661 = vmatpush1.bf16.msra.mxu0 %v10841_v1  ;;  %v10858_v12 = vld [vmem:[%s14902_s1 + $0x104] ss:$8 sps:$4 sm:$0xff]  }
  0xcf   : > { %3932 = vmatprep.subr.bf16.mxu1 %v10846_v2  ;;  %4662 = vmatprep.subr.bf16.mxu0 %v10849_v3  ;;  %v10861_v1 = vld [vmem:[%s14902_s1 + $0x404] ss:$8 sps:$4 sm:$0xff]   ;;  %v10856_v2 = vld [vmem:[%s14902_s1 + $0x100] ss:$8 sps:$4 sm:$0xff]  }
  0xd0   : > { %v10859_v3 = vld [vmem:[%s14902_s1 + $0x400] ss:$8 sps:$4 sm:$0xff]  }
  0xd2   : > { %3933 = vmatpush1.bf16.msra.mxu1 %v10844_v7  ;;  %4663 = vmatpush1.bf16.msra.mxu0 %v10847_v31  ;;  %v10864_v7 = vld [vmem:[%s14902_s1 + $0x1f4] ss:$8 sps:$4 sm:$0xff]  }
  0xd3   : > { %3934 = vmatprep.subr.bf16.mxu1 %v10852_v30  ;;  %4664 = vmatprep.subr.bf16.mxu0 %v10855_v35  ;;  %v10867_v31 = vld [vmem:[%s14902_s1 + $0x4f4] ss:$8 sps:$4 sm:$0xff]   ;;  %v9869_v30 = vld [vmem:[%s11172_s8 + $0xe0] sm:$0xff]  ;;  %v9870_v35 = vld [vmem:[%s11172_s8 + $0xe8] sm:$0xff] }
  0xd4   : > { %2021 = vmatmul.mubr.bf16.gmra.mxu1 %v11590_v43  ;;  %3143 = vmatmul.mubr.bf16.gmra.mxu0 %v11694_v47  ;;  %v9895_v43 = vld [vmem:[%s11172_s8 + $0x1b0] sm:$0xff] }
  0xd5   : > { %2030 = vmatprep.mubr.bf16.mxu1 %v11603_v58  ;;  %3152 = vmatprep.mubr.bf16.mxu0 %v11701_v50 }
  0xd6   : > { %3935 = vmatpush1.bf16.msra.mxu1 %v10850_v36  ;;  %4665 = vmatpush1.bf16.msra.mxu0 %v10853_v59  ;;  %v10862_v36 = vld [vmem:[%s14902_s1 + $0x1f0] ss:$8 sps:$4 sm:$0xff]  }
  0xd7   : > { %3936 = vmatprep.subr.bf16.mxu1 %v10858_v12  ;;  %4666 = vmatprep.subr.bf16.mxu0 %v10861_v1  ;;  %v10865_v59 = vld [vmem:[%s14902_s1 + $0x4f0] ss:$8 sps:$4 sm:$0xff]   ;;  %v10870_v12 = vld [vmem:[%s14902_s1 + $0x1e4] ss:$8 sps:$4 sm:$0xff]  }
  0xd8   : > { %v10873_v1 = vld [vmem:[%s14902_s1 + $0x4e4] ss:$8 sps:$4 sm:$0xff]  }
  0xda   : > { %3937 = vmatpush1.bf16.msra.mxu1 %v10856_v2  ;;  %4667 = vmatpush1.bf16.msra.mxu0 %v10859_v3  ;;  %v432_v2 = vmax.bf16 %v14912_v15, %v9869_v30  ;;  %v433_v3 = vmax.bf16 %v14912_v15, %v9870_v35  ;;  %v10879_v30 = vld [vmem:[%s14902_s1 + $0x4d4] ss:$8 sps:$4 sm:$0xff]   ;;  %v10874_v15 = vld [vmem:[%s14902_s1 + $0x1d0] ss:$8 sps:$4 sm:$0xff]  }
  0xdb   : > { %3938 = vmatprep.subr.bf16.mxu1 %v10864_v7  ;;  %4668 = vmatprep.subr.bf16.mxu0 %v10867_v31  ;;  %v10868_v7 = vld [vmem:[%s14902_s1 + $0x1e0] ss:$8 sps:$4 sm:$0xff]  }
  0xdc   : > { %2031 = vmatmul.mubr.bf16.gmra.mxu1 %v11634_v20  ;;  %3153 = vmatmul.mubr.bf16.gmra.mxu0 %v11713_v4  ;;  %v10871_v31 = vld [vmem:[%s14902_s1 + $0x4e0] ss:$8 sps:$4 sm:$0xff]   ;;  %v11877_v35 = vcombine.high %v432_v2, %v433_v3 }
  0xdd   : > { %2040 = vmatprep.mubr.bf16.mxu1 %v11641_v34  ;;  %3162 = vmatprep.mubr.bf16.mxu0 %v11717_v17 }
  0xde   : > { %3939 = vmatpush2.bf16.msra.mxu1 %v10862_v36  ;;  %4669 = vmatpush2.bf16.msra.mxu0 %v10865_v59  ;;  %15133 = vst [vmem:[#allocation46_spill] sm:$0xff] %v11877_v35  ;;  %v9871_v36 = vld [vmem:[%s11172_s8 + $0xf0] sm:$0xff]  ;;  %v9872_v59 = vld [vmem:[%s11172_s8 + $0xf8] sm:$0xff] }
  0xdf   : > { %3940 = vmatprep.subr.bf16.mxu1 %v10870_v12  ;;  %4670 = vmatprep.subr.bf16.mxu0 %v10873_v1  ;;  %v10877_v12 = vld [vmem:[%s14902_s1 + $0x4d0] ss:$8 sps:$4 sm:$0xff]   ;;  %v10882_v1 = vld [vmem:[%s14902_s1 + $0x1c4] ss:$8 sps:$4 sm:$0xff]  }
  0xe2   : > { %3941 = vmatpush2.bf16.msra.mxu1 %v10868_v7  ;;  %4671 = vmatpush2.bf16.msra.mxu0 %v10871_v31 }
  0xe3   : > { %3942 = vmatprep.subr.bf16.mxu1 %v10876_v57  ;;  %4672 = vmatprep.subr.bf16.mxu0 %v10879_v30  ;;  %v15134_v57 = vmov 0   ;;  %v10880_v30 = vld [vmem:[%s14902_s1 + $0x1c0] ss:$8 sps:$4 sm:$0xff]  }
  0xe4   : > { %2041 = vmatmul.mubr.bf16.gmra.mxu1 %v11653_v41  ;;  %3163 = vmatmul.mubr.bf16.gmra.mxu0 %v11725_v39  ;;  %v434_v7 = vmax.bf16 %v15134_v57, %v9871_v36  ;;  %v435_v31 = vmax.bf16 %v15134_v57, %v9872_v59  ;;  %v10891_v36 = vld [vmem:[%s14902_s1 + $0x4b4] ss:$8 sps:$4 sm:$0xff]   ;;  %v447_v10 = vmax.bf16 %v15134_v57, %v9884_v56  ;;  %v9885_v56 = vld [vmem:[%s11172_s8 + $0x160] sm:$0xff] }
  0xe5   : > { %2050 = vmatprep.mubr.bf16.mxu1 %v11659_v49  ;;  %3172 = vmatprep.mubr.bf16.mxu0 %v11877_v35  ;;  %v9893_v41 = vld [vmem:[%s11172_s8 + $0x1a0] sm:$0xff] }
  0xe6   : > { %3943 = vmatpush2.bf16.msra.mxu1 %v10874_v15  ;;  %4673 = vmatpush2.bf16.msra.mxu0 %v10877_v12  ;;  %v11911_v15 = vcombine.low %v432_v2, %v433_v3  ;;  %v11913_v59 = vcombine.high %v434_v7, %v435_v31  ;;  %v9873_v12 = vld [vmem:[%s11172_s8 + $0x100] sm:$0xff]  ;;  %v437_v2 = vmax.bf16 %v15134_v57, %v9874_v48 }
  0xe7   : > { %3944 = vmatprep.subr.bf16.mxu1 %v10882_v1  ;;  %4674 = vmatprep.subr.bf16.mxu0 %v10885_v29  ;;  %v10886_v29 = vld [vmem:[%s14902_s1 + $0x1b0] ss:$8 sps:$4 sm:$0xff]   ;;  %v11929_v3 = vcombine.low %v434_v7, %v435_v31  ;;  %v10895_v48 = vld [vmem:[%s14902_s1 + $0x4a0] ss:$8 sps:$4 sm:$0xff]   ;;  %v10897_v7 = vld [vmem:[%s14902_s1 + $0x4a4] ss:$8 sps:$4 sm:$0xff]  }
  0xe8   : > { %15135 = vst [vmem:[#allocation47_spill] sm:$0xff] %v11911_v15  ;;  %15136 = vst [vmem:[#allocation48_spill] sm:$0xff] %v11913_v59  ;;  %v10889_v1 = vld [vmem:[%s14902_s1 + $0x4b0] ss:$8 sps:$4 sm:$0xff]  }
  0xe9   : > { %15137 = vst [vmem:[#allocation49_spill] sm:$0xff] %v11929_v3 }
  0xea   : > { %3945 = vmatpush2.bf16.msra.mxu1 %v10880_v30  ;;  %4675 = vmatpush2.bf16.msra.mxu0 %v10883_v16  ;;  %v436_v16 = vmax.bf16 %v15134_v57, %v9873_v12 }
  0xeb   : > { %3946 = vmatprep.subr.bf16.mxu1 %v10888_v5  ;;  %4676 = vmatprep.subr.bf16.mxu0 %v10891_v36  ;;  %v9875_v5 = vld [vmem:[%s11172_s8 + $0x110] sm:$0xff]  ;;  %v9876_v36 = vld [vmem:[%s11172_s8 + $0x118] sm:$0xff] }
  0xec   : > { %2051 = vmatmul.mubr.bf16.gmra.mxu1 %v11674_v6  ;;  %3173 = vmatmul.mubr.bf16.gmra.mxu0 %v11911_v15  ;;  %v11931_v30 = vcombine.high %v436_v16, %v437_v2  ;;  %v438_v31 = vmax.bf16 %v15134_v57, %v9875_v5  ;;  %v439_v12 = vmax.bf16 %v15134_v57, %v9876_v36  ;;  %v9880_v36 = vld [vmem:[%s11172_s8 + $0x138] sm:$0xff] }
  0xed   : > { %2060 = vmatprep.mubr.bf16.mxu1 %v11681_v26  ;;  %3182 = vmatprep.mubr.bf16.mxu0 %v11913_v59  ;;  %v441_v5 = vmax.bf16 %v15134_v57, %v9878_v0 }
  0xee   : > { %3947 = vmatpush2.bf16.msra.mxu1 %v10886_v29  ;;  %4677 = vmatpush2.bf16.msra.mxu0 %v10889_v1  ;;  %15138 = vst [vmem:[#allocation50_spill] sm:$0xff] %v11931_v30  ;;  %v11953_v29 = vcombine.low %v436_v16, %v437_v2  ;;  %v11955_v1 = vcombine.high %v438_v31, %v439_v12  ;;  %v9879_v2 = vld [vmem:[%s11172_s8 + $0x130] sm:$0xff] }
  0xef   : > { %3948 = vmatprep.subr.bf16.mxu1 %v10894_v42  ;;  %4678 = vmatprep.subr.bf16.mxu0 %v10897_v7  ;;  %v440_v42 = vmax.bf16 %v15134_v57, %v9877_v21  ;;  %v10900_v7 = vld [vmem:[%s14902_s1 + $0x194] ss:$8 sps:$4 sm:$0xff]   ;;  %v442_v0 = vmax.bf16 %v15134_v57, %v9879_v2  ;;  %v443_v21 = vmax.bf16 %v15134_v57, %v9880_v36  ;;  %v9882_v2 = vld [vmem:[%s11172_s8 + $0x148] sm:$0xff] }
  0xf0   : > { %15139 = vst [vmem:[#allocation51_spill] sm:$0xff] %v11953_v29  ;;  %15140 = vst [vmem:[#allocation52_spill] sm:$0xff] %v11955_v1 }
  0xf1   : > { %v11967_v16 = vcombine.high %v440_v42, %v441_v5  ;;  %v11989_v46 = vcombine.low %v440_v42, %v441_v5  ;;  %v11991_v23 = vcombine.high %v442_v0, %v443_v21  ;;  %v444_v42 = vmax.bf16 %v15134_v57, %v9881_v11 }
  0xf2   : > { %3949 = vmatpush2.bf16.msra.mxu1 %v10892_v40  ;;  %4679 = vmatpush2.bf16.msra.mxu0 %v10895_v48  ;;  %v11965_v40 = vcombine.low %v438_v31, %v439_v12  ;;  %v10898_v48 = vld [vmem:[%s14902_s1 + $0x190] ss:$8 sps:$4 sm:$0xff]   ;;  %v10903_v12 = vld [vmem:[%s14902_s1 + $0x494] ss:$8 sps:$4 sm:$0xff]   ;;  %v445_v5 = vmax.bf16 %v15134_v57, %v9882_v2  ;;  %v12013_v45 = vcombine.low %v442_v0, %v443_v21  ;;  %v10907_v0 = vld [vmem:[%s14902_s1 + $0x480] ss:$8 sps:$4 sm:$0xff]  }
  0xf3   : > { %15142 = vst [vmem:[#allocation54_spill] sm:$0xff] %v11967_v16  ;;  %v10901_v31 = vld [vmem:[%s14902_s1 + $0x490] ss:$8 sps:$4 sm:$0xff]   ;;  %3950 = vmatprep.subr.bf16.mxu1 %v10900_v7  ;;  %4680 = vmatprep.subr.bf16.mxu0 %v10903_v12  ;;  %15143 = vst [vmem:[#allocation55_spill] sm:$0xff] %v11989_v46  ;;  %v10909_v21 = vld [vmem:[%s14902_s1 + $0x484] ss:$8 sps:$4 sm:$0xff]  }
  0xf4   : > { %2061 = vmatmul.mubr.bf16.gmra.mxu1 %v11694_v47  ;;  %3183 = vmatmul.mubr.bf16.gmra.mxu0 %v11929_v3  ;;  %15141 = vst [vmem:[#allocation53_spill] sm:$0xff] %v11965_v40  ;;  %15144 = vst [vmem:[#allocation56_spill] sm:$0xff] %v11991_v23  ;;  %v12015_v28 = vcombine.high %v444_v42, %v445_v5  ;;  %v9883_v2 = vld [vmem:[%s11172_s8 + $0x150] sm:$0xff] }
  0xf5   : > { %2070 = vmatprep.mubr.bf16.mxu1 %v11701_v50  ;;  %3192 = vmatprep.mubr.bf16.mxu0 %v11931_v30  ;;  %15148 = vst [vmem:[#allocation60_spill] sm:$0xff] %v12013_v45  ;;  %v9891_v47 = vld [vmem:[%s11172_s8 + $0x190] sm:$0xff] }
  0xf6   : > { %3951 = vmatpush2.bf16.msra.mxu1 %v10898_v48  ;;  %4681 = vmatpush2.bf16.msra.mxu0 %v10901_v31  ;;  %15149 = vst [vmem:[#allocation61_spill] sm:$0xff] %v12015_v28 }
  0xf7   : > { %3952 = vmatprep.subr.bf16.mxu1 %v10906_v19  ;;  %v446_v19 = vmax.bf16 %v15134_v57, %v9883_v2  ;;  %4682 = vmatprep.subr.bf16.mxu0 %v10909_v21  ;;  %v10912_v21 = vld [vmem:[%s14902_s1 + $0x774] ss:$8 sps:$4 sm:$0xff]  }
  0xfa   : > { %3953 = vmatpush2.bf16.msra.mxu1 %v10904_v38  ;;  %4683 = vmatpush2.bf16.msra.mxu0 %v10907_v0  ;;  %v448_v38 = vmax.bf16 %v15134_v57, %v9885_v56 }
  0xfb   : > { %5494 = vmatprep.subr.bf16.mxu1 %v10912_v21 }
  0xfc   : > { %2071 = vmatmul.mubr.bf16.gmra.mxu1 %v11713_v4  ;;  %3193 = vmatmul.mubr.bf16.gmra.mxu0 %v11953_v29 }
  0xfd   : > { %2080 = vmatprep.mubr.bf16.mxu1 %v11717_v17  ;;  %3202 = vmatprep.mubr.bf16.mxu0 %v11955_v1 }
 0x104   : > { %2081 = vmatmul.mubr.bf16.gmra.mxu1 %v11725_v39  ;;  %3203 = vmatmul.mubr.bf16.gmra.mxu0 %v11965_v40  ;;  %v9889_v39 = vld [vmem:[%s11172_s8 + $0x180] sm:$0xff] }
 0x105   : > { %2090 = vmatprep.mubr.bf16.mxu1 %v11877_v35  ;;  %3212 = vmatprep.mubr.bf16.mxu0 %v11967_v16 }
 0x10c   : > { %v11995_v52 = vpop.f32.mrf.mxu0  ;;  %v11997_v36 = vpop.f32.mrf.mxu1  ;;  %2091 = vmatmul.mubr.bf16.gmra.mxu1 %v11911_v15  ;;  %3213 = vmatmul.mubr.bf16.gmra.mxu0 %v11989_v46 }
 0x10d   : > { %15145 = vst [vmem:[#allocation57_spill] sm:$0xff] %v11997_v36  ;;  %2100 = vmatprep.mubr.bf16.mxu1 %v11913_v59  ;;  %3222 = vmatprep.mubr.bf16.mxu0 %v11991_v23  ;;  %v9888_v59 = vld [vmem:[%s11172_s8 + $0x178] sm:$0xff] }
 0x10e   : > { %v12005_v48 = vpop.f32.mrf.mxu0  ;;  %v12007_v7 = vpop.f32.mrf.mxu1 }
 0x10f   : > { %15146 = vst [vmem:[#allocation58_spill] sm:$0xff] %v12007_v7 }
 0x110   : > { %v12009_v31 = vpop.f32.mrf.mxu0  ;;  %v12011_v12 = vpop.f32.mrf.mxu1 }
 0x111   : > { %15147 = vst [vmem:[#allocation59_spill] sm:$0xff] %v12011_v12  ;;  %v9886_v12 = vld [vmem:[%s11172_s8 + $0x168] sm:$0xff] }
 0x112   : > { %v12020_v63 = vpop.f32.mrf.mxu0  ;;  %v12022_v11 = vpop.f32.mrf.mxu1 }
 0x113   : > { %15150 = vst [vmem:[#allocation62_spill] sm:$0xff] %v12022_v11 }
 0x114   : > { %v12035_v33 = vpop.f32.mrf.mxu0  ;;  %v12037_v14 = vpop.f32.mrf.mxu1  ;;  %2101 = vmatmul.mubr.bf16.gmra.mxu1 %v11929_v3  ;;  %3223 = vmatmul.mubr.bf16.gmra.mxu0 %v12013_v45  ;;  %v12053_v3 = vcombine.low %v444_v42, %v445_v5  ;;  %v449_v42 = vmax.bf16 %v15134_v57, %v9886_v12  ;;  %v10915_v12 = vld [vmem:[%s14902_s1 + $0x274] ss:$8 sps:$4 sm:$0xff]  }
 0x115   : > { %15151 = vst [vmem:[#allocation63_spill] sm:$0xff] %v12037_v14  ;;  %2110 = vmatprep.mubr.bf16.mxu1 %v11931_v30  ;;  %3232 = vmatprep.mubr.bf16.mxu0 %v12015_v28  ;;  %v12055_v30 = vcombine.high %v446_v19, %v447_v10 }
 0x116   : > { %v12045_v61 = vpop.f32.mrf.mxu0  ;;  %v12047_v55 = vpop.f32.mrf.mxu1  ;;  %15154 = vst [vmem:[#allocation66_spill] sm:$0xff] %v12053_v3  ;;  %6869 = vmatprep.subr.bf16.mxu0 %v10915_v12  ;;  %v12115_v15 = vcombine.low %v448_v38, %v449_v42 }
 0x117   : > { %15152 = vst [vmem:[#allocation64_spill] sm:$0xff] %v12047_v55  ;;  %15155 = vst [vmem:[#allocation67_spill] sm:$0xff] %v12055_v30 }
 0x118   : > { %v12049_v25 = vpop.f32.mrf.mxu0  ;;  %v12051_v14 = vpop.f32.mrf.mxu1  ;;  %15166 = vst [vmem:[#allocation78_spill] sm:$0xff] %v12115_v15 }
 0x119   : > { %15153 = vst [vmem:[#allocation65_spill] sm:$0xff] %v12051_v14  ;;  %v9887_v14 = vld [vmem:[%s11172_s8 + $0x170] sm:$0xff] }
 0x11a   : > { %v12057_v11 = vpop.f32.mrf.mxu0  ;;  %v12059_v2 = vpop.f32.mrf.mxu1 }
 0x11b   : > { %15156 = vst [vmem:[#allocation68_spill] sm:$0xff] %v12059_v2  ;;  %v12086_v2 = vcombine.high %v448_v38, %v449_v42  ;;  %v452_v38 = vmax.bf16 %v15134_v57, %v9889_v39  ;;  %v9892_v39 = vld [vmem:[%s11172_s8 + $0x198] sm:$0xff] }
 0x11c   : > { %v12063_v7 = vpop.f32.mrf.mxu0  ;;  %v12065_v55 = vpop.f32.mrf.mxu1  ;;  %2111 = vmatmul.mubr.bf16.gmra.mxu1 %v11953_v29  ;;  %3233 = vmatmul.mubr.bf16.gmra.mxu0 %v12053_v3 }
 0x11d   : > { %15157 = vst [vmem:[#allocation69_spill] sm:$0xff] %v12065_v55  ;;  %2120 = vmatprep.mubr.bf16.mxu1 %v11955_v1  ;;  %3242 = vmatprep.mubr.bf16.mxu0 %v12055_v30  ;;  %v12084_v1 = vcombine.low %v446_v19, %v447_v10  ;;  %15161 = vst [vmem:[#allocation73_spill] sm:$0xff] %v12086_v2  ;;  %v450_v10 = vmax.bf16 %v15134_v57, %v9887_v14  ;;  %v9890_v14 = vld [vmem:[%s11172_s8 + $0x188] sm:$0xff] }
 0x11e   : > { %v12073_v5 = vpop.f32.mrf.mxu0  ;;  %v12075_v0 = vpop.f32.mrf.mxu1  ;;  %v451_v19 = vmax.bf16 %v15134_v57, %v9888_v59  ;;  %v453_v42 = vmax.bf16 %v15134_v57, %v9890_v14 }
 0x11f   : > { %15158 = vst [vmem:[#allocation70_spill] sm:$0xff] %v12075_v0  ;;  %15160 = vst [vmem:[#allocation72_spill] sm:$0xff] %v12084_v1 }
 0x120   : > { %v12080_v55 = vpop.f32.mrf.mxu0  ;;  %v12082_v29 = vpop.f32.mrf.mxu1  ;;  %v12143_v4 = vcombine.low %v450_v10, %v451_v19  ;;  %v12171_v6 = vcombine.low %v452_v38, %v453_v42 }
 0x121   : > { %15159 = vst [vmem:[#allocation71_spill] sm:$0xff] %v12082_v29 }
 0x122   : > { %v12091_v56 = vpop.f32.mrf.mxu0  ;;  %v12093_v0 = vpop.f32.mrf.mxu1  ;;  %15172 = vst [vmem:[#allocation84_spill] sm:$0xff] %v12143_v4  ;;  %15178 = vst [vmem:[#allocation90_spill] sm:$0xff] %v12171_v6 }
 0x123   : > { %15162 = vst [vmem:[#allocation74_spill] sm:$0xff] %v12093_v0 }
 0x124   : > { %v12097_v36 = vpop.f32.mrf.mxu0  ;;  %v12099_v29 = vpop.f32.mrf.mxu1  ;;  %2121 = vmatmul.mubr.bf16.gmra.mxu1 %v11965_v40  ;;  %3243 = vmatmul.mubr.bf16.gmra.mxu0 %v12084_v1  ;;  %v12117_v40 = vcombine.high %v450_v10, %v451_v19  ;;  %v454_v10 = vmax.bf16 %v15134_v57, %v9891_v47  ;;  %v455_v19 = vmax.bf16 %v15134_v57, %v9892_v39  ;;  %v9894_v47 = vld [vmem:[%s11172_s8 + $0x1a8] sm:$0xff] }
 0x125   : > { %15163 = vst [vmem:[#allocation75_spill] sm:$0xff] %v12099_v29  ;;  %2130 = vmatprep.mubr.bf16.mxu1 %v11967_v16  ;;  %3252 = vmatprep.mubr.bf16.mxu0 %v12086_v2 }
 0x126   : > { %v12107_v21 = vpop.f32.mrf.mxu0  ;;  %v12109_v12 = vpop.f32.mrf.mxu1  ;;  %15167 = vst [vmem:[#allocation79_spill] sm:$0xff] %v12117_v40  ;;  %v12199_v20 = vcombine.low %v454_v10, %v455_v19 }
 0x127   : > { %15164 = vst [vmem:[#allocation76_spill] sm:$0xff] %v12109_v12 }
 0x128   : > { %v12111_v0 = vpop.f32.mrf.mxu0  ;;  %v12113_v29 = vpop.f32.mrf.mxu1  ;;  %15186 = vst [vmem:[#allocation98_spill] sm:$0xff] %v12199_v20 }
 0x129   : > { %15165 = vst [vmem:[#allocation77_spill] sm:$0xff] %v12113_v29 }
 0x12a   : > { %v12119_v35 = vpop.f32.mrf.mxu0  ;;  %v12121_v16 = vpop.f32.mrf.mxu1 }
 0x12b   : > { %15168 = vst [vmem:[#allocation80_spill] sm:$0xff] %v12121_v16 }
 0x12c   : > { %v12125_v17 = vpop.f32.mrf.mxu0  ;;  %v12127_v59 = vpop.f32.mrf.mxu1  ;;  %2131 = vmatmul.mubr.bf16.gmra.mxu1 %v11989_v46  ;;  %3253 = vmatmul.mubr.bf16.gmra.mxu0 %v12115_v15  ;;  %v12145_v46 = vcombine.high %v452_v38, %v453_v42  ;;  %v456_v38 = vmax.bf16 %v15134_v57, %v9893_v41  ;;  %v457_v42 = vmax.bf16 %v15134_v57, %v9894_v47  ;;  %v9896_v41 = vld [vmem:[%s11172_s8 + $0x1b8] sm:$0xff] }
 0x12d   : > { %15169 = vst [vmem:[#allocation81_spill] sm:$0xff] %v12127_v59  ;;  %2140 = vmatprep.mubr.bf16.mxu1 %v11991_v23  ;;  %3262 = vmatprep.mubr.bf16.mxu0 %v12117_v40 }
 0x12e   : > { %v12135_v16 = vpop.f32.mrf.mxu0  ;;  %v12137_v29 = vpop.f32.mrf.mxu1  ;;  %15173 = vst [vmem:[#allocation85_spill] sm:$0xff] %v12145_v46 }
 0x12f   : > { %15170 = vst [vmem:[#allocation82_spill] sm:$0xff] %v12137_v29 }
 0x130   : > { %v12139_v12 = vpop.f32.mrf.mxu0  ;;  %v12141_v59 = vpop.f32.mrf.mxu1 }
 0x131   : > { %15171 = vst [vmem:[#allocation83_spill] sm:$0xff] %v12141_v59 }
 0x132   : > { %v12147_v50 = vpop.f32.mrf.mxu0  ;;  %v12149_v23 = vpop.f32.mrf.mxu1 }
 0x133   : > { %15174 = vst [vmem:[#allocation86_spill] sm:$0xff] %v12149_v23 }
 0x134   : > { %v12153_v26 = vpop.f32.mrf.mxu0  ;;  %v12155_v14 = vpop.f32.mrf.mxu1  ;;  %2141 = vmatmul.mubr.bf16.gmra.mxu1 %v12013_v45  ;;  %3263 = vmatmul.mubr.bf16.gmra.mxu0 %v12143_v4  ;;  %v12173_v45 = vcombine.high %v454_v10, %v455_v19  ;;  %v458_v10 = vmax.bf16 %v15134_v57, %v9895_v43  ;;  %v459_v19 = vmax.bf16 %v15134_v57, %v9896_v41  ;;  %v9898_v43 = vld [vmem:[%s11172_s8 + $0x1c8] sm:$0xff] }
 0x135   : > { %15175 = vst [vmem:[#allocation87_spill] sm:$0xff] %v12155_v14  ;;  %2150 = vmatprep.mubr.bf16.mxu1 %v12015_v28  ;;  %3272 = vmatprep.mubr.bf16.mxu0 %v12145_v46 }
 0x136   : > { %v12163_v23 = vpop.f32.mrf.mxu0  ;;  %v12165_v59 = vpop.f32.mrf.mxu1  ;;  %15179 = vst [vmem:[#allocation91_spill] sm:$0xff] %v12173_v45 }
 0x137   : > { %15176 = vst [vmem:[#allocation88_spill] sm:$0xff] %v12165_v59 }
 0x138   : > { %v12167_v29 = vpop.f32.mrf.mxu0  ;;  %v12169_v14 = vpop.f32.mrf.mxu1 }
 0x139   : > { %15177 = vst [vmem:[#allocation89_spill] sm:$0xff] %v12169_v14 }
 0x13a   : > { %v12175_v49 = vpop.f32.mrf.mxu0  ;;  %v12177_v28 = vpop.f32.mrf.mxu1 }
 0x13b   : > { %15180 = vst [vmem:[#allocation92_spill] sm:$0xff] %v12177_v28 }
 0x13c   : > { %v12181_v34 = vpop.f32.mrf.mxu0  ;;  %v12183_v39 = vpop.f32.mrf.mxu1  ;;  %2151 = vmatmul.mubr.bf16.gmra.mxu1 %v12053_v3  ;;  %3273 = vmatmul.mubr.bf16.gmra.mxu0 %v12171_v6  ;;  %v12201_v3 = vcombine.high %v456_v38, %v457_v42 }
 0x13d   : > { %15181 = vst [vmem:[#allocation93_spill] sm:$0xff] %v12183_v39  ;;  %2160 = vmatprep.mubr.bf16.mxu1 %v12055_v30  ;;  %3282 = vmatprep.mubr.bf16.mxu0 %v12173_v45 }
 0x13e   : > { %v12191_v28 = vpop.f32.mrf.mxu0  ;;  %v12193_v14 = vpop.f32.mrf.mxu1  ;;  %15187 = vst [vmem:[#allocation99_spill] sm:$0xff] %v12201_v3 }
 0x13f   : > { %15182 = vst [vmem:[#allocation94_spill] sm:$0xff] %v12191_v28  ;;  %15183 = vst [vmem:[#allocation95_spill] sm:$0xff] %v12193_v14 }
 0x140   : > { %v12195_v59 = vpop.f32.mrf.mxu0  ;;  %v12197_v39 = vpop.f32.mrf.mxu1 }
 0x141   : > { %15184 = vst [vmem:[#allocation96_spill] sm:$0xff] %v12195_v59  ;;  %15185 = vst [vmem:[#allocation97_spill] sm:$0xff] %v12197_v39  ;;  %v9897_v59 = vld [vmem:[%s11172_s8 + $0x1c0] sm:$0xff] }
 0x142   : > { %v12203_v58 = vpop.f32.mrf.mxu0  ;;  %v12205_v30 = vpop.f32.mrf.mxu1 }
 0x143   : > { %15188 = vst [vmem:[#allocation100_spill] sm:$0xff] %v12203_v58  ;;  %15189 = vst [vmem:[#allocation101_spill] sm:$0xff] %v12205_v30 }
 0x144   : > { %v12209_v53 = vpop.f32.mrf.mxu0  ;;  %v12211_v47 = vpop.f32.mrf.mxu1  ;;  %2161 = vmatmul.mubr.bf16.gmra.mxu1 %v12084_v1  ;;  %3283 = vmatmul.mubr.bf16.gmra.mxu0 %v12199_v20  ;;  %v12229_v1 = vcombine.high %v458_v10, %v459_v19 }
 0x145   : > { %15190 = vst [vmem:[#allocation102_spill] sm:$0xff] %v12209_v53  ;;  %15191 = vst [vmem:[#allocation103_spill] sm:$0xff] %v12211_v47  ;;  %2170 = vmatprep.mubr.bf16.mxu1 %v12086_v2  ;;  %3292 = vmatprep.mubr.bf16.mxu0 %v12201_v3  ;;  %v12227_v53 = vcombine.low %v456_v38, %v457_v42  ;;  %v460_v38 = vmax.bf16 %v15134_v57, %v9897_v59  ;;  %v9900_v59 = vld [vmem:[%s11172_s8 + $0x1d8] sm:$0xff] }
 0x146   : > { %v12219_v30 = vpop.f32.mrf.mxu0  ;;  %v12221_v39 = vpop.f32.mrf.mxu1  ;;  %15197 = vst [vmem:[#allocation109_spill] sm:$0xff] %v12229_v1  ;;  %v461_v42 = vmax.bf16 %v15134_v57, %v9898_v43 }
 0x147   : > { %15192 = vst [vmem:[#allocation104_spill] sm:$0xff] %v12219_v30  ;;  %15193 = vst [vmem:[#allocation105_spill] sm:$0xff] %v12221_v39 }
 0x148   : > { %v12223_v14 = vpop.f32.mrf.mxu0  ;;  %v12225_v47 = vpop.f32.mrf.mxu1  ;;  %15196 = vst [vmem:[#allocation108_spill] sm:$0xff] %v12227_v53 }
 0x149   : > { %15194 = vst [vmem:[#allocation106_spill] sm:$0xff] %v12223_v14  ;;  %15195 = vst [vmem:[#allocation107_spill] sm:$0xff] %v12225_v47  ;;  %v9899_v14 = vld [vmem:[%s11172_s8 + $0x1d0] sm:$0xff] }
 0x14a   : > { %v12231_v58 = vpop.f32.mrf.mxu0  ;;  %v12233_v2 = vpop.f32.mrf.mxu1 }
 0x14b   : > { %15198 = vst [vmem:[#allocation110_spill] sm:$0xff] %v12231_v58  ;;  %15199 = vst [vmem:[#allocation111_spill] sm:$0xff] %v12233_v2 }
 0x14c   : > { %v12237_v28 = vpop.f32.mrf.mxu0  ;;  %v12239_v41 = vpop.f32.mrf.mxu1  ;;  %2171 = vmatmul.mubr.bf16.gmra.mxu1 %v12115_v15  ;;  %3293 = vmatmul.mubr.bf16.gmra.mxu0 %v12227_v53  ;;  %v12257_v15 = vcombine.high %v460_v38, %v461_v42 }
 0x14d   : > { %15200 = vst [vmem:[#allocation112_spill] sm:$0xff] %v12237_v28  ;;  %15201 = vst [vmem:[#allocation113_spill] sm:$0xff] %v12239_v41  ;;  %2180 = vmatprep.mubr.bf16.mxu1 %v12117_v40  ;;  %3302 = vmatprep.mubr.bf16.mxu0 %v12229_v1  ;;  %v12255_v28 = vcombine.low %v458_v10, %v459_v19  ;;  %v462_v10 = vmax.bf16 %v15134_v57, %v9899_v14  ;;  %v9902_v14 = vld [vmem:[%s11172_s8 + $0x1e8] sm:$0xff] }
 0x14e   : > { %v12247_v2 = vpop.f32.mrf.mxu0  ;;  %v12249_v47 = vpop.f32.mrf.mxu1  ;;  %15207 = vst [vmem:[#allocation119_spill] sm:$0xff] %v12257_v15  ;;  %v463_v19 = vmax.bf16 %v15134_v57, %v9900_v59 }
 0x14f   : > { %15202 = vst [vmem:[#allocation114_spill] sm:$0xff] %v12247_v2  ;;  %15203 = vst [vmem:[#allocation115_spill] sm:$0xff] %v12249_v47 }
 0x150   : > { %v12251_v39 = vpop.f32.mrf.mxu0  ;;  %v12253_v41 = vpop.f32.mrf.mxu1  ;;  %15206 = vst [vmem:[#allocation118_spill] sm:$0xff] %v12255_v28 }
 0x151   : > { %15204 = vst [vmem:[#allocation116_spill] sm:$0xff] %v12251_v39  ;;  %15205 = vst [vmem:[#allocation117_spill] sm:$0xff] %v12253_v41  ;;  %v9901_v39 = vld [vmem:[%s11172_s8 + $0x1e0] sm:$0xff] }
 0x152   : > { %v12259_v58 = vpop.f32.mrf.mxu0  ;;  %v12261_v40 = vpop.f32.mrf.mxu1 }
 0x153   : > { %15208 = vst [vmem:[#allocation120_spill] sm:$0xff] %v12259_v58  ;;  %15209 = vst [vmem:[#allocation121_spill] sm:$0xff] %v12261_v40 }
 0x154   : > { %v12265_v30 = vpop.f32.mrf.mxu0  ;;  %v12267_v43 = vpop.f32.mrf.mxu1  ;;  %2181 = vmatmul.mubr.bf16.gmra.mxu1 %v12143_v4  ;;  %3303 = vmatmul.mubr.bf16.gmra.mxu0 %v12255_v28  ;;  %v12285_v4 = vcombine.high %v462_v10, %v463_v19 }
 0x155   : > { %15210 = vst [vmem:[#allocation122_spill] sm:$0xff] %v12265_v30  ;;  %15211 = vst [vmem:[#allocation123_spill] sm:$0xff] %v12267_v43  ;;  %2190 = vmatprep.mubr.bf16.mxu1 %v12145_v46  ;;  %3312 = vmatprep.mubr.bf16.mxu0 %v12257_v15  ;;  %v12283_v30 = vcombine.low %v460_v38, %v461_v42  ;;  %v464_v38 = vmax.bf16 %v15134_v57, %v9901_v39  ;;  %v9904_v39 = vld [vmem:[%s11172_s8 + $0x1f8] sm:$0xff] }
 0x156   : > { %v12275_v40 = vpop.f32.mrf.mxu0  ;;  %v12277_v41 = vpop.f32.mrf.mxu1  ;;  %15217 = vst [vmem:[#allocation129_spill] sm:$0xff] %v12285_v4  ;;  %v465_v42 = vmax.bf16 %v15134_v57, %v9902_v14 }
 0x157   : > { %15212 = vst [vmem:[#allocation124_spill] sm:$0xff] %v12275_v40  ;;  %15213 = vst [vmem:[#allocation125_spill] sm:$0xff] %v12277_v41 }
 0x158   : > { %v12279_v47 = vpop.f32.mrf.mxu0  ;;  %v12281_v43 = vpop.f32.mrf.mxu1  ;;  %15216 = vst [vmem:[#allocation128_spill] sm:$0xff] %v12283_v30 }
 0x159   : > { %15214 = vst [vmem:[#allocation126_spill] sm:$0xff] %v12279_v47  ;;  %15215 = vst [vmem:[#allocation127_spill] sm:$0xff] %v12281_v43  ;;  %v9903_v47 = vld [vmem:[%s11172_s8 + $0x1f0] sm:$0xff] }
 0x15a   : > { %v12287_v58 = vpop.f32.mrf.mxu0  ;;  %v12289_v46 = vpop.f32.mrf.mxu1 }
 0x15b   : > { %15218 = vst [vmem:[#allocation130_spill] sm:$0xff] %v12287_v58  ;;  %15219 = vst [vmem:[#allocation131_spill] sm:$0xff] %v12289_v46 }
 0x15c   : > { %v12293_v2 = vpop.f32.mrf.mxu0  ;;  %v12295_v59 = vpop.f32.mrf.mxu1  ;;  %2191 = vmatmul.mubr.bf16.gmra.mxu1 %v12171_v6  ;;  %3313 = vmatmul.mubr.bf16.gmra.mxu0 %v12283_v30  ;;  %v12313_v6 = vcombine.high %v464_v38, %v465_v42 }
 0x15d   : > { %15220 = vst [vmem:[#allocation132_spill] sm:$0xff] %v12293_v2  ;;  %15221 = vst [vmem:[#allocation133_spill] sm:$0xff] %v12295_v59  ;;  %2200 = vmatprep.mubr.bf16.mxu1 %v12173_v45  ;;  %3322 = vmatprep.mubr.bf16.mxu0 %v12285_v4  ;;  %v12311_v2 = vcombine.low %v462_v10, %v463_v19  ;;  %v466_v10 = vmax.bf16 %v15134_v57, %v9903_v47  ;;  %v9906_v47 = vld [vmem:[%s11172_s8 + $0x208] sm:$0xff] }
 0x15e   : > { %v12303_v46 = vpop.f32.mrf.mxu0  ;;  %v12305_v43 = vpop.f32.mrf.mxu1  ;;  %15227 = vst [vmem:[#allocation139_spill] sm:$0xff] %v12313_v6  ;;  %v467_v19 = vmax.bf16 %v15134_v57, %v9904_v39 }
 0x15f   : > { %15222 = vst [vmem:[#allocation134_spill] sm:$0xff] %v12303_v46  ;;  %15223 = vst [vmem:[#allocation135_spill] sm:$0xff] %v12305_v43 }
 0x160   : > { %v12307_v41 = vpop.f32.mrf.mxu0  ;;  %v12309_v59 = vpop.f32.mrf.mxu1  ;;  %15226 = vst [vmem:[#allocation138_spill] sm:$0xff] %v12311_v2 }
 0x161   : > { %15224 = vst [vmem:[#allocation136_spill] sm:$0xff] %v12307_v41  ;;  %15225 = vst [vmem:[#allocation137_spill] sm:$0xff] %v12309_v59  ;;  %v9905_v41 = vld [vmem:[%s11172_s8 + $0x200] sm:$0xff] }
 0x162   : > { %v12315_v58 = vpop.f32.mrf.mxu0  ;;  %v12317_v45 = vpop.f32.mrf.mxu1 }
 0x163   : > { %15228 = vst [vmem:[#allocation140_spill] sm:$0xff] %v12315_v58  ;;  %15229 = vst [vmem:[#allocation141_spill] sm:$0xff] %v12317_v45 }
 0x164   : > { %v12321_v40 = vpop.f32.mrf.mxu0  ;;  %v12323_v14 = vpop.f32.mrf.mxu1  ;;  %2201 = vmatmul.mubr.bf16.gmra.mxu1 %v12199_v20  ;;  %3323 = vmatmul.mubr.bf16.gmra.mxu0 %v12311_v2  ;;  %v12341_v20 = vcombine.high %v466_v10, %v467_v19 }
 0x165   : > { %15230 = vst [vmem:[#allocation142_spill] sm:$0xff] %v12321_v40  ;;  %15231 = vst [vmem:[#allocation143_spill] sm:$0xff] %v12323_v14  ;;  %2210 = vmatprep.mubr.bf16.mxu1 %v12201_v3  ;;  %3332 = vmatprep.mubr.bf16.mxu0 %v12313_v6  ;;  %v12339_v40 = vcombine.low %v464_v38, %v465_v42  ;;  %v468_v38 = vmax.bf16 %v15134_v57, %v9905_v41  ;;  %v9908_v41 = vld [vmem:[%s11172_s8 + $0x218] sm:$0xff] }
 0x166   : > { %v12331_v45 = vpop.f32.mrf.mxu0  ;;  %v12333_v59 = vpop.f32.mrf.mxu1  ;;  %15237 = vst [vmem:[#allocation149_spill] sm:$0xff] %v12341_v20  ;;  %v469_v42 = vmax.bf16 %v15134_v57, %v9906_v47 }
 0x167   : > { %15232 = vst [vmem:[#allocation144_spill] sm:$0xff] %v12331_v45  ;;  %15233 = vst [vmem:[#allocation145_spill] sm:$0xff] %v12333_v59 }
 0x168   : > { %v12335_v43 = vpop.f32.mrf.mxu0  ;;  %v12337_v14 = vpop.f32.mrf.mxu1  ;;  %15236 = vst [vmem:[#allocation148_spill] sm:$0xff] %v12339_v40 }
 0x169   : > { %15234 = vst [vmem:[#allocation146_spill] sm:$0xff] %v12335_v43  ;;  %15235 = vst [vmem:[#allocation147_spill] sm:$0xff] %v12337_v14  ;;  %v9907_v43 = vld [vmem:[%s11172_s8 + $0x210] sm:$0xff] }
 0x16a   : > { %v12343_v58 = vpop.f32.mrf.mxu0  ;;  %v12345_v3 = vpop.f32.mrf.mxu1 }
 0x16b   : > { %15238 = vst [vmem:[#allocation150_spill] sm:$0xff] %v12343_v58  ;;  %15239 = vst [vmem:[#allocation151_spill] sm:$0xff] %v12345_v3 }
 0x16c   : > { %v12349_v46 = vpop.f32.mrf.mxu0  ;;  %v12351_v39 = vpop.f32.mrf.mxu1  ;;  %2211 = vmatmul.mubr.bf16.gmra.mxu1 %v12227_v53  ;;  %3333 = vmatmul.mubr.bf16.gmra.mxu0 %v12339_v40  ;;  %v12369_v53 = vcombine.high %v468_v38, %v469_v42 }
 0x16d   : > { %15240 = vst [vmem:[#allocation152_spill] sm:$0xff] %v12349_v46  ;;  %15241 = vst [vmem:[#allocation153_spill] sm:$0xff] %v12351_v39  ;;  %2220 = vmatprep.mubr.bf16.mxu1 %v12229_v1  ;;  %3342 = vmatprep.mubr.bf16.mxu0 %v12341_v20  ;;  %v12367_v46 = vcombine.low %v466_v10, %v467_v19  ;;  %v470_v10 = vmax.bf16 %v15134_v57, %v9907_v43  ;;  %v9910_v43 = vld [vmem:[%s11172_s8 + $0x228] sm:$0xff] }
 0x16e   : > { %v12359_v3 = vpop.f32.mrf.mxu0  ;;  %v12361_v14 = vpop.f32.mrf.mxu1  ;;  %15247 = vst [vmem:[#allocation159_spill] sm:$0xff] %v12369_v53  ;;  %v471_v19 = vmax.bf16 %v15134_v57, %v9908_v41 }
 0x16f   : > { %15242 = vst [vmem:[#allocation154_spill] sm:$0xff] %v12359_v3  ;;  %15243 = vst [vmem:[#allocation155_spill] sm:$0xff] %v12361_v14 }
 0x170   : > { %v12363_v59 = vpop.f32.mrf.mxu0  ;;  %v12365_v39 = vpop.f32.mrf.mxu1  ;;  %15246 = vst [vmem:[#allocation158_spill] sm:$0xff] %v12367_v46 }
 0x171   : > { %15244 = vst [vmem:[#allocation156_spill] sm:$0xff] %v12363_v59  ;;  %15245 = vst [vmem:[#allocation157_spill] sm:$0xff] %v12365_v39 }
 0x172   : > { %v12371_v58 = vpop.f32.mrf.mxu0  ;;  %v12373_v1 = vpop.f32.mrf.mxu1 }
 0x173   : > { %15248 = vst [vmem:[#allocation160_spill] sm:$0xff] %v12371_v58  ;;  %15249 = vst [vmem:[#allocation161_spill] sm:$0xff] %v12373_v1 }
 0x174   : > { %v12377_v45 = vpop.f32.mrf.mxu0  ;;  %v12379_v47 = vpop.f32.mrf.mxu1  ;;  %2221 = vmatmul.mubr.bf16.gmra.mxu1 %v12255_v28  ;;  %3343 = vmatmul.mubr.bf16.gmra.mxu0 %v12367_v46  ;;  %v12397_v28 = vcombine.high %v470_v10, %v471_v19 }
 0x175   : > { %15250 = vst [vmem:[#allocation162_spill] sm:$0xff] %v12377_v45  ;;  %15251 = vst [vmem:[#allocation163_spill] sm:$0xff] %v12379_v47  ;;  %2230 = vmatprep.mubr.bf16.mxu1 %v12257_v15  ;;  %3352 = vmatprep.mubr.bf16.mxu0 %v12369_v53  ;;  %v12395_v45 = vcombine.low %v468_v38, %v469_v42  ;;  %v9909_v53 = vld [vmem:[%s11172_s8 + $0x220] sm:$0xff]  ;;  %v473_v42 = vmax.bf16 %v15134_v57, %v9910_v43  ;;  %v9912_v43 = vld [vmem:[%s11172_s8 + $0x238] sm:$0xff] }
 0x176   : > { %v12387_v1 = vpop.f32.mrf.mxu0  ;;  %v12389_v39 = vpop.f32.mrf.mxu1  ;;  %15257 = vst [vmem:[#allocation169_spill] sm:$0xff] %v12397_v28  ;;  %v472_v38 = vmax.bf16 %v15134_v57, %v9909_v53 }
 0x177   : > { %15252 = vst [vmem:[#allocation164_spill] sm:$0xff] %v12387_v1  ;;  %15253 = vst [vmem:[#allocation165_spill] sm:$0xff] %v12389_v39  ;;  %v12415_v1 = vcombine.low %v470_v10, %v471_v19 }
 0x178   : > { %v12391_v14 = vpop.f32.mrf.mxu0  ;;  %v12393_v47 = vpop.f32.mrf.mxu1  ;;  %15256 = vst [vmem:[#allocation168_spill] sm:$0xff] %v12395_v45 }
 0x179   : > { %15254 = vst [vmem:[#allocation166_spill] sm:$0xff] %v12391_v14  ;;  %15255 = vst [vmem:[#allocation167_spill] sm:$0xff] %v12393_v47 }
 0x17a   : > { %v12399_v58 = vpop.f32.mrf.mxu0  ;;  %v12401_v15 = vpop.f32.mrf.mxu1  ;;  %15261 = vst [vmem:[#allocation173_spill] sm:$0xff] %v12415_v1 }
 0x17b   : > { %15258 = vst [vmem:[#allocation170_spill] sm:$0xff] %v12399_v58  ;;  %15259 = vst [vmem:[#allocation171_spill] sm:$0xff] %v12401_v15 }
 0x17c   : > { %v1992_v59 = vpop.f32.mrf.mxu1  ;;  %2231 = vmatmul.mubr.bf16.gmra.mxu1 %v12283_v30  ;;  %v3114_v41 = vpop.f32.mrf.mxu0  ;;  %3353 = vmatmul.mubr.bf16.gmra.mxu0 %v12395_v45 }
 0x17d   : > { %v2271_v39 = vadd.f32 %v1992_v59, %v11995_v52  ;;  %2240 = vmatprep.mubr.bf16.mxu1 %v12285_v4  ;;  %3362 = vmatprep.mubr.bf16.mxu0 %v12397_v28  ;;  %v12420_v28 = vcombine.high %v472_v38, %v473_v42  ;;  %v9911_v4 = vld [vmem:[%s11172_s8 + $0x230] sm:$0xff] }
 0x17e   : > { %v1994_v15 = vpop.f32.mrf.mxu1  ;;  %v3116_v47 = vpop.f32.mrf.mxu0 }
 0x17f   : > { %v12412_v58 = vadd.f32 %v3114_v41, %v2271_v39  ;;  %v2272_v30 = vadd.f32 %v1994_v15, %v12005_v48  ;;  %15263 = vst [vmem:[#allocation175_spill] sm:$0xff] %v12420_v28 }
 0x180   : > { %v1996_v14 = vpop.f32.mrf.mxu1  ;;  %v3118_v45 = vpop.f32.mrf.mxu0 }
 0x181   : > { %15260 = vst [vmem:[#allocation172_spill] sm:$0xff] %v12412_v58  ;;  %v12417_v52 = vadd.f32 %v3116_v47, %v2272_v30  ;;  %v2273_v59 = vadd.f32 %v1996_v14, %v12009_v31  ;;  %v474_v30 = vmax.bf16 %v15134_v57, %v9911_v4 }
 0x182   : > { %v1998_v53 = vpop.f32.mrf.mxu1  ;;  %v3120_v3 = vpop.f32.mrf.mxu0 }
 0x183   : > { %15262 = vst [vmem:[#allocation174_spill] sm:$0xff] %v12417_v52  ;;  %v12424_v22 = vadd.f32 %v3118_v45, %v2273_v59  ;;  %v2274_v39 = vadd.f32 %v1998_v53, %v12020_v63  ;;  %v475_v45 = vmax.bf16 %v15134_v57, %v9912_v43  ;;  %v12439_v53 = vcombine.low %v472_v38, %v473_v42 }
 0x184   : > { %v2002_v41 = vpop.f32.mrf.mxu1  ;;  %2241 = vmatmul.mubr.bf16.gmra.mxu1 %v12311_v2  ;;  %v3124_v15 = vpop.f32.mrf.mxu0  ;;  %3363 = vmatmul.mubr.bf16.gmra.mxu0 %v12415_v1 }
 0x185   : > { %15264 = vst [vmem:[#allocation176_spill] sm:$0xff] %v12424_v22  ;;  %v12430_v48 = vadd.f32 %v3120_v3, %v2274_v39  ;;  %v2275_v31 = vadd.f32 %v2002_v41, %v12035_v33  ;;  %2250 = vmatprep.mubr.bf16.mxu1 %v12313_v6  ;;  %3372 = vmatprep.mubr.bf16.mxu0 %v12420_v28  ;;  %15267 = vst [vmem:[#allocation179_spill] sm:$0xff] %v12439_v53  ;;  %v15408_v28 = vld [vmem:[#allocation4_spill] sm:$0xff] }
 0x186   : > { %v2004_v14 = vpop.f32.mrf.mxu1  ;;  %v3126_v63 = vpop.f32.mrf.mxu0  ;;  %v12444_v3 = vcombine.high %v474_v30, %v475_v45 }
 0x187   : > { %15265 = vst [vmem:[#allocation177_spill] sm:$0xff] %v12430_v48  ;;  %v12436_v47 = vadd.f32 %v3124_v15, %v2275_v31  ;;  %v2276_v10 = vadd.f32 %v2004_v14, %v12045_v61 }
 0x188   : > { %v2006_v19 = vpop.f32.mrf.mxu1  ;;  %v3128_v59 = vpop.f32.mrf.mxu0  ;;  %15269 = vst [vmem:[#allocation181_spill] sm:$0xff] %v12444_v3 }
 0x189   : > { %15266 = vst [vmem:[#allocation178_spill] sm:$0xff] %v12436_v47  ;;  %v12441_v4 = vadd.f32 %v3126_v63, %v2276_v10  ;;  %v2277_v33 = vadd.f32 %v2006_v19, %v12049_v25  ;;  %v12459_v10 = vcombine.low %v474_v30, %v475_v45 }
 0x18a   : > { %v2008_v39 = vpop.f32.mrf.mxu1  ;;  %v3130_v41 = vpop.f32.mrf.mxu0 }
 0x18b   : > { %15268 = vst [vmem:[#allocation180_spill] sm:$0xff] %v12441_v4  ;;  %v12446_v48 = vadd.f32 %v3128_v59, %v2277_v33  ;;  %v2278_v57 = vadd.f32 %v2008_v39, %v12057_v11  ;;  %15273 = vst [vmem:[#allocation185_spill] sm:$0xff] %v12459_v10 }
 0x18c   : > { %v2012_v43 = vpop.f32.mrf.mxu1  ;;  %2251 = vmatmul.mubr.bf16.gmra.mxu1 %v12339_v40  ;;  %v3134_v61 = vpop.f32.mrf.mxu0  ;;  %3373 = vmatmul.mubr.bf16.gmra.mxu0 %v12439_v53  ;;  %v15405_v53 = vld [vmem:[#allocation77_spill] sm:$0xff] }
 0x18d   : > { %15270 = vst [vmem:[#allocation182_spill] sm:$0xff] %v12446_v48  ;;  %v12451_v38 = vadd.f32 %v3130_v41, %v2278_v57  ;;  %v2279_v42 = vadd.f32 %v2012_v43, %v12063_v7  ;;  %2260 = vmatprep.mubr.bf16.mxu1 %v12341_v20  ;;  %3382 = vmatprep.mubr.bf16.mxu0 %v12444_v3 }
 0x18e   : > { %v2014_v25 = vpop.f32.mrf.mxu1  ;;  %v3136_v15 = vpop.f32.mrf.mxu0 }
 0x18f   : > { %15271 = vst [vmem:[#allocation183_spill] sm:$0xff] %v12451_v38  ;;  %v12456_v31 = vadd.f32 %v3134_v61, %v2279_v42  ;;  %v2280_v11 = vadd.f32 %v2014_v25, %v12073_v5 }
 0x190   : > { %v2016_v14 = vpop.f32.mrf.mxu1  ;;  %v3138_v63 = vpop.f32.mrf.mxu0 }
 0x191   : > { %15272 = vst [vmem:[#allocation184_spill] sm:$0xff] %v12456_v31  ;;  %v12461_v19 = vadd.f32 %v3136_v15, %v2280_v11  ;;  %v2281_v59 = vadd.f32 %v2016_v14, %v12080_v55  ;;  %v10913_v14 = vld [vmem:[%s14902_s1 + $0x270] ss:$8 sps:$4 sm:$0xff]  }
 0x192   : > { %v2018_v33 = vpop.f32.mrf.mxu1  ;;  %v3140_v7 = vpop.f32.mrf.mxu0 }
 0x193   : > { %15274 = vst [vmem:[#allocation186_spill] sm:$0xff] %v12461_v19  ;;  %v12464_v39 = vadd.f32 %v3138_v63, %v2281_v59  ;;  %v2282_v41 = vadd.f32 %v2018_v33, %v12091_v56 }
 0x194   : > { %v2022_v57 = vpop.f32.mrf.mxu1  ;;  %2261 = vmatmul.mubr.bf16.gmra.mxu1 %v12367_v46  ;;  %v3144_v43 = vpop.f32.mrf.mxu0  ;;  %3383 = vmatmul.mubr.bf16.gmra.mxu0 %v12459_v10  ;;  %v15366_v10 = vld [vmem:[#allocation170_spill] sm:$0xff] }
 0x195   : > { %15275 = vst [vmem:[#allocation187_spill] sm:$0xff] %v12464_v39  ;;  %v12469_v5 = vadd.f32 %v3140_v7, %v2282_v41  ;;  %v2283_v30 = vadd.f32 %v2022_v57, %v12097_v36  ;;  %3954 = vmatprep.mubr.bf16.mxu1 %v11204_v24  ;;  %4684 = vmatprep.mubr.bf16.mxu0 %v11421_v62  ;;  %v10910_v36 = vld [vmem:[%s14902_s1 + $0x770] ss:$8 sps:$4 sm:$0xff]   ;;  %v10918_v7 = vld [vmem:[%s14902_s1 + $0x764] ss:$8 sps:$4 sm:$0xff]  }
 0x196   : > { %v2024_v55 = vpop.f32.mrf.mxu1  ;;  %v3146_v45 = vpop.f32.mrf.mxu0 }
 0x197   : > { %15276 = vst [vmem:[#allocation188_spill] sm:$0xff] %v12469_v5  ;;  %v12474_v61 = vadd.f32 %v3144_v43, %v2283_v30  ;;  %v2284_v56 = vadd.f32 %v2024_v55, %v12107_v21  ;;  %v10919_v55 = vld [vmem:[%s14902_s1 + $0x260] ss:$8 sps:$4 sm:$0xff]  }
 0x198   : > { %v2026_v42 = vpop.f32.mrf.mxu1  ;;  %v3148_v25 = vpop.f32.mrf.mxu0 }
 0x199   : > { %15277 = vst [vmem:[#allocation189_spill] sm:$0xff] %v12474_v61  ;;  %v12477_v15 = vadd.f32 %v3146_v45, %v2284_v56  ;;  %v2285_v11 = vadd.f32 %v2026_v42, %v12111_v0  ;;  %v10921_v0 = vld [vmem:[%s14902_s1 + $0x264] ss:$8 sps:$4 sm:$0xff]   ;;  %v10927_v42 = vld [vmem:[%s14902_s1 + $0x254] ss:$8 sps:$4 sm:$0xff]  }
 0x19a   : > { %v2028_v63 = vpop.f32.mrf.mxu1  ;;  %v3150_v59 = vpop.f32.mrf.mxu0 }
 0x19b   : > { %15278 = vst [vmem:[#allocation190_spill] sm:$0xff] %v12477_v15  ;;  %v12486_v33 = vadd.f32 %v3148_v25, %v2285_v11  ;;  %v2286_v21 = vadd.f32 %v2028_v63, %v12119_v35  ;;  %v10916_v35 = vld [vmem:[%s14902_s1 + $0x760] ss:$8 sps:$4 sm:$0xff]   ;;  %v10922_v15 = vld [vmem:[%s14902_s1 + $0x750] ss:$8 sps:$4 sm:$0xff]  }
 0x19c   : > { %v2032_v41 = vpop.f32.mrf.mxu1  ;;  %v3154_v57 = vpop.f32.mrf.mxu0  ;;  %3955 = vmatmul.mubr.bf16.vlgmr.msra.gmra.mxu1 %v11282_v54  ;;  %4685 = vmatmul.mubr.bf16.vlgmr.msra.gmra.mxu0 %v11458_v18 }
 0x19d   : > { %15279 = vst [vmem:[#allocation191_spill] sm:$0xff] %v12486_v33  ;;  %v12497_v43 = vadd.f32 %v3150_v59, %v2286_v21  ;;  %v2287_v30 = vadd.f32 %v2032_v41, %v12125_v17  ;;  %5495 = vmatpush1.bf16.msra.mxu1 %v10910_v36  ;;  %6870 = vmatpush1.bf16.msra.mxu0 %v10913_v14  ;;  %v10924_v17 = vld [vmem:[%s14902_s1 + $0x754] ss:$8 sps:$4 sm:$0xff]  }
 0x19e   : > { %v2034_v45 = vpop.f32.mrf.mxu1  ;;  %v3156_v56 = vpop.f32.mrf.mxu0  ;;  %3964 = vmatprep.mubr.bf16.mxu1 %v11294_v60  ;;  %4694 = vmatprep.mubr.bf16.mxu0 %v11471_v27 }
 0x19f   : > { %15280 = vst [vmem:[#allocation192_spill] sm:$0xff] %v12497_v43  ;;  %v12514_v25 = vadd.f32 %v3154_v57, %v2287_v30  ;;  %v2288_v11 = vadd.f32 %v2034_v45, %v12135_v16  ;;  %5496 = vmatprep.subr.bf16.mxu1 %v10918_v7  ;;  %6871 = vmatprep.subr.bf16.mxu0 %v10921_v0  ;;  %v10925_v16 = vld [vmem:[%s14902_s1 + $0x250] ss:$8 sps:$4 sm:$0xff]   ;;  %v10933_v57 = vld [vmem:[%s14902_s1 + $0x244] ss:$8 sps:$4 sm:$0xff]  }
 0x1a0   : > { %v2036_v36 = vpop.f32.mrf.mxu1  ;;  %v3158_v14 = vpop.f32.mrf.mxu0  ;;  %v15336_v43 = vld [vmem:[#allocation140_spill] sm:$0xff] }
 0x1a1   : > { %15281 = vst [vmem:[#allocation193_spill] sm:$0xff] %v12514_v25  ;;  %v12517_v63 = vadd.f32 %v3156_v56, %v2288_v11  ;;  %v2289_v59 = vadd.f32 %v2036_v36, %v12139_v12  ;;  %5497 = vmatpush1.bf16.msra.mxu1 %v10916_v35  ;;  %6872 = vmatpush1.bf16.msra.mxu0 %v10919_v55  ;;  %v10930_v12 = vld [vmem:[%s14902_s1 + $0x744] ss:$8 sps:$4 sm:$0xff]   ;;  %v10936_v36 = vld [vmem:[%s14902_s1 + $0x734] ss:$8 sps:$4 sm:$0xff]  }
 0x1a2   : > { %v2038_v21 = vpop.f32.mrf.mxu1  ;;  %v3160_v41 = vpop.f32.mrf.mxu0  ;;  %5498 = vmatprep.subr.bf16.mxu1 %v10924_v17  ;;  %6873 = vmatprep.subr.bf16.mxu0 %v10927_v42  ;;  %v10928_v17 = vld [vmem:[%s14902_s1 + $0x740] ss:$8 sps:$4 sm:$0xff]  }
 0x1a3   : > { %15282 = vst [vmem:[#allocation194_spill] sm:$0xff] %v12517_v63  ;;  %v12526_v7 = vadd.f32 %v3158_v14, %v2289_v59  ;;  %v2290_v0 = vadd.f32 %v2038_v21, %v12147_v50  ;;  %v10931_v42 = vld [vmem:[%s14902_s1 + $0x240] ss:$8 sps:$4 sm:$0xff]   ;;  %v10987_v63 = vld [vmem:[%s14902_s1 + $0x2b4] ss:$8 sps:$4 sm:$0xff]  }
 0x1a4   : > { %v2042_v30 = vpop.f32.mrf.mxu1  ;;  %v3164_v35 = vpop.f32.mrf.mxu0  ;;  %3965 = vmatmul.mubr.bf16.gmra.mxu1 %v11325_v9  ;;  %4695 = vmatmul.mubr.bf16.gmra.mxu0 %v11502_v44 }
 0x1a5   : > { %15283 = vst [vmem:[#allocation195_spill] sm:$0xff] %v12526_v7  ;;  %v12537_v55 = vadd.f32 %v3160_v41, %v2290_v0  ;;  %v2291_v45 = vadd.f32 %v2042_v30, %v12153_v26  ;;  %3974 = vmatprep.mubr.bf16.mxu1 %v11335_v13  ;;  %4704 = vmatprep.mubr.bf16.mxu0 %v11515_v51 }
 0x1a6   : > { %v2044_v50 = vpop.f32.mrf.mxu1  ;;  %v3166_v56 = vpop.f32.mrf.mxu0  ;;  %5499 = vmatpush1.bf16.msra.mxu1 %v10922_v15  ;;  %6874 = vmatpush1.bf16.msra.mxu0 %v10925_v16  ;;  %v10939_v15 = vld [vmem:[%s14902_s1 + $0x234] ss:$8 sps:$4 sm:$0xff]  }
 0x1a7   : > { %15284 = vst [vmem:[#allocation196_spill] sm:$0xff] %v12537_v55  ;;  %v12548_v11 = vadd.f32 %v3164_v35, %v2291_v45  ;;  %v2292_v26 = vadd.f32 %v2044_v50, %v12163_v23  ;;  %5500 = vmatprep.subr.bf16.mxu1 %v10930_v12  ;;  %6875 = vmatprep.subr.bf16.mxu0 %v10933_v57  ;;  %v10934_v23 = vld [vmem:[%s14902_s1 + $0x730] ss:$8 sps:$4 sm:$0xff]   ;;  %v10945_v35 = vld [vmem:[%s14902_s1 + $0x224] ss:$8 sps:$4 sm:$0xff]  }
 0x1a8   : > { %v2046_v14 = vpop.f32.mrf.mxu1  ;;  %v3168_v59 = vpop.f32.mrf.mxu0  ;;  %v10937_v12 = vld [vmem:[%s14902_s1 + $0x230] ss:$8 sps:$4 sm:$0xff]  }
 0x1a9   : > { %15285 = vst [vmem:[#allocation197_spill] sm:$0xff] %v12548_v11  ;;  %v12557_v21 = vadd.f32 %v3166_v56, %v2292_v26  ;;  %v2293_v41 = vadd.f32 %v2046_v14, %v12167_v29  ;;  %v10942_v29 = vld [vmem:[%s14902_s1 + $0x724] ss:$8 sps:$4 sm:$0xff]  }
 0x1aa   : > { %v2048_v16 = vpop.f32.mrf.mxu1  ;;  %v3170_v0 = vpop.f32.mrf.mxu0  ;;  %5501 = vmatpush1.bf16.msra.mxu1 %v10928_v17  ;;  %6876 = vmatpush1.bf16.msra.mxu0 %v10931_v42  ;;  %v15289_v17 = vld [vmem:[#allocation18_spill] sm:$0xff] }
 0x1ab   : > { %15286 = vst [vmem:[#allocation198_spill] sm:$0xff] %v12557_v21  ;;  %v12566_v57 = vadd.f32 %v3168_v59, %v2293_v41  ;;  %v2294_v30 = vadd.f32 %v2048_v16, %v12175_v49  ;;  %5502 = vmatprep.subr.bf16.mxu1 %v10936_v36  ;;  %6877 = vmatprep.subr.bf16.mxu0 %v10939_v15  ;;  %v10940_v36 = vld [vmem:[%s14902_s1 + $0x720] ss:$8 sps:$4 sm:$0xff]   ;;  %v15291_v59 = vld [vmem:[#allocation94_spill] sm:$0xff] }
 0x1ac   : > { %v2052_v45 = vpop.f32.mrf.mxu1  ;;  %v3174_v50 = vpop.f32.mrf.mxu0  ;;  %3975 = vmatmul.mubr.bf16.gmra.mxu1 %v11369_v32  ;;  %4705 = vmatmul.mubr.bf16.gmra.mxu0 %v11546_v8  ;;  %v10943_v15 = vld [vmem:[%s14902_s1 + $0x220] ss:$8 sps:$4 sm:$0xff]   ;;  %v10948_v41 = vld [vmem:[%s14902_s1 + $0x714] ss:$8 sps:$4 sm:$0xff]  }
 0x1ad   : > { %15287 = vst [vmem:[#allocation199_spill] sm:$0xff] %v12566_v57  ;;  %v12577_v56 = vadd.f32 %v3170_v0, %v2294_v30  ;;  %v2295_v49 = vadd.f32 %v2052_v45, %v12181_v34  ;;  %3984 = vmatprep.mubr.bf16.mxu1 %v11380_v37  ;;  %4714 = vmatprep.mubr.bf16.mxu0 %v15289_v17  ;;  %v10951_v16 = vld [vmem:[%s14902_s1 + $0x214] ss:$8 sps:$4 sm:$0xff]   ;;  %v15293_v30 = vld [vmem:[#allocation96_spill] sm:$0xff] }
 0x1ae   : > { %v2054_v42 = vpop.f32.mrf.mxu1  ;;  %v3176_v26 = vpop.f32.mrf.mxu0  ;;  %5503 = vmatpush1.bf16.msra.mxu1 %v10934_v23  ;;  %6878 = vmatpush1.bf16.msra.mxu0 %v10937_v12  ;;  %v15314_v57 = vld [vmem:[#allocation116_spill] sm:$0xff] }
 0x1af   : > { %15288 = vst [vmem:[#allocation200_spill] sm:$0xff] %v12577_v56  ;;  %v12588_v14 = vadd.f32 %v3174_v50, %v2295_v49  ;;  %v2296_v34 = vadd.f32 %v2054_v42, %v15291_v59  ;;  %5504 = vmatprep.subr.bf16.mxu1 %v10942_v29  ;;  %6879 = vmatprep.subr.bf16.mxu0 %v10945_v35  ;;  %v10946_v29 = vld [vmem:[%s14902_s1 + $0x710] ss:$8 sps:$4 sm:$0xff]   ;;  %v15295_v59 = vld [vmem:[#allocation100_spill] sm:$0xff] }
 0x1b0   : > { %v2056_v0 = vpop.f32.mrf.mxu1  ;;  %v3178_v23 = vpop.f32.mrf.mxu0  ;;  %v10949_v35 = vld [vmem:[%s14902_s1 + $0x210] ss:$8 sps:$4 sm:$0xff]  }
 0x1b1   : > { %15290 = vst [vmem:[#allocation18_spill] sm:$0xff] %v12588_v14  ;;  %v12597_v12 = vadd.f32 %v3176_v26, %v2296_v34  ;;  %v2297_v45 = vadd.f32 %v2056_v0, %v15293_v30  ;;  %v10954_v26 = vld [vmem:[%s14902_s1 + $0x704] ss:$8 sps:$4 sm:$0xff]   ;;  %v15296_v0 = vld [vmem:[#allocation10_spill] sm:$0xff] }
 0x1b2   : > { %v2058_v50 = vpop.f32.mrf.mxu1  ;;  %v3180_v49 = vpop.f32.mrf.mxu0  ;;  %5505 = vmatpush1.bf16.msra.mxu1 %v10940_v36  ;;  %6880 = vmatpush1.bf16.msra.mxu0 %v10943_v15  ;;  %v10957_v36 = vld [vmem:[%s14902_s1 + $0x204] ss:$8 sps:$4 sm:$0xff]   ;;  %v15304_v56 = vld [vmem:[#allocation106_spill] sm:$0xff] }
 0x1b3   : > { %15292 = vst [vmem:[#allocation94_spill] sm:$0xff] %v12597_v12  ;;  %v12606_v42 = vadd.f32 %v3178_v23, %v2297_v45  ;;  %v2298_v14 = vadd.f32 %v2058_v50, %v15295_v59  ;;  %5506 = vmatprep.subr.bf16.mxu1 %v10948_v41  ;;  %6881 = vmatprep.subr.bf16.mxu0 %v10951_v16  ;;  %v15297_v30 = vld [vmem:[#allocation20_spill] sm:$0xff]  ;;  %v15299_v45 = vld [vmem:[#allocation102_spill] sm:$0xff] }
 0x1b4   : > { %v2062_v15 = vpop.f32.mrf.mxu1  ;;  %v3184_v34 = vpop.f32.mrf.mxu0  ;;  %3985 = vmatmul.mubr.bf16.gmra.mxu1 %v15296_v0  ;;  %4715 = vmatmul.mubr.bf16.gmra.mxu0 %v15297_v30  ;;  %v15300_v41 = vld [vmem:[#allocation22_spill] sm:$0xff]  ;;  %v10955_v12 = vld [vmem:[%s14902_s1 + $0x200] ss:$8 sps:$4 sm:$0xff]  }
 0x1b5   : > { %15294 = vst [vmem:[#allocation96_spill] sm:$0xff] %v12606_v42  ;;  %v12617_v23 = vadd.f32 %v3180_v49, %v2298_v14  ;;  %v2299_v50 = vadd.f32 %v2062_v15, %v15299_v45  ;;  %3994 = vmatprep.mubr.bf16.mxu1 %v11421_v62  ;;  %4724 = vmatprep.mubr.bf16.mxu0 %v15300_v41  ;;  %v10952_v42 = vld [vmem:[%s14902_s1 + $0x700] ss:$8 sps:$4 sm:$0xff]   ;;  %v10960_v45 = vld [vmem:[%s14902_s1 + $0x7f4] ss:$8 sps:$4 sm:$0xff]  }
 0x1b6   : > { %v2064_v16 = vpop.f32.mrf.mxu1  ;;  %v3186_v59 = vpop.f32.mrf.mxu0  ;;  %5507 = vmatpush1.bf16.msra.mxu1 %v10946_v29  ;;  %6882 = vmatpush1.bf16.msra.mxu0 %v10949_v35  ;;  %v15302_v49 = vld [vmem:[#allocation104_spill] sm:$0xff]  ;;  %v10963_v29 = vld [vmem:[%s14902_s1 + $0x2f4] ss:$8 sps:$4 sm:$0xff]  }
 0x1b7   : > { %15298 = vst [vmem:[#allocation100_spill] sm:$0xff] %v12617_v23  ;;  %v12628_v14 = vadd.f32 %v3184_v34, %v2299_v50  ;;  %v2300_v15 = vadd.f32 %v2064_v16, %v15302_v49  ;;  %5508 = vmatprep.subr.bf16.mxu1 %v10954_v26  ;;  %6883 = vmatprep.subr.bf16.mxu0 %v10957_v36  ;;  %v10958_v26 = vld [vmem:[%s14902_s1 + $0x7f0] ss:$8 sps:$4 sm:$0xff]  }
 0x1b8   : > { %v2066_v35 = vpop.f32.mrf.mxu1  ;;  %v3188_v23 = vpop.f32.mrf.mxu0  ;;  %v10961_v36 = vld [vmem:[%s14902_s1 + $0x2f0] ss:$8 sps:$4 sm:$0xff]  }
 0x1b9   : > { %15301 = vst [vmem:[#allocation10_spill] sm:$0xff] %v12628_v14  ;;  %v12637_v21 = vadd.f32 %v3186_v59, %v2300_v15  ;;  %v2301_v11 = vadd.f32 %v2066_v35, %v15304_v56  ;;  %v15306_v49 = vld [vmem:[#allocation110_spill] sm:$0xff]  ;;  %v10966_v56 = vld [vmem:[%s14902_s1 + $0x7e4] ss:$8 sps:$4 sm:$0xff]  }
 0x1ba   : > { %v2068_v34 = vpop.f32.mrf.mxu1  ;;  %v3190_v50 = vpop.f32.mrf.mxu0  ;;  %5509 = vmatpush1.bf16.msra.mxu1 %v10952_v42  ;;  %6884 = vmatpush1.bf16.msra.mxu0 %v10955_v12  ;;  %v10969_v12 = vld [vmem:[%s14902_s1 + $0x2e4] ss:$8 sps:$4 sm:$0xff]  }
 0x1bb   : > { %15303 = vst [vmem:[#allocation20_spill] sm:$0xff] %v12637_v21  ;;  %v12646_v16 = vadd.f32 %v3188_v23, %v2301_v11  ;;  %v2302_v14 = vadd.f32 %v2068_v34, %v15306_v49  ;;  %5510 = vmatprep.subr.bf16.mxu1 %v10960_v45  ;;  %6885 = vmatprep.subr.bf16.mxu0 %v10963_v29  ;;  %v15307_v15 = vld [vmem:[#allocation24_spill] sm:$0xff]  ;;  %v15310_v45 = vld [vmem:[#allocation26_spill] sm:$0xff] }
 0x1bc   : > { %v2072_v42 = vpop.f32.mrf.mxu1  ;;  %v3194_v59 = vpop.f32.mrf.mxu0  ;;  %3995 = vmatmul.mubr.bf16.gmra.mxu1 %v11458_v18  ;;  %4725 = vmatmul.mubr.bf16.gmra.mxu0 %v15307_v15  ;;  %v15309_v23 = vld [vmem:[#allocation112_spill] sm:$0xff] }
 0x1bd   : > { %15305 = vst [vmem:[#allocation102_spill] sm:$0xff] %v12646_v16  ;;  %v12657_v11 = vadd.f32 %v3190_v50, %v2302_v14  ;;  %v2303_v35 = vadd.f32 %v2072_v42, %v15309_v23  ;;  %4004 = vmatprep.mubr.bf16.mxu1 %v11471_v27  ;;  %4734 = vmatprep.mubr.bf16.mxu0 %v15310_v45  ;;  %v10964_v49 = vld [vmem:[%s14902_s1 + $0x7e0] ss:$8 sps:$4 sm:$0xff]   ;;  %v15312_v50 = vld [vmem:[#allocation114_spill] sm:$0xff] }
 0x1be   : > { %v2074_v29 = vpop.f32.mrf.mxu1  ;;  %v3196_v34 = vpop.f32.mrf.mxu0  ;;  %5511 = vmatpush2.bf16.msra.mxu1 %v10958_v26  ;;  %6886 = vmatpush2.bf16.msra.mxu0 %v10961_v36  ;;  %v10967_v21 = vld [vmem:[%s14902_s1 + $0x2e0] ss:$8 sps:$4 sm:$0xff]   ;;  %v10972_v23 = vld [vmem:[%s14902_s1 + $0x7d4] ss:$8 sps:$4 sm:$0xff]  }
 0x1bf   : > { %15308 = vst [vmem:[#allocation22_spill] sm:$0xff] %v12657_v11  ;;  %v12668_v14 = vadd.f32 %v3194_v59, %v2303_v35  ;;  %v2304_v42 = vadd.f32 %v2074_v29, %v15312_v50  ;;  %5512 = vmatprep.subr.bf16.mxu1 %v10966_v56  ;;  %6887 = vmatprep.subr.bf16.mxu0 %v10969_v12  ;;  %v10975_v26 = vld [vmem:[%s14902_s1 + $0x2d4] ss:$8 sps:$4 sm:$0xff]   ;;  %v10970_v56 = vld [vmem:[%s14902_s1 + $0x7d0] ss:$8 sps:$4 sm:$0xff]   ;;  %v15316_v50 = vld [vmem:[#allocation120_spill] sm:$0xff] }
 0x1c0   : > { %v2076_v36 = vpop.f32.mrf.mxu1  ;;  %v3198_v11 = vpop.f32.mrf.mxu0  ;;  %v10973_v12 = vld [vmem:[%s14902_s1 + $0x2d0] ss:$8 sps:$4 sm:$0xff]  }
 0x1c1   : > { %15311 = vst [vmem:[#allocation104_spill] sm:$0xff] %v12668_v14  ;;  %v12677_v16 = vadd.f32 %v3196_v34, %v2304_v42  ;;  %v2305_v55 = vadd.f32 %v2076_v36, %v15314_v57  ;;  %v10978_v57 = vld [vmem:[%s14902_s1 + $0x7c4] ss:$8 sps:$4 sm:$0xff]  }
 0x1c2   : > { %v2078_v59 = vpop.f32.mrf.mxu1  ;;  %v3200_v35 = vpop.f32.mrf.mxu0  ;;  %5513 = vmatpush2.bf16.msra.mxu1 %v10964_v49  ;;  %6888 = vmatpush2.bf16.msra.mxu0 %v10967_v21  ;;  %v10981_v21 = vld [vmem:[%s14902_s1 + $0x2c4] ss:$8 sps:$4 sm:$0xff]  }
 0x1c3   : > { %15313 = vst [vmem:[#allocation106_spill] sm:$0xff] %v12677_v16  ;;  %v12686_v29 = vadd.f32 %v3198_v11, %v2305_v55  ;;  %v2306_v14 = vadd.f32 %v2078_v59, %v15316_v50  ;;  %5514 = vmatprep.subr.bf16.mxu1 %v10972_v23  ;;  %6889 = vmatprep.subr.bf16.mxu0 %v10975_v26  ;;  %v15317_v42 = vld [vmem:[#allocation28_spill] sm:$0xff]  ;;  %v15319_v11 = vld [vmem:[#allocation122_spill] sm:$0xff] }
 0x1c4   : > { %v2082_v34 = vpop.f32.mrf.mxu1  ;;  %v3204_v49 = vpop.f32.mrf.mxu0  ;;  %4005 = vmatmul.mubr.bf16.gmra.mxu1 %v11502_v44  ;;  %4735 = vmatmul.mubr.bf16.gmra.mxu0 %v15317_v42  ;;  %v15320_v23 = vld [vmem:[#allocation30_spill] sm:$0xff]  ;;  %v10976_v50 = vld [vmem:[%s14902_s1 + $0x7c0] ss:$8 sps:$4 sm:$0xff]  }
 0x1c5   : > { %15315 = vst [vmem:[#allocation110_spill] sm:$0xff] %v12686_v29  ;;  %v12697_v55 = vadd.f32 %v3200_v35, %v2306_v14  ;;  %v2307_v36 = vadd.f32 %v2082_v34, %v15319_v11  ;;  %4014 = vmatprep.mubr.bf16.mxu1 %v11515_v51  ;;  %4744 = vmatprep.mubr.bf16.mxu0 %v15320_v23  ;;  %v10979_v29 = vld [vmem:[%s14902_s1 + $0x2c0] ss:$8 sps:$4 sm:$0xff]   ;;  %v10984_v11 = vld [vmem:[%s14902_s1 + $0x7b4] ss:$8 sps:$4 sm:$0xff]  }
 0x1c6   : > { %v2084_v26 = vpop.f32.mrf.mxu1  ;;  %v3206_v59 = vpop.f32.mrf.mxu0  ;;  %5515 = vmatpush2.bf16.msra.mxu1 %v10970_v56  ;;  %6890 = vmatpush2.bf16.msra.mxu0 %v10973_v12  ;;  %v15322_v35 = vld [vmem:[#allocation124_spill] sm:$0xff]  ;;  %v15324_v16 = vld [vmem:[#allocation126_spill] sm:$0xff] }
 0x1c7   : > { %15318 = vst [vmem:[#allocation24_spill] sm:$0xff] %v12697_v55  ;;  %v12708_v14 = vadd.f32 %v3204_v49, %v2307_v36  ;;  %v2308_v34 = vadd.f32 %v2084_v26, %v15322_v35  ;;  %5516 = vmatprep.subr.bf16.mxu1 %v10978_v57  ;;  %6891 = vmatprep.subr.bf16.mxu0 %v10981_v21  ;;  %v10982_v57 = vld [vmem:[%s14902_s1 + $0x7b0] ss:$8 sps:$4 sm:$0xff]  }
 0x1c8   : > { %v2086_v56 = vpop.f32.mrf.mxu1  ;;  %v3208_v12 = vpop.f32.mrf.mxu0  ;;  %v10985_v21 = vld [vmem:[%s14902_s1 + $0x2b0] ss:$8 sps:$4 sm:$0xff]  }
 0x1c9   : > { %15321 = vst [vmem:[#allocation112_spill] sm:$0xff] %v12708_v14  ;;  %v12714_v55 = vadd.f32 %v3206_v59, %v2308_v34  ;;  %v2309_v7 = vadd.f32 %v2086_v56, %v15324_v16  ;;  %v15326_v59 = vld [vmem:[#allocation130_spill] sm:$0xff]  ;;  %v15329_v56 = vld [vmem:[#allocation132_spill] sm:$0xff] }
 0x1ca   : > { %v2088_v49 = vpop.f32.mrf.mxu1  ;;  %v3210_v36 = vpop.f32.mrf.mxu0  ;;  %5517 = vmatpush2.bf16.msra.mxu1 %v10976_v50  ;;  %6892 = vmatpush2.bf16.msra.mxu0 %v10979_v29  ;;  %v15327_v50 = vld [vmem:[#allocation32_spill] sm:$0xff]  ;;  %v15330_v14 = vld [vmem:[#allocation34_spill] sm:$0xff] }
 0x1cb   : > { %15323 = vst [vmem:[#allocation26_spill] sm:$0xff] %v12714_v55  ;;  %v12726_v26 = vadd.f32 %v3208_v12, %v2309_v7  ;;  %v2310_v16 = vadd.f32 %v2088_v49, %v15326_v59  ;;  %5518 = vmatprep.subr.bf16.mxu1 %v10984_v11  ;;  %6893 = vmatprep.subr.bf16.mxu0 %v10987_v63  ;;  %v15332_v63 = vld [vmem:[#allocation134_spill] sm:$0xff] }
 0x1cc   : > { %v2092_v35 = vpop.f32.mrf.mxu1  ;;  %v3214_v34 = vpop.f32.mrf.mxu0  ;;  %4015 = vmatmul.mubr.bf16.gmra.mxu1 %v11546_v8  ;;  %4745 = vmatmul.mubr.bf16.gmra.mxu0 %v15327_v50 }
 0x1cd   : > { %15325 = vst [vmem:[#allocation114_spill] sm:$0xff] %v12726_v26  ;;  %v12731_v29 = vadd.f32 %v3210_v36, %v2310_v16  ;;  %v2311_v55 = vadd.f32 %v2092_v35, %v15329_v56  ;;  %4024 = vmatprep.mubr.bf16.mxu1 %v15289_v17  ;;  %4754 = vmatprep.mubr.bf16.mxu0 %v15330_v14  ;;  %v15334_v36 = vld [vmem:[#allocation136_spill] sm:$0xff] }
 0x1ce   : > { %v2094_v7 = vpop.f32.mrf.mxu1  ;;  %v3216_v12 = vpop.f32.mrf.mxu0  ;;  %5519 = vmatpush2.bf16.msra.mxu1 %v10982_v57  ;;  %6894 = vmatpush2.bf16.msra.mxu0 %v10985_v21  ;;  %v15339_v21 = vld [vmem:[#allocation142_spill] sm:$0xff] }
 0x1cf   : > { %15328 = vst [vmem:[#allocation116_spill] sm:$0xff] %v12731_v29  ;;  %v12736_v11 = vadd.f32 %v3214_v34, %v2311_v55  ;;  %v2312_v49 = vadd.f32 %v2094_v7, %v15332_v63  ;;  %v15337_v55 = vld [vmem:[#allocation36_spill] sm:$0xff]  ;;  %v15340_v7 = vld [vmem:[#allocation38_spill] sm:$0xff] }
 0x1d0   : > { %v2096_v59 = vpop.f32.mrf.mxu1  ;;  %v3218_v26 = vpop.f32.mrf.mxu0 }
 0x1d1   : > { %15331 = vst [vmem:[#allocation120_spill] sm:$0xff] %v12736_v11  ;;  %v12739_v25 = vadd.f32 %v3216_v12, %v2312_v49  ;;  %v2313_v16 = vadd.f32 %v2096_v59, %v15334_v36  ;;  %v10993_v59 = vld [vmem:[%s14902_s1 + $0x2a4] ss:$8 sps:$4 sm:$0xff]  }
 0x1d2   : > { %v2098_v29 = vpop.f32.mrf.mxu1  ;;  %v3220_v35 = vpop.f32.mrf.mxu0  ;;  %6895 = vmatprep.subr.bf16.mxu0 %v10993_v59 }
 0x1d3   : > { %15333 = vst [vmem:[#allocation28_spill] sm:$0xff] %v12739_v25  ;;  %v12742_v56 = vadd.f32 %v3218_v26, %v2313_v16  ;;  %v2314_v61 = vadd.f32 %v2098_v29, %v15336_v43  ;;  %v10988_v26 = vld [vmem:[%s14902_s1 + $0x7a0] ss:$8 sps:$4 sm:$0xff]   ;;  %v10990_v43 = vld [vmem:[%s14902_s1 + $0x7a4] ss:$8 sps:$4 sm:$0xff]  }
 0x1d4   : > { %v2102_v33 = vpop.f32.mrf.mxu1  ;;  %v3224_v5 = vpop.f32.mrf.mxu0  ;;  %4025 = vmatmul.mubr.bf16.gmra.mxu1 %v15297_v30  ;;  %4755 = vmatmul.mubr.bf16.gmra.mxu0 %v15337_v55  ;;  %v15347_v25 = vld [vmem:[#allocation40_spill] sm:$0xff] }
 0x1d5   : > { %15335 = vst [vmem:[#allocation122_spill] sm:$0xff] %v12742_v56  ;;  %v12747_v57 = vadd.f32 %v3220_v35, %v2314_v61  ;;  %v2315_v34 = vadd.f32 %v2102_v33, %v15339_v21  ;;  %4034 = vmatprep.mubr.bf16.mxu1 %v15300_v41  ;;  %4764 = vmatprep.mubr.bf16.mxu0 %v15340_v7  ;;  %v15342_v61 = vld [vmem:[#allocation144_spill] sm:$0xff]  ;;  %v15344_v21 = vld [vmem:[#allocation146_spill] sm:$0xff] }
 0x1d6   : > { %v2104_v29 = vpop.f32.mrf.mxu1  ;;  %v3226_v12 = vpop.f32.mrf.mxu0  ;;  %5520 = vmatprep.subr.bf16.mxu1 %v10990_v43  ;;  %v10991_v33 = vld [vmem:[%s14902_s1 + $0x2a0] ss:$8 sps:$4 sm:$0xff]  }
 0x1d7   : > { %15338 = vst [vmem:[#allocation30_spill] sm:$0xff] %v12747_v57  ;;  %v12758_v63 = vadd.f32 %v3224_v5, %v2315_v34  ;;  %v2316_v49 = vadd.f32 %v2104_v29, %v15342_v61  ;;  %5521 = vmatpush2.bf16.msra.mxu1 %v10988_v26  ;;  %6896 = vmatpush2.bf16.msra.mxu0 %v10991_v33  ;;  %v15346_v29 = vld [vmem:[#allocation150_spill] sm:$0xff]  ;;  %v15349_v26 = vld [vmem:[#allocation152_spill] sm:$0xff] }
 0x1d8   : > { %v2106_v36 = vpop.f32.mrf.mxu1  ;;  %v3228_v16 = vpop.f32.mrf.mxu0 }
 0x1d9   : > { %15341 = vst [vmem:[#allocation124_spill] sm:$0xff] %v12758_v63  ;;  %v12767_v35 = vadd.f32 %v3226_v12, %v2316_v49  ;;  %v2317_v57 = vadd.f32 %v2106_v36, %v15344_v21  ;;  %v15350_v49 = vld [vmem:[#allocation42_spill] sm:$0xff] }
 0x1da   : > { %v2108_v5 = vpop.f32.mrf.mxu1  ;;  %v3230_v34 = vpop.f32.mrf.mxu0  ;;  %v15352_v36 = vld [vmem:[#allocation154_spill] sm:$0xff] }
 0x1db   : > { %15343 = vst [vmem:[#allocation126_spill] sm:$0xff] %v12767_v35  ;;  %v12770_v43 = vadd.f32 %v3228_v16, %v2317_v57  ;;  %v2318_v61 = vadd.f32 %v2108_v5, %v15346_v29  ;;  %v15354_v35 = vld [vmem:[#allocation156_spill] sm:$0xff] }
 0x1dc   : > { %v2112_v63 = vpop.f32.mrf.mxu1  ;;  %v3234_v56 = vpop.f32.mrf.mxu0  ;;  %4035 = vmatmul.mubr.bf16.gmra.mxu1 %v15307_v15  ;;  %4765 = vmatmul.mubr.bf16.gmra.mxu0 %v15347_v25 }
 0x1dd   : > { %15345 = vst [vmem:[#allocation130_spill] sm:$0xff] %v12770_v43  ;;  %v12775_v11 = vadd.f32 %v3230_v34, %v2318_v61  ;;  %v2319_v12 = vadd.f32 %v2112_v63, %v15349_v26  ;;  %4044 = vmatprep.mubr.bf16.mxu1 %v15310_v45  ;;  %4774 = vmatprep.mubr.bf16.mxu0 %v15350_v49  ;;  %v10996_v63 = vld [vmem:[%s14902_s1 + $0x794] ss:$8 sps:$4 sm:$0xff]   ;;  %v10994_v26 = vld [vmem:[%s14902_s1 + $0x790] ss:$8 sps:$4 sm:$0xff]  }
 0x1de   : > { %v2114_v59 = vpop.f32.mrf.mxu1  ;;  %v3236_v33 = vpop.f32.mrf.mxu0  ;;  %5522 = vmatprep.subr.bf16.mxu1 %v10996_v63  ;;  %v15360_v63 = vld [vmem:[#allocation46_spill] sm:$0xff] }
 0x1df   : > { %15348 = vst [vmem:[#allocation32_spill] sm:$0xff] %v12775_v11  ;;  %v12780_v57 = vadd.f32 %v3234_v56, %v2319_v12  ;;  %v2320_v16 = vadd.f32 %v2114_v59, %v15352_v36  ;;  %v15356_v12 = vld [vmem:[#allocation160_spill] sm:$0xff]  ;;  %5523 = vmatpush2.bf16.msra.mxu1 %v10994_v26 }
 0x1e0   : > { %v2116_v21 = vpop.f32.mrf.mxu1  ;;  %v3238_v5 = vpop.f32.mrf.mxu0 }
 0x1e1   : > { %15351 = vst [vmem:[#allocation132_spill] sm:$0xff] %v12780_v57  ;;  %v12783_v29 = vadd.f32 %v3236_v33, %v2320_v16  ;;  %v2321_v43 = vadd.f32 %v2116_v21, %v15354_v35  ;;  %v10997_v33 = vld [vmem:[%s14902_s1 + $0x290] ss:$8 sps:$4 sm:$0xff]   ;;  %v10999_v35 = vld [vmem:[%s14902_s1 + $0x294] ss:$8 sps:$4 sm:$0xff]   ;;  %v15357_v21 = vld [vmem:[#allocation44_spill] sm:$0xff] }
 0x1e2   : > { %v2118_v34 = vpop.f32.mrf.mxu1  ;;  %v3240_v61 = vpop.f32.mrf.mxu0  ;;  %6897 = vmatprep.subr.bf16.mxu0 %v10999_v35  ;;  %v15362_v57 = vld [vmem:[#allocation164_spill] sm:$0xff]  ;;  %v15367_v35 = vld [vmem:[#allocation47_spill] sm:$0xff] }
 0x1e3   : > { %15353 = vst [vmem:[#allocation34_spill] sm:$0xff] %v12783_v29  ;;  %v12792_v56 = vadd.f32 %v3238_v5, %v2321_v43  ;;  %v2322_v59 = vadd.f32 %v2118_v34, %v15356_v12  ;;  %v15359_v43 = vld [vmem:[#allocation162_spill] sm:$0xff]  ;;  %6898 = vmatpush2.bf16.msra.mxu0 %v10997_v33  ;;  %v15369_v33 = vld [vmem:[#allocation57_spill] sm:$0xff] }
 0x1e4   : > { %v2122_v36 = vpop.f32.mrf.mxu1  ;;  %v3244_v16 = vpop.f32.mrf.mxu0  ;;  %4045 = vmatmul.mubr.bf16.gmra.mxu1 %v15317_v42  ;;  %4775 = vmatmul.mubr.bf16.gmra.mxu0 %v15357_v21 }
 0x1e5   : > { %15355 = vst [vmem:[#allocation134_spill] sm:$0xff] %v12792_v56  ;;  %v12803_v29 = vadd.f32 %v3240_v61, %v2322_v59  ;;  %v2323_v5 = vadd.f32 %v2122_v36, %v15359_v43  ;;  %4054 = vmatprep.mubr.bf16.mxu1 %v15320_v23  ;;  %4784 = vmatprep.mubr.bf16.mxu0 %v15360_v63  ;;  %v15364_v61 = vld [vmem:[#allocation166_spill] sm:$0xff] }
 0x1e6   : > { %v2124_v34 = vpop.f32.mrf.mxu1  ;;  %v3246_v12 = vpop.f32.mrf.mxu0 }
 0x1e7   : > { %15358 = vst [vmem:[#allocation136_spill] sm:$0xff] %v12803_v29  ;;  %v12808_v56 = vadd.f32 %v3244_v16, %v2323_v5  ;;  %v2324_v11 = vadd.f32 %v2124_v34, %v15362_v57  ;;  %v15372_v34 = vld [vmem:[#allocation58_spill] sm:$0xff] }
 0x1e8   : > { %v2126_v39 = vpop.f32.mrf.mxu1  ;;  %v3248_v19 = vpop.f32.mrf.mxu0 }
 0x1e9   : > { %15361 = vst [vmem:[#allocation140_spill] sm:$0xff] %v12808_v56  ;;  %v12811_v31 = vadd.f32 %v3246_v12, %v2324_v11  ;;  %v2325_v59 = vadd.f32 %v2126_v39, %v15364_v61  ;;  %v15370_v11 = vld [vmem:[#allocation48_spill] sm:$0xff] }
 0x1ea   : > { %v2128_v36 = vpop.f32.mrf.mxu1  ;;  %v3250_v43 = vpop.f32.mrf.mxu0  ;;  %v11000_v12 = vld [vmem:[%s14902_s1 + $0x780] ss:$8 sps:$4 sm:$0xff]  }
 0x1eb   : > { %15363 = vst [vmem:[#allocation36_spill] sm:$0xff] %v12811_v31  ;;  %v12814_v29 = vadd.f32 %v3248_v19, %v2325_v59  ;;  %v2326_v4 = vadd.f32 %v2128_v36, %v15366_v10  ;;  %v15374_v36 = vld [vmem:[#allocation59_spill] sm:$0xff] }
 0x1ec   : > { %v2132_v38 = vpop.f32.mrf.mxu1  ;;  %v3254_v26 = vpop.f32.mrf.mxu0  ;;  %4055 = vmatmul.mubr.bf16.gmra.mxu1 %v15327_v50  ;;  %4785 = vmatmul.mubr.bf16.gmra.mxu0 %v15367_v35 }
 0x1ed   : > { %15365 = vst [vmem:[#allocation142_spill] sm:$0xff] %v12814_v29  ;;  %v12819_v57 = vadd.f32 %v3250_v43, %v2326_v4  ;;  %v2327_v16 = vadd.f32 %v2132_v38, %v15369_v33  ;;  %4064 = vmatprep.mubr.bf16.mxu1 %v15330_v14  ;;  %4794 = vmatprep.mubr.bf16.mxu0 %v15370_v11  ;;  %v11002_v4 = vld [vmem:[%s14902_s1 + $0x784] ss:$8 sps:$4 sm:$0xff]   ;;  %v15384_v29 = vld [vmem:[#allocation65_spill] sm:$0xff] }
 0x1ee   : > { %v2134_v39 = vpop.f32.mrf.mxu1  ;;  %v3256_v5 = vpop.f32.mrf.mxu0  ;;  %5524 = vmatprep.subr.bf16.mxu1 %v11002_v4  ;;  %v15377_v4 = vld [vmem:[#allocation49_spill] sm:$0xff] }
 0x1ef   : > { %15368 = vst [vmem:[#allocation38_spill] sm:$0xff] %v12819_v57  ;;  %v12824_v19 = vadd.f32 %v3254_v26, %v2327_v16  ;;  %v2328_v10 = vadd.f32 %v2134_v39, %v15372_v34  ;;  %v11005_v26 = vld [vmem:[%s14902_s1 + $0x284] ss:$8 sps:$4 sm:$0xff]   ;;  %5525 = vmatpush2.bf16.msra.mxu1 %v11000_v12  ;;  %v11003_v39 = vld [vmem:[%s14902_s1 + $0x280] ss:$8 sps:$4 sm:$0xff]   ;;  %v15380_v12 = vld [vmem:[#allocation50_spill] sm:$0xff] }
 0x1f0   : > { %v2136_v61 = vpop.f32.mrf.mxu1  ;;  %v3258_v38 = vpop.f32.mrf.mxu0  ;;  %6899 = vmatprep.subr.bf16.mxu0 %v11005_v26 }
 0x1f1   : > { %15371 = vst [vmem:[#allocation144_spill] sm:$0xff] %v12824_v19  ;;  %v12833_v59 = vadd.f32 %v3256_v5, %v2328_v10  ;;  %v2329_v43 = vadd.f32 %v2136_v61, %v15374_v36  ;;  %v15376_v19 = vld [vmem:[#allocation62_spill] sm:$0xff]  ;;  %v15379_v36 = vld [vmem:[#allocation63_spill] sm:$0xff]  ;;  %6900 = vmatpush2.bf16.msra.mxu0 %v11003_v39 }
 0x1f2   : > { %v2138_v33 = vpop.f32.mrf.mxu1  ;;  %v3260_v16 = vpop.f32.mrf.mxu0 }
 0x1f3   : > { %15373 = vst [vmem:[#allocation146_spill] sm:$0xff] %v12833_v59  ;;  %v12842_v34 = vadd.f32 %v3258_v38, %v2329_v43  ;;  %v2330_v31 = vadd.f32 %v2138_v33, %v15376_v19  ;;  %v15382_v19 = vld [vmem:[#allocation64_spill] sm:$0xff] }
 0x1f4   : > { %v2142_v5 = vpop.f32.mrf.mxu1  ;;  %v3264_v10 = vpop.f32.mrf.mxu0  ;;  %4065 = vmatmul.mubr.bf16.gmra.mxu1 %v15337_v55  ;;  %4795 = vmatmul.mubr.bf16.gmra.mxu0 %v15377_v4 }
 0x1f5   : > { %15375 = vst [vmem:[#allocation150_spill] sm:$0xff] %v12842_v34  ;;  %v12847_v61 = vadd.f32 %v3260_v16, %v2330_v31  ;;  %v2331_v59 = vadd.f32 %v2142_v5, %v15379_v36  ;;  %4074 = vmatprep.mubr.bf16.mxu1 %v15340_v7  ;;  %4804 = vmatprep.mubr.bf16.mxu0 %v15380_v12  ;;  %v15386_v36 = vld [vmem:[#allocation68_spill] sm:$0xff] }
 0x1f6   : > { %v2144_v57 = vpop.f32.mrf.mxu1  ;;  %v3266_v38 = vpop.f32.mrf.mxu0 }
 0x1f7   : > { %15378 = vst [vmem:[#allocation40_spill] sm:$0xff] %v12847_v61  ;;  %v12852_v43 = vadd.f32 %v3264_v10, %v2331_v59  ;;  %v2332_v26 = vadd.f32 %v2144_v57, %v15382_v19  ;;  %v15387_v59 = vld [vmem:[#allocation51_spill] sm:$0xff]  ;;  %v15389_v57 = vld [vmem:[#allocation69_spill] sm:$0xff] }
 0x1f8   : > { %v2146_v33 = vpop.f32.mrf.mxu1  ;;  %v3268_v34 = vpop.f32.mrf.mxu0 }
 0x1f9   : > { %15381 = vst [vmem:[#allocation152_spill] sm:$0xff] %v12852_v43  ;;  %v12855_v56 = vadd.f32 %v3266_v38, %v2332_v26  ;;  %v2333_v31 = vadd.f32 %v2146_v33, %v15384_v29  ;;  %v15390_v38 = vld [vmem:[#allocation52_spill] sm:$0xff]  ;;  %v11008_v29 = vld [vmem:[%s14902_s1 + $0x574] ss:$8 sps:$4 sm:$0xff]  }
 0x1fa   : > { %v2148_v16 = vpop.f32.mrf.mxu1  ;;  %v3270_v61 = vpop.f32.mrf.mxu0  ;;  %v15392_v33 = vld [vmem:[#allocation70_spill] sm:$0xff]  ;;  %7599 = vmatprep.subr.bf16.mxu1 %v11008_v29  ;;  %v15397_v29 = vld [vmem:[#allocation53_spill] sm:$0xff] }
 0x1fb   : > { %15383 = vst [vmem:[#allocation42_spill] sm:$0xff] %v12855_v56  ;;  %v12858_v5 = vadd.f32 %v3268_v34, %v2333_v31  ;;  %v2334_v47 = vadd.f32 %v2148_v16, %v15386_v36  ;;  %v15394_v36 = vld [vmem:[#allocation71_spill] sm:$0xff] }
 0x1fc   : > { %v2152_v3 = vpop.f32.mrf.mxu1  ;;  %v3274_v48 = vpop.f32.mrf.mxu0  ;;  %4075 = vmatmul.mubr.bf16.gmra.mxu1 %v15347_v25  ;;  %4805 = vmatmul.mubr.bf16.gmra.mxu0 %v15387_v59 }
 0x1fd   : > { %15385 = vst [vmem:[#allocation154_spill] sm:$0xff] %v12858_v5  ;;  %v12863_v39 = vadd.f32 %v3270_v61, %v2334_v47  ;;  %v2335_v10 = vadd.f32 %v2152_v3, %v15389_v57  ;;  %4084 = vmatprep.mubr.bf16.mxu1 %v15350_v49  ;;  %4814 = vmatprep.mubr.bf16.mxu0 %v15390_v38  ;;  %v11011_v47 = vld [vmem:[%s14902_s1 + $0x874] ss:$8 sps:$4 sm:$0xff]   ;;  %v15399_v5 = vld [vmem:[#allocation75_spill] sm:$0xff] }
 0x1fe   : > { %v2154_v34 = vpop.f32.mrf.mxu1  ;;  %v3276_v19 = vpop.f32.mrf.mxu0  ;;  %8441 = vmatprep.subr.bf16.mxu0 %v11011_v47 }
 0x1ff   : > { %15388 = vst [vmem:[#allocation156_spill] sm:$0xff] %v12863_v39  ;;  %v12871_v26 = vadd.f32 %v3274_v48, %v2335_v10  ;;  %v2336_v31 = vadd.f32 %v2154_v34, %v15392_v33  ;;  %v15396_v48 = vld [vmem:[#allocation74_spill] sm:$0xff] }
 0x200   : > { %v2156_v3 = vpop.f32.mrf.mxu1  ;;  %v3278_v61 = vpop.f32.mrf.mxu0 }
 0x201   : > { %15391 = vst [vmem:[#allocation160_spill] sm:$0xff] %v12871_v26  ;;  %v12877_v16 = vadd.f32 %v3276_v19, %v2336_v31  ;;  %v2337_v57 = vadd.f32 %v2156_v3, %v15394_v36  ;;  %v15400_v31 = vld [vmem:[#allocation3_spill] sm:$0xff]  ;;  %v15401_v3 = vld [vmem:[#allocation54_spill] sm:$0xff] }
 0x202   : > { %v2158_v56 = vpop.f32.mrf.mxu1  ;;  %v3280_v39 = vpop.f32.mrf.mxu0 }
 0x203   : > { %15393 = vst [vmem:[#allocation44_spill] sm:$0xff] %v12877_v16  ;;  %v12880_v43 = vadd.f32 %v3278_v61, %v2337_v57  ;;  %v2338_v10 = vadd.f32 %v2158_v56, %v15396_v48  ;;  %v15403_v57 = vld [vmem:[#allocation76_spill] sm:$0xff] }
 0x204   : > { %v2162_v26 = vpop.f32.mrf.mxu1  ;;  %v3284_v34 = vpop.f32.mrf.mxu0  ;;  %4085 = vmatmul.mubr.bf16.gmra.mxu1 %v15357_v21  ;;  %4815 = vmatmul.mubr.bf16.gmra.mxu0 %v15397_v29 }
 0x205   : > { %15395 = vst [vmem:[#allocation162_spill] sm:$0xff] %v12880_v43  ;;  %v12885_v33 = vadd.f32 %v3280_v39, %v2338_v10  ;;  %v2339_v19 = vadd.f32 %v2162_v26, %v15399_v5  ;;  %4094 = vmatprep.mubr.bf16.mxu1 %v15400_v31  ;;  %4824 = vmatprep.mubr.bf16.mxu0 %v15401_v3  ;;  %v15407_v5 = vld [vmem:[#allocation80_spill] sm:$0xff]  ;;  %v15420_v31 = vld [vmem:[#allocation6_spill] sm:$0xff] }
 0x206   : > { %v2164_v47 = vpop.f32.mrf.mxu1  ;;  %v3286_v36 = vpop.f32.mrf.mxu0 }
 0x207   : > { %15398 = vst [vmem:[#allocation164_spill] sm:$0xff] %v12885_v33  ;;  %v12890_v61 = vadd.f32 %v3284_v34, %v2339_v19  ;;  %v2340_v56 = vadd.f32 %v2164_v47, %v15403_v57  ;;  %v15409_v34 = vld [vmem:[#allocation55_spill] sm:$0xff]  ;;  %v15411_v47 = vld [vmem:[#allocation81_spill] sm:$0xff] }
 0x208   : > { %v2166_v48 = vpop.f32.mrf.mxu1  ;;  %v3288_v43 = vpop.f32.mrf.mxu0 }
 0x209   : > { %15402 = vst [vmem:[#allocation166_spill] sm:$0xff] %v12890_v61  ;;  %v12893_v16 = vadd.f32 %v3286_v36, %v2340_v56  ;;  %v2341_v22 = vadd.f32 %v2166_v48, %v15405_v53  ;;  %v15412_v36 = vld [vmem:[#allocation5_spill] sm:$0xff]  ;;  %v15413_v56 = vld [vmem:[#allocation56_spill] sm:$0xff] }
 0x20a   : > { %v2168_v39 = vpop.f32.mrf.mxu1  ;;  %v3290_v10 = vpop.f32.mrf.mxu0 }
 0x20b   : > { %15404 = vst [vmem:[#allocation170_spill] sm:$0xff] %v12893_v16  ;;  %v12896_v33 = vadd.f32 %v3288_v43, %v2341_v22  ;;  %v2342_v26 = vadd.f32 %v2168_v39, %v15407_v5  ;;  %v15415_v43 = vld [vmem:[#allocation82_spill] sm:$0xff] }
 0x20c   : > { %v2172_v52 = vpop.f32.mrf.mxu1  ;;  %v3294_v58 = vpop.f32.mrf.mxu0  ;;  %4095 = vmatmul.mubr.bf16.gmra.mxu1 %v15408_v28  ;;  %4825 = vmatmul.mubr.bf16.gmra.mxu0 %v15409_v34 }
 0x20d   : > { %15406 = vst [vmem:[#allocation57_spill] sm:$0xff] %v12896_v33  ;;  %v12901_v19 = vadd.f32 %v3290_v10, %v2342_v26  ;;  %v2343_v57 = vadd.f32 %v2172_v52, %v15411_v47  ;;  %4104 = vmatprep.mubr.bf16.mxu1 %v15412_v36  ;;  %4834 = vmatprep.mubr.bf16.mxu0 %v15413_v56  ;;  %v15417_v33 = vld [vmem:[#allocation83_spill] sm:$0xff]  ;;  %v15419_v52 = vld [vmem:[#allocation86_spill] sm:$0xff] }
 0x20e   : > { %v2174_v53 = vpop.f32.mrf.mxu1  ;;  %v3296_v48 = vpop.f32.mrf.mxu0 }
 0x20f   : > { %15410 = vst [vmem:[#allocation48_spill] sm:$0xff] %v12901_v19  ;;  %v12906_v22 = vadd.f32 %v3294_v58, %v2343_v57  ;;  %v2344_v39 = vadd.f32 %v2174_v53, %v15415_v43  ;;  %v15421_v58 = vld [vmem:[#allocation60_spill] sm:$0xff]  ;;  %v15423_v53 = vld [vmem:[#allocation87_spill] sm:$0xff] }
 0x210   : > { %v2176_v5 = vpop.f32.mrf.mxu1  ;;  %v3298_v16 = vpop.f32.mrf.mxu0 }
 0x211   : > { %15414 = vst [vmem:[#allocation58_spill] sm:$0xff] %v12906_v22  ;;  %v12909_v61 = vadd.f32 %v3296_v48, %v2344_v39  ;;  %v2345_v1 = vadd.f32 %v2176_v5, %v15417_v33  ;;  %v15424_v48 = vld [vmem:[#allocation7_spill] sm:$0xff]  ;;  %v15425_v39 = vld [vmem:[#allocation61_spill] sm:$0xff] }
 0x212   : > { %v2178_v10 = vpop.f32.mrf.mxu1  ;;  %v3300_v26 = vpop.f32.mrf.mxu0  ;;  %v15429_v22 = vld [vmem:[#allocation89_spill] sm:$0xff] }
 0x213   : > { %15416 = vst [vmem:[#allocation59_spill] sm:$0xff] %v12909_v61  ;;  %v12912_v19 = vadd.f32 %v3298_v16, %v2345_v1  ;;  %v2346_v47 = vadd.f32 %v2178_v10, %v15419_v52  ;;  %v15427_v16 = vld [vmem:[#allocation88_spill] sm:$0xff] }
 0x214   : > { %v2182_v36 = vpop.f32.mrf.mxu1  ;;  %v3304_v28 = vpop.f32.mrf.mxu0  ;;  %4105 = vmatmul.mubr.bf16.gmra.mxu1 %v15420_v31  ;;  %4835 = vmatmul.mubr.bf16.gmra.mxu0 %v15421_v58  ;;  %v15432_v58 = vld [vmem:[#allocation8_spill] sm:$0xff] }
 0x215   : > { %15418 = vst [vmem:[#allocation62_spill] sm:$0xff] %v12912_v19  ;;  %v12917_v57 = vadd.f32 %v3300_v26, %v2346_v47  ;;  %v2347_v43 = vadd.f32 %v2182_v36, %v15423_v53  ;;  %4114 = vmatprep.mubr.bf16.mxu1 %v15424_v48  ;;  %4844 = vmatprep.mubr.bf16.mxu0 %v15425_v39  ;;  %v15431_v36 = vld [vmem:[#allocation92_spill] sm:$0xff] }
 0x216   : > { %v2184_v33 = vpop.f32.mrf.mxu1  ;;  %v3306_v5 = vpop.f32.mrf.mxu0 }
 0x217   : > { %15422 = vst [vmem:[#allocation63_spill] sm:$0xff] %v12917_v57  ;;  %v12922_v1 = vadd.f32 %v3304_v28, %v2347_v43  ;;  %v2348_v10 = vadd.f32 %v2184_v33, %v15427_v16  ;;  %v15433_v28 = vld [vmem:[#allocation66_spill] sm:$0xff]  ;;  %v15435_v33 = vld [vmem:[#allocation93_spill] sm:$0xff] }
 0x218   : > { %v2186_v52 = vpop.f32.mrf.mxu1  ;;  %v3308_v19 = vpop.f32.mrf.mxu0 }
 0x219   : > { %15426 = vst [vmem:[#allocation64_spill] sm:$0xff] %v12922_v1  ;;  %v12925_v61 = vadd.f32 %v3306_v5, %v2348_v10  ;;  %v2349_v31 = vadd.f32 %v2186_v52, %v15429_v22  ;;  %v15436_v5 = vld [vmem:[#allocation9_spill] sm:$0xff]  ;;  %v15437_v10 = vld [vmem:[#allocation67_spill] sm:$0xff] }
 0x21a   : > { %v2188_v26 = vpop.f32.mrf.mxu1  ;;  %v3310_v47 = vpop.f32.mrf.mxu0 }
 0x21b   : > { %15428 = vst [vmem:[#allocation65_spill] sm:$0xff] %v12925_v61  ;;  %v12928_v57 = vadd.f32 %v3308_v19, %v2349_v31  ;;  %v2350_v53 = vadd.f32 %v2188_v26, %v15431_v36  ;;  %v15439_v19 = vld [vmem:[#allocation95_spill] sm:$0xff] }
 0x21c   : > { %v2192_v48 = vpop.f32.mrf.mxu1  ;;  %v3314_v39 = vpop.f32.mrf.mxu0  ;;  %4115 = vmatmul.mubr.bf16.gmra.mxu1 %v15432_v58  ;;  %4845 = vmatmul.mubr.bf16.gmra.mxu0 %v15433_v28  ;;  %v15444_v28 = vld [vmem:[#allocation11_spill] sm:$0xff] }
 0x21d   : > { %15430 = vst [vmem:[#allocation68_spill] sm:$0xff] %v12928_v57  ;;  %v12933_v43 = vadd.f32 %v3310_v47, %v2350_v53  ;;  %v2351_v16 = vadd.f32 %v2192_v48, %v15435_v33  ;;  %4124 = vmatprep.mubr.bf16.mxu1 %v15436_v5  ;;  %4854 = vmatprep.mubr.bf16.mxu0 %v15437_v10  ;;  %v15441_v57 = vld [vmem:[#allocation97_spill] sm:$0xff] }
 0x21e   : > { %v2194_v22 = vpop.f32.mrf.mxu1  ;;  %v3316_v52 = vpop.f32.mrf.mxu0  ;;  %v15443_v48 = vld [vmem:[#allocation101_spill] sm:$0xff] }
 0x21f   : > { %15434 = vst [vmem:[#allocation69_spill] sm:$0xff] %v12933_v43  ;;  %v12938_v31 = vadd.f32 %v3314_v39, %v2351_v16  ;;  %v2352_v26 = vadd.f32 %v2194_v22, %v15439_v19  ;;  %v15445_v39 = vld [vmem:[#allocation72_spill] sm:$0xff]  ;;  %v15447_v22 = vld [vmem:[#allocation103_spill] sm:$0xff] }
 0x220   : > { %v2196_v36 = vpop.f32.mrf.mxu1  ;;  %v3318_v61 = vpop.f32.mrf.mxu0 }
 0x221   : > { %15438 = vst [vmem:[#allocation52_spill] sm:$0xff] %v12938_v31  ;;  %v12941_v1 = vadd.f32 %v3316_v52, %v2352_v26  ;;  %v2353_v58 = vadd.f32 %v2196_v36, %v15441_v57  ;;  %v15448_v52 = vld [vmem:[#allocation12_spill] sm:$0xff]  ;;  %v15449_v26 = vld [vmem:[#allocation73_spill] sm:$0xff]  ;;  %v15453_v31 = vld [vmem:[#allocation107_spill] sm:$0xff] }
 0x222   : > { %v2198_v47 = vpop.f32.mrf.mxu1  ;;  %v3320_v53 = vpop.f32.mrf.mxu0 }
 0x223   : > { %15440 = vst [vmem:[#allocation70_spill] sm:$0xff] %v12941_v1  ;;  %v12944_v43 = vadd.f32 %v3318_v61, %v2353_v58  ;;  %v2354_v33 = vadd.f32 %v2198_v47, %v15443_v48  ;;  %v15451_v58 = vld [vmem:[#allocation105_spill] sm:$0xff] }
 0x224   : > { %v2202_v5 = vpop.f32.mrf.mxu1  ;;  %v3324_v10 = vpop.f32.mrf.mxu0  ;;  %4125 = vmatmul.mubr.bf16.gmra.mxu1 %v15444_v28  ;;  %4855 = vmatmul.mubr.bf16.gmra.mxu0 %v15445_v39  ;;  %v15456_v39 = vld [vmem:[#allocation13_spill] sm:$0xff] }
 0x225   : > { %15442 = vst [vmem:[#allocation71_spill] sm:$0xff] %v12944_v43  ;;  %v12949_v16 = vadd.f32 %v3320_v53, %v2354_v33  ;;  %v2355_v19 = vadd.f32 %v2202_v5, %v15447_v22  ;;  %4134 = vmatprep.mubr.bf16.mxu1 %v15448_v52  ;;  %4864 = vmatprep.mubr.bf16.mxu0 %v15449_v26  ;;  %v15455_v5 = vld [vmem:[#allocation111_spill] sm:$0xff] }
 0x226   : > { %v2204_v57 = vpop.f32.mrf.mxu1  ;;  %v3326_v36 = vpop.f32.mrf.mxu0 }
 0x227   : > { %15446 = vst [vmem:[#allocation74_spill] sm:$0xff] %v12949_v16  ;;  %v12954_v61 = vadd.f32 %v3324_v10, %v2355_v19  ;;  %v2356_v47 = vadd.f32 %v2204_v57, %v15451_v58  ;;  %v15457_v10 = vld [vmem:[#allocation78_spill] sm:$0xff]  ;;  %v15459_v57 = vld [vmem:[#allocation113_spill] sm:$0xff] }
 0x228   : > { %v2206_v48 = vpop.f32.mrf.mxu1  ;;  %v3328_v43 = vpop.f32.mrf.mxu0 }
 0x229   : > { %15450 = vst [vmem:[#allocation75_spill] sm:$0xff] %v12954_v61  ;;  %v12957_v1 = vadd.f32 %v3326_v36, %v2356_v47  ;;  %v2357_v28 = vadd.f32 %v2206_v48, %v15453_v31  ;;  %v15460_v36 = vld [vmem:[#allocation14_spill] sm:$0xff]  ;;  %v15461_v47 = vld [vmem:[#allocation79_spill] sm:$0xff] }
 0x22a   : > { %v2208_v53 = vpop.f32.mrf.mxu1  ;;  %v3330_v33 = vpop.f32.mrf.mxu0 }
 0x22b   : > { %15452 = vst [vmem:[#allocation76_spill] sm:$0xff] %v12957_v1  ;;  %v12960_v16 = vadd.f32 %v3328_v43, %v2357_v28  ;;  %v2358_v22 = vadd.f32 %v2208_v53, %v15455_v5  ;;  %v15463_v43 = vld [vmem:[#allocation115_spill] sm:$0xff] }
 0x22c   : > { %v2212_v52 = vpop.f32.mrf.mxu1  ;;  %v3334_v26 = vpop.f32.mrf.mxu0  ;;  %4135 = vmatmul.mubr.bf16.gmra.mxu1 %v15456_v39  ;;  %4865 = vmatmul.mubr.bf16.gmra.mxu0 %v15457_v10  ;;  %v15468_v10 = vld [vmem:[#allocation15_spill] sm:$0xff] }
 0x22d   : > { %15454 = vst [vmem:[#allocation77_spill] sm:$0xff] %v12960_v16  ;;  %v12965_v19 = vadd.f32 %v3330_v33, %v2358_v22  ;;  %v2359_v58 = vadd.f32 %v2212_v52, %v15459_v57  ;;  %4144 = vmatprep.mubr.bf16.mxu1 %v15460_v36  ;;  %4874 = vmatprep.mubr.bf16.mxu0 %v15461_v47  ;;  %v15465_v16 = vld [vmem:[#allocation117_spill] sm:$0xff] }
 0x22e   : > { %v2214_v31 = vpop.f32.mrf.mxu1  ;;  %v3336_v48 = vpop.f32.mrf.mxu0  ;;  %v15467_v52 = vld [vmem:[#allocation121_spill] sm:$0xff] }
 0x22f   : > { %15458 = vst [vmem:[#allocation80_spill] sm:$0xff] %v12965_v19  ;;  %v12970_v28 = vadd.f32 %v3334_v26, %v2359_v58  ;;  %v2360_v53 = vadd.f32 %v2214_v31, %v15463_v43  ;;  %v15469_v26 = vld [vmem:[#allocation84_spill] sm:$0xff]  ;;  %v15471_v31 = vld [vmem:[#allocation123_spill] sm:$0xff] }
 0x230   : > { %v2216_v5 = vpop.f32.mrf.mxu1  ;;  %v3338_v1 = vpop.f32.mrf.mxu0 }
 0x231   : > { %15462 = vst [vmem:[#allocation81_spill] sm:$0xff] %v12970_v28  ;;  %v12973_v61 = vadd.f32 %v3336_v48, %v2360_v53  ;;  %v2361_v39 = vadd.f32 %v2216_v5, %v15465_v16  ;;  %v15472_v48 = vld [vmem:[#allocation16_spill] sm:$0xff]  ;;  %v15473_v53 = vld [vmem:[#allocation85_spill] sm:$0xff]  ;;  %v15477_v28 = vld [vmem:[#allocation127_spill] sm:$0xff] }
 0x232   : > { %v2218_v33 = vpop.f32.mrf.mxu1  ;;  %v3340_v22 = vpop.f32.mrf.mxu0 }
 0x233   : > { %15464 = vst [vmem:[#allocation82_spill] sm:$0xff] %v12973_v61  ;;  %v12976_v19 = vadd.f32 %v3338_v1, %v2361_v39  ;;  %v2362_v57 = vadd.f32 %v2218_v33, %v15467_v52  ;;  %v15475_v39 = vld [vmem:[#allocation125_spill] sm:$0xff] }
 0x234   : > { %v2222_v36 = vpop.f32.mrf.mxu1  ;;  %v3344_v47 = vpop.f32.mrf.mxu0  ;;  %4145 = vmatmul.mubr.bf16.gmra.mxu1 %v15468_v10  ;;  %4875 = vmatmul.mubr.bf16.gmra.mxu0 %v15469_v26  ;;  %v15480_v26 = vld [vmem:[#allocation17_spill] sm:$0xff] }
 0x235   : > { %15466 = vst [vmem:[#allocation83_spill] sm:$0xff] %v12976_v19  ;;  %v12981_v58 = vadd.f32 %v3340_v22, %v2362_v57  ;;  %v2363_v43 = vadd.f32 %v2222_v36, %v15471_v31  ;;  %4154 = vmatprep.mubr.bf16.mxu1 %v15472_v48  ;;  %4884 = vmatprep.mubr.bf16.mxu0 %v15473_v53  ;;  %v15479_v36 = vld [vmem:[#allocation131_spill] sm:$0xff] }
 0x236   : > { %v2224_v16 = vpop.f32.mrf.mxu1  ;;  %v3346_v5 = vpop.f32.mrf.mxu0 }
 0x237   : > { %15470 = vst [vmem:[#allocation86_spill] sm:$0xff] %v12981_v58  ;;  %v12986_v1 = vadd.f32 %v3344_v47, %v2363_v43  ;;  %v2364_v33 = vadd.f32 %v2224_v16, %v15475_v39  ;;  %v15481_v47 = vld [vmem:[#allocation90_spill] sm:$0xff]  ;;  %v15483_v16 = vld [vmem:[#allocation133_spill] sm:$0xff] }
 0x238   : > { %v2226_v52 = vpop.f32.mrf.mxu1  ;;  %v3348_v19 = vpop.f32.mrf.mxu0 }
 0x239   : > { %15474 = vst [vmem:[#allocation87_spill] sm:$0xff] %v12986_v1  ;;  %v12989_v61 = vadd.f32 %v3346_v5, %v2364_v33  ;;  %v2365_v10 = vadd.f32 %v2226_v52, %v15477_v28  ;;  %v15484_v5 = vld [vmem:[#allocation19_spill] sm:$0xff] }
 0x23a   : > { %v2228_v22 = vpop.f32.mrf.mxu1  ;;  %v3350_v57 = vpop.f32.mrf.mxu0  ;;  %v15485_v33 = vld [vmem:[#allocation91_spill] sm:$0xff] }
 0x23b   : > { %15476 = vst [vmem:[#allocation88_spill] sm:$0xff] %v12989_v61  ;;  %v12992_v58 = vadd.f32 %v3348_v19, %v2365_v10  ;;  %v2366_v31 = vadd.f32 %v2228_v22, %v15479_v36  ;;  %v15487_v19 = vld [vmem:[#allocation135_spill] sm:$0xff] }
 0x23c   : > { %v2232_v48 = vpop.f32.mrf.mxu1  ;;  %v3354_v53 = vpop.f32.mrf.mxu0  ;;  %4155 = vmatmul.mubr.bf16.gmra.mxu1 %v15480_v26  ;;  %4885 = vmatmul.mubr.bf16.gmra.mxu0 %v15481_v47  ;;  %v15492_v47 = vld [vmem:[#allocation21_spill] sm:$0xff] }
 0x23d   : > { %15478 = vst [vmem:[#allocation89_spill] sm:$0xff] %v12992_v58  ;;  %v12997_v43 = vadd.f32 %v3350_v57, %v2366_v31  ;;  %v2367_v39 = vadd.f32 %v2232_v48, %v15483_v16  ;;  %4164 = vmatprep.mubr.bf16.mxu1 %v15484_v5  ;;  %4894 = vmatprep.mubr.bf16.mxu0 %v15485_v33  ;;  %v15489_v58 = vld [vmem:[#allocation137_spill] sm:$0xff] }
 0x23e   : > { %v2234_v28 = vpop.f32.mrf.mxu1  ;;  %v3356_v52 = vpop.f32.mrf.mxu0  ;;  %v15491_v48 = vld [vmem:[#allocation141_spill] sm:$0xff] }
 0x23f   : > { %15482 = vst [vmem:[#allocation92_spill] sm:$0xff] %v12997_v43  ;;  %v13002_v10 = vadd.f32 %v3354_v53, %v2367_v39  ;;  %v2368_v22 = vadd.f32 %v2234_v28, %v15487_v19  ;;  %v15493_v53 = vld [vmem:[#allocation98_spill] sm:$0xff]  ;;  %v15495_v28 = vld [vmem:[#allocation143_spill] sm:$0xff] }
 0x240   : > { %v2236_v36 = vpop.f32.mrf.mxu1  ;;  %v3358_v61 = vpop.f32.mrf.mxu0 }
 0x241   : > { %15486 = vst [vmem:[#allocation93_spill] sm:$0xff] %v13002_v10  ;;  %v13005_v1 = vadd.f32 %v3356_v52, %v2368_v22  ;;  %v2369_v26 = vadd.f32 %v2236_v36, %v15489_v58  ;;  %v15496_v52 = vld [vmem:[#allocation23_spill] sm:$0xff] }
 0x242   : > { %v2238_v57 = vpop.f32.mrf.mxu1  ;;  %v3360_v31 = vpop.f32.mrf.mxu0  ;;  %v15497_v22 = vld [vmem:[#allocation99_spill] sm:$0xff] }
 0x243   : > { %15488 = vst [vmem:[#allocation95_spill] sm:$0xff] %v13005_v1  ;;  %v13008_v43 = vadd.f32 %v3358_v61, %v2369_v26  ;;  %v2370_v16 = vadd.f32 %v2238_v57, %v15491_v48  ;;  %v15499_v26 = vld [vmem:[#allocation145_spill] sm:$0xff]  ;;  %v15501_v10 = vld [vmem:[#allocation147_spill] sm:$0xff] }
 0x244   : > { %v2242_v5 = vpop.f32.mrf.mxu1  ;;  %v3364_v33 = vpop.f32.mrf.mxu0  ;;  %4165 = vmatmul.mubr.bf16.gmra.mxu1 %v15492_v47  ;;  %4895 = vmatmul.mubr.bf16.gmra.mxu0 %v15493_v53  ;;  %v15504_v53 = vld [vmem:[#allocation25_spill] sm:$0xff] }
 0x245   : > { %15490 = vst [vmem:[#allocation97_spill] sm:$0xff] %v13008_v43  ;;  %v13013_v39 = vadd.f32 %v3360_v31, %v2370_v16  ;;  %v2371_v19 = vadd.f32 %v2242_v5, %v15495_v28  ;;  %4174 = vmatprep.mubr.bf16.mxu1 %v15496_v52  ;;  %4904 = vmatprep.mubr.bf16.mxu0 %v15497_v22  ;;  %v15503_v5 = vld [vmem:[#allocation151_spill] sm:$0xff] }
 0x246   : > { %v2244_v58 = vpop.f32.mrf.mxu1  ;;  %v3366_v36 = vpop.f32.mrf.mxu0 }
 0x247   : > { %15494 = vst [vmem:[#allocation101_spill] sm:$0xff] %v13013_v39  ;;  %v13018_v61 = vadd.f32 %v3364_v33, %v2371_v19  ;;  %v2372_v57 = vadd.f32 %v2244_v58, %v15499_v26  ;;  %v15505_v33 = vld [vmem:[#allocation108_spill] sm:$0xff]  ;;  %v15507_v58 = vld [vmem:[#allocation153_spill] sm:$0xff] }
 0x248   : > { %v2246_v48 = vpop.f32.mrf.mxu1  ;;  %v3368_v43 = vpop.f32.mrf.mxu0 }
 0x249   : > { %15498 = vst [vmem:[#allocation103_spill] sm:$0xff] %v13018_v61  ;;  %v13021_v1 = vadd.f32 %v3366_v36, %v2372_v57  ;;  %v2373_v47 = vadd.f32 %v2246_v48, %v15501_v10  ;;  %v15508_v36 = vld [vmem:[#allocation27_spill] sm:$0xff]  ;;  %v15509_v57 = vld [vmem:[#allocation109_spill] sm:$0xff] }
 0x24a   : > { %v2248_v31 = vpop.f32.mrf.mxu1  ;;  %v3370_v16 = vpop.f32.mrf.mxu0 }
 0x24b   : > { %15500 = vst [vmem:[#allocation105_spill] sm:$0xff] %v13021_v1  ;;  %v13024_v39 = vadd.f32 %v3368_v43, %v2373_v47  ;;  %v2374_v28 = vadd.f32 %v2248_v31, %v15503_v5  ;;  %v15511_v43 = vld [vmem:[#allocation155_spill] sm:$0xff] }
 0x24c   : > { %v2252_v52 = vpop.f32.mrf.mxu1  ;;  %v3374_v22 = vpop.f32.mrf.mxu0  ;;  %4175 = vmatmul.mubr.bf16.gmra.mxu1 %v15504_v53  ;;  %4905 = vmatmul.mubr.bf16.gmra.mxu0 %v15505_v33  ;;  %v15516_v33 = vld [vmem:[#allocation29_spill] sm:$0xff] }
 0x24d   : > { %15502 = vst [vmem:[#allocation107_spill] sm:$0xff] %v13024_v39  ;;  %v13029_v19 = vadd.f32 %v3370_v16, %v2374_v28  ;;  %v2375_v26 = vadd.f32 %v2252_v52, %v15507_v58  ;;  %4184 = vmatprep.mubr.bf16.mxu1 %v15508_v36  ;;  %4914 = vmatprep.mubr.bf16.mxu0 %v15509_v57  ;;  %v15513_v39 = vld [vmem:[#allocation157_spill] sm:$0xff] }
 0x24e   : > { %v2254_v10 = vpop.f32.mrf.mxu1  ;;  %v3376_v48 = vpop.f32.mrf.mxu0  ;;  %v15515_v52 = vld [vmem:[#allocation161_spill] sm:$0xff] }
 0x24f   : > { %15506 = vst [vmem:[#allocation111_spill] sm:$0xff] %v13029_v19  ;;  %v13034_v47 = vadd.f32 %v3374_v22, %v2375_v26  ;;  %v2376_v31 = vadd.f32 %v2254_v10, %v15511_v43  ;;  %v15517_v22 = vld [vmem:[#allocation118_spill] sm:$0xff]  ;;  %v15519_v10 = vld [vmem:[#allocation163_spill] sm:$0xff] }
 0x250   : > { %v2256_v5 = vpop.f32.mrf.mxu1  ;;  %v3378_v1 = vpop.f32.mrf.mxu0 }
 0x251   : > { %15510 = vst [vmem:[#allocation113_spill] sm:$0xff] %v13034_v47  ;;  %v13037_v61 = vadd.f32 %v3376_v48, %v2376_v31  ;;  %v2377_v53 = vadd.f32 %v2256_v5, %v15513_v39  ;;  %v15520_v48 = vld [vmem:[#allocation31_spill] sm:$0xff] }
 0x252   : > { %v2258_v16 = vpop.f32.mrf.mxu1  ;;  %v3380_v28 = vpop.f32.mrf.mxu0  ;;  %v15521_v31 = vld [vmem:[#allocation119_spill] sm:$0xff] }
 0x253   : > { %15512 = vst [vmem:[#allocation115_spill] sm:$0xff] %v13037_v61  ;;  %v13040_v19 = vadd.f32 %v3378_v1, %v2377_v53  ;;  %v2378_v58 = vadd.f32 %v2258_v16, %v15515_v52  ;;  %v15523_v53 = vld [vmem:[#allocation165_spill] sm:$0xff]  ;;  %v15525_v47 = vld [vmem:[#allocation167_spill] sm:$0xff] }
 0x254   : > { %v2262_v36 = vpop.f32.mrf.mxu1  ;;  %v3384_v57 = vpop.f32.mrf.mxu0  ;;  %4185 = vmatmul.mubr.bf16.gmra.mxu1 %v15516_v33  ;;  %4915 = vmatmul.mubr.bf16.gmra.mxu0 %v15517_v22 }
 0x255   : > { %15514 = vst [vmem:[#allocation117_spill] sm:$0xff] %v13040_v19  ;;  %v13045_v26 = vadd.f32 %v3380_v28, %v2378_v58  ;;  %v2379_v43 = vadd.f32 %v2262_v36, %v15519_v10  ;;  %4194 = vmatprep.mubr.bf16.mxu1 %v15520_v48  ;;  %4924 = vmatprep.mubr.bf16.mxu0 %v15521_v31  ;;  %v15527_v36 = vld [vmem:[#allocation171_spill] sm:$0xff]  ;;  %v15528_v31 = vld [vmem:[#allocation33_spill] sm:$0xff] }
 0x256   : > { %v2264_v39 = vpop.f32.mrf.mxu1  ;;  %v3386_v5 = vpop.f32.mrf.mxu0 }
 0x257   : > { %15518 = vst [vmem:[#allocation121_spill] sm:$0xff] %v13045_v26  ;;  %v13050_v1 = vadd.f32 %v3384_v57, %v2379_v43  ;;  %v2380_v16 = vadd.f32 %v2264_v39, %v15523_v53  ;;  %v15529_v57 = vld [vmem:[#allocation128_spill] sm:$0xff]  ;;  %v15532_v53 = vld [vmem:[#allocation129_spill] sm:$0xff] }
 0x258   : > { %v2266_v52 = vpop.f32.mrf.mxu1  ;;  %v3388_v19 = vpop.f32.mrf.mxu0 }
 0x259   : > { %15522 = vst [vmem:[#allocation123_spill] sm:$0xff] %v13050_v1  ;;  %v13053_v61 = vadd.f32 %v3386_v5, %v2380_v16  ;;  %v2381_v33 = vadd.f32 %v2266_v52, %v15525_v47  ;;  %v15531_v5 = vld [vmem:[#allocation35_spill] sm:$0xff] }
 0x25a   : > { %v2268_v28 = vpop.f32.mrf.mxu1  ;;  %v3390_v58 = vpop.f32.mrf.mxu0 }
 0x25b   : > { %15524 = vst [vmem:[#allocation125_spill] sm:$0xff] %v13053_v61  ;;  %v13056_v26 = vadd.f32 %v3388_v19, %v2381_v33  ;;  %v2382_v10 = vadd.f32 %v2268_v28, %v15527_v36 }
 0x25c   : > { %v3956_v48 = vpop.f32.mrf.mxu1  ;;  %4195 = vmatmul.mubr.bf16.gmra.mxu1 %v15528_v31  ;;  %v4686_v22 = vpop.f32.mrf.mxu0  ;;  %4925 = vmatmul.mubr.bf16.gmra.mxu0 %v15529_v57 }
 0x25d   : > { %15526 = vst [vmem:[#allocation127_spill] sm:$0xff] %v13056_v26  ;;  %v13061_v43 = vadd.f32 %v3390_v58, %v2382_v10  ;;  %v13063_v39 = vadd.f32 %v4686_v22, %v3956_v48  ;;  %4204 = vmatprep.mubr.bf16.mxu1 %v15531_v5  ;;  %4934 = vmatprep.mubr.bf16.mxu0 %v15532_v53  ;;  %v15536_v10 = vld [vmem:[#allocation37_spill] sm:$0xff] }
 0x25e   : > { %v3958_v47 = vpop.f32.mrf.mxu1  ;;  %v4688_v16 = vpop.f32.mrf.mxu0 }
 0x25f   : > { %15530 = vst [vmem:[#allocation131_spill] sm:$0xff] %v13061_v43  ;;  %v13067_v33 = vadd.f32 %v4688_v16, %v3958_v47  ;;  %v15538_v43 = vld [vmem:[#allocation39_spill] sm:$0xff] }
 0x260   : > { %v3960_v19 = vpop.f32.mrf.mxu1  ;;  %v4690_v52 = vpop.f32.mrf.mxu0 }
 0x261   : > { %15533 = vst [vmem:[#allocation133_spill] sm:$0xff] %v13067_v33  ;;  %v13069_v28 = vadd.f32 %v4690_v52, %v3960_v19  ;;  %v15542_v33 = vld [vmem:[#allocation41_spill] sm:$0xff] }
 0x262   : > { %v3962_v36 = vpop.f32.mrf.mxu1  ;;  %v4692_v61 = vpop.f32.mrf.mxu0 }
 0x263   : > { %15534 = vst [vmem:[#allocation135_spill] sm:$0xff] %v13069_v28  ;;  %v13071_v1 = vadd.f32 %v4692_v61, %v3962_v36 }
 0x264   : > { %v3966_v58 = vpop.f32.mrf.mxu1  ;;  %4205 = vmatmul.mubr.bf16.gmra.mxu1 %v15536_v10  ;;  %v4696_v22 = vpop.f32.mrf.mxu0  ;;  %4935 = vmatmul.mubr.bf16.gmra.mxu0 %v12311_v2 }
 0x265   : > { %15535 = vst [vmem:[#allocation137_spill] sm:$0xff] %v13071_v1  ;;  %v13075_v48 = vadd.f32 %v4696_v22, %v3966_v58  ;;  %4214 = vmatprep.mubr.bf16.mxu1 %v15538_v43  ;;  %4944 = vmatprep.mubr.bf16.mxu0 %v12313_v6  ;;  %v15543_v43 = vld [vmem:[#allocation43_spill] sm:$0xff] }
 0x266   : > { %v3968_v47 = vpop.f32.mrf.mxu1  ;;  %v4698_v16 = vpop.f32.mrf.mxu0 }
 0x267   : > { %15537 = vst [vmem:[#allocation141_spill] sm:$0xff] %v13075_v48  ;;  %v13079_v19 = vadd.f32 %v4698_v16, %v3968_v47  ;;  %v15546_v48 = vld [vmem:[#allocation45_spill] sm:$0xff] }
 0x268   : > { %v3970_v52 = vpop.f32.mrf.mxu1  ;;  %v4700_v26 = vpop.f32.mrf.mxu0 }
 0x269   : > { %15539 = vst [vmem:[#allocation143_spill] sm:$0xff] %v13079_v19  ;;  %v13081_v61 = vadd.f32 %v4700_v26, %v3970_v52 }
 0x26a   : > { %v3972_v36 = vpop.f32.mrf.mxu1  ;;  %v4702_v1 = vpop.f32.mrf.mxu0 }
 0x26b   : > { %15540 = vst [vmem:[#allocation145_spill] sm:$0xff] %v13081_v61  ;;  %v13083_v10 = vadd.f32 %v4702_v1, %v3972_v36 }
 0x26c   : > { %v3976_v28 = vpop.f32.mrf.mxu1  ;;  %4215 = vmatmul.mubr.bf16.gmra.mxu1 %v15542_v33  ;;  %v4706_v58 = vpop.f32.mrf.mxu0  ;;  %4945 = vmatmul.mubr.bf16.gmra.mxu0 %v12339_v40 }
 0x26d   : > { %15541 = vst [vmem:[#allocation147_spill] sm:$0xff] %v13083_v10  ;;  %v13087_v22 = vadd.f32 %v4706_v58, %v3976_v28  ;;  %4224 = vmatprep.mubr.bf16.mxu1 %v15543_v43  ;;  %4954 = vmatprep.mubr.bf16.mxu0 %v12341_v20 }
 0x26e   : > { %v3978_v47 = vpop.f32.mrf.mxu1  ;;  %v4708_v16 = vpop.f32.mrf.mxu0 }
 0x26f   : > { %v13091_v26 = vadd.f32 %v4708_v16, %v3978_v47 }
 0x270   : > { %v3980_v52 = vpop.f32.mrf.mxu1  ;;  %v4710_v61 = vpop.f32.mrf.mxu0 }
 0x271   : > { %v13093_v1 = vadd.f32 %v4710_v61, %v3980_v52 }
 0x272   : > { %v3982_v36 = vpop.f32.mrf.mxu1  ;;  %v4712_v10 = vpop.f32.mrf.mxu0 }
 0x273   : > { %15544 = vst [vmem:[#allocation151_spill] sm:$0xff] %v13093_v1  ;;  %v13095_v33 = vadd.f32 %v4712_v10, %v3982_v36  ;;  %v11006_v36 = vld [vmem:[%s14902_s1 + $0x570] ss:$8 sps:$4 sm:$0xff]  }
 0x274   : > { %v3986_v19 = vpop.f32.mrf.mxu1  ;;  %4225 = vmatmul.mubr.bf16.gmra.mxu1 %v15546_v48  ;;  %v4716_v28 = vpop.f32.mrf.mxu0  ;;  %4955 = vmatmul.mubr.bf16.gmra.mxu0 %v12367_v46 }
 0x275   : > { %15545 = vst [vmem:[#allocation153_spill] sm:$0xff] %v13095_v33  ;;  %v13099_v58 = vadd.f32 %v4716_v28, %v3986_v19  ;;  %5526 = vmatprep.mubr.bf16.mxu1 %v15300_v41  ;;  %6901 = vmatprep.mubr.bf16.mxu0 %v11204_v24  ;;  %v11009_v19 = vld [vmem:[%s14902_s1 + $0x870] ss:$8 sps:$4 sm:$0xff]   ;;  %v11014_v24 = vld [vmem:[%s14902_s1 + $0x564] ss:$8 sps:$4 sm:$0xff]  }
 0x276   : > { %v3988_v47 = vpop.f32.mrf.mxu1  ;;  %v4718_v16 = vpop.f32.mrf.mxu0  ;;  %v11018_v33 = vld [vmem:[%s14902_s1 + $0x550] ss:$8 sps:$4 sm:$0xff]  }
 0x277   : > { %15547 = vst [vmem:[#allocation155_spill] sm:$0xff] %v13099_v58  ;;  %v13103_v61 = vadd.f32 %v4718_v16, %v3988_v47 }
 0x278   : > { %v3990_v52 = vpop.f32.mrf.mxu1  ;;  %v4720_v1 = vpop.f32.mrf.mxu0 }
 0x279   : > { %15548 = vst [vmem:[#allocation157_spill] sm:$0xff] %v13103_v61  ;;  %v13105_v10 = vadd.f32 %v4720_v1, %v3990_v52  ;;  %v11017_v1 = vld [vmem:[%s14902_s1 + $0x864] ss:$8 sps:$4 sm:$0xff]  }
 0x27a   : > { %v3992_v28 = vpop.f32.mrf.mxu1  ;;  %v4722_v58 = vpop.f32.mrf.mxu0 }
 0x27b   : > { %15549 = vst [vmem:[#allocation161_spill] sm:$0xff] %v13105_v10  ;;  %v13113_v48 = vadd.f32 %v4722_v58, %v3992_v28  ;;  %v11012_v58 = vld [vmem:[%s14902_s1 + $0x560] ss:$8 sps:$4 sm:$0xff]  }
 0x27c   : > { %v3996_v47 = vpop.f32.mrf.mxu1  ;;  %v4726_v16 = vpop.f32.mrf.mxu0  ;;  %5527 = vmatmul.mubr.bf16.vlgmr.msra.gmra.mxu1 %v15307_v15  ;;  %6902 = vmatmul.mubr.bf16.vlgmr.msra.gmra.mxu0 %v11282_v54  ;;  %v11015_v28 = vld [vmem:[%s14902_s1 + $0x860] ss:$8 sps:$4 sm:$0xff]   ;;  %v11020_v54 = vld [vmem:[%s14902_s1 + $0x554] ss:$8 sps:$4 sm:$0xff]  }
 0x27d   : > { %15550 = vst [vmem:[#allocation163_spill] sm:$0xff] %v13113_v48  ;;  %v13123_v52 = vadd.f32 %v4726_v16, %v3996_v47  ;;  %7600 = vmatpush1.bf16.msra.mxu1 %v11006_v36  ;;  %8442 = vmatpush1.bf16.msra.mxu0 %v11009_v19  ;;  %v11023_v36 = vld [vmem:[%s14902_s1 + $0x854] ss:$8 sps:$4 sm:$0xff]  }
 0x27e   : > { %v3998_v48 = vpop.f32.mrf.mxu1  ;;  %v4728_v10 = vpop.f32.mrf.mxu0  ;;  %5536 = vmatprep.mubr.bf16.mxu1 %v15310_v45  ;;  %6911 = vmatprep.mubr.bf16.mxu0 %v11294_v60 }
 0x27f   : > { %15551 = vst [vmem:[#allocation165_spill] sm:$0xff] %v13123_v52  ;;  %v13139_v19 = vadd.f32 %v4728_v10, %v3998_v48  ;;  %7601 = vmatprep.subr.bf16.mxu1 %v11014_v24  ;;  %8443 = vmatprep.subr.bf16.mxu0 %v11017_v1  ;;  %v11021_v48 = vld [vmem:[%s14902_s1 + $0x850] ss:$8 sps:$4 sm:$0xff]   ;;  %v11026_v24 = vld [vmem:[%s14902_s1 + $0x544] ss:$8 sps:$4 sm:$0xff]  }
 0x280   : > { %v4000_v47 = vpop.f32.mrf.mxu1  ;;  %v4730_v16 = vpop.f32.mrf.mxu0  ;;  %v11029_v1 = vld [vmem:[%s14902_s1 + $0x844] ss:$8 sps:$4 sm:$0xff]  }
 0x281   : > { %v13141_v52 = vadd.f32 %v4730_v16, %v4000_v47  ;;  %7602 = vmatpush1.bf16.msra.mxu1 %v11012_v58  ;;  %8444 = vmatpush1.bf16.msra.mxu0 %v11015_v28  ;;  %v11024_v47 = vld [vmem:[%s14902_s1 + $0x540] ss:$8 sps:$4 sm:$0xff]  }
 0x282   : > { %v4002_v61 = vpop.f32.mrf.mxu1  ;;  %v4732_v60 = vpop.f32.mrf.mxu0  ;;  %7603 = vmatprep.subr.bf16.mxu1 %v11020_v54  ;;  %8445 = vmatprep.subr.bf16.mxu0 %v11023_v36  ;;  %v11027_v16 = vld [vmem:[%s14902_s1 + $0x840] ss:$8 sps:$4 sm:$0xff]  }
 0x283   : > { %v13149_v10 = vadd.f32 %v4732_v60, %v4002_v61 }
 0x284   : > { %v4006_v58 = vpop.f32.mrf.mxu1  ;;  %v4736_v28 = vpop.f32.mrf.mxu0  ;;  %5537 = vmatmul.mubr.bf16.gmra.mxu1 %v15317_v42  ;;  %6912 = vmatmul.mubr.bf16.gmra.mxu0 %v11325_v9  ;;  %v11032_v9 = vld [vmem:[%s14902_s1 + $0x534] ss:$8 sps:$4 sm:$0xff]  }
 0x285   : > { %v13159_v54 = vadd.f32 %v4736_v28, %v4006_v58  ;;  %5546 = vmatprep.mubr.bf16.mxu1 %v15320_v23  ;;  %6921 = vmatprep.mubr.bf16.mxu0 %v11335_v13  ;;  %v11035_v13 = vld [vmem:[%s14902_s1 + $0x834] ss:$8 sps:$4 sm:$0xff]  }
 0x286   : > { %v4008_v61 = vpop.f32.mrf.mxu1  ;;  %v4738_v36 = vpop.f32.mrf.mxu0  ;;  %7604 = vmatpush1.bf16.msra.mxu1 %v11018_v33  ;;  %8446 = vmatpush1.bf16.msra.mxu0 %v11021_v48 }
 0x287   : > { %15552 = vst [vmem:[#allocation167_spill] sm:$0xff] %v13159_v54  ;;  %v13169_v60 = vadd.f32 %v4738_v36, %v4008_v61  ;;  %7605 = vmatprep.subr.bf16.mxu1 %v11026_v24  ;;  %8447 = vmatprep.subr.bf16.mxu0 %v11029_v1  ;;  %v11030_v24 = vld [vmem:[%s14902_s1 + $0x530] ss:$8 sps:$4 sm:$0xff]   ;;  %v11038_v36 = vld [vmem:[%s14902_s1 + $0x524] ss:$8 sps:$4 sm:$0xff]  }
 0x288   : > { %v4010_v33 = vpop.f32.mrf.mxu1  ;;  %v4740_v48 = vpop.f32.mrf.mxu0  ;;  %v11033_v1 = vld [vmem:[%s14902_s1 + $0x830] ss:$8 sps:$4 sm:$0xff]  }
 0x289   : > { %v13177_v58 = vadd.f32 %v4740_v48, %v4010_v33 }
 0x28a   : > { %v4012_v28 = vpop.f32.mrf.mxu1  ;;  %v4742_v54 = vpop.f32.mrf.mxu0  ;;  %7606 = vmatpush1.bf16.msra.mxu1 %v11024_v47  ;;  %8448 = vmatpush1.bf16.msra.mxu0 %v11027_v16  ;;  %v11041_v47 = vld [vmem:[%s14902_s1 + $0x824] ss:$8 sps:$4 sm:$0xff]  }
 0x28b   : > { %v13185_v61 = vadd.f32 %v4742_v54, %v4012_v28  ;;  %7607 = vmatprep.subr.bf16.mxu1 %v11032_v9  ;;  %8449 = vmatprep.subr.bf16.mxu0 %v11035_v13  ;;  %v11036_v13 = vld [vmem:[%s14902_s1 + $0x520] ss:$8 sps:$4 sm:$0xff]  }
 0x28c   : > { %v4016_v16 = vpop.f32.mrf.mxu1  ;;  %v4746_v33 = vpop.f32.mrf.mxu0  ;;  %5547 = vmatmul.mubr.bf16.gmra.mxu1 %v15327_v50  ;;  %6922 = vmatmul.mubr.bf16.gmra.mxu0 %v11369_v32  ;;  %v11039_v28 = vld [vmem:[%s14902_s1 + $0x820] ss:$8 sps:$4 sm:$0xff]   ;;  %v11044_v32 = vld [vmem:[%s14902_s1 + $0x514] ss:$8 sps:$4 sm:$0xff]  }
 0x28d   : > { %15553 = vst [vmem:[#allocation171_spill] sm:$0xff] %v13185_v61  ;;  %v13195_v48 = vadd.f32 %v4746_v33, %v4016_v16  ;;  %5556 = vmatprep.mubr.bf16.mxu1 %v15330_v14  ;;  %6931 = vmatprep.mubr.bf16.mxu0 %v11380_v37  ;;  %v11047_v37 = vld [vmem:[%s14902_s1 + $0x814] ss:$8 sps:$4 sm:$0xff]  }
 0x28e   : > { %v4018_v54 = vpop.f32.mrf.mxu1  ;;  %v4748_v9 = vpop.f32.mrf.mxu0  ;;  %7608 = vmatpush1.bf16.msra.mxu1 %v11030_v24  ;;  %8450 = vmatpush1.bf16.msra.mxu0 %v11033_v1 }
 0x28f   : > { %15554 = vst [vmem:[#allocation33_spill] sm:$0xff] %v13195_v48  ;;  %v13205_v61 = vadd.f32 %v4748_v9, %v4018_v54  ;;  %7609 = vmatprep.subr.bf16.mxu1 %v11038_v36  ;;  %8451 = vmatprep.subr.bf16.mxu0 %v11041_v47  ;;  %v11042_v36 = vld [vmem:[%s14902_s1 + $0x510] ss:$8 sps:$4 sm:$0xff]   ;;  %v11050_v9 = vld [vmem:[%s14902_s1 + $0x504] ss:$8 sps:$4 sm:$0xff]  }
 0x290   : > { %v4020_v24 = vpop.f32.mrf.mxu1  ;;  %v4750_v1 = vpop.f32.mrf.mxu0  ;;  %v11045_v47 = vld [vmem:[%s14902_s1 + $0x810] ss:$8 sps:$4 sm:$0xff]  }
 0x291   : > { %v13213_v16 = vadd.f32 %v4750_v1, %v4020_v24 }
 0x292   : > { %v4022_v33 = vpop.f32.mrf.mxu1  ;;  %v4752_v48 = vpop.f32.mrf.mxu0  ;;  %7610 = vmatpush1.bf16.msra.mxu1 %v11036_v13  ;;  %8452 = vmatpush1.bf16.msra.mxu0 %v11039_v28  ;;  %v11053_v13 = vld [vmem:[%s14902_s1 + $0x804] ss:$8 sps:$4 sm:$0xff]  }
 0x293   : > { %15555 = vst [vmem:[#allocation35_spill] sm:$0xff] %v13213_v16  ;;  %v13221_v54 = vadd.f32 %v4752_v48, %v4022_v33  ;;  %7611 = vmatprep.subr.bf16.mxu1 %v11044_v32  ;;  %8453 = vmatprep.subr.bf16.mxu0 %v11047_v37  ;;  %v11048_v37 = vld [vmem:[%s14902_s1 + $0x500] ss:$8 sps:$4 sm:$0xff]  }
 0x294   : > { %v4026_v28 = vpop.f32.mrf.mxu1  ;;  %v4756_v24 = vpop.f32.mrf.mxu0  ;;  %5557 = vmatmul.mubr.bf16.gmra.mxu1 %v15337_v55  ;;  %6932 = vmatmul.mubr.bf16.gmra.mxu0 %v15296_v0  ;;  %v11051_v33 = vld [vmem:[%s14902_s1 + $0x800] ss:$8 sps:$4 sm:$0xff]   ;;  %v11056_v0 = vld [vmem:[%s14902_s1 + $0x5f4] ss:$8 sps:$4 sm:$0xff]  }
 0x295   : > { %15556 = vst [vmem:[#allocation129_spill] sm:$0xff] %v13221_v54  ;;  %v13231_v1 = vadd.f32 %v4756_v24, %v4026_v28  ;;  %5566 = vmatprep.mubr.bf16.mxu1 %v15340_v7  ;;  %6941 = vmatprep.mubr.bf16.mxu0 %v11421_v62 }
 0x296   : > { %v4028_v48 = vpop.f32.mrf.mxu1  ;;  %v4758_v32 = vpop.f32.mrf.mxu0  ;;  %7612 = vmatpush1.bf16.msra.mxu1 %v11042_v36  ;;  %8454 = vmatpush1.bf16.msra.mxu0 %v11045_v47  ;;  %v11059_v36 = vld [vmem:[%s14902_s1 + $0x8f4] ss:$8 sps:$4 sm:$0xff]  }
 0x297   : > { %15557 = vst [vmem:[#allocation43_spill] sm:$0xff] %v13231_v1  ;;  %v13241_v54 = vadd.f32 %v4758_v32, %v4028_v48  ;;  %7613 = vmatprep.subr.bf16.mxu1 %v11050_v9  ;;  %8455 = vmatprep.subr.bf16.mxu0 %v11053_v13  ;;  %v11054_v9 = vld [vmem:[%s14902_s1 + $0x5f0] ss:$8 sps:$4 sm:$0xff]   ;;  %v11062_v32 = vld [vmem:[%s14902_s1 + $0x5e4] ss:$8 sps:$4 sm:$0xff]  }
 0x298   : > { %v4030_v47 = vpop.f32.mrf.mxu1  ;;  %v4760_v28 = vpop.f32.mrf.mxu0  ;;  %v11057_v13 = vld [vmem:[%s14902_s1 + $0x8f0] ss:$8 sps:$4 sm:$0xff]  }
 0x299   : > { %15558 = vst [vmem:[#allocation201_spill] sm:$0xff] %v13241_v54  ;;  %v13249_v24 = vadd.f32 %v4760_v28, %v4030_v47 }
 0x29a   : > { %v4032_v1 = vpop.f32.mrf.mxu1  ;;  %v4762_v16 = vpop.f32.mrf.mxu0  ;;  %7614 = vmatpush1.bf16.msra.mxu1 %v11048_v37  ;;  %8456 = vmatpush1.bf16.msra.mxu0 %v11051_v33  ;;  %v11065_v37 = vld [vmem:[%s14902_s1 + $0x8e4] ss:$8 sps:$4 sm:$0xff]  }
 0x29b   : > { %15559 = vst [vmem:[#allocation202_spill] sm:$0xff] %v13249_v24  ;;  %v13257_v48 = vadd.f32 %v4762_v16, %v4032_v1  ;;  %7615 = vmatprep.subr.bf16.mxu1 %v11056_v0  ;;  %8457 = vmatprep.subr.bf16.mxu0 %v11059_v36  ;;  %v11060_v0 = vld [vmem:[%s14902_s1 + $0x5e0] ss:$8 sps:$4 sm:$0xff]  }
 0x29c   : > { %v4036_v33 = vpop.f32.mrf.mxu1  ;;  %v4766_v47 = vpop.f32.mrf.mxu0  ;;  %5567 = vmatmul.mubr.bf16.gmra.mxu1 %v15347_v25  ;;  %6942 = vmatmul.mubr.bf16.gmra.mxu0 %v11458_v18  ;;  %v11063_v36 = vld [vmem:[%s14902_s1 + $0x8e0] ss:$8 sps:$4 sm:$0xff]  }
 0x29d   : > { %15560 = vst [vmem:[#allocation203_spill] sm:$0xff] %v13257_v48  ;;  %v13267_v28 = vadd.f32 %v4766_v47, %v4036_v33  ;;  %5576 = vmatprep.mubr.bf16.mxu1 %v15350_v49  ;;  %6951 = vmatprep.mubr.bf16.mxu0 %v11471_v27  ;;  %v11068_v33 = vld [vmem:[%s14902_s1 + $0x5d4] ss:$8 sps:$4 sm:$0xff]  }
 0x29e   : > { %v4038_v16 = vpop.f32.mrf.mxu1  ;;  %v4768_v1 = vpop.f32.mrf.mxu0  ;;  %7616 = vmatpush2.bf16.msra.mxu1 %v11054_v9  ;;  %8458 = vmatpush2.bf16.msra.mxu0 %v11057_v13  ;;  %v11071_v9 = vld [vmem:[%s14902_s1 + $0x8d4] ss:$8 sps:$4 sm:$0xff]  }
 0x29f   : > { %15561 = vst [vmem:[#allocation204_spill] sm:$0xff] %v13267_v28  ;;  %v13277_v48 = vadd.f32 %v4768_v1, %v4038_v16  ;;  %7617 = vmatprep.subr.bf16.mxu1 %v11062_v32  ;;  %8459 = vmatprep.subr.bf16.mxu0 %v11065_v37  ;;  %v11066_v32 = vld [vmem:[%s14902_s1 + $0x5d0] ss:$8 sps:$4 sm:$0xff]   ;;  %v11074_v1 = vld [vmem:[%s14902_s1 + $0x5c4] ss:$8 sps:$4 sm:$0xff]  }
 0x2a0   : > { %v4040_v13 = vpop.f32.mrf.mxu1  ;;  %v4770_v47 = vpop.f32.mrf.mxu0  ;;  %v11069_v37 = vld [vmem:[%s14902_s1 + $0x8d0] ss:$8 sps:$4 sm:$0xff]  }
 0x2a1   : > { %v13285_v28 = vadd.f32 %v4770_v47, %v4040_v13 }
 0x2a2   : > { %v4042_v24 = vpop.f32.mrf.mxu1  ;;  %v4772_v54 = vpop.f32.mrf.mxu0  ;;  %7618 = vmatpush2.bf16.msra.mxu1 %v11060_v0  ;;  %8460 = vmatpush2.bf16.msra.mxu0 %v11063_v36  ;;  %v11077_v0 = vld [vmem:[%s14902_s1 + $0x8c4] ss:$8 sps:$4 sm:$0xff]  }
 0x2a3   : > { %15562 = vst [vmem:[#allocation205_spill] sm:$0xff] %v13285_v28  ;;  %v13293_v16 = vadd.f32 %v4772_v54, %v4042_v24  ;;  %7619 = vmatprep.subr.bf16.mxu1 %v11068_v33  ;;  %8461 = vmatprep.subr.bf16.mxu0 %v11071_v9  ;;  %v11072_v33 = vld [vmem:[%s14902_s1 + $0x5c0] ss:$8 sps:$4 sm:$0xff]  }
 0x2a4   : > { %v4046_v36 = vpop.f32.mrf.mxu1  ;;  %v4776_v13 = vpop.f32.mrf.mxu0  ;;  %5577 = vmatmul.mubr.bf16.gmra.mxu1 %v15357_v21  ;;  %6952 = vmatmul.mubr.bf16.gmra.mxu0 %v11502_v44  ;;  %v11075_v9 = vld [vmem:[%s14902_s1 + $0x8c0] ss:$8 sps:$4 sm:$0xff]  }
 0x2a5   : > { %15563 = vst [vmem:[#allocation206_spill] sm:$0xff] %v13293_v16  ;;  %v13303_v47 = vadd.f32 %v4776_v13, %v4046_v36  ;;  %5586 = vmatprep.mubr.bf16.mxu1 %v15360_v63  ;;  %6961 = vmatprep.mubr.bf16.mxu0 %v11515_v51  ;;  %v11080_v36 = vld [vmem:[%s14902_s1 + $0x5b4] ss:$8 sps:$4 sm:$0xff]  }
 0x2a6   : > { %v4048_v54 = vpop.f32.mrf.mxu1  ;;  %v4778_v24 = vpop.f32.mrf.mxu0  ;;  %7620 = vmatpush2.bf16.msra.mxu1 %v11066_v32  ;;  %8462 = vmatpush2.bf16.msra.mxu0 %v11069_v37  ;;  %v11083_v32 = vld [vmem:[%s14902_s1 + $0x8b4] ss:$8 sps:$4 sm:$0xff]  }
 0x2a7   : > { %15564 = vst [vmem:[#allocation207_spill] sm:$0xff] %v13303_v47  ;;  %v13313_v16 = vadd.f32 %v4778_v24, %v4048_v54  ;;  %7621 = vmatprep.subr.bf16.mxu1 %v11074_v1  ;;  %8463 = vmatprep.subr.bf16.mxu0 %v11077_v0  ;;  %v11078_v1 = vld [vmem:[%s14902_s1 + $0x5b0] ss:$8 sps:$4 sm:$0xff]  }
 0x2a8   : > { %v4050_v37 = vpop.f32.mrf.mxu1  ;;  %v4780_v13 = vpop.f32.mrf.mxu0  ;;  %v11081_v0 = vld [vmem:[%s14902_s1 + $0x8b0] ss:$8 sps:$4 sm:$0xff]  }
 0x2a9   : > { %15565 = vst [vmem:[#allocation208_spill] sm:$0xff] %v13313_v16  ;;  %v13321_v63 = vadd.f32 %v4780_v13, %v4050_v37 }
 0x2aa   : > { %v4052_v47 = vpop.f32.mrf.mxu1  ;;  %v4782_v28 = vpop.f32.mrf.mxu0  ;;  %7622 = vmatpush2.bf16.msra.mxu1 %v11072_v33  ;;  %8464 = vmatpush2.bf16.msra.mxu0 %v11075_v9 }
 0x2ab   : > { %v13329_v54 = vadd.f32 %v4782_v28, %v4052_v47  ;;  %7623 = vmatprep.subr.bf16.mxu1 %v11080_v36  ;;  %8465 = vmatprep.subr.bf16.mxu0 %v11083_v32 }
 0x2ac   : > { %v4056_v24 = vpop.f32.mrf.mxu1  ;;  %v4786_v16 = vpop.f32.mrf.mxu0  ;;  %5587 = vmatmul.mubr.bf16.gmra.mxu1 %v15367_v35  ;;  %6962 = vmatmul.mubr.bf16.gmra.mxu0 %v11546_v8 }
 0x2ad   : > { %15566 = vst [vmem:[#allocation209_spill] sm:$0xff] %v13329_v54  ;;  %v13333_v33 = vadd.f32 %v4786_v16, %v4056_v24  ;;  %5596 = vmatprep.mubr.bf16.mxu1 %v15370_v11  ;;  %6971 = vmatprep.mubr.bf16.mxu0 %v15289_v17  ;;  %v11084_v16 = vld [vmem:[%s14902_s1 + $0x5a0] ss:$8 sps:$4 sm:$0xff]   ;;  %v11086_v24 = vld [vmem:[%s14902_s1 + $0x5a4] ss:$8 sps:$4 sm:$0xff]  }
 0x2ae   : > { %v4058_v9 = vpop.f32.mrf.mxu1  ;;  %v4788_v37 = vpop.f32.mrf.mxu0  ;;  %7624 = vmatpush2.bf16.msra.mxu1 %v11078_v1  ;;  %8466 = vmatpush2.bf16.msra.mxu0 %v11081_v0 }
 0x2af   : > { %v13337_v28 = vadd.f32 %v4788_v37, %v4058_v9  ;;  %v11089_v37 = vld [vmem:[%s14902_s1 + $0x8a4] ss:$8 sps:$4 sm:$0xff]   ;;  %7625 = vmatprep.subr.bf16.mxu1 %v11086_v24 }
 0x2b0   : > { %v4060_v47 = vpop.f32.mrf.mxu1  ;;  %v4790_v36 = vpop.f32.mrf.mxu0  ;;  %8467 = vmatprep.subr.bf16.mxu0 %v11089_v37 }
 0x2b1   : > { %15567 = vst [vmem:[#allocation210_spill] sm:$0xff] %v13337_v28  ;;  %v13339_v32 = vadd.f32 %v4790_v36, %v4060_v47 }
 0x2b2   : > { %v4062_v13 = vpop.f32.mrf.mxu1  ;;  %v4792_v35 = vpop.f32.mrf.mxu0  ;;  %7626 = vmatpush2.bf16.msra.mxu1 %v11084_v16 }
 0x2b3   : > { %15568 = vst [vmem:[#allocation211_spill] sm:$0xff] %v13339_v32  ;;  %v13341_v54 = vadd.f32 %v4792_v35, %v4062_v13  ;;  %v11087_v35 = vld [vmem:[%s14902_s1 + $0x8a0] ss:$8 sps:$4 sm:$0xff]  }
 0x2b4   : > { %v4066_v1 = vpop.f32.mrf.mxu1  ;;  %v4796_v0 = vpop.f32.mrf.mxu0  ;;  %5597 = vmatmul.mubr.bf16.gmra.mxu1 %v15377_v4  ;;  %6972 = vmatmul.mubr.bf16.gmra.mxu0 %v15297_v30 }
 0x2b5   : > { %15569 = vst [vmem:[#allocation212_spill] sm:$0xff] %v13341_v54  ;;  %v13351_v9 = vadd.f32 %v4796_v0, %v4066_v1  ;;  %5606 = vmatprep.mubr.bf16.mxu1 %v15380_v12  ;;  %6981 = vmatprep.mubr.bf16.mxu0 %v15300_v41 }
 0x2b6   : > { %v4068_v47 = vpop.f32.mrf.mxu1  ;;  %v4798_v36 = vpop.f32.mrf.mxu0  ;;  %8468 = vmatpush2.bf16.msra.mxu0 %v11087_v35 }
 0x2b7   : > { %15570 = vst [vmem:[#allocation213_spill] sm:$0xff] %v13351_v9  ;;  %v13361_v13 = vadd.f32 %v4798_v36, %v4068_v47 }
 0x2b8   : > { %v4070_v1 = vpop.f32.mrf.mxu1  ;;  %v4800_v0 = vpop.f32.mrf.mxu0 }
 0x2b9   : > { %v13363_v12 = vadd.f32 %v4800_v0, %v4070_v1 }
 0x2ba   : > { %v4072_v9 = vpop.f32.mrf.mxu1  ;;  %v4802_v4 = vpop.f32.mrf.mxu0 }
 0x2bb   : > { %v13365_v54 = vadd.f32 %v4802_v4, %v4072_v9 }
 0x2bc   : > { %v4076_v32 = vpop.f32.mrf.mxu1  ;;  %v4806_v28 = vpop.f32.mrf.mxu0  ;;  %5607 = vmatmul.mubr.bf16.gmra.mxu1 %v15387_v59  ;;  %6982 = vmatmul.mubr.bf16.gmra.mxu0 %v15307_v15 }
 0x2bd   : > { %15571 = vst [vmem:[#allocation214_spill] sm:$0xff] %v13365_v54  ;;  %v13369_v24 = vadd.f32 %v4806_v28, %v4076_v32  ;;  %5616 = vmatprep.mubr.bf16.mxu1 %v15390_v38  ;;  %6991 = vmatprep.mubr.bf16.mxu0 %v15310_v45 }
 0x2be   : > { %v4078_v16 = vpop.f32.mrf.mxu1  ;;  %v4808_v35 = vpop.f32.mrf.mxu0 }
 0x2bf   : > { %v13373_v37 = vadd.f32 %v4808_v35, %v4078_v16  ;;  %v11090_v35 = vld [vmem:[%s14902_s1 + $0x590] ss:$8 sps:$4 sm:$0xff]  }
 0x2c0   : > { %v4080_v47 = vpop.f32.mrf.mxu1  ;;  %v4810_v36 = vpop.f32.mrf.mxu0 }
 0x2c1   : > { %v13375_v4 = vadd.f32 %v4810_v36, %v4080_v47  ;;  %v11092_v47 = vld [vmem:[%s14902_s1 + $0x594] ss:$8 sps:$4 sm:$0xff]  }
 0x2c2   : > { %v4082_v9 = vpop.f32.mrf.mxu1  ;;  %v4812_v1 = vpop.f32.mrf.mxu0  ;;  %7627 = vmatprep.subr.bf16.mxu1 %v11092_v47 }
 0x2c3   : > { %15572 = vst [vmem:[#allocation215_spill] sm:$0xff] %v13375_v4  ;;  %v13377_v0 = vadd.f32 %v4812_v1, %v4082_v9  ;;  %7628 = vmatpush2.bf16.msra.mxu1 %v11090_v35 }
 0x2c4   : > { %v4086_v59 = vpop.f32.mrf.mxu1  ;;  %v4816_v54 = vpop.f32.mrf.mxu0  ;;  %5617 = vmatmul.mubr.bf16.gmra.mxu1 %v15397_v29  ;;  %6992 = vmatmul.mubr.bf16.gmra.mxu0 %v15317_v42 }
 0x2c5   : > { %15573 = vst [vmem:[#allocation216_spill] sm:$0xff] %v13377_v0  ;;  %v13381_v28 = vadd.f32 %v4816_v54, %v4086_v59  ;;  %5626 = vmatprep.mubr.bf16.mxu1 %v15401_v3  ;;  %7001 = vmatprep.mubr.bf16.mxu0 %v15320_v23  ;;  %v11093_v59 = vld [vmem:[%s14902_s1 + $0x890] ss:$8 sps:$4 sm:$0xff]   ;;  %v11095_v54 = vld [vmem:[%s14902_s1 + $0x894] ss:$8 sps:$4 sm:$0xff]  }
 0x2c6   : > { %v4088_v32 = vpop.f32.mrf.mxu1  ;;  %v4818_v16 = vpop.f32.mrf.mxu0  ;;  %8469 = vmatprep.subr.bf16.mxu0 %v11095_v54 }
 0x2c7   : > { %15574 = vst [vmem:[#allocation217_spill] sm:$0xff] %v13381_v28  ;;  %v13391_v36 = vadd.f32 %v4818_v16, %v4088_v32  ;;  %8470 = vmatpush2.bf16.msra.mxu0 %v11093_v59  ;;  %v11098_v59 = vld [vmem:[%s14902_s1 + $0x584] ss:$8 sps:$4 sm:$0xff]  }
 0x2c8   : > { %v4090_v9 = vpop.f32.mrf.mxu1  ;;  %v4820_v1 = vpop.f32.mrf.mxu0  ;;  %7629 = vmatprep.subr.bf16.mxu1 %v11098_v59 }
 0x2c9   : > { %15575 = vst [vmem:[#allocation218_spill] sm:$0xff] %v13391_v36  ;;  %v13399_v3 = vadd.f32 %v4820_v1, %v4090_v9 }
 0x2ca   : > { %v4092_v28 = vpop.f32.mrf.mxu1  ;;  %v4822_v29 = vpop.f32.mrf.mxu0 }
 0x2cb   : > { %15576 = vst [vmem:[#allocation219_spill] sm:$0xff] %v13399_v3  ;;  %v13401_v0 = vadd.f32 %v4822_v29, %v4092_v28  ;;  %v15588_v3 = vld [vmem:[#allocation66_spill] sm:$0xff] }
 0x2cc   : > { %v4096_v32 = vpop.f32.mrf.mxu1  ;;  %v4826_v16 = vpop.f32.mrf.mxu0  ;;  %5627 = vmatmul.mubr.bf16.gmra.mxu1 %v15409_v34  ;;  %7002 = vmatmul.mubr.bf16.gmra.mxu0 %v15327_v50 }
 0x2cd   : > { %15577 = vst [vmem:[#allocation220_spill] sm:$0xff] %v13401_v0  ;;  %v13405_v47 = vadd.f32 %v4826_v16, %v4096_v32  ;;  %5636 = vmatprep.mubr.bf16.mxu1 %v15413_v56  ;;  %7011 = vmatprep.mubr.bf16.mxu0 %v15330_v14  ;;  %v11096_v32 = vld [vmem:[%s14902_s1 + $0x580] ss:$8 sps:$4 sm:$0xff]  }
 0x2ce   : > { %v4098_v9 = vpop.f32.mrf.mxu1  ;;  %v4828_v35 = vpop.f32.mrf.mxu0  ;;  %7630 = vmatpush2.bf16.msra.mxu1 %v11096_v32 }
 0x2cf   : > { %15578 = vst [vmem:[#allocation221_spill] sm:$0xff] %v13405_v47  ;;  %v13409_v1 = vadd.f32 %v4828_v35, %v4098_v9  ;;  %v15582_v35 = vld [vmem:[#allocation60_spill] sm:$0xff] }
 0x2d0   : > { %v4100_v54 = vpop.f32.mrf.mxu1  ;;  %v4830_v29 = vpop.f32.mrf.mxu0 }
 0x2d1   : > { %15579 = vst [vmem:[#allocation222_spill] sm:$0xff] %v13409_v1  ;;  %v13411_v28 = vadd.f32 %v4830_v29, %v4100_v54  ;;  %v15584_v29 = vld [vmem:[#allocation61_spill] sm:$0xff] }
 0x2d2   : > { %v4102_v34 = vpop.f32.mrf.mxu1  ;;  %v4832_v0 = vpop.f32.mrf.mxu0 }
 0x2d3   : > { %15580 = vst [vmem:[#allocation223_spill] sm:$0xff] %v13411_v28  ;;  %v13419_v16 = vadd.f32 %v4832_v0, %v4102_v34  ;;  %v11099_v34 = vld [vmem:[%s14902_s1 + $0x880] ss:$8 sps:$4 sm:$0xff]   ;;  %v11101_v0 = vld [vmem:[%s14902_s1 + $0x884] ss:$8 sps:$4 sm:$0xff]  }
 0x2d4   : > { %v4106_v56 = vpop.f32.mrf.mxu1  ;;  %v4836_v9 = vpop.f32.mrf.mxu0  ;;  %5637 = vmatmul.mubr.bf16.gmra.mxu1 %v15582_v35  ;;  %7012 = vmatmul.mubr.bf16.gmra.mxu0 %v15337_v55 }
 0x2d5   : > { %15581 = vst [vmem:[#allocation224_spill] sm:$0xff] %v13419_v16  ;;  %v13423_v54 = vadd.f32 %v4836_v9, %v4106_v56  ;;  %5646 = vmatprep.mubr.bf16.mxu1 %v15584_v29  ;;  %7021 = vmatprep.mubr.bf16.mxu0 %v15340_v7 }
 0x2d6   : > { %v4108_v28 = vpop.f32.mrf.mxu1  ;;  %v4838_v1 = vpop.f32.mrf.mxu0  ;;  %8471 = vmatprep.subr.bf16.mxu0 %v11101_v0 }
 0x2d7   : > { %15583 = vst [vmem:[#allocation225_spill] sm:$0xff] %v13423_v54  ;;  %v13433_v59 = vadd.f32 %v4838_v1, %v4108_v28  ;;  %8472 = vmatpush2.bf16.msra.mxu0 %v11099_v34  ;;  %v15590_v1 = vld [vmem:[#allocation67_spill] sm:$0xff] }
 0x2d8   : > { %v4110_v35 = vpop.f32.mrf.mxu1  ;;  %v4840_v56 = vpop.f32.mrf.mxu0 }
 0x2d9   : > { %15585 = vst [vmem:[#allocation226_spill] sm:$0xff] %v13433_v59  ;;  %v13435_v9 = vadd.f32 %v4840_v56, %v4110_v35 }
 0x2da   : > { %v4112_v29 = vpop.f32.mrf.mxu1  ;;  %v4842_v54 = vpop.f32.mrf.mxu0 }
 0x2db   : > { %15586 = vst [vmem:[#allocation227_spill] sm:$0xff] %v13435_v9  ;;  %v13437_v16 = vadd.f32 %v4842_v54, %v4112_v29 }
 0x2dc   : > { %v4116_v32 = vpop.f32.mrf.mxu1  ;;  %v4846_v47 = vpop.f32.mrf.mxu0  ;;  %5647 = vmatmul.mubr.bf16.gmra.mxu1 %v15588_v3  ;;  %7022 = vmatmul.mubr.bf16.gmra.mxu0 %v15347_v25 }
 0x2dd   : > { %15587 = vst [vmem:[#allocation228_spill] sm:$0xff] %v13437_v16  ;;  %v13441_v36 = vadd.f32 %v4846_v47, %v4116_v32  ;;  %5656 = vmatprep.mubr.bf16.mxu1 %v15590_v1  ;;  %7031 = vmatprep.mubr.bf16.mxu0 %v15350_v49  ;;  %v15594_v47 = vld [vmem:[#allocation72_spill] sm:$0xff]  ;;  %v15596_v1 = vld [vmem:[#allocation73_spill] sm:$0xff] }
 0x2de   : > { %v4118_v28 = vpop.f32.mrf.mxu1  ;;  %v4848_v35 = vpop.f32.mrf.mxu0 }
 0x2df   : > { %15589 = vst [vmem:[#allocation229_spill] sm:$0xff] %v13441_v36  ;;  %v13445_v0 = vadd.f32 %v4848_v35, %v4118_v28  ;;  %v15597_v28 = vld [vmem:[#allocation3_spill] sm:$0xff] }
 0x2e0   : > { %v4120_v34 = vpop.f32.mrf.mxu1  ;;  %v4850_v56 = vpop.f32.mrf.mxu0 }
 0x2e1   : > { %15591 = vst [vmem:[#allocation230_spill] sm:$0xff] %v13445_v0  ;;  %v13447_v54 = vadd.f32 %v4850_v56, %v4120_v34 }
 0x2e2   : > { %v4122_v29 = vpop.f32.mrf.mxu1  ;;  %v4852_v16 = vpop.f32.mrf.mxu0 }
 0x2e3   : > { %15592 = vst [vmem:[#allocation231_spill] sm:$0xff] %v13447_v54  ;;  %v13449_v9 = vadd.f32 %v4852_v16, %v4122_v29 }
 0x2e4   : > { %v4126_v3 = vpop.f32.mrf.mxu1  ;;  %v4856_v59 = vpop.f32.mrf.mxu0  ;;  %5657 = vmatmul.mubr.bf16.gmra.mxu1 %v15594_v47  ;;  %7032 = vmatmul.mubr.bf16.gmra.mxu0 %v15357_v21 }
 0x2e5   : > { %15593 = vst [vmem:[#allocation232_spill] sm:$0xff] %v13449_v9  ;;  %v13453_v32 = vadd.f32 %v4856_v59, %v4126_v3  ;;  %5666 = vmatprep.mubr.bf16.mxu1 %v15596_v1  ;;  %7041 = vmatprep.mubr.bf16.mxu0 %v15597_v28  ;;  %v15601_v3 = vld [vmem:[#allocation78_spill] sm:$0xff]  ;;  %v15602_v59 = vld [vmem:[#allocation4_spill] sm:$0xff]  ;;  %v15604_v28 = vld [vmem:[#allocation79_spill] sm:$0xff] }
 0x2e6   : > { %v4128_v35 = vpop.f32.mrf.mxu1  ;;  %v4858_v0 = vpop.f32.mrf.mxu0 }
 0x2e7   : > { %15595 = vst [vmem:[#allocation233_spill] sm:$0xff] %v13453_v32  ;;  %v13457_v34 = vadd.f32 %v4858_v0, %v4128_v35  ;;  %v15605_v0 = vld [vmem:[#allocation5_spill] sm:$0xff] }
 0x2e8   : > { %v4130_v56 = vpop.f32.mrf.mxu1  ;;  %v4860_v54 = vpop.f32.mrf.mxu0 }
 0x2e9   : > { %15598 = vst [vmem:[#allocation3_spill] sm:$0xff] %v13457_v34  ;;  %v13459_v16 = vadd.f32 %v4860_v54, %v4130_v56 }
 0x2ea   : > { %v4132_v29 = vpop.f32.mrf.mxu1  ;;  %v4862_v9 = vpop.f32.mrf.mxu0 }
 0x2eb   : > { %15599 = vst [vmem:[#allocation234_spill] sm:$0xff] %v13459_v16  ;;  %v13461_v36 = vadd.f32 %v4862_v9, %v4132_v29 }
 0x2ec   : > { %v4136_v47 = vpop.f32.mrf.mxu1  ;;  %v4866_v4 = vpop.f32.mrf.mxu0  ;;  %5667 = vmatmul.mubr.bf16.gmra.mxu1 %v15601_v3  ;;  %7042 = vmatmul.mubr.bf16.gmra.mxu0 %v15602_v59 }
 0x2ed   : > { %15600 = vst [vmem:[#allocation235_spill] sm:$0xff] %v13461_v36  ;;  %v13465_v1 = vadd.f32 %v4866_v4, %v4136_v47  ;;  %5676 = vmatprep.mubr.bf16.mxu1 %v15604_v28  ;;  %7051 = vmatprep.mubr.bf16.mxu0 %v15605_v0  ;;  %v15609_v4 = vld [vmem:[#allocation84_spill] sm:$0xff]  ;;  %v15610_v47 = vld [vmem:[#allocation6_spill] sm:$0xff]  ;;  %v15612_v0 = vld [vmem:[#allocation85_spill] sm:$0xff] }
 0x2ee   : > { %v4138_v35 = vpop.f32.mrf.mxu1  ;;  %v4868_v34 = vpop.f32.mrf.mxu0 }
 0x2ef   : > { %15603 = vst [vmem:[#allocation4_spill] sm:$0xff] %v13465_v1  ;;  %v13469_v54 = vadd.f32 %v4868_v34, %v4138_v35  ;;  %v15613_v34 = vld [vmem:[#allocation7_spill] sm:$0xff] }
 0x2f0   : > { %v4140_v56 = vpop.f32.mrf.mxu1  ;;  %v4870_v16 = vpop.f32.mrf.mxu0 }
 0x2f1   : > { %15606 = vst [vmem:[#allocation5_spill] sm:$0xff] %v13469_v54  ;;  %v13471_v9 = vadd.f32 %v4870_v16, %v4140_v56 }
 0x2f2   : > { %v4142_v29 = vpop.f32.mrf.mxu1  ;;  %v4872_v36 = vpop.f32.mrf.mxu0 }
 0x2f3   : > { %15607 = vst [vmem:[#allocation236_spill] sm:$0xff] %v13471_v9  ;;  %v13473_v32 = vadd.f32 %v4872_v36, %v4142_v29 }
 0x2f4   : > { %v4146_v3 = vpop.f32.mrf.mxu1  ;;  %v4876_v59 = vpop.f32.mrf.mxu0  ;;  %5677 = vmatmul.mubr.bf16.gmra.mxu1 %v15609_v4  ;;  %7052 = vmatmul.mubr.bf16.gmra.mxu0 %v15610_v47 }
 0x2f5   : > { %15608 = vst [vmem:[#allocation237_spill] sm:$0xff] %v13473_v32  ;;  %v13477_v28 = vadd.f32 %v4876_v59, %v4146_v3  ;;  %5686 = vmatprep.mubr.bf16.mxu1 %v15612_v0  ;;  %7061 = vmatprep.mubr.bf16.mxu0 %v15613_v34  ;;  %v15617_v3 = vld [vmem:[#allocation90_spill] sm:$0xff]  ;;  %v15618_v59 = vld [vmem:[#allocation8_spill] sm:$0xff]  ;;  %v15620_v34 = vld [vmem:[#allocation91_spill] sm:$0xff] }
 0x2f6   : > { %v4148_v35 = vpop.f32.mrf.mxu1  ;;  %v4878_v54 = vpop.f32.mrf.mxu0 }
 0x2f7   : > { %15611 = vst [vmem:[#allocation6_spill] sm:$0xff] %v13477_v28  ;;  %v13481_v16 = vadd.f32 %v4878_v54, %v4148_v35  ;;  %v15621_v54 = vld [vmem:[#allocation9_spill] sm:$0xff] }
 0x2f8   : > { %v4150_v56 = vpop.f32.mrf.mxu1  ;;  %v4880_v9 = vpop.f32.mrf.mxu0 }
 0x2f9   : > { %15614 = vst [vmem:[#allocation7_spill] sm:$0xff] %v13481_v16  ;;  %v13483_v36 = vadd.f32 %v4880_v9, %v4150_v56 }
 0x2fa   : > { %v4152_v29 = vpop.f32.mrf.mxu1  ;;  %v4882_v32 = vpop.f32.mrf.mxu0 }
 0x2fb   : > { %15615 = vst [vmem:[#allocation238_spill] sm:$0xff] %v13483_v36  ;;  %v13485_v1 = vadd.f32 %v4882_v32, %v4152_v29 }
 0x2fc   : > { %v4156_v4 = vpop.f32.mrf.mxu1  ;;  %v4886_v47 = vpop.f32.mrf.mxu0  ;;  %5687 = vmatmul.mubr.bf16.gmra.mxu1 %v15617_v3  ;;  %7062 = vmatmul.mubr.bf16.gmra.mxu0 %v15618_v59 }
 0x2fd   : > { %15616 = vst [vmem:[#allocation239_spill] sm:$0xff] %v13485_v1  ;;  %v13489_v0 = vadd.f32 %v4886_v47, %v4156_v4  ;;  %5696 = vmatprep.mubr.bf16.mxu1 %v15620_v34  ;;  %7071 = vmatprep.mubr.bf16.mxu0 %v15621_v54  ;;  %v15625_v4 = vld [vmem:[#allocation98_spill] sm:$0xff]  ;;  %v15626_v47 = vld [vmem:[#allocation11_spill] sm:$0xff] }
 0x2fe   : > { %v4158_v35 = vpop.f32.mrf.mxu1  ;;  %v4888_v16 = vpop.f32.mrf.mxu0  ;;  %v15628_v54 = vld [vmem:[#allocation99_spill] sm:$0xff] }
 0x2ff   : > { %15619 = vst [vmem:[#allocation8_spill] sm:$0xff] %v13489_v0  ;;  %v13493_v9 = vadd.f32 %v4888_v16, %v4158_v35  ;;  %v15629_v16 = vld [vmem:[#allocation12_spill] sm:$0xff] }
 0x300   : > { %v4160_v56 = vpop.f32.mrf.mxu1  ;;  %v4890_v36 = vpop.f32.mrf.mxu0 }
 0x301   : > { %15622 = vst [vmem:[#allocation9_spill] sm:$0xff] %v13493_v9  ;;  %v13495_v32 = vadd.f32 %v4890_v36, %v4160_v56 }
 0x302   : > { %v4162_v29 = vpop.f32.mrf.mxu1  ;;  %v4892_v1 = vpop.f32.mrf.mxu0 }
 0x303   : > { %15623 = vst [vmem:[#allocation240_spill] sm:$0xff] %v13495_v32  ;;  %v13497_v28 = vadd.f32 %v4892_v1, %v4162_v29 }
 0x304   : > { %v4166_v3 = vpop.f32.mrf.mxu1  ;;  %v4896_v59 = vpop.f32.mrf.mxu0  ;;  %5697 = vmatmul.mubr.bf16.gmra.mxu1 %v15625_v4  ;;  %7072 = vmatmul.mubr.bf16.gmra.mxu0 %v15626_v47 }
 0x305   : > { %15624 = vst [vmem:[#allocation241_spill] sm:$0xff] %v13497_v28  ;;  %v13501_v34 = vadd.f32 %v4896_v59, %v4166_v3  ;;  %5706 = vmatprep.mubr.bf16.mxu1 %v15628_v54  ;;  %7081 = vmatprep.mubr.bf16.mxu0 %v15629_v16  ;;  %v15633_v3 = vld [vmem:[#allocation108_spill] sm:$0xff]  ;;  %v15634_v59 = vld [vmem:[#allocation13_spill] sm:$0xff] }
 0x306   : > { %v4168_v35 = vpop.f32.mrf.mxu1  ;;  %v4898_v9 = vpop.f32.mrf.mxu0  ;;  %v15636_v16 = vld [vmem:[#allocation109_spill] sm:$0xff] }
 0x307   : > { %15627 = vst [vmem:[#allocation11_spill] sm:$0xff] %v13501_v34  ;;  %v13505_v36 = vadd.f32 %v4898_v9, %v4168_v35  ;;  %v15637_v9 = vld [vmem:[#allocation14_spill] sm:$0xff] }
 0x308   : > { %v4170_v56 = vpop.f32.mrf.mxu1  ;;  %v4900_v32 = vpop.f32.mrf.mxu0 }
 0x309   : > { %15630 = vst [vmem:[#allocation12_spill] sm:$0xff] %v13505_v36  ;;  %v13507_v1 = vadd.f32 %v4900_v32, %v4170_v56 }
 0x30a   : > { %v4172_v29 = vpop.f32.mrf.mxu1  ;;  %v4902_v28 = vpop.f32.mrf.mxu0 }
 0x30b   : > { %15631 = vst [vmem:[#allocation242_spill] sm:$0xff] %v13507_v1  ;;  %v13509_v0 = vadd.f32 %v4902_v28, %v4172_v29 }
 0x30c   : > { %v4176_v4 = vpop.f32.mrf.mxu1  ;;  %v4906_v47 = vpop.f32.mrf.mxu0  ;;  %5707 = vmatmul.mubr.bf16.gmra.mxu1 %v15633_v3  ;;  %7082 = vmatmul.mubr.bf16.gmra.mxu0 %v15634_v59 }
 0x30d   : > { %15632 = vst [vmem:[#allocation243_spill] sm:$0xff] %v13509_v0  ;;  %v13513_v54 = vadd.f32 %v4906_v47, %v4176_v4  ;;  %5716 = vmatprep.mubr.bf16.mxu1 %v15636_v16  ;;  %7091 = vmatprep.mubr.bf16.mxu0 %v15637_v9  ;;  %v15641_v4 = vld [vmem:[#allocation118_spill] sm:$0xff]  ;;  %v15642_v47 = vld [vmem:[#allocation15_spill] sm:$0xff] }
 0x30e   : > { %v4178_v35 = vpop.f32.mrf.mxu1  ;;  %v4908_v36 = vpop.f32.mrf.mxu0  ;;  %v15643_v9 = vld [vmem:[#allocation119_spill] sm:$0xff] }
 0x30f   : > { %15635 = vst [vmem:[#allocation13_spill] sm:$0xff] %v13513_v54  ;;  %v13517_v32 = vadd.f32 %v4908_v36, %v4178_v35  ;;  %v15644_v36 = vld [vmem:[#allocation16_spill] sm:$0xff] }
 0x310   : > { %v4180_v56 = vpop.f32.mrf.mxu1  ;;  %v4910_v1 = vpop.f32.mrf.mxu0 }
 0x311   : > { %15638 = vst [vmem:[#allocation14_spill] sm:$0xff] %v13517_v32  ;;  %v13519_v28 = vadd.f32 %v4910_v1, %v4180_v56 }
 0x312   : > { %v4182_v29 = vpop.f32.mrf.mxu1  ;;  %v4912_v0 = vpop.f32.mrf.mxu0 }
 0x313   : > { %15639 = vst [vmem:[#allocation244_spill] sm:$0xff] %v13519_v28  ;;  %v13521_v34 = vadd.f32 %v4912_v0, %v4182_v29 }
 0x314   : > { %v4186_v3 = vpop.f32.mrf.mxu1  ;;  %v4916_v59 = vpop.f32.mrf.mxu0  ;;  %5717 = vmatmul.mubr.bf16.gmra.mxu1 %v15641_v4  ;;  %7092 = vmatmul.mubr.bf16.gmra.mxu0 %v15642_v47 }
 0x315   : > { %15640 = vst [vmem:[#allocation245_spill] sm:$0xff] %v13521_v34  ;;  %v13525_v16 = vadd.f32 %v4916_v59, %v4186_v3  ;;  %5726 = vmatprep.mubr.bf16.mxu1 %v15643_v9  ;;  %7101 = vmatprep.mubr.bf16.mxu0 %v15644_v36  ;;  %v15648_v3 = vld [vmem:[#allocation17_spill] sm:$0xff] }
 0x316   : > { %v4188_v35 = vpop.f32.mrf.mxu1  ;;  %v4918_v32 = vpop.f32.mrf.mxu0 }
 0x317   : > { %v13529_v1 = vadd.f32 %v4918_v32, %v4188_v35  ;;  %v15649_v32 = vld [vmem:[#allocation19_spill] sm:$0xff] }
 0x318   : > { %v4190_v56 = vpop.f32.mrf.mxu1  ;;  %v4920_v28 = vpop.f32.mrf.mxu0 }
 0x319   : > { %15645 = vst [vmem:[#allocation15_spill] sm:$0xff] %v13529_v1  ;;  %v13531_v0 = vadd.f32 %v4920_v28, %v4190_v56 }
 0x31a   : > { %v4192_v29 = vpop.f32.mrf.mxu1  ;;  %v4922_v34 = vpop.f32.mrf.mxu0 }
 0x31b   : > { %15646 = vst [vmem:[#allocation119_spill] sm:$0xff] %v13531_v0  ;;  %v13533_v54 = vadd.f32 %v4922_v34, %v4192_v29 }
 0x31c   : > { %v4196_v4 = vpop.f32.mrf.mxu1  ;;  %v4926_v47 = vpop.f32.mrf.mxu0  ;;  %5727 = vmatmul.mubr.bf16.gmra.mxu1 %v15529_v57  ;;  %7102 = vmatmul.mubr.bf16.gmra.mxu0 %v15648_v3 }
 0x31d   : > { %15647 = vst [vmem:[#allocation16_spill] sm:$0xff] %v13533_v54  ;;  %v13537_v59 = vadd.f32 %v4926_v47, %v4196_v4  ;;  %5736 = vmatprep.mubr.bf16.mxu1 %v15532_v53  ;;  %7111 = vmatprep.mubr.bf16.mxu0 %v15649_v32  ;;  %v15653_v4 = vld [vmem:[#allocation21_spill] sm:$0xff]  ;;  %v15654_v32 = vld [vmem:[#allocation23_spill] sm:$0xff] }
 0x31e   : > { %v4198_v36 = vpop.f32.mrf.mxu1  ;;  %v4928_v35 = vpop.f32.mrf.mxu0 }
 0x31f   : > { %v13541_v28 = vadd.f32 %v4928_v35, %v4198_v36 }
 0x320   : > { %v4200_v56 = vpop.f32.mrf.mxu1  ;;  %v4930_v0 = vpop.f32.mrf.mxu0 }
 0x321   : > { %15650 = vst [vmem:[#allocation17_spill] sm:$0xff] %v13541_v28  ;;  %v13543_v34 = vadd.f32 %v4930_v0, %v4200_v56 }
 0x322   : > { %v4202_v29 = vpop.f32.mrf.mxu1  ;;  %v4932_v54 = vpop.f32.mrf.mxu0 }
 0x323   : > { %15651 = vst [vmem:[#allocation19_spill] sm:$0xff] %v13543_v34  ;;  %v13545_v1 = vadd.f32 %v4932_v54, %v4202_v29 }
 0x324   : > { %v4206_v57 = vpop.f32.mrf.mxu1  ;;  %v4936_v3 = vpop.f32.mrf.mxu0  ;;  %5737 = vmatmul.mubr.bf16.gmra.mxu1 %v12311_v2  ;;  %7112 = vmatmul.mubr.bf16.gmra.mxu0 %v15653_v4 }
 0x325   : > { %15652 = vst [vmem:[#allocation246_spill] sm:$0xff] %v13545_v1  ;;  %v13549_v47 = vadd.f32 %v4936_v3, %v4206_v57  ;;  %5746 = vmatprep.mubr.bf16.mxu1 %v12313_v6  ;;  %7121 = vmatprep.mubr.bf16.mxu0 %v15654_v32  ;;  %v15658_v57 = vld [vmem:[#allocation25_spill] sm:$0xff]  ;;  %v15660_v32 = vld [vmem:[#allocation27_spill] sm:$0xff] }
 0x326   : > { %v4208_v36 = vpop.f32.mrf.mxu1  ;;  %v4938_v35 = vpop.f32.mrf.mxu0 }
 0x327   : > { %v13553_v0 = vadd.f32 %v4938_v35, %v4208_v36 }
 0x328   : > { %v4210_v56 = vpop.f32.mrf.mxu1  ;;  %v4940_v34 = vpop.f32.mrf.mxu0 }
 0x329   : > { %15655 = vst [vmem:[#allocation21_spill] sm:$0xff] %v13553_v0  ;;  %v13555_v54 = vadd.f32 %v4940_v34, %v4210_v56 }
 0x32a   : > { %v4212_v29 = vpop.f32.mrf.mxu1  ;;  %v4942_v1 = vpop.f32.mrf.mxu0 }
 0x32b   : > { %15656 = vst [vmem:[#allocation23_spill] sm:$0xff] %v13555_v54  ;;  %v13557_v28 = vadd.f32 %v4942_v1, %v4212_v29 }
 0x32c   : > { %v4216_v2 = vpop.f32.mrf.mxu1  ;;  %v4946_v4 = vpop.f32.mrf.mxu0  ;;  %5747 = vmatmul.mubr.bf16.gmra.mxu1 %v12339_v40  ;;  %7122 = vmatmul.mubr.bf16.gmra.mxu0 %v15658_v57 }
 0x32d   : > { %15657 = vst [vmem:[#allocation247_spill] sm:$0xff] %v13557_v28  ;;  %v13561_v3 = vadd.f32 %v4946_v4, %v4216_v2  ;;  %5756 = vmatprep.mubr.bf16.mxu1 %v12341_v20  ;;  %7131 = vmatprep.mubr.bf16.mxu0 %v15660_v32  ;;  %v15664_v2 = vld [vmem:[#allocation29_spill] sm:$0xff]  ;;  %v15666_v32 = vld [vmem:[#allocation159_spill] sm:$0xff] }
 0x32e   : > { %v4218_v36 = vpop.f32.mrf.mxu1  ;;  %v4948_v35 = vpop.f32.mrf.mxu0 }
 0x32f   : > { %15659 = vst [vmem:[#allocation25_spill] sm:$0xff] %v13561_v3  ;;  %v13565_v34 = vadd.f32 %v4948_v35, %v4218_v36  ;;  %v15667_v36 = vld [vmem:[#allocation31_spill] sm:$0xff]  ;;  %v15690_v3 = vld [vmem:[#allocation174_spill] sm:$0xff] }
 0x330   : > { %v4220_v56 = vpop.f32.mrf.mxu1  ;;  %v4950_v54 = vpop.f32.mrf.mxu0 }
 0x331   : > { %15661 = vst [vmem:[#allocation27_spill] sm:$0xff] %v13565_v34  ;;  %v13567_v1 = vadd.f32 %v4950_v54, %v4220_v56 }
 0x332   : > { %v4222_v29 = vpop.f32.mrf.mxu1  ;;  %v4952_v28 = vpop.f32.mrf.mxu0 }
 0x333   : > { %15662 = vst [vmem:[#allocation248_spill] sm:$0xff] %v13567_v1  ;;  %v13569_v0 = vadd.f32 %v4952_v28, %v4222_v29 }
 0x334   : > { %v4226_v40 = vpop.f32.mrf.mxu1  ;;  %v4956_v57 = vpop.f32.mrf.mxu0  ;;  %5757 = vmatmul.mubr.bf16.gmra.mxu1 %v12367_v46  ;;  %7132 = vmatmul.mubr.bf16.gmra.mxu0 %v15664_v2  ;;  %v15671_v2 = vld [vmem:[#allocation168_spill] sm:$0xff] }
 0x335   : > { %15663 = vst [vmem:[#allocation249_spill] sm:$0xff] %v13569_v0  ;;  %v13573_v4 = vadd.f32 %v4956_v57, %v4226_v40  ;;  %5766 = vmatprep.mubr.bf16.mxu1 %v15666_v32  ;;  %7141 = vmatprep.mubr.bf16.mxu0 %v15667_v36  ;;  %v15673_v36 = vld [vmem:[#allocation169_spill] sm:$0xff] }
 0x336   : > { %v4228_v35 = vpop.f32.mrf.mxu1  ;;  %v4958_v34 = vpop.f32.mrf.mxu0 }
 0x337   : > { %15665 = vst [vmem:[#allocation29_spill] sm:$0xff] %v13573_v4  ;;  %v13577_v54 = vadd.f32 %v4958_v34, %v4228_v35  ;;  %v15675_v35 = vld [vmem:[#allocation133_spill] sm:$0xff]  ;;  %v15684_v4 = vld [vmem:[#allocation175_spill] sm:$0xff] }
 0x338   : > { %v4230_v56 = vpop.f32.mrf.mxu1  ;;  %v4960_v1 = vpop.f32.mrf.mxu0 }
 0x339   : > { %15668 = vst [vmem:[#allocation31_spill] sm:$0xff] %v13577_v54  ;;  %v13579_v28 = vadd.f32 %v4960_v1, %v4230_v56 }
 0x33a   : > { %v4232_v29 = vpop.f32.mrf.mxu1  ;;  %v4962_v0 = vpop.f32.mrf.mxu0 }
 0x33b   : > { %15669 = vst [vmem:[#allocation250_spill] sm:$0xff] %v13579_v28  ;;  %v13581_v20 = vadd.f32 %v4962_v0, %v4232_v29 }
 0x33c   : > { %v5528_v46 = vpop.f32.mrf.mxu1  ;;  %5767 = vmatmul.mubr.bf16.gmra.mxu1 %v15671_v2  ;;  %v13584_v40 = vpop.f32.mrf.mxu0  ;;  %7142 = vmatmul.mubr.bf16.gmra.mxu0 %v15528_v31 }
 0x33d   : > { %15670 = vst [vmem:[#allocation251_spill] sm:$0xff] %v13581_v20  ;;  %15672 = vst [vmem:[#allocation252_spill] sm:$0xff] %v13584_v40  ;;  %v5807_v57 = vadd.f32 %v5528_v46, %v13063_v39  ;;  %5776 = vmatprep.mubr.bf16.mxu1 %v15673_v36  ;;  %7151 = vmatprep.mubr.bf16.mxu0 %v15531_v5  ;;  %v15677_v20 = vld [vmem:[#allocation135_spill] sm:$0xff]  ;;  %v15679_v39 = vld [vmem:[#allocation137_spill] sm:$0xff] }
 0x33e   : > { %v5530_v34 = vpop.f32.mrf.mxu1  ;;  %v13590_v1 = vpop.f32.mrf.mxu0  ;;  %v15680_v5 = vld [vmem:[#allocation173_spill] sm:$0xff] }
 0x33f   : > { %15674 = vst [vmem:[#allocation253_spill] sm:$0xff] %v13590_v1  ;;  %v5808_v56 = vadd.f32 %v5530_v34, %v15675_v35  ;;  %v6256_v31 = vrot.slane %v5807_v57, 2  ;;  %v15682_v1 = vld [vmem:[#allocation37_spill] sm:$0xff] }
 0x340   : > { %v5532_v0 = vpop.f32.mrf.mxu1  ;;  %v13593_v29 = vpop.f32.mrf.mxu0 }
 0x341   : > { %15676 = vst [vmem:[#allocation133_spill] sm:$0xff] %v13593_v29  ;;  %v5809_v2 = vadd.f32 %v5532_v0, %v15677_v20  ;;  %v6259_v34 = vrot.slane %v5808_v56, 2  ;;  %v15683_v20 = vld [vmem:[#allocation141_spill] sm:$0xff] }
 0x342   : > { %v5534_v40 = vpop.f32.mrf.mxu1  ;;  %v13596_v28 = vpop.f32.mrf.mxu0 }
 0x343   : > { %15678 = vst [vmem:[#allocation135_spill] sm:$0xff] %v13596_v28  ;;  %v6257_v46 = vrot.slane %v5809_v2, 2  ;;  %v5810_v36 = vadd.f32 %v5534_v40, %v15679_v39  ;;  %v15685_v28 = vld [vmem:[#allocation39_spill] sm:$0xff]  ;;  %v15686_v2 = vld [vmem:[#allocation172_spill] sm:$0xff] }
 0x344   : > { %v5538_v54 = vpop.f32.mrf.mxu1  ;;  %5777 = vmatmul.mubr.bf16.gmra.mxu1 %v15680_v5  ;;  %v13600_v32 = vpop.f32.mrf.mxu0  ;;  %7152 = vmatmul.mubr.bf16.gmra.mxu0 %v15682_v1  ;;  %v15689_v1 = vld [vmem:[#allocation143_spill] sm:$0xff] }
 0x345   : > { %15681 = vst [vmem:[#allocation137_spill] sm:$0xff] %v13600_v32  ;;  %v6258_v35 = vsel %vm6255_vm0, %v6256_v31, %v6257_v46  ;;  %v6260_v29 = vrot.slane %v5810_v36, 2  ;;  %v5811_v0 = vadd.f32 %v5538_v54, %v15683_v20  ;;  %5786 = vmatprep.mubr.bf16.mxu1 %v15684_v4  ;;  %7161 = vmatprep.mubr.bf16.mxu0 %v15685_v28  ;;  %v15693_v4 = vld [vmem:[#allocation145_spill] sm:$0xff] }
 0x346   : > { %v13608_v57 = vadd.f32 %v6258_v35, %v15686_v2  ;;  %v5540_v40 = vpop.f32.mrf.mxu1  ;;  %v13610_v39 = vpop.f32.mrf.mxu0  ;;  %v15694_v2 = vld [vmem:[#allocation176_spill] sm:$0xff] }
 0x347   : > { %15688 = vst [vmem:[#allocation141_spill] sm:$0xff] %v13610_v39  ;;  %v6261_v32 = vsel %vm6255_vm0, %v6259_v34, %v6260_v29  ;;  %v6262_v5 = vrot.slane %v5811_v0, 2  ;;  %v5812_v56 = vadd.f32 %v5540_v40, %v15689_v1  ;;  %v15695_v40 = vld [vmem:[#allocation147_spill] sm:$0xff] }
 0x348   : > { %15687 = vst [vmem:[#allocation37_spill] sm:$0xff] %v13608_v57  ;;  %v13615_v31 = vadd.f32 %v6261_v32, %v15690_v3  ;;  %v5542_v36 = vpop.f32.mrf.mxu1  ;;  %v13617_v54 = vpop.f32.mrf.mxu0  ;;  %v15696_v32 = vld [vmem:[#allocation177_spill] sm:$0xff] }
 0x349   : > { %15692 = vst [vmem:[#allocation172_spill] sm:$0xff] %v13617_v54  ;;  %v6263_v20 = vsel %vm6255_vm0, %v6257_v46, %v6262_v5  ;;  %v6264_v28 = vrot.slane %v5812_v56, 2  ;;  %v5813_v35 = vadd.f32 %v5542_v36, %v15693_v4  ;;  %v15698_v54 = vld [vmem:[#allocation179_spill] sm:$0xff]  ;;  %v15700_v4 = vld [vmem:[#allocation41_spill] sm:$0xff]  ;;  %v15701_v36 = vld [vmem:[#allocation182_spill] sm:$0xff] }
 0x34a   : > { %15691 = vst [vmem:[#allocation39_spill] sm:$0xff] %v13615_v31  ;;  %v13622_v57 = vadd.f32 %v6263_v20, %v15694_v2  ;;  %v5544_v39 = vpop.f32.mrf.mxu1  ;;  %v13624_v6 = vpop.f32.mrf.mxu0 }
 0x34b   : > { %v6265_v34 = vsel %vm6255_vm0, %v6260_v29, %v6264_v28  ;;  %v6266_v0 = vrot.slane %v5813_v35, 2  ;;  %v5814_v3 = vadd.f32 %v5544_v39, %v15695_v40  ;;  %v15703_v35 = vld [vmem:[#allocation181_spill] sm:$0xff]  ;;  %v15704_v39 = vld [vmem:[#allocation178_spill] sm:$0xff] }
 0x34c   : > { %v13629_v1 = vadd.f32 %v6265_v34, %v15696_v32  ;;  %v5548_v31 = vpop.f32.mrf.mxu1  ;;  %5787 = vmatmul.mubr.bf16.gmra.mxu1 %v15698_v54  ;;  %v13632_v46 = vpop.f32.mrf.mxu0  ;;  %7162 = vmatmul.mubr.bf16.gmra.mxu0 %v15700_v4 }
 0x34d   : > { %15699 = vst [vmem:[#allocation174_spill] sm:$0xff] %v13632_v46  ;;  %v6267_v56 = vsel %vm6255_vm0, %v6262_v5, %v6266_v0  ;;  %v13637_v20 = vadd.f32 %v6266_v0, %v15701_v36  ;;  %v6268_v2 = vrot.slane %v5814_v3, 2  ;;  %v5815_v29 = vadd.f32 %v5548_v31, %v13087_v22  ;;  %5796 = vmatprep.mubr.bf16.mxu1 %v15703_v35  ;;  %v15708_v3 = vld [vmem:[#allocation180_spill] sm:$0xff]  ;;  %v15713_v35 = vld [vmem:[#allocation153_spill] sm:$0xff] }
 0x34e   : > { %15697 = vst [vmem:[#allocation143_spill] sm:$0xff] %v13629_v1  ;;  %7171 = vmatprep.mubr.bf16.mxu0 %v15543_v43  ;;  %v13643_v34 = vadd.f32 %v6267_v56, %v15704_v39  ;;  %v5550_v40 = vpop.f32.mrf.mxu1  ;;  %v13645_v32 = vpop.f32.mrf.mxu0  ;;  %v15707_v1 = vld [vmem:[#allocation183_spill] sm:$0xff] }
 0x34f   : > { %15702 = vst [vmem:[#allocation145_spill] sm:$0xff] %v13637_v20  ;;  %15706 = vst [vmem:[#allocation147_spill] sm:$0xff] %v13645_v32  ;;  %v6269_v4 = vsel %vm6255_vm0, %v6264_v28, %v6268_v2  ;;  %v13649_v5 = vadd.f32 %v6268_v2, %v15707_v1  ;;  %v5816_v0 = vadd.f32 %v5550_v40, %v13091_v26  ;;  %v15711_v43 = vld [vmem:[#allocation151_spill] sm:$0xff]  ;;  %v15714_v1 = vld [vmem:[#allocation185_spill] sm:$0xff] }
 0x350   : > { %15705 = vst [vmem:[#allocation176_spill] sm:$0xff] %v13643_v34  ;;  %v13653_v36 = vadd.f32 %v6269_v4, %v15708_v3  ;;  %v5552_v22 = vpop.f32.mrf.mxu1  ;;  %v13655_v31 = vpop.f32.mrf.mxu0  ;;  %v6270_v34 = vrot.slane %v5815_v29, 2  ;;  %v15716_v26 = vld [vmem:[#allocation45_spill] sm:$0xff] }
 0x351   : > { %15710 = vst [vmem:[#allocation179_spill] sm:$0xff] %v13655_v31  ;;  %v5817_v20 = vadd.f32 %v5552_v22, %v15711_v43  ;;  %v6273_v40 = vrot.slane %v5816_v0, 2 }
 0x352   : > { %15709 = vst [vmem:[#allocation177_spill] sm:$0xff] %v13653_v36  ;;  %v5554_v56 = vpop.f32.mrf.mxu1  ;;  %v13658_v39 = vpop.f32.mrf.mxu0  ;;  %v15717_v36 = vld [vmem:[#allocation155_spill] sm:$0xff] }
 0x353   : > { %15712 = vst [vmem:[#allocation41_spill] sm:$0xff] %v13658_v39  ;;  %v6271_v32 = vrot.slane %v5817_v20, 2  ;;  %v5818_v28 = vadd.f32 %v5554_v56, %v15713_v35  ;;  %v15718_v20 = vld [vmem:[#allocation184_spill] sm:$0xff]  ;;  %v15725_v39 = vld [vmem:[#allocation161_spill] sm:$0xff] }
 0x354   : > { %v5558_v46 = vpop.f32.mrf.mxu1  ;;  %5797 = vmatmul.mubr.bf16.gmra.mxu1 %v15714_v1  ;;  %v13662_v2 = vpop.f32.mrf.mxu0  ;;  %7172 = vmatmul.mubr.bf16.gmra.mxu0 %v15716_v26  ;;  %v15721_v26 = vld [vmem:[#allocation157_spill] sm:$0xff]  ;;  %v15722_v1 = vld [vmem:[#allocation186_spill] sm:$0xff] }
 0x355   : > { %15715 = vst [vmem:[#allocation182_spill] sm:$0xff] %v13662_v2  ;;  %v6272_v4 = vsel %vm6255_vm0, %v6270_v34, %v6271_v32  ;;  %v6274_v3 = vrot.slane %v5818_v28, 2  ;;  %v5819_v22 = vadd.f32 %v5558_v46, %v15717_v36  ;;  %7631 = vmatprep.mubr.bf16.mxu1 %v11421_v62  ;;  %8473 = vmatprep.mubr.bf16.mxu0 %v15300_v41 }
 0x356   : > { %v13670_v29 = vadd.f32 %v6272_v4, %v15718_v20  ;;  %v5560_v35 = vpop.f32.mrf.mxu1  ;;  %v13672_v43 = vpop.f32.mrf.mxu0  ;;  %v15726_v20 = vld [vmem:[#allocation187_spill] sm:$0xff] }
 0x357   : > { %15720 = vst [vmem:[#allocation183_spill] sm:$0xff] %v13672_v43  ;;  %v6275_v56 = vsel %vm6255_vm0, %v6273_v40, %v6274_v3  ;;  %v6276_v2 = vrot.slane %v5819_v22, 2  ;;  %v5820_v0 = vadd.f32 %v5560_v35, %v15721_v26  ;;  %v15727_v35 = vld [vmem:[#allocation163_spill] sm:$0xff] }
 0x358   : > { %15719 = vst [vmem:[#allocation178_spill] sm:$0xff] %v13670_v29  ;;  %v13677_v34 = vadd.f32 %v6275_v56, %v15722_v1  ;;  %v5562_v28 = vpop.f32.mrf.mxu1  ;;  %v13679_v46 = vpop.f32.mrf.mxu0  ;;  %v15728_v56 = vld [vmem:[#allocation188_spill] sm:$0xff] }
 0x359   : > { %15724 = vst [vmem:[#allocation151_spill] sm:$0xff] %v13679_v46  ;;  %v6277_v62 = vsel %vm6255_vm0, %v6271_v32, %v6276_v2  ;;  %v6278_v36 = vrot.slane %v5820_v0, 2  ;;  %v5821_v4 = vadd.f32 %v5562_v28, %v15725_v39  ;;  %v15729_v39 = vld [vmem:[#allocation191_spill] sm:$0xff] }
 0x35a   : > { %15723 = vst [vmem:[#allocation180_spill] sm:$0xff] %v13677_v34  ;;  %v13684_v29 = vadd.f32 %v6277_v62, %v15726_v20  ;;  %v5564_v43 = vpop.f32.mrf.mxu1  ;;  %v13686_v31 = vpop.f32.mrf.mxu0 }
 0x35b   : > { %v6279_v40 = vsel %vm6255_vm0, %v6274_v3, %v6278_v36  ;;  %v6280_v22 = vrot.slane %v5821_v4, 2  ;;  %v5822_v1 = vadd.f32 %v5564_v43, %v15727_v35  ;;  %v15730_v3 = vld [vmem:[#allocation165_spill] sm:$0xff]  ;;  %v15734_v35 = vld [vmem:[#allocation192_spill] sm:$0xff] }
 0x35c   : > { %v13691_v26 = vadd.f32 %v6279_v40, %v15728_v56  ;;  %v5568_v34 = vpop.f32.mrf.mxu1  ;;  %v13693_v46 = vpop.f32.mrf.mxu0  ;;  %7632 = vmatmul.mubr.bf16.vlgmr.msra.gmra.mxu1 %v11458_v18  ;;  %8474 = vmatmul.mubr.bf16.vlgmr.msra.gmra.mxu0 %v15307_v15  ;;  %v15731_v43 = vld [vmem:[#allocation189_spill] sm:$0xff] }
 0x35d   : > { %v6281_v32 = vsel %vm6255_vm0, %v6276_v2, %v6280_v22  ;;  %v13699_v0 = vadd.f32 %v6280_v22, %v15729_v39  ;;  %v6282_v28 = vrot.slane %v5822_v1, 2  ;;  %v5823_v62 = vadd.f32 %v5568_v34, %v15730_v3  ;;  %7641 = vmatprep.mubr.bf16.mxu1 %v11471_v27  ;;  %8483 = vmatprep.mubr.bf16.mxu0 %v15310_v45  ;;  %v15735_v1 = vld [vmem:[#allocation190_spill] sm:$0xff] }
 0x35e   : > { %v13705_v4 = vadd.f32 %v6281_v32, %v15731_v43  ;;  %v5570_v20 = vpop.f32.mrf.mxu1  ;;  %v13707_v40 = vpop.f32.mrf.mxu0 }
 0x35f   : > { %15733 = vst [vmem:[#allocation45_spill] sm:$0xff] %v13707_v40  ;;  %v6283_v18 = vsel %vm6255_vm0, %v6278_v36, %v6282_v28  ;;  %v13711_v2 = vadd.f32 %v6282_v28, %v15734_v35  ;;  %v5824_v22 = vadd.f32 %v5570_v20, %v13139_v19  ;;  %v6284_v43 = vrot.slane %v5823_v62, 2  ;;  %v15737_v35 = vld [vmem:[#allocation167_spill] sm:$0xff]  ;;  %v15738_v62 = vld [vmem:[#allocation193_spill] sm:$0xff] }
 0x360   : > { %15732 = vst [vmem:[#allocation153_spill] sm:$0xff] %v13705_v4  ;;  %v13715_v56 = vadd.f32 %v6283_v18, %v15735_v1  ;;  %v5572_v34 = vpop.f32.mrf.mxu1  ;;  %v13717_v27 = vpop.f32.mrf.mxu0 }
 0x361   : > { %v5825_v39 = vadd.f32 %v5572_v34, %v13141_v52  ;;  %v6287_v19 = vrot.slane %v5824_v22, 2 }
 0x362   : > { %v5574_v32 = vpop.f32.mrf.mxu1  ;;  %v13720_v3 = vpop.f32.mrf.mxu0 }
 0x363   : > { %v6285_v40 = vrot.slane %v5825_v39, 2  ;;  %v5826_v36 = vadd.f32 %v5574_v32, %v13149_v10  ;;  %v15741_v32 = vld [vmem:[#allocation194_spill] sm:$0xff] }
 0x364   : > { %v5578_v4 = vpop.f32.mrf.mxu1  ;;  %v13723_v28 = vpop.f32.mrf.mxu0  ;;  %7642 = vmatmul.mubr.bf16.gmra.mxu1 %v11502_v44  ;;  %8484 = vmatmul.mubr.bf16.gmra.mxu0 %v15317_v42 }
 0x365   : > { %15736 = vst [vmem:[#allocation155_spill] sm:$0xff] %v13723_v28  ;;  %v6286_v20 = vsel %vm6255_vm0, %v6284_v43, %v6285_v40  ;;  %v6288_v18 = vrot.slane %v5826_v36, 2  ;;  %v5827_v52 = vadd.f32 %v5578_v4, %v15737_v35  ;;  %7651 = vmatprep.mubr.bf16.mxu1 %v11515_v51  ;;  %8493 = vmatprep.mubr.bf16.mxu0 %v15320_v23 }
 0x366   : > { %v13732_v1 = vadd.f32 %v6286_v20, %v15738_v62  ;;  %v5580_v10 = vpop.f32.mrf.mxu1  ;;  %v13734_v34 = vpop.f32.mrf.mxu0  ;;  %v15744_v62 = vld [vmem:[#allocation195_spill] sm:$0xff] }
 0x367   : > { %15740 = vst [vmem:[#allocation157_spill] sm:$0xff] %v13734_v34  ;;  %v6289_v44 = vsel %vm6255_vm0, %v6287_v19, %v6288_v18  ;;  %v6290_v39 = vrot.slane %v5827_v52, 2  ;;  %v5828_v22 = vadd.f32 %v5580_v10, %v13169_v60  ;;  %v15745_v52 = vld [vmem:[#allocation171_spill] sm:$0xff] }
 0x368   : > { %15739 = vst [vmem:[#allocation184_spill] sm:$0xff] %v13732_v1  ;;  %v13739_v43 = vadd.f32 %v6289_v44, %v15741_v32  ;;  %v5582_v36 = vpop.f32.mrf.mxu1  ;;  %v13741_v4 = vpop.f32.mrf.mxu0  ;;  %v15746_v44 = vld [vmem:[#allocation196_spill] sm:$0xff] }
 0x369   : > { %15743 = vst [vmem:[#allocation161_spill] sm:$0xff] %v13741_v4  ;;  %v6291_v51 = vsel %vm6255_vm0, %v6285_v40, %v6290_v39  ;;  %v6292_v35 = vrot.slane %v5828_v22, 2  ;;  %v5829_v20 = vadd.f32 %v5582_v36, %v13177_v58  ;;  %v15748_v40 = vld [vmem:[#allocation199_spill] sm:$0xff] }
 0x36a   : > { %15742 = vst [vmem:[#allocation186_spill] sm:$0xff] %v13739_v43  ;;  %v13746_v1 = vadd.f32 %v6291_v51, %v15744_v62  ;;  %v5584_v34 = vpop.f32.mrf.mxu1  ;;  %v13748_v28 = vpop.f32.mrf.mxu0 }
 0x36b   : > { %v6293_v19 = vsel %vm6255_vm0, %v6288_v18, %v6292_v35  ;;  %v6294_v60 = vrot.slane %v5829_v20, 2  ;;  %v5830_v10 = vadd.f32 %v5584_v34, %v15745_v52  ;;  %v15750_v18 = vld [vmem:[#allocation33_spill] sm:$0xff]  ;;  %v15754_v52 = vld [vmem:[#allocation200_spill] sm:$0xff] }
 0x36c   : > { %v13753_v32 = vadd.f32 %v6293_v19, %v15746_v44  ;;  %v5588_v43 = vpop.f32.mrf.mxu1  ;;  %v13755_v4 = vpop.f32.mrf.mxu0  ;;  %7652 = vmatmul.mubr.bf16.gmra.mxu1 %v11546_v8  ;;  %8494 = vmatmul.mubr.bf16.gmra.mxu0 %v15327_v50  ;;  %v15751_v34 = vld [vmem:[#allocation197_spill] sm:$0xff] }
 0x36d   : > { %v6295_v58 = vsel %vm6255_vm0, %v6290_v39, %v6294_v60  ;;  %v13761_v22 = vadd.f32 %v6294_v60, %v15748_v40  ;;  %v6296_v36 = vrot.slane %v5830_v10, 2  ;;  %v5831_v51 = vadd.f32 %v5588_v43, %v15750_v18  ;;  %7661 = vmatprep.mubr.bf16.mxu1 %v15289_v17  ;;  %8503 = vmatprep.mubr.bf16.mxu0 %v15330_v14  ;;  %v15755_v10 = vld [vmem:[#allocation198_spill] sm:$0xff]  ;;  %v15757_v40 = vld [vmem:[#allocation35_spill] sm:$0xff] }
 0x36e   : > { %15747 = vst [vmem:[#allocation187_spill] sm:$0xff] %v13753_v32  ;;  %v13767_v20 = vadd.f32 %v6295_v58, %v15751_v34  ;;  %v5590_v62 = vpop.f32.mrf.mxu1  ;;  %v13769_v19 = vpop.f32.mrf.mxu0 }
 0x36f   : > { %15749 = vst [vmem:[#allocation163_spill] sm:$0xff] %v13761_v22  ;;  %15753 = vst [vmem:[#allocation191_spill] sm:$0xff] %v13769_v19  ;;  %v6297_v8 = vsel %vm6255_vm0, %v6292_v35, %v6296_v36  ;;  %v13773_v39 = vadd.f32 %v6296_v36, %v15754_v52  ;;  %v5832_v60 = vadd.f32 %v5590_v62, %v13205_v61  ;;  %v15759_v22 = vld [vmem:[#allocation129_spill] sm:$0xff]  ;;  %v15761_v52 = vld [vmem:[#allocation43_spill] sm:$0xff] }
 0x370   : > { %15752 = vst [vmem:[#allocation188_spill] sm:$0xff] %v13767_v20  ;;  %v13777_v44 = vadd.f32 %v6297_v8, %v15755_v10  ;;  %v5592_v43 = vpop.f32.mrf.mxu1  ;;  %v13779_v17 = vpop.f32.mrf.mxu0  ;;  %v6298_v20 = vrot.slane %v5831_v51, 2  ;;  %v15762_v51 = vld [vmem:[#allocation18_spill] sm:$0xff] }
 0x371   : > { %v5833_v18 = vadd.f32 %v5592_v43, %v15757_v40  ;;  %v6301_v61 = vrot.slane %v5832_v60, 2 }
 0x372   : > { %15756 = vst [vmem:[#allocation165_spill] sm:$0xff] %v13777_v44  ;;  %v5594_v58 = vpop.f32.mrf.mxu1  ;;  %v13782_v34 = vpop.f32.mrf.mxu0 }
 0x373   : > { %15758 = vst [vmem:[#allocation189_spill] sm:$0xff] %v13782_v34  ;;  %v6299_v19 = vrot.slane %v5833_v18, 2  ;;  %v5834_v35 = vadd.f32 %v5594_v58, %v15759_v22  ;;  %v15765_v58 = vld [vmem:[#allocation201_spill] sm:$0xff]  ;;  %v15769_v34 = vld [vmem:[#allocation202_spill] sm:$0xff] }
 0x374   : > { %v5598_v32 = vpop.f32.mrf.mxu1  ;;  %v13785_v36 = vpop.f32.mrf.mxu0  ;;  %7662 = vmatmul.mubr.bf16.gmra.mxu1 %v15297_v30  ;;  %8504 = vmatmul.mubr.bf16.gmra.mxu0 %v15337_v55 }
 0x375   : > { %15760 = vst [vmem:[#allocation192_spill] sm:$0xff] %v13785_v36  ;;  %v6300_v62 = vsel %vm6255_vm0, %v6298_v20, %v6299_v19  ;;  %v6302_v8 = vrot.slane %v5834_v35, 2  ;;  %v5835_v10 = vadd.f32 %v5598_v32, %v15761_v52  ;;  %7671 = vmatprep.mubr.bf16.mxu1 %v15300_v41  ;;  %8513 = vmatprep.mubr.bf16.mxu0 %v15340_v7  ;;  %v15766_v36 = vld [vmem:[#allocation94_spill] sm:$0xff] }
 0x376   : > { %v13794_v43 = vadd.f32 %v6300_v62, %v15762_v51  ;;  %v5600_v22 = vpop.f32.mrf.mxu1  ;;  %v13796_v40 = vpop.f32.mrf.mxu0  ;;  %v15770_v51 = vld [vmem:[#allocation96_spill] sm:$0xff] }
 0x377   : > { %15764 = vst [vmem:[#allocation167_spill] sm:$0xff] %v13796_v40  ;;  %v6303_v30 = vsel %vm6255_vm0, %v6301_v61, %v6302_v8  ;;  %v6304_v18 = vrot.slane %v5835_v10, 2  ;;  %v5836_v60 = vadd.f32 %v5600_v22, %v15765_v58  ;;  %v15771_v22 = vld [vmem:[#allocation203_spill] sm:$0xff] }
 0x378   : > { %15763 = vst [vmem:[#allocation190_spill] sm:$0xff] %v13794_v43  ;;  %v13801_v20 = vadd.f32 %v6303_v30, %v15766_v36  ;;  %v5602_v35 = vpop.f32.mrf.mxu1  ;;  %v13803_v32 = vpop.f32.mrf.mxu0  ;;  %v15772_v30 = vld [vmem:[#allocation100_spill] sm:$0xff] }
 0x379   : > { %15768 = vst [vmem:[#allocation194_spill] sm:$0xff] %v13803_v32  ;;  %v6305_v41 = vsel %vm6255_vm0, %v6299_v19, %v6304_v18  ;;  %v6306_v52 = vrot.slane %v5836_v60, 2  ;;  %v5837_v62 = vadd.f32 %v5602_v35, %v15769_v34  ;;  %v15774_v34 = vld [vmem:[#allocation102_spill] sm:$0xff] }
 0x37a   : > { %15767 = vst [vmem:[#allocation193_spill] sm:$0xff] %v13801_v20  ;;  %v13808_v43 = vadd.f32 %v6305_v41, %v15770_v51  ;;  %v5604_v40 = vpop.f32.mrf.mxu1  ;;  %v13810_v44 = vpop.f32.mrf.mxu0 }
 0x37b   : > { %v6307_v61 = vsel %vm6255_vm0, %v6302_v8, %v6306_v52  ;;  %v6308_v10 = vrot.slane %v5837_v62, 2  ;;  %v5838_v36 = vadd.f32 %v5604_v40, %v15771_v22  ;;  %v15776_v8 = vld [vmem:[#allocation204_spill] sm:$0xff]  ;;  %v15777_v40 = vld [vmem:[#allocation10_spill] sm:$0xff] }
 0x37c   : > { %v13815_v58 = vadd.f32 %v6307_v61, %v15772_v30  ;;  %v5608_v20 = vpop.f32.mrf.mxu1  ;;  %v13817_v32 = vpop.f32.mrf.mxu0  ;;  %7672 = vmatmul.mubr.bf16.gmra.mxu1 %v15307_v15  ;;  %8514 = vmatmul.mubr.bf16.gmra.mxu0 %v15347_v25  ;;  %v15780_v22 = vld [vmem:[#allocation22_spill] sm:$0xff] }
 0x37d   : > { %v6309_v19 = vsel %vm6255_vm0, %v6304_v18, %v6308_v10  ;;  %v13823_v60 = vadd.f32 %v6308_v10, %v15774_v34  ;;  %v6310_v35 = vrot.slane %v5838_v36, 2  ;;  %v5839_v41 = vadd.f32 %v5608_v20, %v15776_v8  ;;  %7681 = vmatprep.mubr.bf16.mxu1 %v15310_v45  ;;  %8523 = vmatprep.mubr.bf16.mxu0 %v15350_v49  ;;  %v15781_v36 = vld [vmem:[#allocation20_spill] sm:$0xff]  ;;  %v15783_v34 = vld [vmem:[#allocation205_spill] sm:$0xff] }
 0x37e   : > { %15773 = vst [vmem:[#allocation195_spill] sm:$0xff] %v13815_v58  ;;  %v13829_v62 = vadd.f32 %v6309_v19, %v15777_v40  ;;  %v5610_v51 = vpop.f32.mrf.mxu1  ;;  %v13831_v61 = vpop.f32.mrf.mxu0 }
 0x37f   : > { %15775 = vst [vmem:[#allocation171_spill] sm:$0xff] %v13823_v60  ;;  %15779 = vst [vmem:[#allocation199_spill] sm:$0xff] %v13831_v61  ;;  %v6311_v15 = vsel %vm6255_vm0, %v6306_v52, %v6310_v35  ;;  %v13835_v18 = vadd.f32 %v6310_v35, %v15780_v22  ;;  %v5840_v10 = vadd.f32 %v5610_v51, %v13277_v48  ;;  %v15785_v60 = vld [vmem:[#allocation206_spill] sm:$0xff]  ;;  %v15787_v22 = vld [vmem:[#allocation207_spill] sm:$0xff] }
 0x380   : > { %15778 = vst [vmem:[#allocation196_spill] sm:$0xff] %v13829_v62  ;;  %v13839_v30 = vadd.f32 %v6311_v15, %v15781_v36  ;;  %v5612_v20 = vpop.f32.mrf.mxu1  ;;  %v13841_v45 = vpop.f32.mrf.mxu0  ;;  %v6312_v62 = vrot.slane %v5839_v41, 2  ;;  %v15789_v41 = vld [vmem:[#allocation104_spill] sm:$0xff] }
 0x381   : > { %v5841_v8 = vadd.f32 %v5612_v20, %v15783_v34  ;;  %v6315_v48 = vrot.slane %v5840_v10, 2  ;;  %v15788_v20 = vld [vmem:[#allocation46_spill] sm:$0xff] }
 0x382   : > { %15782 = vst [vmem:[#allocation33_spill] sm:$0xff] %v13839_v30  ;;  %v5614_v19 = vpop.f32.mrf.mxu1  ;;  %v13844_v40 = vpop.f32.mrf.mxu0 }
 0x383   : > { %15784 = vst [vmem:[#allocation197_spill] sm:$0xff] %v13844_v40  ;;  %v6313_v61 = vrot.slane %v5841_v8, 2  ;;  %v5842_v52 = vadd.f32 %v5614_v19, %v15785_v60  ;;  %v15793_v40 = vld [vmem:[#allocation106_spill] sm:$0xff] }
 0x384   : > { %v5618_v58 = vpop.f32.mrf.mxu1  ;;  %v13847_v35 = vpop.f32.mrf.mxu0  ;;  %7682 = vmatmul.mubr.bf16.gmra.mxu1 %v15317_v42  ;;  %8524 = vmatmul.mubr.bf16.gmra.mxu0 %v15357_v21 }
 0x385   : > { %15786 = vst [vmem:[#allocation200_spill] sm:$0xff] %v13847_v35  ;;  %v6314_v51 = vsel %vm6255_vm0, %v6312_v62, %v6313_v61  ;;  %v6316_v15 = vrot.slane %v5842_v52, 2  ;;  %v5843_v36 = vadd.f32 %v5618_v58, %v15787_v22  ;;  %7691 = vmatprep.mubr.bf16.mxu1 %v15320_v23  ;;  %8533 = vmatprep.mubr.bf16.mxu0 %v15788_v20  ;;  %v15792_v35 = vld [vmem:[#allocation208_spill] sm:$0xff] }
 0x386   : > { %v13856_v34 = vadd.f32 %v6314_v51, %v15789_v41  ;;  %v5620_v60 = vpop.f32.mrf.mxu1  ;;  %v13858_v8 = vpop.f32.mrf.mxu0  ;;  %v15796_v41 = vld [vmem:[#allocation110_spill] sm:$0xff] }
 0x387   : > { %15791 = vst [vmem:[#allocation35_spill] sm:$0xff] %v13858_v8  ;;  %v6317_v42 = vsel %vm6255_vm0, %v6315_v48, %v6316_v15  ;;  %v6318_v19 = vrot.slane %v5843_v36, 2  ;;  %v5844_v10 = vadd.f32 %v5620_v60, %v15792_v35  ;;  %v15797_v36 = vld [vmem:[#allocation209_spill] sm:$0xff]  ;;  %v15798_v60 = vld [vmem:[#allocation24_spill] sm:$0xff] }
 0x388   : > { %15790 = vst [vmem:[#allocation198_spill] sm:$0xff] %v13856_v34  ;;  %v13863_v62 = vadd.f32 %v6317_v42, %v15793_v40  ;;  %v5622_v52 = vpop.f32.mrf.mxu1  ;;  %v13865_v58 = vpop.f32.mrf.mxu0 }
 0x389   : > { %15795 = vst [vmem:[#allocation43_spill] sm:$0xff] %v13865_v58  ;;  %v6319_v23 = vsel %vm6255_vm0, %v6313_v61, %v6318_v19  ;;  %v6320_v22 = vrot.slane %v5844_v10, 2  ;;  %v5845_v51 = vadd.f32 %v5622_v52, %v13321_v63  ;;  %v15801_v63 = vld [vmem:[#allocation47_spill] sm:$0xff]  ;;  %v15802_v10 = vld [vmem:[#allocation114_spill] sm:$0xff] }
 0x38a   : > { %15794 = vst [vmem:[#allocation129_spill] sm:$0xff] %v13863_v62  ;;  %v13870_v34 = vadd.f32 %v6319_v23, %v15796_v41  ;;  %v5624_v8 = vpop.f32.mrf.mxu1  ;;  %v13872_v30 = vpop.f32.mrf.mxu0 }
 0x38b   : > { %v6321_v48 = vsel %vm6255_vm0, %v6316_v15, %v6320_v22  ;;  %v6322_v35 = vrot.slane %v5845_v51, 2  ;;  %v5846_v40 = vadd.f32 %v5624_v8, %v15797_v36  ;;  %v15804_v8 = vld [vmem:[#allocation112_spill] sm:$0xff] }
 0x38c   : > { %v13877_v42 = vadd.f32 %v6321_v48, %v15798_v60  ;;  %v5628_v62 = vpop.f32.mrf.mxu1  ;;  %v13879_v58 = vpop.f32.mrf.mxu0  ;;  %7692 = vmatmul.mubr.bf16.gmra.mxu1 %v15327_v50  ;;  %8534 = vmatmul.mubr.bf16.gmra.mxu0 %v15801_v63  ;;  %v15807_v36 = vld [vmem:[#allocation116_spill] sm:$0xff] }
 0x38d   : > { %15800 = vst [vmem:[#allocation201_spill] sm:$0xff] %v13879_v58  ;;  %v6323_v61 = vsel %vm6255_vm0, %v6318_v19, %v6322_v35  ;;  %v13885_v52 = vadd.f32 %v6322_v35, %v15802_v10  ;;  %v6324_v23 = vrot.slane %v5846_v40, 2  ;;  %v5847_v15 = vadd.f32 %v5628_v62, %v13333_v33  ;;  %7701 = vmatprep.mubr.bf16.mxu1 %v15330_v14  ;;  %v15808_v35 = vld [vmem:[#allocation210_spill] sm:$0xff]  ;;  %v15811_v62 = vld [vmem:[#allocation211_spill] sm:$0xff] }
 0x38e   : > { %15799 = vst [vmem:[#allocation18_spill] sm:$0xff] %v13877_v42  ;;  %8543 = vmatprep.mubr.bf16.mxu0 %v15370_v11  ;;  %v13891_v51 = vadd.f32 %v6323_v61, %v15804_v8  ;;  %v5630_v41 = vpop.f32.mrf.mxu1  ;;  %v13893_v48 = vpop.f32.mrf.mxu0  ;;  %v15809_v40 = vld [vmem:[#allocation26_spill] sm:$0xff]  ;;  %v15813_v42 = vld [vmem:[#allocation212_spill] sm:$0xff] }
 0x38f   : > { %15803 = vst [vmem:[#allocation94_spill] sm:$0xff] %v13885_v52  ;;  %15806 = vst [vmem:[#allocation96_spill] sm:$0xff] %v13893_v48  ;;  %v6325_v50 = vsel %vm6255_vm0, %v6320_v22, %v6324_v23  ;;  %v13897_v19 = vadd.f32 %v6324_v23, %v15807_v36  ;;  %v5848_v60 = vadd.f32 %v5630_v41, %v15808_v35  ;;  %v15815_v41 = vld [vmem:[#allocation49_spill] sm:$0xff] }
 0x390   : > { %15805 = vst [vmem:[#allocation202_spill] sm:$0xff] %v13891_v51  ;;  %v13901_v10 = vadd.f32 %v6325_v50, %v15809_v40  ;;  %v5632_v33 = vpop.f32.mrf.mxu1  ;;  %v13903_v14 = vpop.f32.mrf.mxu0  ;;  %v6326_v51 = vrot.slane %v5847_v15, 2  ;;  %v15816_v40 = vld [vmem:[#allocation213_spill] sm:$0xff] }
 0x391   : > { %v5849_v52 = vadd.f32 %v5632_v33, %v15811_v62  ;;  %v6329_v50 = vrot.slane %v5848_v60, 2  ;;  %v15817_v62 = vld [vmem:[#allocation50_spill] sm:$0xff] }
 0x392   : > { %15810 = vst [vmem:[#allocation203_spill] sm:$0xff] %v13901_v10  ;;  %v5634_v61 = vpop.f32.mrf.mxu1  ;;  %v13906_v8 = vpop.f32.mrf.mxu0 }
 0x393   : > { %15812 = vst [vmem:[#allocation100_spill] sm:$0xff] %v13906_v8  ;;  %v6327_v48 = vrot.slane %v5849_v52, 2  ;;  %v5850_v22 = vadd.f32 %v5634_v61, %v15813_v42  ;;  %v15818_v52 = vld [vmem:[#allocation120_spill] sm:$0xff] }
 0x394   : > { %v5638_v58 = vpop.f32.mrf.mxu1  ;;  %v13909_v23 = vpop.f32.mrf.mxu0  ;;  %7702 = vmatmul.mubr.bf16.gmra.mxu1 %v15337_v55  ;;  %8544 = vmatmul.mubr.bf16.gmra.mxu0 %v15815_v41  ;;  %v15821_v8 = vld [vmem:[#allocation28_spill] sm:$0xff] }
 0x395   : > { %15814 = vst [vmem:[#allocation102_spill] sm:$0xff] %v13909_v23  ;;  %v6328_v36 = vsel %vm6255_vm0, %v6326_v51, %v6327_v48  ;;  %v6330_v35 = vrot.slane %v5850_v22, 2  ;;  %v5851_v33 = vadd.f32 %v5638_v58, %v15816_v40  ;;  %7711 = vmatprep.mubr.bf16.mxu1 %v15340_v7  ;;  %8553 = vmatprep.mubr.bf16.mxu0 %v15817_v62 }
 0x396   : > { %v13918_v15 = vadd.f32 %v6328_v36, %v15818_v52  ;;  %v5640_v42 = vpop.f32.mrf.mxu1  ;;  %v13920_v61 = vpop.f32.mrf.mxu0  ;;  %v15824_v52 = vld [vmem:[#allocation122_spill] sm:$0xff] }
 0x397   : > { %15820 = vst [vmem:[#allocation10_spill] sm:$0xff] %v13920_v61  ;;  %v6331_v55 = vsel %vm6255_vm0, %v6329_v50, %v6330_v35  ;;  %v6332_v23 = vrot.slane %v5851_v33, 2  ;;  %v5852_v60 = vadd.f32 %v5640_v42, %v13361_v13  ;;  %v15825_v33 = vld [vmem:[#allocation214_spill] sm:$0xff] }
 0x398   : > { %15819 = vst [vmem:[#allocation204_spill] sm:$0xff] %v13918_v15  ;;  %v13925_v51 = vadd.f32 %v6331_v55, %v15821_v8  ;;  %v5642_v22 = vpop.f32.mrf.mxu1  ;;  %v13927_v58 = vpop.f32.mrf.mxu0  ;;  %v15826_v42 = vld [vmem:[#allocation30_spill] sm:$0xff] }
 0x399   : > { %15823 = vst [vmem:[#allocation20_spill] sm:$0xff] %v13927_v58  ;;  %v6333_v7 = vsel %vm6255_vm0, %v6327_v48, %v6332_v23  ;;  %v6334_v40 = vrot.slane %v5852_v60, 2  ;;  %v5853_v36 = vadd.f32 %v5642_v22, %v13363_v12  ;;  %v15828_v12 = vld [vmem:[#allocation51_spill] sm:$0xff]  ;;  %v15829_v60 = vld [vmem:[#allocation130_spill] sm:$0xff] }
 0x39a   : > { %15822 = vst [vmem:[#allocation22_spill] sm:$0xff] %v13925_v51  ;;  %v13932_v15 = vadd.f32 %v6333_v7, %v15824_v52  ;;  %v5644_v61 = vpop.f32.mrf.mxu1  ;;  %v13934_v10 = vpop.f32.mrf.mxu0 }
 0x39b   : > { %v6335_v50 = vsel %vm6255_vm0, %v6330_v35, %v6334_v40  ;;  %v6336_v13 = vrot.slane %v5853_v36, 2  ;;  %v5854_v8 = vadd.f32 %v5644_v61, %v15825_v33  ;;  %v15831_v61 = vld [vmem:[#allocation124_spill] sm:$0xff] }
 0x39c   : > { %v13939_v55 = vadd.f32 %v6335_v50, %v15826_v42  ;;  %v5648_v51 = vpop.f32.mrf.mxu1  ;;  %v13941_v58 = vpop.f32.mrf.mxu0  ;;  %7712 = vmatmul.mubr.bf16.gmra.mxu1 %v15347_v25  ;;  %8554 = vmatmul.mubr.bf16.gmra.mxu0 %v15828_v12  ;;  %v15834_v33 = vld [vmem:[#allocation32_spill] sm:$0xff] }
 0x39d   : > { %v6337_v48 = vsel %vm6255_vm0, %v6332_v23, %v6336_v13  ;;  %v13947_v22 = vadd.f32 %v6336_v13, %v15829_v60  ;;  %v6338_v7 = vrot.slane %v5854_v8, 2  ;;  %v5855_v35 = vadd.f32 %v5648_v51, %v13369_v24  ;;  %7721 = vmatprep.mubr.bf16.mxu1 %v15350_v49  ;;  %8563 = vmatprep.mubr.bf16.mxu0 %v15390_v38  ;;  %v15836_v8 = vld [vmem:[#allocation126_spill] sm:$0xff]  ;;  %v15839_v51 = vld [vmem:[#allocation215_spill] sm:$0xff] }
 0x39e   : > { %15827 = vst [vmem:[#allocation205_spill] sm:$0xff] %v13939_v55  ;;  %v13953_v36 = vadd.f32 %v6337_v48, %v15831_v61  ;;  %v5650_v52 = vpop.f32.mrf.mxu1  ;;  %v13955_v50 = vpop.f32.mrf.mxu0 }
 0x39f   : > { %15830 = vst [vmem:[#allocation206_spill] sm:$0xff] %v13947_v22  ;;  %15833 = vst [vmem:[#allocation46_spill] sm:$0xff] %v13955_v50  ;;  %v6339_v25 = vsel %vm6255_vm0, %v6334_v40, %v6338_v7  ;;  %v13959_v23 = vadd.f32 %v6338_v7, %v15834_v33  ;;  %v5856_v13 = vadd.f32 %v5650_v52, %v13373_v37  ;;  %v15841_v22 = vld [vmem:[#allocation216_spill] sm:$0xff]  ;;  %v15843_v37 = vld [vmem:[#allocation53_spill] sm:$0xff] }
 0x3a0   : > { %15832 = vst [vmem:[#allocation207_spill] sm:$0xff] %v13953_v36  ;;  %v13963_v42 = vadd.f32 %v6339_v25, %v15836_v8  ;;  %v5652_v24 = vpop.f32.mrf.mxu1  ;;  %v13965_v49 = vpop.f32.mrf.mxu0  ;;  %v6340_v36 = vrot.slane %v5855_v35, 2  ;;  %v15844_v8 = vld [vmem:[#allocation217_spill] sm:$0xff]  ;;  %v15846_v35 = vld [vmem:[#allocation132_spill] sm:$0xff] }
 0x3a1   : > { %15835 = vst [vmem:[#allocation104_spill] sm:$0xff] %v13959_v23  ;;  %15838 = vst [vmem:[#allocation106_spill] sm:$0xff] %v13965_v49  ;;  %v5857_v60 = vadd.f32 %v5652_v24, %v15839_v51  ;;  %v6343_v52 = vrot.slane %v5856_v13, 2  ;;  %v15845_v51 = vld [vmem:[#allocation54_spill] sm:$0xff]  ;;  %v15853_v49 = vld [vmem:[#allocation219_spill] sm:$0xff] }
 0x3a2   : > { %15837 = vst [vmem:[#allocation208_spill] sm:$0xff] %v13963_v42  ;;  %v5654_v48 = vpop.f32.mrf.mxu1  ;;  %v13968_v61 = vpop.f32.mrf.mxu0  ;;  %v15850_v42 = vld [vmem:[#allocation34_spill] sm:$0xff] }
 0x3a3   : > { %15840 = vst [vmem:[#allocation110_spill] sm:$0xff] %v13968_v61  ;;  %v6341_v50 = vrot.slane %v5857_v60, 2  ;;  %v5858_v40 = vadd.f32 %v5654_v48, %v15841_v22  ;;  %v15849_v61 = vld [vmem:[#allocation218_spill] sm:$0xff] }
 0x3a4   : > { %v5658_v55 = vpop.f32.mrf.mxu1  ;;  %v13971_v7 = vpop.f32.mrf.mxu0  ;;  %7722 = vmatmul.mubr.bf16.gmra.mxu1 %v15357_v21  ;;  %8564 = vmatmul.mubr.bf16.gmra.mxu0 %v15843_v37 }
 0x3a5   : > { %15842 = vst [vmem:[#allocation209_spill] sm:$0xff] %v13971_v7  ;;  %v6342_v25 = vsel %vm6255_vm0, %v6340_v36, %v6341_v50  ;;  %v6344_v33 = vrot.slane %v5858_v40, 2  ;;  %v5859_v24 = vadd.f32 %v5658_v55, %v15844_v8  ;;  %7731 = vmatprep.mubr.bf16.mxu1 %v15788_v20  ;;  %8573 = vmatprep.mubr.bf16.mxu0 %v15845_v51 }
 0x3a6   : > { %v13980_v60 = vadd.f32 %v6342_v25, %v15846_v35  ;;  %v5660_v22 = vpop.f32.mrf.mxu1  ;;  %v13982_v48 = vpop.f32.mrf.mxu0  ;;  %v15854_v35 = vld [vmem:[#allocation134_spill] sm:$0xff] }
 0x3a7   : > { %15848 = vst [vmem:[#allocation47_spill] sm:$0xff] %v13982_v48  ;;  %v6345_v21 = vsel %vm6255_vm0, %v6343_v52, %v6344_v33  ;;  %v6346_v7 = vrot.slane %v5859_v24, 2  ;;  %v5860_v13 = vadd.f32 %v5660_v22, %v15849_v61  ;;  %v15857_v24 = vld [vmem:[#allocation220_spill] sm:$0xff] }
 0x3a8   : > { %15847 = vst [vmem:[#allocation24_spill] sm:$0xff] %v13980_v60  ;;  %v13987_v36 = vadd.f32 %v6345_v21, %v15850_v42  ;;  %v5662_v40 = vpop.f32.mrf.mxu1  ;;  %v13989_v55 = vpop.f32.mrf.mxu0  ;;  %v15858_v22 = vld [vmem:[#allocation136_spill] sm:$0xff] }
 0x3a9   : > { %15852 = vst [vmem:[#allocation112_spill] sm:$0xff] %v13989_v55  ;;  %v6347_v20 = vsel %vm6255_vm0, %v6341_v50, %v6346_v7  ;;  %v6348_v8 = vrot.slane %v5860_v13, 2  ;;  %v5861_v25 = vadd.f32 %v5662_v40, %v15853_v49  ;;  %v15861_v50 = vld [vmem:[#allocation55_spill] sm:$0xff]  ;;  %v15862_v13 = vld [vmem:[#allocation142_spill] sm:$0xff] }
 0x3aa   : > { %15851 = vst [vmem:[#allocation114_spill] sm:$0xff] %v13987_v36  ;;  %v13994_v60 = vadd.f32 %v6347_v20, %v15854_v35  ;;  %v5664_v48 = vpop.f32.mrf.mxu1  ;;  %v13996_v23 = vpop.f32.mrf.mxu0  ;;  %v15866_v35 = vld [vmem:[#allocation140_spill] sm:$0xff] }
 0x3ab   : > { %15856 = vst [vmem:[#allocation210_spill] sm:$0xff] %v13996_v23  ;;  %v6349_v52 = vsel %vm6255_vm0, %v6344_v33, %v6348_v8  ;;  %v6350_v61 = vrot.slane %v5861_v25, 2  ;;  %v5862_v42 = vadd.f32 %v5664_v48, %v15857_v24  ;;  %v15864_v33 = vld [vmem:[#allocation221_spill] sm:$0xff]  ;;  %v15865_v48 = vld [vmem:[#allocation56_spill] sm:$0xff] }
 0x3ac   : > { %15855 = vst [vmem:[#allocation116_spill] sm:$0xff] %v13994_v60  ;;  %v14001_v21 = vadd.f32 %v6349_v52, %v15858_v22  ;;  %v5668_v36 = vpop.f32.mrf.mxu1  ;;  %v14003_v55 = vpop.f32.mrf.mxu0  ;;  %7732 = vmatmul.mubr.bf16.gmra.mxu1 %v15801_v63  ;;  %8574 = vmatmul.mubr.bf16.gmra.mxu0 %v15861_v50  ;;  %v15877_v60 = vld [vmem:[#allocation224_spill] sm:$0xff] }
 0x3ad   : > { %15860 = vst [vmem:[#allocation211_spill] sm:$0xff] %v14003_v55  ;;  %v6351_v49 = vsel %vm6255_vm0, %v6346_v7, %v6350_v61  ;;  %v14009_v40 = vadd.f32 %v6350_v61, %v15862_v13  ;;  %v6352_v20 = vrot.slane %v5862_v42, 2  ;;  %v5863_v25 = vadd.f32 %v5668_v36, %v15864_v33  ;;  %7741 = vmatprep.mubr.bf16.mxu1 %v15370_v11  ;;  %v15871_v61 = vld [vmem:[#allocation222_spill] sm:$0xff]  ;;  %v15872_v42 = vld [vmem:[#allocation36_spill] sm:$0xff]  ;;  %v15875_v33 = vld [vmem:[#allocation223_spill] sm:$0xff] }
 0x3ae   : > { %15859 = vst [vmem:[#allocation26_spill] sm:$0xff] %v14001_v21  ;;  %8583 = vmatprep.mubr.bf16.mxu0 %v15865_v48  ;;  %v14015_v52 = vadd.f32 %v6351_v49, %v15866_v35  ;;  %v5670_v24 = vpop.f32.mrf.mxu1  ;;  %v14017_v22 = vpop.f32.mrf.mxu0  ;;  %v15869_v21 = vld [vmem:[#allocation38_spill] sm:$0xff] }
 0x3af   : > { %15863 = vst [vmem:[#allocation212_spill] sm:$0xff] %v14009_v40  ;;  %15868 = vst [vmem:[#allocation213_spill] sm:$0xff] %v14017_v22  ;;  %v6353_v63 = vsel %vm6255_vm0, %v6348_v8, %v6352_v20  ;;  %v14021_v7 = vadd.f32 %v6352_v20, %v15869_v21  ;;  %v5864_v13 = vadd.f32 %v5670_v24, %v15871_v61  ;;  %v15879_v20 = vld [vmem:[#allocation60_spill] sm:$0xff] }
 0x3b0   : > { %15867 = vst [vmem:[#allocation49_spill] sm:$0xff] %v14015_v52  ;;  %v14025_v40 = vadd.f32 %v6353_v63, %v15872_v42  ;;  %v5672_v36 = vpop.f32.mrf.mxu1  ;;  %v14027_v11 = vpop.f32.mrf.mxu0  ;;  %v6354_v52 = vrot.slane %v5863_v25, 2  ;;  %v15880_v42 = vld [vmem:[#allocation225_spill] sm:$0xff] }
 0x3b1   : > { %15870 = vst [vmem:[#allocation50_spill] sm:$0xff] %v14021_v7  ;;  %15874 = vst [vmem:[#allocation28_spill] sm:$0xff] %v14027_v11  ;;  %v5865_v55 = vadd.f32 %v5672_v36, %v15875_v33  ;;  %v6357_v24 = vrot.slane %v5864_v13, 2  ;;  %v15881_v33 = vld [vmem:[#allocation61_spill] sm:$0xff]  ;;  %v15889_v11 = vld [vmem:[#allocation227_spill] sm:$0xff] }
 0x3b2   : > { %15873 = vst [vmem:[#allocation120_spill] sm:$0xff] %v14025_v40  ;;  %v5674_v49 = vpop.f32.mrf.mxu1  ;;  %v14030_v35 = vpop.f32.mrf.mxu0  ;;  %v15886_v40 = vld [vmem:[#allocation146_spill] sm:$0xff] }
 0x3b3   : > { %15876 = vst [vmem:[#allocation122_spill] sm:$0xff] %v14030_v35  ;;  %v6355_v22 = vrot.slane %v5865_v55, 2  ;;  %v5866_v8 = vadd.f32 %v5674_v49, %v15877_v60  ;;  %v15882_v55 = vld [vmem:[#allocation144_spill] sm:$0xff]  ;;  %v15885_v35 = vld [vmem:[#allocation226_spill] sm:$0xff] }
 0x3b4   : > { %v5678_v23 = vpop.f32.mrf.mxu1  ;;  %v14033_v21 = vpop.f32.mrf.mxu0  ;;  %7742 = vmatmul.mubr.bf16.gmra.mxu1 %v15815_v41  ;;  %8584 = vmatmul.mubr.bf16.gmra.mxu0 %v15879_v20 }
 0x3b5   : > { %15878 = vst [vmem:[#allocation214_spill] sm:$0xff] %v14033_v21  ;;  %v6356_v63 = vsel %vm6255_vm0, %v6354_v52, %v6355_v22  ;;  %v6358_v61 = vrot.slane %v5866_v8, 2  ;;  %v5867_v36 = vadd.f32 %v5678_v23, %v15880_v42  ;;  %7751 = vmatprep.mubr.bf16.mxu1 %v15817_v62  ;;  %8593 = vmatprep.mubr.bf16.mxu0 %v15881_v33 }
 0x3b6   : > { %v14042_v25 = vadd.f32 %v6356_v63, %v15882_v55  ;;  %v5680_v60 = vpop.f32.mrf.mxu1  ;;  %v14044_v49 = vpop.f32.mrf.mxu0  ;;  %v15890_v55 = vld [vmem:[#allocation150_spill] sm:$0xff] }
 0x3b7   : > { %15884 = vst [vmem:[#allocation51_spill] sm:$0xff] %v14044_v49  ;;  %v6359_v41 = vsel %vm6255_vm0, %v6357_v24, %v6358_v61  ;;  %v6360_v21 = vrot.slane %v5867_v36, 2  ;;  %v5868_v13 = vadd.f32 %v5680_v60, %v15885_v35  ;;  %v15893_v36 = vld [vmem:[#allocation228_spill] sm:$0xff] }
 0x3b8   : > { %15883 = vst [vmem:[#allocation30_spill] sm:$0xff] %v14042_v25  ;;  %v14049_v52 = vadd.f32 %v6359_v41, %v15886_v40  ;;  %v5682_v8 = vpop.f32.mrf.mxu1  ;;  %v14051_v23 = vpop.f32.mrf.mxu0  ;;  %v15894_v60 = vld [vmem:[#allocation40_spill] sm:$0xff] }
 0x3b9   : > { %15888 = vst [vmem:[#allocation124_spill] sm:$0xff] %v14051_v23  ;;  %v6361_v62 = vsel %vm6255_vm0, %v6355_v22, %v6360_v21  ;;  %v6362_v42 = vrot.slane %v5868_v13, 2  ;;  %v5869_v63 = vadd.f32 %v5682_v8, %v15889_v11  ;;  %v15897_v22 = vld [vmem:[#allocation66_spill] sm:$0xff] }
 0x3ba   : > { %15887 = vst [vmem:[#allocation130_spill] sm:$0xff] %v14049_v52  ;;  %v14056_v25 = vadd.f32 %v6361_v62, %v15890_v55  ;;  %v5684_v49 = vpop.f32.mrf.mxu1  ;;  %v14058_v7 = vpop.f32.mrf.mxu0  ;;  %v15898_v13 = vld [vmem:[#allocation154_spill] sm:$0xff]  ;;  %v15902_v55 = vld [vmem:[#allocation152_spill] sm:$0xff] }
 0x3bb   : > { %15892 = vst [vmem:[#allocation126_spill] sm:$0xff] %v14058_v7  ;;  %v6363_v24 = vsel %vm6255_vm0, %v6358_v61, %v6362_v42  ;;  %v6364_v35 = vrot.slane %v5869_v63, 2  ;;  %v5870_v40 = vadd.f32 %v5684_v49, %v15893_v36  ;;  %v15900_v61 = vld [vmem:[#allocation229_spill] sm:$0xff]  ;;  %v15901_v49 = vld [vmem:[#allocation67_spill] sm:$0xff] }
 0x3bc   : > { %15891 = vst [vmem:[#allocation32_spill] sm:$0xff] %v14056_v25  ;;  %v14063_v41 = vadd.f32 %v6363_v24, %v15894_v60  ;;  %v5688_v52 = vpop.f32.mrf.mxu1  ;;  %v14065_v23 = vpop.f32.mrf.mxu0  ;;  %7752 = vmatmul.mubr.bf16.gmra.mxu1 %v15828_v12  ;;  %8594 = vmatmul.mubr.bf16.gmra.mxu0 %v15897_v22  ;;  %v15913_v25 = vld [vmem:[#allocation232_spill] sm:$0xff] }
 0x3bd   : > { %15896 = vst [vmem:[#allocation216_spill] sm:$0xff] %v14065_v23  ;;  %v6365_v11 = vsel %vm6255_vm0, %v6360_v21, %v6364_v35  ;;  %v14071_v8 = vadd.f32 %v6364_v35, %v15898_v13  ;;  %v6366_v62 = vrot.slane %v5870_v40, 2  ;;  %v5871_v63 = vadd.f32 %v5688_v52, %v15900_v61  ;;  %7761 = vmatprep.mubr.bf16.mxu1 %v15390_v38  ;;  %v15907_v35 = vld [vmem:[#allocation230_spill] sm:$0xff]  ;;  %v15911_v61 = vld [vmem:[#allocation231_spill] sm:$0xff] }
 0x3be   : > { %15895 = vst [vmem:[#allocation215_spill] sm:$0xff] %v14063_v41  ;;  %8603 = vmatprep.mubr.bf16.mxu0 %v15901_v49  ;;  %v14077_v24 = vadd.f32 %v6365_v11, %v15902_v55  ;;  %v5690_v36 = vpop.f32.mrf.mxu1  ;;  %v14079_v60 = vpop.f32.mrf.mxu0  ;;  %v15905_v41 = vld [vmem:[#allocation156_spill] sm:$0xff]  ;;  %v15908_v40 = vld [vmem:[#allocation42_spill] sm:$0xff] }
 0x3bf   : > { %15899 = vst [vmem:[#allocation53_spill] sm:$0xff] %v14071_v8  ;;  %15904 = vst [vmem:[#allocation54_spill] sm:$0xff] %v14079_v60  ;;  %v6367_v12 = vsel %vm6255_vm0, %v6362_v42, %v6366_v62  ;;  %v14083_v21 = vadd.f32 %v6366_v62, %v15905_v41  ;;  %v5872_v13 = vadd.f32 %v5690_v36, %v15907_v35  ;;  %v15915_v62 = vld [vmem:[#allocation72_spill] sm:$0xff] }
 0x3c0   : > { %15903 = vst [vmem:[#allocation217_spill] sm:$0xff] %v14077_v24  ;;  %v14087_v8 = vadd.f32 %v6367_v12, %v15908_v40  ;;  %v5692_v52 = vpop.f32.mrf.mxu1  ;;  %v14089_v38 = vpop.f32.mrf.mxu0  ;;  %v6368_v24 = vrot.slane %v5871_v63, 2  ;;  %v15916_v40 = vld [vmem:[#allocation233_spill] sm:$0xff] }
 0x3c1   : > { %15906 = vst [vmem:[#allocation132_spill] sm:$0xff] %v14083_v21  ;;  %15910 = vst [vmem:[#allocation34_spill] sm:$0xff] %v14089_v38  ;;  %v5873_v23 = vadd.f32 %v5692_v52, %v15911_v61  ;;  %v6371_v36 = vrot.slane %v5872_v13, 2  ;;  %v15917_v61 = vld [vmem:[#allocation73_spill] sm:$0xff]  ;;  %v15925_v38 = vld [vmem:[#allocation234_spill] sm:$0xff] }
 0x3c2   : > { %15909 = vst [vmem:[#allocation218_spill] sm:$0xff] %v14087_v8  ;;  %v5694_v11 = vpop.f32.mrf.mxu1  ;;  %v14092_v55 = vpop.f32.mrf.mxu0  ;;  %v15922_v8 = vld [vmem:[#allocation44_spill] sm:$0xff] }
 0x3c3   : > { %15912 = vst [vmem:[#allocation219_spill] sm:$0xff] %v14092_v55  ;;  %v6369_v60 = vrot.slane %v5873_v23, 2  ;;  %v5874_v42 = vadd.f32 %v5694_v11, %v15913_v25  ;;  %v15918_v23 = vld [vmem:[#allocation160_spill] sm:$0xff]  ;;  %v15921_v55 = vld [vmem:[#allocation3_spill] sm:$0xff] }
 0x3c4   : > { %v5698_v7 = vpop.f32.mrf.mxu1  ;;  %v14095_v41 = vpop.f32.mrf.mxu0  ;;  %7762 = vmatmul.mubr.bf16.gmra.mxu1 %v15843_v37  ;;  %8604 = vmatmul.mubr.bf16.gmra.mxu0 %v15915_v62 }
 0x3c5   : > { %15914 = vst [vmem:[#allocation134_spill] sm:$0xff] %v14095_v41  ;;  %v6370_v12 = vsel %vm6255_vm0, %v6368_v24, %v6369_v60  ;;  %v6372_v35 = vrot.slane %v5874_v42, 2  ;;  %v5875_v52 = vadd.f32 %v5698_v7, %v15916_v40  ;;  %7771 = vmatprep.mubr.bf16.mxu1 %v15845_v51  ;;  %8613 = vmatprep.mubr.bf16.mxu0 %v15917_v61 }
 0x3c6   : > { %v14104_v63 = vadd.f32 %v6370_v12, %v15918_v23  ;;  %v5700_v25 = vpop.f32.mrf.mxu1  ;;  %v14106_v11 = vpop.f32.mrf.mxu0  ;;  %v15926_v23 = vld [vmem:[#allocation162_spill] sm:$0xff] }
 0x3c7   : > { %15920 = vst [vmem:[#allocation136_spill] sm:$0xff] %v14106_v11  ;;  %v6373_v37 = vsel %vm6255_vm0, %v6371_v36, %v6372_v35  ;;  %v6374_v41 = vrot.slane %v5875_v52, 2  ;;  %v5876_v13 = vadd.f32 %v5700_v25, %v15921_v55  ;;  %v15929_v52 = vld [vmem:[#allocation235_spill] sm:$0xff]  ;;  %v15930_v25 = vld [vmem:[#allocation164_spill] sm:$0xff] }
 0x3c8   : > { %15919 = vst [vmem:[#allocation220_spill] sm:$0xff] %v14104_v63  ;;  %v14111_v24 = vadd.f32 %v6373_v37, %v15922_v8  ;;  %v5702_v42 = vpop.f32.mrf.mxu1  ;;  %v14113_v7 = vpop.f32.mrf.mxu0 }
 0x3c9   : > { %15924 = vst [vmem:[#allocation142_spill] sm:$0xff] %v14113_v7  ;;  %v6375_v51 = vsel %vm6255_vm0, %v6369_v60, %v6374_v41  ;;  %v6376_v40 = vrot.slane %v5876_v13, 2  ;;  %v5877_v12 = vadd.f32 %v5702_v42, %v15925_v38  ;;  %v15933_v60 = vld [vmem:[#allocation78_spill] sm:$0xff]  ;;  %v15934_v13 = vld [vmem:[#allocation57_spill] sm:$0xff] }
 0x3ca   : > { %15923 = vst [vmem:[#allocation55_spill] sm:$0xff] %v14111_v24  ;;  %v14118_v63 = vadd.f32 %v6375_v51, %v15926_v23  ;;  %v5704_v11 = vpop.f32.mrf.mxu1  ;;  %v14120_v21 = vpop.f32.mrf.mxu0  ;;  %v15938_v23 = vld [vmem:[#allocation166_spill] sm:$0xff] }
 0x3cb   : > { %15928 = vst [vmem:[#allocation56_spill] sm:$0xff] %v14120_v21  ;;  %v6377_v36 = vsel %vm6255_vm0, %v6372_v35, %v6376_v40  ;;  %v6378_v55 = vrot.slane %v5877_v12, 2  ;;  %v5878_v8 = vadd.f32 %v5704_v11, %v15929_v52  ;;  %v15936_v35 = vld [vmem:[#allocation4_spill] sm:$0xff]  ;;  %v15937_v11 = vld [vmem:[#allocation79_spill] sm:$0xff] }
 0x3cc   : > { %15927 = vst [vmem:[#allocation221_spill] sm:$0xff] %v14118_v63  ;;  %v14125_v37 = vadd.f32 %v6377_v36, %v15930_v25  ;;  %v5708_v24 = vpop.f32.mrf.mxu1  ;;  %v14127_v7 = vpop.f32.mrf.mxu0  ;;  %7772 = vmatmul.mubr.bf16.gmra.mxu1 %v15861_v50  ;;  %8614 = vmatmul.mubr.bf16.gmra.mxu0 %v15933_v60  ;;  %v15949_v63 = vld [vmem:[#allocation237_spill] sm:$0xff] }
 0x3cd   : > { %15932 = vst [vmem:[#allocation38_spill] sm:$0xff] %v14127_v7  ;;  %v6379_v38 = vsel %vm6255_vm0, %v6374_v41, %v6378_v55  ;;  %v14133_v42 = vadd.f32 %v6378_v55, %v15934_v13  ;;  %v6380_v51 = vrot.slane %v5878_v8, 2  ;;  %v5879_v12 = vadd.f32 %v5708_v24, %v15936_v35  ;;  %7781 = vmatprep.mubr.bf16.mxu1 %v15865_v48  ;;  %v15943_v55 = vld [vmem:[#allocation5_spill] sm:$0xff]  ;;  %v15944_v8 = vld [vmem:[#allocation170_spill] sm:$0xff]  ;;  %v15947_v35 = vld [vmem:[#allocation236_spill] sm:$0xff] }
 0x3ce   : > { %15931 = vst [vmem:[#allocation140_spill] sm:$0xff] %v14125_v37  ;;  %8623 = vmatprep.mubr.bf16.mxu0 %v15937_v11  ;;  %v14139_v36 = vadd.f32 %v6379_v38, %v15938_v23  ;;  %v5710_v52 = vpop.f32.mrf.mxu1  ;;  %v14141_v25 = vpop.f32.mrf.mxu0  ;;  %v15941_v37 = vld [vmem:[#allocation48_spill] sm:$0xff] }
 0x3cf   : > { %15935 = vst [vmem:[#allocation222_spill] sm:$0xff] %v14133_v42  ;;  %15940 = vst [vmem:[#allocation223_spill] sm:$0xff] %v14141_v25  ;;  %v6381_v50 = vsel %vm6255_vm0, %v6376_v40, %v6380_v51  ;;  %v14145_v41 = vadd.f32 %v6380_v51, %v15941_v37  ;;  %v5880_v13 = vadd.f32 %v5710_v52, %v15943_v55  ;;  %v15951_v51 = vld [vmem:[#allocation84_spill] sm:$0xff] }
 0x3d0   : > { %15939 = vst [vmem:[#allocation36_spill] sm:$0xff] %v14139_v36  ;;  %v14149_v42 = vadd.f32 %v6381_v50, %v15944_v8  ;;  %v5712_v24 = vpop.f32.mrf.mxu1  ;;  %v14151_v48 = vpop.f32.mrf.mxu0  ;;  %v6382_v36 = vrot.slane %v5879_v12, 2  ;;  %v15952_v8 = vld [vmem:[#allocation6_spill] sm:$0xff] }
 0x3d1   : > { %15942 = vst [vmem:[#allocation224_spill] sm:$0xff] %v14145_v41  ;;  %15946 = vst [vmem:[#allocation225_spill] sm:$0xff] %v14151_v48  ;;  %v5881_v7 = vadd.f32 %v5712_v24, %v15947_v35  ;;  %v6385_v52 = vrot.slane %v5880_v13, 2  ;;  %v15953_v35 = vld [vmem:[#allocation85_spill] sm:$0xff]  ;;  %v15961_v48 = vld [vmem:[#allocation238_spill] sm:$0xff] }
 0x3d2   : > { %15945 = vst [vmem:[#allocation60_spill] sm:$0xff] %v14149_v42  ;;  %v5714_v38 = vpop.f32.mrf.mxu1  ;;  %v14154_v23 = vpop.f32.mrf.mxu0  ;;  %v15958_v42 = vld [vmem:[#allocation59_spill] sm:$0xff] }
 0x3d3   : > { %15948 = vst [vmem:[#allocation61_spill] sm:$0xff] %v14154_v23  ;;  %v6383_v25 = vrot.slane %v5881_v7, 2  ;;  %v5882_v40 = vadd.f32 %v5714_v38, %v15949_v63  ;;  %v15954_v7 = vld [vmem:[#allocation58_spill] sm:$0xff]  ;;  %v15957_v23 = vld [vmem:[#allocation7_spill] sm:$0xff] }
 0x3d4   : > { %v5718_v21 = vpop.f32.mrf.mxu1  ;;  %v14157_v37 = vpop.f32.mrf.mxu0  ;;  %7782 = vmatmul.mubr.bf16.gmra.mxu1 %v15879_v20  ;;  %8624 = vmatmul.mubr.bf16.gmra.mxu0 %v15951_v51 }
 0x3d5   : > { %15950 = vst [vmem:[#allocation144_spill] sm:$0xff] %v14157_v37  ;;  %v6384_v50 = vsel %vm6255_vm0, %v6382_v36, %v6383_v25  ;;  %v6386_v55 = vrot.slane %v5882_v40, 2  ;;  %v5883_v24 = vadd.f32 %v5718_v21, %v15952_v8  ;;  %7791 = vmatprep.mubr.bf16.mxu1 %v15881_v33  ;;  %8633 = vmatprep.mubr.bf16.mxu0 %v15953_v35 }
 0x3d6   : > { %v14166_v12 = vadd.f32 %v6384_v50, %v15954_v7  ;;  %v5720_v63 = vpop.f32.mrf.mxu1  ;;  %v14168_v38 = vpop.f32.mrf.mxu0  ;;  %v15962_v7 = vld [vmem:[#allocation62_spill] sm:$0xff] }
 0x3d7   : > { %15956 = vst [vmem:[#allocation146_spill] sm:$0xff] %v14168_v38  ;;  %v6387_v20 = vsel %vm6255_vm0, %v6385_v52, %v6386_v55  ;;  %v6388_v37 = vrot.slane %v5883_v24, 2  ;;  %v5884_v13 = vadd.f32 %v5720_v63, %v15957_v23  ;;  %v15965_v24 = vld [vmem:[#allocation239_spill] sm:$0xff] }
 0x3d8   : > { %15955 = vst [vmem:[#allocation226_spill] sm:$0xff] %v14166_v12  ;;  %v14173_v36 = vadd.f32 %v6387_v20, %v15958_v42  ;;  %v5722_v40 = vpop.f32.mrf.mxu1  ;;  %v14175_v21 = vpop.f32.mrf.mxu0  ;;  %v15966_v63 = vld [vmem:[#allocation63_spill] sm:$0xff] }
 0x3d9   : > { %15960 = vst [vmem:[#allocation150_spill] sm:$0xff] %v14175_v21  ;;  %v6389_v33 = vsel %vm6255_vm0, %v6383_v25, %v6388_v37  ;;  %v6390_v8 = vrot.slane %v5884_v13, 2  ;;  %v5885_v50 = vadd.f32 %v5722_v40, %v15961_v48  ;;  %v15969_v25 = vld [vmem:[#allocation90_spill] sm:$0xff]  ;;  %v15970_v13 = vld [vmem:[#allocation68_spill] sm:$0xff] }
 0x3da   : > { %15959 = vst [vmem:[#allocation227_spill] sm:$0xff] %v14173_v36  ;;  %v14180_v12 = vadd.f32 %v6389_v33, %v15962_v7  ;;  %v5724_v38 = vpop.f32.mrf.mxu1  ;;  %v14182_v41 = vpop.f32.mrf.mxu0  ;;  %v15974_v7 = vld [vmem:[#allocation64_spill] sm:$0xff] }
 0x3db   : > { %15964 = vst [vmem:[#allocation40_spill] sm:$0xff] %v14182_v41  ;;  %v6391_v52 = vsel %vm6255_vm0, %v6386_v55, %v6390_v8  ;;  %v6392_v23 = vrot.slane %v5885_v50, 2  ;;  %v5886_v42 = vadd.f32 %v5724_v38, %v15965_v24  ;;  %v15972_v55 = vld [vmem:[#allocation8_spill] sm:$0xff]  ;;  %v15973_v38 = vld [vmem:[#allocation91_spill] sm:$0xff] }
 0x3dc   : > { %15963 = vst [vmem:[#allocation228_spill] sm:$0xff] %v14180_v12  ;;  %v14187_v20 = vadd.f32 %v6391_v52, %v15966_v63  ;;  %v5728_v36 = vpop.f32.mrf.mxu1  ;;  %v14189_v21 = vpop.f32.mrf.mxu0  ;;  %7792 = vmatmul.mubr.bf16.gmra.mxu1 %v15897_v22  ;;  %8634 = vmatmul.mubr.bf16.gmra.mxu0 %v15969_v25  ;;  %v15985_v12 = vld [vmem:[#allocation241_spill] sm:$0xff] }
 0x3dd   : > { %15968 = vst [vmem:[#allocation154_spill] sm:$0xff] %v14189_v21  ;;  %v6393_v48 = vsel %vm6255_vm0, %v6388_v37, %v6392_v23  ;;  %v14195_v40 = vadd.f32 %v6392_v23, %v15970_v13  ;;  %v6394_v33 = vrot.slane %v5886_v42, 2  ;;  %v5887_v50 = vadd.f32 %v5728_v36, %v15972_v55  ;;  %7801 = vmatprep.mubr.bf16.mxu1 %v15901_v49  ;;  %v15979_v23 = vld [vmem:[#allocation9_spill] sm:$0xff]  ;;  %v15983_v55 = vld [vmem:[#allocation240_spill] sm:$0xff] }
 0x3de   : > { %15967 = vst [vmem:[#allocation66_spill] sm:$0xff] %v14187_v20  ;;  %8643 = vmatprep.mubr.bf16.mxu0 %v15973_v38  ;;  %v14201_v52 = vadd.f32 %v6393_v48, %v15974_v7  ;;  %v5730_v24 = vpop.f32.mrf.mxu1  ;;  %v14203_v63 = vpop.f32.mrf.mxu0  ;;  %v15977_v20 = vld [vmem:[#allocation69_spill] sm:$0xff] }
 0x3df   : > { %15971 = vst [vmem:[#allocation229_spill] sm:$0xff] %v14195_v40  ;;  %15976 = vst [vmem:[#allocation152_spill] sm:$0xff] %v14203_v63  ;;  %v6395_v22 = vsel %vm6255_vm0, %v6390_v8, %v6394_v33  ;;  %v14207_v37 = vadd.f32 %v6394_v33, %v15977_v20  ;;  %v5888_v13 = vadd.f32 %v5730_v24, %v15979_v23  ;;  %v15980_v42 = vld [vmem:[#allocation65_spill] sm:$0xff]  ;;  %v15987_v33 = vld [vmem:[#allocation98_spill] sm:$0xff] }
 0x3e0   : > { %15975 = vst [vmem:[#allocation67_spill] sm:$0xff] %v14201_v52  ;;  %v14211_v40 = vadd.f32 %v6395_v22, %v15980_v42  ;;  %v5732_v36 = vpop.f32.mrf.mxu1  ;;  %v14213_v49 = vpop.f32.mrf.mxu0  ;;  %v6396_v52 = vrot.slane %v5887_v50, 2  ;;  %v15988_v42 = vld [vmem:[#allocation11_spill] sm:$0xff] }
 0x3e1   : > { %15978 = vst [vmem:[#allocation156_spill] sm:$0xff] %v14207_v37  ;;  %15982 = vst [vmem:[#allocation42_spill] sm:$0xff] %v14213_v49  ;;  %v5889_v21 = vadd.f32 %v5732_v36, %v15983_v55  ;;  %v6399_v24 = vrot.slane %v5888_v13, 2  ;;  %v15989_v55 = vld [vmem:[#allocation99_spill] sm:$0xff]  ;;  %v15997_v49 = vld [vmem:[#allocation242_spill] sm:$0xff] }
 0x3e2   : > { %15981 = vst [vmem:[#allocation230_spill] sm:$0xff] %v14211_v40  ;;  %v5734_v48 = vpop.f32.mrf.mxu1  ;;  %v14216_v7 = vpop.f32.mrf.mxu0  ;;  %v15994_v40 = vld [vmem:[#allocation70_spill] sm:$0xff] }
 0x3e3   : > { %15984 = vst [vmem:[#allocation231_spill] sm:$0xff] %v14216_v7  ;;  %v6397_v63 = vrot.slane %v5889_v21, 2  ;;  %v5890_v8 = vadd.f32 %v5734_v48, %v15985_v12  ;;  %v15990_v21 = vld [vmem:[#allocation52_spill] sm:$0xff] }
 0x3e4   : > { %v5738_v41 = vpop.f32.mrf.mxu1  ;;  %v14219_v20 = vpop.f32.mrf.mxu0  ;;  %7802 = vmatmul.mubr.bf16.gmra.mxu1 %v15915_v62  ;;  %8644 = vmatmul.mubr.bf16.gmra.mxu0 %v15987_v33  ;;  %v15993_v7 = vld [vmem:[#allocation12_spill] sm:$0xff] }
 0x3e5   : > { %15986 = vst [vmem:[#allocation232_spill] sm:$0xff] %v14219_v20  ;;  %v6398_v22 = vsel %vm6255_vm0, %v6396_v52, %v6397_v63  ;;  %v6400_v23 = vrot.slane %v5890_v8, 2  ;;  %v5891_v36 = vadd.f32 %v5738_v41, %v15988_v42  ;;  %7811 = vmatprep.mubr.bf16.mxu1 %v15917_v61  ;;  %8653 = vmatprep.mubr.bf16.mxu0 %v15989_v55 }
 0x3e6   : > { %v14228_v50 = vadd.f32 %v6398_v22, %v15990_v21  ;;  %v5740_v12 = vpop.f32.mrf.mxu1  ;;  %v14230_v48 = vpop.f32.mrf.mxu0  ;;  %v15998_v21 = vld [vmem:[#allocation71_spill] sm:$0xff] }
 0x3e7   : > { %15992 = vst [vmem:[#allocation233_spill] sm:$0xff] %v14230_v48  ;;  %v6401_v62 = vsel %vm6255_vm0, %v6399_v24, %v6400_v23  ;;  %v6402_v20 = vrot.slane %v5891_v36, 2  ;;  %v5892_v13 = vadd.f32 %v5740_v12, %v15993_v7  ;;  %v16001_v36 = vld [vmem:[#allocation243_spill] sm:$0xff]  ;;  %v16002_v12 = vld [vmem:[#allocation74_spill] sm:$0xff] }
 0x3e8   : > { %15991 = vst [vmem:[#allocation72_spill] sm:$0xff] %v14228_v50  ;;  %v14235_v52 = vadd.f32 %v6401_v62, %v15994_v40  ;;  %v5742_v8 = vpop.f32.mrf.mxu1  ;;  %v14237_v41 = vpop.f32.mrf.mxu0 }
 0x3e9   : > { %15996 = vst [vmem:[#allocation160_spill] sm:$0xff] %v14237_v41  ;;  %v6403_v61 = vsel %vm6255_vm0, %v6397_v63, %v6402_v20  ;;  %v6404_v42 = vrot.slane %v5892_v13, 2  ;;  %v5893_v22 = vadd.f32 %v5742_v8, %v15997_v49  ;;  %v16005_v63 = vld [vmem:[#allocation108_spill] sm:$0xff]  ;;  %v16006_v13 = vld [vmem:[#allocation77_spill] sm:$0xff] }
 0x3ea   : > { %15995 = vst [vmem:[#allocation73_spill] sm:$0xff] %v14235_v52  ;;  %v14242_v50 = vadd.f32 %v6403_v61, %v15998_v21  ;;  %v5744_v48 = vpop.f32.mrf.mxu1  ;;  %v14244_v37 = vpop.f32.mrf.mxu0  ;;  %v16010_v21 = vld [vmem:[#allocation75_spill] sm:$0xff] }
 0x3eb   : > { %16000 = vst [vmem:[#allocation44_spill] sm:$0xff] %v14244_v37  ;;  %v6405_v24 = vsel %vm6255_vm0, %v6400_v23, %v6404_v42  ;;  %v6406_v7 = vrot.slane %v5893_v22, 2  ;;  %v5894_v40 = vadd.f32 %v5744_v48, %v16001_v36  ;;  %v16008_v23 = vld [vmem:[#allocation13_spill] sm:$0xff] }
 0x3ec   : > { %15999 = vst [vmem:[#allocation3_spill] sm:$0xff] %v14242_v50  ;;  %v14249_v62 = vadd.f32 %v6405_v24, %v16002_v12  ;;  %v5748_v52 = vpop.f32.mrf.mxu1  ;;  %v14251_v41 = vpop.f32.mrf.mxu0  ;;  %7812 = vmatmul.mubr.bf16.gmra.mxu1 %v15933_v60  ;;  %8654 = vmatmul.mubr.bf16.gmra.mxu0 %v16005_v63  ;;  %v16009_v48 = vld [vmem:[#allocation109_spill] sm:$0xff] }
 0x3ed   : > { %16004 = vst [vmem:[#allocation162_spill] sm:$0xff] %v14251_v41  ;;  %v6407_v49 = vsel %vm6255_vm0, %v6402_v20, %v6406_v7  ;;  %v14257_v8 = vadd.f32 %v6406_v7, %v16006_v13  ;;  %v6408_v61 = vrot.slane %v5894_v40, 2  ;;  %v5895_v22 = vadd.f32 %v5748_v52, %v16008_v23  ;;  %7821 = vmatprep.mubr.bf16.mxu1 %v15937_v11  ;;  %v16014_v7 = vld [vmem:[#allocation14_spill] sm:$0xff]  ;;  %v16015_v40 = vld [vmem:[#allocation76_spill] sm:$0xff]  ;;  %v16019_v50 = vld [vmem:[#allocation245_spill] sm:$0xff] }
 0x3ee   : > { %16003 = vst [vmem:[#allocation234_spill] sm:$0xff] %v14249_v62  ;;  %8663 = vmatprep.mubr.bf16.mxu0 %v16009_v48  ;;  %v14263_v24 = vadd.f32 %v6407_v49, %v16010_v21  ;;  %v5750_v36 = vpop.f32.mrf.mxu1  ;;  %v14265_v12 = vpop.f32.mrf.mxu0  ;;  %v16013_v62 = vld [vmem:[#allocation80_spill] sm:$0xff] }
 0x3ef   : > { %16007 = vst [vmem:[#allocation235_spill] sm:$0xff] %v14257_v8  ;;  %16012 = vst [vmem:[#allocation78_spill] sm:$0xff] %v14265_v12  ;;  %v6409_v60 = vsel %vm6255_vm0, %v6404_v42, %v6408_v61  ;;  %v14269_v20 = vadd.f32 %v6408_v61, %v16013_v62  ;;  %v5896_v13 = vadd.f32 %v5750_v36, %v16014_v7  ;;  %v16017_v23 = vld [vmem:[#allocation244_spill] sm:$0xff]  ;;  %v16021_v61 = vld [vmem:[#allocation118_spill] sm:$0xff] }
 0x3f0   : > { %16011 = vst [vmem:[#allocation164_spill] sm:$0xff] %v14263_v24  ;;  %v14273_v8 = vadd.f32 %v6409_v60, %v16015_v40  ;;  %v5752_v52 = vpop.f32.mrf.mxu1  ;;  %v14275_v11 = vpop.f32.mrf.mxu0  ;;  %v6410_v24 = vrot.slane %v5895_v22, 2 }
 0x3f1   : > { %v5897_v41 = vadd.f32 %v5752_v52, %v16017_v23  ;;  %v6413_v36 = vrot.slane %v5896_v13, 2 }
 0x3f2   : > { %16016 = vst [vmem:[#allocation57_spill] sm:$0xff] %v14273_v8  ;;  %v5754_v49 = vpop.f32.mrf.mxu1  ;;  %v14278_v21 = vpop.f32.mrf.mxu0 }
 0x3f3   : > { %16018 = vst [vmem:[#allocation4_spill] sm:$0xff] %v14278_v21  ;;  %v6411_v12 = vrot.slane %v5897_v41, 2  ;;  %v5898_v42 = vadd.f32 %v5754_v49, %v16019_v50  ;;  %v16022_v41 = vld [vmem:[#allocation81_spill] sm:$0xff]  ;;  %v16025_v49 = vld [vmem:[#allocation15_spill] sm:$0xff] }
 0x3f4   : > { %v5758_v37 = vpop.f32.mrf.mxu1  ;;  %v14281_v62 = vpop.f32.mrf.mxu0  ;;  %7822 = vmatmul.mubr.bf16.gmra.mxu1 %v15951_v51  ;;  %8664 = vmatmul.mubr.bf16.gmra.mxu0 %v16021_v61  ;;  %v16029_v21 = vld [vmem:[#allocation119_spill] sm:$0xff] }
 0x3f5   : > { %16020 = vst [vmem:[#allocation79_spill] sm:$0xff] %v14281_v62  ;;  %v6412_v60 = vsel %vm6255_vm0, %v6410_v24, %v6411_v12  ;;  %v6414_v7 = vrot.slane %v5898_v42, 2  ;;  %v5899_v40 = vadd.f32 %v5758_v37, %v13525_v16  ;;  %7831 = vmatprep.mubr.bf16.mxu1 %v15953_v35  ;;  %8673 = vmatprep.mubr.bf16.mxu0 %v15643_v9  ;;  %v16026_v62 = vld [vmem:[#allocation82_spill] sm:$0xff] }
 0x3f6   : > { %v14290_v22 = vadd.f32 %v6412_v60, %v16022_v41  ;;  %v5760_v50 = vpop.f32.mrf.mxu1  ;;  %v14292_v52 = vpop.f32.mrf.mxu0  ;;  %v16030_v41 = vld [vmem:[#allocation83_spill] sm:$0xff] }
 0x3f7   : > { %16024 = vst [vmem:[#allocation48_spill] sm:$0xff] %v14292_v52  ;;  %v6415_v51 = vsel %vm6255_vm0, %v6413_v36, %v6414_v7  ;;  %v6416_v23 = vrot.slane %v5899_v40, 2  ;;  %v5900_v13 = vadd.f32 %v5760_v50, %v16025_v49  ;;  %v16031_v50 = vld [vmem:[#allocation16_spill] sm:$0xff] }
 0x3f8   : > { %16023 = vst [vmem:[#allocation166_spill] sm:$0xff] %v14290_v22  ;;  %v14297_v24 = vadd.f32 %v6415_v51, %v16026_v62  ;;  %v5762_v42 = vpop.f32.mrf.mxu1  ;;  %v14299_v16 = vpop.f32.mrf.mxu0  ;;  %v16032_v51 = vld [vmem:[#allocation86_spill] sm:$0xff] }
 0x3f9   : > { %16028 = vst [vmem:[#allocation170_spill] sm:$0xff] %v14299_v16  ;;  %v6417_v35 = vsel %vm6255_vm0, %v6411_v12, %v6416_v23  ;;  %v6418_v37 = vrot.slane %v5900_v13, 2  ;;  %v5901_v60 = vadd.f32 %v5762_v42, %v16029_v21  ;;  %v16035_v12 = vld [vmem:[#allocation128_spill] sm:$0xff]  ;;  %v16036_v13 = vld [vmem:[#allocation89_spill] sm:$0xff] }
 0x3fa   : > { %16027 = vst [vmem:[#allocation5_spill] sm:$0xff] %v14297_v24  ;;  %v14304_v22 = vadd.f32 %v6417_v35, %v16030_v41  ;;  %v5764_v52 = vpop.f32.mrf.mxu1  ;;  %v14306_v8 = vpop.f32.mrf.mxu0 }
 0x3fb   : > { %v6419_v36 = vsel %vm6255_vm0, %v6414_v7, %v6418_v37  ;;  %v6420_v40 = vrot.slane %v5901_v60, 2  ;;  %v5902_v62 = vadd.f32 %v5764_v52, %v16031_v50  ;;  %v16038_v52 = vld [vmem:[#allocation87_spill] sm:$0xff]  ;;  %v16041_v50 = vld [vmem:[#allocation92_spill] sm:$0xff] }
 0x3fc   : > { %v14311_v49 = vadd.f32 %v6419_v36, %v16032_v51  ;;  %v5768_v24 = vpop.f32.mrf.mxu1  ;;  %v14313_v16 = vpop.f32.mrf.mxu0  ;;  %7832 = vmatmul.mubr.bf16.gmra.mxu1 %v15969_v25  ;;  %8674 = vmatmul.mubr.bf16.gmra.mxu0 %v16035_v12 }
 0x3fd   : > { %16034 = vst [vmem:[#allocation237_spill] sm:$0xff] %v14313_v16  ;;  %v6421_v21 = vsel %vm6255_vm0, %v6416_v23, %v6420_v40  ;;  %v14319_v42 = vadd.f32 %v6420_v40, %v16036_v13  ;;  %v6422_v35 = vrot.slane %v5902_v62, 2  ;;  %v5903_v7 = vadd.f32 %v5768_v24, %v13537_v59  ;;  %7841 = vmatprep.mubr.bf16.mxu1 %v15973_v38  ;;  %v16042_v40 = vld [vmem:[#allocation17_spill] sm:$0xff]  ;;  %v16043_v62 = vld [vmem:[#allocation88_spill] sm:$0xff]  ;;  %v16046_v24 = vld [vmem:[#allocation19_spill] sm:$0xff] }
 0x3fe   : > { %16033 = vst [vmem:[#allocation236_spill] sm:$0xff] %v14311_v49  ;;  %8683 = vmatprep.mubr.bf16.mxu0 %v15532_v53  ;;  %v14325_v60 = vadd.f32 %v6421_v21, %v16038_v52  ;;  %v5770_v41 = vpop.f32.mrf.mxu1  ;;  %v14327_v36 = vpop.f32.mrf.mxu0  ;;  %v16048_v49 = vld [vmem:[#allocation246_spill] sm:$0xff] }
 0x3ff   : > { %16037 = vst [vmem:[#allocation84_spill] sm:$0xff] %v14319_v42  ;;  %16040 = vst [vmem:[#allocation85_spill] sm:$0xff] %v14327_v36  ;;  %v6423_v25 = vsel %vm6255_vm0, %v6418_v37, %v6422_v35  ;;  %v14331_v23 = vadd.f32 %v6422_v35, %v16041_v50  ;;  %v5904_v51 = vadd.f32 %v5770_v41, %v16042_v40  ;;  %v16050_v41 = vld [vmem:[#allocation138_spill] sm:$0xff] }
 0x400   : > { %16039 = vst [vmem:[#allocation6_spill] sm:$0xff] %v14325_v60  ;;  %v14335_v13 = vadd.f32 %v6423_v25, %v16043_v62  ;;  %v5772_v59 = vpop.f32.mrf.mxu1  ;;  %v14337_v38 = vpop.f32.mrf.mxu0  ;;  %v6424_v60 = vrot.slane %v5903_v7, 2 }
 0x401   : > { %16045 = vst [vmem:[#allocation7_spill] sm:$0xff] %v14337_v38  ;;  %v5905_v42 = vadd.f32 %v5772_v59, %v16046_v24  ;;  %v6427_v25 = vrot.slane %v5904_v51, 2  ;;  %v16051_v59 = vld [vmem:[#allocation139_spill] sm:$0xff] }
 0x402   : > { %16044 = vst [vmem:[#allocation58_spill] sm:$0xff] %v14335_v13  ;;  %v5774_v21 = vpop.f32.mrf.mxu1  ;;  %v14340_v52 = vpop.f32.mrf.mxu0  ;;  %v16059_v13 = vld [vmem:[#allocation23_spill] sm:$0xff] }
 0x403   : > { %16047 = vst [vmem:[#allocation59_spill] sm:$0xff] %v14340_v52  ;;  %v6425_v36 = vrot.slane %v5905_v42, 2  ;;  %v5906_v37 = vadd.f32 %v5774_v21, %v16048_v49  ;;  %v16052_v42 = vld [vmem:[#allocation93_spill] sm:$0xff]  ;;  %v16056_v52 = vld [vmem:[#allocation95_spill] sm:$0xff] }
 0x404   : > { %v5778_v16 = vpop.f32.mrf.mxu1  ;;  %v14343_v35 = vpop.f32.mrf.mxu0  ;;  %7842 = vmatmul.mubr.bf16.gmra.mxu1 %v15987_v33  ;;  %8684 = vmatmul.mubr.bf16.gmra.mxu0 %v16050_v41 }
 0x405   : > { %16049 = vst [vmem:[#allocation238_spill] sm:$0xff] %v14343_v35  ;;  %v6426_v50 = vsel %vm6255_vm0, %v6424_v60, %v6425_v36  ;;  %v6428_v40 = vrot.slane %v5906_v37, 2  ;;  %v5907_v62 = vadd.f32 %v5778_v16, %v13549_v47  ;;  %7851 = vmatprep.mubr.bf16.mxu1 %v15989_v55  ;;  %8693 = vmatprep.mubr.bf16.mxu0 %v16051_v59  ;;  %v16055_v35 = vld [vmem:[#allocation21_spill] sm:$0xff] }
 0x406   : > { %v14352_v7 = vadd.f32 %v6426_v50, %v16052_v42  ;;  %v5780_v49 = vpop.f32.mrf.mxu1  ;;  %v14354_v24 = vpop.f32.mrf.mxu0  ;;  %v16060_v42 = vld [vmem:[#allocation97_spill] sm:$0xff] }
 0x407   : > { %16054 = vst [vmem:[#allocation239_spill] sm:$0xff] %v14354_v24  ;;  %v6429_v33 = vsel %vm6255_vm0, %v6427_v25, %v6428_v40  ;;  %v6430_v21 = vrot.slane %v5907_v62, 2  ;;  %v5908_v51 = vadd.f32 %v5780_v49, %v16055_v35  ;;  %v16063_v62 = vld [vmem:[#allocation247_spill] sm:$0xff]  ;;  %v16064_v49 = vld [vmem:[#allocation101_spill] sm:$0xff] }
 0x408   : > { %16053 = vst [vmem:[#allocation62_spill] sm:$0xff] %v14352_v7  ;;  %v14359_v60 = vadd.f32 %v6429_v33, %v16056_v52  ;;  %v5782_v37 = vpop.f32.mrf.mxu1  ;;  %v14361_v47 = vpop.f32.mrf.mxu0 }
 0x409   : > { %16058 = vst [vmem:[#allocation90_spill] sm:$0xff] %v14361_v47  ;;  %v6431_v55 = vsel %vm6255_vm0, %v6425_v36, %v6430_v21  ;;  %v6432_v16 = vrot.slane %v5908_v51, 2  ;;  %v5909_v50 = vadd.f32 %v5782_v37, %v16059_v13  ;;  %v16067_v36 = vld [vmem:[#allocation148_spill] sm:$0xff]  ;;  %v16068_v51 = vld [vmem:[#allocation107_spill] sm:$0xff] }
 0x40a   : > { %16057 = vst [vmem:[#allocation63_spill] sm:$0xff] %v14359_v60  ;;  %v14366_v7 = vadd.f32 %v6431_v55, %v16060_v42  ;;  %v5784_v24 = vpop.f32.mrf.mxu1  ;;  %v14368_v38 = vpop.f32.mrf.mxu0  ;;  %v16072_v42 = vld [vmem:[#allocation103_spill] sm:$0xff] }
 0x40b   : > { %16062 = vst [vmem:[#allocation8_spill] sm:$0xff] %v14368_v38  ;;  %v6433_v25 = vsel %vm6255_vm0, %v6428_v40, %v6432_v16  ;;  %v6434_v35 = vrot.slane %v5909_v50, 2  ;;  %v5910_v52 = vadd.f32 %v5784_v24, %v16063_v62  ;;  %v16070_v40 = vld [vmem:[#allocation25_spill] sm:$0xff] }
 0x40c   : > { %16061 = vst [vmem:[#allocation68_spill] sm:$0xff] %v14366_v7  ;;  %v14373_v33 = vadd.f32 %v6433_v25, %v16064_v49  ;;  %v5788_v60 = vpop.f32.mrf.mxu1  ;;  %v14375_v47 = vpop.f32.mrf.mxu0  ;;  %7852 = vmatmul.mubr.bf16.gmra.mxu1 %v16005_v63  ;;  %8694 = vmatmul.mubr.bf16.gmra.mxu0 %v16067_v36  ;;  %v16071_v24 = vld [vmem:[#allocation149_spill] sm:$0xff] }
 0x40d   : > { %16066 = vst [vmem:[#allocation64_spill] sm:$0xff] %v14375_v47  ;;  %v6435_v13 = vsel %vm6255_vm0, %v6430_v21, %v6434_v35  ;;  %v14381_v37 = vadd.f32 %v6434_v35, %v16068_v51  ;;  %v6436_v55 = vrot.slane %v5910_v52, 2  ;;  %v5911_v50 = vadd.f32 %v5788_v60, %v16070_v40  ;;  %7861 = vmatprep.mubr.bf16.mxu1 %v16009_v48  ;;  %v16076_v35 = vld [vmem:[#allocation27_spill] sm:$0xff]  ;;  %v16077_v52 = vld [vmem:[#allocation105_spill] sm:$0xff]  ;;  %v16080_v40 = vld [vmem:[#allocation248_spill] sm:$0xff] }
 0x40e   : > { %16065 = vst [vmem:[#allocation91_spill] sm:$0xff] %v14373_v33  ;;  %8703 = vmatprep.mubr.bf16.mxu0 %v16071_v24  ;;  %v14387_v25 = vadd.f32 %v6435_v13, %v16072_v42  ;;  %v5790_v62 = vpop.f32.mrf.mxu1  ;;  %v14389_v49 = vpop.f32.mrf.mxu0  ;;  %v16075_v33 = vld [vmem:[#allocation111_spill] sm:$0xff]  ;;  %v16082_v7 = vld [vmem:[#allocation249_spill] sm:$0xff] }
 0x40f   : > { %16069 = vst [vmem:[#allocation69_spill] sm:$0xff] %v14381_v37  ;;  %16074 = vst [vmem:[#allocation65_spill] sm:$0xff] %v14389_v49  ;;  %v6437_v63 = vsel %vm6255_vm0, %v6432_v16, %v6436_v55  ;;  %v14393_v21 = vadd.f32 %v6436_v55, %v16075_v33  ;;  %v5912_v51 = vadd.f32 %v5790_v62, %v16076_v35  ;;  %v16084_v55 = vld [vmem:[#allocation158_spill] sm:$0xff] }
 0x410   : > { %16073 = vst [vmem:[#allocation9_spill] sm:$0xff] %v14387_v25  ;;  %v14397_v37 = vadd.f32 %v6437_v63, %v16077_v52  ;;  %v5792_v60 = vpop.f32.mrf.mxu1  ;;  %v14399_v48 = vpop.f32.mrf.mxu0  ;;  %v6438_v25 = vrot.slane %v5911_v50, 2  ;;  %v16085_v52 = vld [vmem:[#allocation29_spill] sm:$0xff]  ;;  %v16086_v50 = vld [vmem:[#allocation159_spill] sm:$0xff] }
 0x411   : > { %16079 = vst [vmem:[#allocation241_spill] sm:$0xff] %v14399_v48  ;;  %v5913_v47 = vadd.f32 %v5792_v60, %v16080_v40  ;;  %v6441_v62 = vrot.slane %v5912_v51, 2 }
 0x412   : > { %16078 = vst [vmem:[#allocation240_spill] sm:$0xff] %v14397_v37  ;;  %v5794_v13 = vpop.f32.mrf.mxu1  ;;  %v14402_v42 = vpop.f32.mrf.mxu0  ;;  %v16091_v37 = vld [vmem:[#allocation115_spill] sm:$0xff] }
 0x413   : > { %16081 = vst [vmem:[#allocation98_spill] sm:$0xff] %v14402_v42  ;;  %v6439_v49 = vrot.slane %v5913_v47, 2  ;;  %v5914_v16 = vadd.f32 %v5794_v13, %v16082_v7  ;;  %v16087_v47 = vld [vmem:[#allocation113_spill] sm:$0xff]  ;;  %v16090_v42 = vld [vmem:[#allocation31_spill] sm:$0xff] }
 0x414   : > { %v5798_v38 = vpop.f32.mrf.mxu1  ;;  %v14405_v33 = vpop.f32.mrf.mxu0  ;;  %7862 = vmatmul.mubr.bf16.gmra.mxu1 %v16021_v61  ;;  %8704 = vmatmul.mubr.bf16.gmra.mxu0 %v16084_v55 }
 0x415   : > { %16083 = vst [vmem:[#allocation11_spill] sm:$0xff] %v14405_v33  ;;  %v6440_v63 = vsel %vm6255_vm0, %v6438_v25, %v6439_v49  ;;  %v6442_v35 = vrot.slane %v5914_v16, 2  ;;  %v5915_v60 = vadd.f32 %v5798_v38, %v16085_v52  ;;  %7871 = vmatprep.mubr.bf16.mxu1 %v15643_v9  ;;  %8713 = vmatprep.mubr.bf16.mxu0 %v16086_v50  ;;  %v16094_v52 = vld [vmem:[#allocation250_spill] sm:$0xff] }
 0x416   : > { %v14414_v7 = vadd.f32 %v6440_v63, %v16087_v47  ;;  %v5800_v40 = vpop.f32.mrf.mxu1  ;;  %v14416_v13 = vpop.f32.mrf.mxu0  ;;  %v16095_v47 = vld [vmem:[#allocation117_spill] sm:$0xff] }
 0x417   : > { %16089 = vst [vmem:[#allocation52_spill] sm:$0xff] %v14416_v13  ;;  %v6443_v61 = vsel %vm6255_vm0, %v6441_v62, %v6442_v35  ;;  %v6444_v33 = vrot.slane %v5915_v60, 2  ;;  %v5916_v51 = vadd.f32 %v5800_v40, %v16090_v42 }
 0x418   : > { %16088 = vst [vmem:[#allocation99_spill] sm:$0xff] %v14414_v7  ;;  %v14421_v25 = vadd.f32 %v6443_v61, %v16091_v37  ;;  %v5802_v16 = vpop.f32.mrf.mxu1  ;;  %v14423_v38 = vpop.f32.mrf.mxu0  ;;  %v16098_v61 = vld [vmem:[#allocation251_spill] sm:$0xff] }
 0x419   : > { %16093 = vst [vmem:[#allocation70_spill] sm:$0xff] %v14423_v38  ;;  %v6445_v9 = vsel %vm6255_vm0, %v6439_v49, %v6444_v33  ;;  %v6446_v63 = vrot.slane %v5916_v51, 2  ;;  %v5917_v50 = vadd.f32 %v5802_v16, %v16094_v52  ;;  %v16099_v38 = vld [vmem:[#allocation121_spill] sm:$0xff]  ;;  %v16101_v51 = vld [vmem:[#allocation168_spill] sm:$0xff] }
 0x41a   : > { %16092 = vst [vmem:[#allocation12_spill] sm:$0xff] %v14421_v25  ;;  %v14432_v62 = vadd.f32 %v6445_v9, %v16095_v47  ;;  %v5804_v60 = vpop.f32.mrf.mxu1  ;;  %v14434_v42 = vpop.f32.mrf.mxu0  ;;  %v16102_v9 = vld [vmem:[#allocation127_spill] sm:$0xff] }
 0x41b   : > { %16097 = vst [vmem:[#allocation71_spill] sm:$0xff] %v14434_v42  ;;  %v6447_v37 = vsel %vm6255_vm0, %v6442_v35, %v6446_v63  ;;  %v6448_v40 = vrot.slane %v5917_v50, 2  ;;  %v5918_v25 = vadd.f32 %v5804_v60, %v16098_v61  ;;  %v16104_v50 = vld [vmem:[#allocation252_spill] sm:$0xff]  ;;  %v16106_v60 = vld [vmem:[#allocation123_spill] sm:$0xff] }
 0x41c   : > { %16096 = vst [vmem:[#allocation242_spill] sm:$0xff] %v14432_v62  ;;  %v14439_v7 = vadd.f32 %v6447_v37, %v16099_v38  ;;  %v7633_v13 = vpop.f32.mrf.mxu1  ;;  %7872 = vmatmul.mubr.bf16.gmra.mxu1 %v16035_v12  ;;  %v8475_v49 = vpop.f32.mrf.mxu0  ;;  %8714 = vmatmul.mubr.bf16.gmra.mxu0 %v16101_v51  ;;  %v16105_v38 = vld [vmem:[#allocation169_spill] sm:$0xff] }
 0x41d   : > { %v6449_v16 = vsel %vm6255_vm0, %v6444_v33, %v6448_v40  ;;  %v14446_v52 = vadd.f32 %v6448_v40, %v16102_v9  ;;  %v6450_v35 = vrot.slane %v5918_v25, 2  ;;  %v7912_v47 = vadd.f32 %v7633_v13, %v16104_v50  ;;  %7881 = vmatprep.mubr.bf16.mxu1 %v15532_v53  ;;  %8723 = vmatprep.mubr.bf16.mxu0 %v16105_v38  ;;  %v16110_v33 = vld [vmem:[#allocation253_spill] sm:$0xff] }
 0x41e   : > { %16100 = vst [vmem:[#allocation243_spill] sm:$0xff] %v14439_v7  ;;  %v14452_v12 = vadd.f32 %v6449_v16, %v16106_v60  ;;  %v7635_v37 = vpop.f32.mrf.mxu1  ;;  %v8477_v61 = vpop.f32.mrf.mxu0  ;;  %v16108_v7 = vld [vmem:[#allocation131_spill] sm:$0xff]  ;;  %v16111_v9 = vld [vmem:[#allocation125_spill] sm:$0xff] }
 0x41f   : > { %16103 = vst [vmem:[#allocation74_spill] sm:$0xff] %v14446_v52  ;;  %v6451_v51 = vsel %vm6255_vm0, %v6446_v63, %v6450_v35  ;;  %v14456_v62 = vadd.f32 %v6450_v35, %v16108_v7  ;;  %v7913_v40 = vadd.f32 %v7635_v37, %v16110_v33  ;;  %v8754_v50 = vadd.f32 %v8475_v49, %v7912_v47  ;;  %v16113_v38 = vld [vmem:[#allocation133_spill] sm:$0xff]  ;;  %v16114_v63 = vld [vmem:[#allocation135_spill] sm:$0xff] }
 0x420   : > { %16107 = vst [vmem:[#allocation108_spill] sm:$0xff] %v14452_v12  ;;  %v14460_v25 = vadd.f32 %v6451_v51, %v16111_v9  ;;  %v7637_v13 = vpop.f32.mrf.mxu1  ;;  %v8479_v53 = vpop.f32.mrf.mxu0  ;;  %v16115_v37 = vld [vmem:[#allocation173_spill] sm:$0xff] }
 0x421   : > { %16109 = vst [vmem:[#allocation77_spill] sm:$0xff] %v14456_v62  ;;  %v7914_v16 = vadd.f32 %v7637_v13, %v16113_v38  ;;  %v8755_v60 = vadd.f32 %v8477_v61, %v7913_v40  ;;  %v9203_v51 = vrot.slane %v8754_v50, 4  ;;  %v16116_v49 = vld [vmem:[#allocation137_spill] sm:$0xff]  ;;  %v16117_v61 = vld [vmem:[#allocation175_spill] sm:$0xff] }
 0x422   : > { %16112 = vst [vmem:[#allocation13_spill] sm:$0xff] %v14460_v25  ;;  %v7639_v12 = vpop.f32.mrf.mxu1  ;;  %v8481_v52 = vpop.f32.mrf.mxu0  ;;  %v16119_v50 = vld [vmem:[#allocation37_spill] sm:$0xff] }
 0x423   : > { %v8756_v42 = vadd.f32 %v8479_v53, %v7914_v16  ;;  %v7915_v48 = vadd.f32 %v7639_v12, %v16114_v63  ;;  %v9206_v40 = vrot.slane %v8755_v60, 4 }
 0x424   : > { %v7643_v7 = vpop.f32.mrf.mxu1  ;;  %7882 = vmatmul.mubr.bf16.gmra.mxu1 %v16050_v41  ;;  %v8485_v35 = vpop.f32.mrf.mxu0  ;;  %8724 = vmatmul.mubr.bf16.gmra.mxu0 %v16115_v37  ;;  %v16120_v37 = vld [vmem:[#allocation172_spill] sm:$0xff] }
 0x425   : > { %v9204_v33 = vrot.slane %v8756_v42, 4  ;;  %v8757_v9 = vadd.f32 %v8481_v52, %v7915_v48  ;;  %v7916_v47 = vadd.f32 %v7643_v7, %v16116_v49  ;;  %7891 = vmatprep.mubr.bf16.mxu1 %v16051_v59  ;;  %8733 = vmatprep.mubr.bf16.mxu0 %v16117_v61  ;;  %v16118_v48 = vld [vmem:[#allocation141_spill] sm:$0xff]  ;;  %v16121_v61 = vld [vmem:[#allocation39_spill] sm:$0xff] }
 0x426   : > { %v7645_v13 = vpop.f32.mrf.mxu1  ;;  %v8487_v12 = vpop.f32.mrf.mxu0 }
 0x427   : > { %v9205_v41 = vsel %vm9202_vm1, %v9203_v51, %v9204_v33  ;;  %v9207_v53 = vrot.slane %v8757_v9, 4  ;;  %v8758_v42 = vadd.f32 %v8485_v35, %v7916_v47  ;;  %v7917_v52 = vadd.f32 %v7645_v13, %v16118_v48 }
 0x428   : > { %v9511_v59 = vadd.f32 %v9205_v41, %v16119_v50  ;;  %v7647_v38 = vpop.f32.mrf.mxu1  ;;  %v8489_v16 = vpop.f32.mrf.mxu0 }
 0x429   : > { %v9208_v60 = vsel %vm9202_vm1, %v9206_v40, %v9207_v53  ;;  %v9209_v63 = vrot.slane %v8758_v42, 4  ;;  %v8759_v7 = vadd.f32 %v8487_v12, %v7917_v52  ;;  %v7918_v49 = vadd.f32 %v7647_v38, %v16120_v37 }
 0x42a   : > { %9623 = vst [vmem:[%s14475_s5] sm:$0xff] %v9511_v59  ;;  %v9512_v25 = vadd.f32 %v9208_v60, %v16121_v61  ;;  %v7649_v62 = vpop.f32.mrf.mxu1  ;;  %v8491_v51 = vpop.f32.mrf.mxu0 }
 0x42b   : > { %v9210_v35 = vsel %vm9202_vm1, %v9204_v33, %v9209_v63  ;;  %v9211_v9 = vrot.slane %v8759_v7, 4  ;;  %v8760_v47 = vadd.f32 %v8489_v16, %v7918_v49  ;;  %v7919_v13 = vadd.f32 %v7649_v62, %v13624_v6  ;;  %v16122_v33 = vld [vmem:[#allocation174_spill] sm:$0xff]  ;;  %v16123_v6 = vld [vmem:[#allocation181_spill] sm:$0xff]  ;;  %v16126_v16 = vld [vmem:[#allocation176_spill] sm:$0xff] }
 0x42c   : > { %9624 = vst [vmem:[%s14475_s5 + $0x8] sm:$0xff] %v9512_v25  ;;  %v9513_v41 = vadd.f32 %v9210_v35, %v13622_v57  ;;  %v7653_v40 = vpop.f32.mrf.mxu1  ;;  %7892 = vmatmul.mubr.bf16.gmra.mxu1 %v16067_v36  ;;  %v8495_v12 = vpop.f32.mrf.mxu0  ;;  %8734 = vmatmul.mubr.bf16.gmra.mxu0 %v15698_v54  ;;  %v16124_v57 = vld [vmem:[#allocation143_spill] sm:$0xff]  ;;  %v16125_v54 = vld [vmem:[#allocation145_spill] sm:$0xff] }
 0x42d   : > { %v9212_v42 = vsel %vm9202_vm1, %v9207_v53, %v9211_v9  ;;  %v9213_v48 = vrot.slane %v8760_v47, 4  ;;  %v8761_v52 = vadd.f32 %v8491_v51, %v7919_v13  ;;  %v7920_v50 = vadd.f32 %v7653_v40, %v16122_v33  ;;  %7901 = vmatprep.mubr.bf16.mxu1 %v16071_v24  ;;  %8743 = vmatprep.mubr.bf16.mxu0 %v16123_v6  ;;  %v16127_v7 = vld [vmem:[#allocation147_spill] sm:$0xff]  ;;  %v16129_v13 = vld [vmem:[#allocation177_spill] sm:$0xff] }
 0x42e   : > { %9625 = vst [vmem:[%s14475_s5 + $0x10] sm:$0xff] %v9513_v41  ;;  %v9514_v62 = vadd.f32 %v9212_v42, %v16124_v57  ;;  %v7655_v36 = vpop.f32.mrf.mxu1  ;;  %v8497_v25 = vpop.f32.mrf.mxu0  ;;  %v16128_v47 = vld [vmem:[#allocation179_spill] sm:$0xff]  ;;  %v16130_v33 = vld [vmem:[#allocation41_spill] sm:$0xff] }
 0x42f   : > { %v9214_v59 = vsel %vm9202_vm1, %v9209_v63, %v9213_v48  ;;  %v9517_v38 = vadd.f32 %v9213_v48, %v16125_v54  ;;  %v9215_v53 = vrot.slane %v8761_v52, 4  ;;  %v7921_v37 = vadd.f32 %v7655_v36, %v16127_v7  ;;  %v16132_v36 = vld [vmem:[#allocation182_spill] sm:$0xff]  ;;  %v16133_v7 = vld [vmem:[#allocation183_spill] sm:$0xff] }
 0x430   : > { %9626 = vst [vmem:[%s14475_s5 + $0x18] sm:$0xff] %v9514_v62  ;;  %v9515_v60 = vadd.f32 %v9214_v59, %v16126_v16  ;;  %v7657_v24 = vpop.f32.mrf.mxu1  ;;  %v8499_v49 = vpop.f32.mrf.mxu0  ;;  %v8762_v35 = vadd.f32 %v8495_v12, %v7920_v50  ;;  %v16131_v62 = vld [vmem:[#allocation185_spill] sm:$0xff] }
 0x431   : > { %9629 = vst [vmem:[%s14475_s5 + $0x30] sm:$0xf] %v9517_v38  ;;  %v9216_v61 = vsel %vm9202_vm1, %v9211_v9, %v9215_v53  ;;  %v9518_v51 = vadd.f32 %v9215_v53, %v13649_v5  ;;  %v7922_v63 = vadd.f32 %v7657_v24, %v16128_v47  ;;  %v8763_v40 = vadd.f32 %v8497_v25, %v7921_v37  ;;  %v16134_v24 = vld [vmem:[#allocation178_spill] sm:$0xff] }
 0x432   : > { %9627 = vst [vmem:[%s14475_s5 + $0x20] sm:$0xff] %v9515_v60  ;;  %v9516_v41 = vadd.f32 %v9216_v61, %v16129_v13  ;;  %v7659_v42 = vpop.f32.mrf.mxu1  ;;  %v8501_v48 = vpop.f32.mrf.mxu0  ;;  %v9217_v5 = vrot.slane %v8762_v35, 4 }
 0x433   : > { %9630 = vst [vmem:[%s14475_s5 + $0x38] sm:$0xf] %v9518_v51  ;;  %v8764_v52 = vadd.f32 %v8499_v49, %v7922_v63  ;;  %v7923_v6 = vadd.f32 %v7659_v42, %v16130_v33  ;;  %v9220_v25 = vrot.slane %v8763_v40, 4  ;;  %v16135_v63 = vld [vmem:[#allocation151_spill] sm:$0xff] }
 0x434   : > { %9628 = vst [vmem:[%s14475_s5 + $0x28] sm:$0xff] %v9516_v41  ;;  %v7663_v57 = vpop.f32.mrf.mxu1  ;;  %7902 = vmatmul.mubr.bf16.gmra.mxu1 %v16084_v55  ;;  %v8505_v9 = vpop.f32.mrf.mxu0  ;;  %8744 = vmatmul.mubr.bf16.gmra.mxu0 %v16131_v62  ;;  %v16136_v41 = vld [vmem:[#allocation180_spill] sm:$0xff] }
 0x435   : > { %v9218_v12 = vrot.slane %v8764_v52, 4  ;;  %v8765_v50 = vadd.f32 %v8501_v48, %v7923_v6  ;;  %v7924_v59 = vadd.f32 %v7663_v57, %v16132_v36 }
 0x436   : > { %v7665_v54 = vpop.f32.mrf.mxu1  ;;  %v8507_v38 = vpop.f32.mrf.mxu0 }
 0x437   : > { %v9219_v53 = vsel %vm9202_vm1, %v9217_v5, %v9218_v12  ;;  %v9221_v16 = vrot.slane %v8765_v50, 4  ;;  %v8766_v60 = vadd.f32 %v8505_v9, %v7924_v59  ;;  %v7925_v37 = vadd.f32 %v7665_v54, %v16133_v7  ;;  %v16138_v7 = vld [vmem:[#allocation45_spill] sm:$0xff] }
 0x438   : > { %v9519_v55 = vadd.f32 %v9219_v53, %v16134_v24  ;;  %v7667_v49 = vpop.f32.mrf.mxu1  ;;  %v8509_v61 = vpop.f32.mrf.mxu0 }
 0x439   : > { %v9222_v51 = vsel %vm9202_vm1, %v9220_v25, %v9221_v16  ;;  %v9223_v35 = vrot.slane %v8766_v60, 4  ;;  %v8767_v47 = vadd.f32 %v8507_v38, %v7925_v37  ;;  %v7926_v13 = vadd.f32 %v7667_v49, %v16135_v63  ;;  %v16137_v60 = vld [vmem:[#allocation153_spill] sm:$0xff] }
 0x43a   : > { %9631 = vst [vmem:[%s14475_s5 + $0x40] sm:$0xff] %v9519_v55  ;;  %v9520_v40 = vadd.f32 %v9222_v51, %v16136_v41  ;;  %v7669_v42 = vpop.f32.mrf.mxu1  ;;  %v8511_v48 = vpop.f32.mrf.mxu0 }
 0x43b   : > { %v9224_v52 = vsel %vm9202_vm1, %v9218_v12, %v9223_v35  ;;  %v9225_v33 = vrot.slane %v8767_v47, 4  ;;  %v8768_v6 = vadd.f32 %v8509_v61, %v7926_v13  ;;  %v7927_v57 = vadd.f32 %v7669_v42, %v13686_v31 }
 0x43c   : > { %9632 = vst [vmem:[%s14475_s5 + $0x48] sm:$0xff] %v9520_v40  ;;  %v9521_v9 = vadd.f32 %v9224_v52, %v13684_v29  ;;  %v7673_v62 = vpop.f32.mrf.mxu1  ;;  %v8515_v5 = vpop.f32.mrf.mxu0 }
 0x43d   : > { %v9226_v50 = vsel %vm9202_vm1, %v9221_v16, %v9225_v33  ;;  %v9227_v36 = vrot.slane %v8768_v6, 4  ;;  %v8769_v59 = vadd.f32 %v8511_v48, %v7927_v57  ;;  %v7928_v25 = vadd.f32 %v7673_v62, %v13693_v46 }
 0x43e   : > { %9633 = vst [vmem:[%s14475_s5 + $0x50] sm:$0xff] %v9521_v9  ;;  %v9522_v12 = vadd.f32 %v9226_v50, %v13691_v26  ;;  %v7675_v54 = vpop.f32.mrf.mxu1  ;;  %v8517_v38 = vpop.f32.mrf.mxu0 }
 0x43f   : > { %v9228_v31 = vsel %vm9202_vm1, %v9223_v35, %v9227_v36  ;;  %v9525_v53 = vadd.f32 %v9227_v36, %v13699_v0  ;;  %v9229_v29 = vrot.slane %v8769_v59, 4  ;;  %v7929_v37 = vadd.f32 %v7675_v54, %v16138_v7  ;;  %v16141_v36 = vld [vmem:[#allocation184_spill] sm:$0xff] }
 0x440   : > { %9634 = vst [vmem:[%s14475_s5 + $0x58] sm:$0xff] %v9522_v12  ;;  %v9523_v16 = vadd.f32 %v9228_v31, %v16137_v60  ;;  %v7677_v24 = vpop.f32.mrf.mxu1  ;;  %v8519_v46 = vpop.f32.mrf.mxu0  ;;  %v8770_v49 = vadd.f32 %v8515_v5, %v7928_v25  ;;  %v16140_v5 = vld [vmem:[#allocation157_spill] sm:$0xff] }
 0x441   : > { %9637 = vst [vmem:[%s14475_s5 + $0x70] sm:$0xf] %v9525_v53  ;;  %v9230_v26 = vsel %vm9202_vm1, %v9225_v33, %v9229_v29  ;;  %v9526_v55 = vadd.f32 %v9229_v29, %v13711_v2  ;;  %v7930_v61 = vadd.f32 %v7677_v24, %v13717_v27  ;;  %v8771_v51 = vadd.f32 %v8517_v38, %v7929_v37  ;;  %v16139_v2 = vld [vmem:[#allocation155_spill] sm:$0xff]  ;;  %v16142_v31 = vld [vmem:[#allocation161_spill] sm:$0xff]  ;;  %v16143_v29 = vld [vmem:[#allocation186_spill] sm:$0xff] }
 0x442   : > { %9635 = vst [vmem:[%s14475_s5 + $0x60] sm:$0xff] %v9523_v16  ;;  %v9524_v0 = vadd.f32 %v9230_v26, %v13715_v56  ;;  %v7679_v35 = vpop.f32.mrf.mxu1  ;;  %v8521_v47 = vpop.f32.mrf.mxu0  ;;  %v9231_v42 = vrot.slane %v8770_v49, 4 }
 0x443   : > { %9638 = vst [vmem:[%s14475_s5 + $0x78] sm:$0xf] %v9526_v55  ;;  %v8772_v63 = vadd.f32 %v8519_v46, %v7930_v61  ;;  %v7931_v13 = vadd.f32 %v7679_v35, %v13720_v3  ;;  %v9234_v27 = vrot.slane %v8771_v51, 4 }
 0x444   : > { %9636 = vst [vmem:[%s14475_s5 + $0x68] sm:$0xff] %v9524_v0  ;;  %v7683_v41 = vpop.f32.mrf.mxu1  ;;  %v8525_v40 = vpop.f32.mrf.mxu0 }
 0x445   : > { %v9232_v48 = vrot.slane %v8772_v63, 4  ;;  %v8773_v52 = vadd.f32 %v8521_v47, %v7931_v13  ;;  %v7932_v33 = vadd.f32 %v7683_v41, %v16139_v2  ;;  %v16144_v63 = vld [vmem:[#allocation187_spill] sm:$0xff] }
 0x446   : > { %v7685_v6 = vpop.f32.mrf.mxu1  ;;  %v8527_v57 = vpop.f32.mrf.mxu0 }
 0x447   : > { %v9233_v56 = vsel %vm9202_vm1, %v9231_v42, %v9232_v48  ;;  %v9235_v9 = vrot.slane %v8773_v52, 4  ;;  %v8774_v62 = vadd.f32 %v8525_v40, %v7932_v33  ;;  %v7933_v50 = vadd.f32 %v7685_v6, %v16140_v5  ;;  %v16145_v42 = vld [vmem:[#allocation163_spill] sm:$0xff]  ;;  %v16146_v52 = vld [vmem:[#allocation188_spill] sm:$0xff]  ;;  %v16148_v5 = vld [vmem:[#allocation165_spill] sm:$0xff] }
 0x448   : > { %v9527_v3 = vadd.f32 %v9233_v56, %v16141_v36  ;;  %v7687_v59 = vpop.f32.mrf.mxu1  ;;  %v8529_v25 = vpop.f32.mrf.mxu0  ;;  %v16147_v33 = vld [vmem:[#allocation191_spill] sm:$0xff] }
 0x449   : > { %v9236_v12 = vsel %vm9202_vm1, %v9234_v27, %v9235_v9  ;;  %v9237_v54 = vrot.slane %v8774_v62, 4  ;;  %v8775_v38 = vadd.f32 %v8527_v57, %v7933_v50  ;;  %v7934_v53 = vadd.f32 %v7687_v59, %v16142_v31 }
 0x44a   : > { %9639 = vst [vmem:[%s14475_s5 + $0x80] sm:$0xff] %v9527_v3  ;;  %v9528_v60 = vadd.f32 %v9236_v12, %v16143_v29  ;;  %v7689_v16 = vpop.f32.mrf.mxu1  ;;  %v8531_v7 = vpop.f32.mrf.mxu0  ;;  %v16149_v12 = vld [vmem:[#allocation189_spill] sm:$0xff] }
 0x44b   : > { %v9238_v37 = vsel %vm9202_vm1, %v9232_v48, %v9237_v54  ;;  %v9239_v24 = vrot.slane %v8775_v38, 4  ;;  %v8776_v46 = vadd.f32 %v8529_v25, %v7934_v53  ;;  %v7935_v26 = vadd.f32 %v7689_v16, %v13748_v28 }
 0x44c   : > { %9640 = vst [vmem:[%s14475_s5 + $0x88] sm:$0xff] %v9528_v60  ;;  %v9529_v55 = vadd.f32 %v9238_v37, %v13746_v1  ;;  %v7693_v49 = vpop.f32.mrf.mxu1  ;;  %v8535_v61 = vpop.f32.mrf.mxu0 }
 0x44d   : > { %v9240_v0 = vsel %vm9202_vm1, %v9235_v9, %v9239_v24  ;;  %v9241_v51 = vrot.slane %v8776_v46, 4  ;;  %v8777_v35 = vadd.f32 %v8531_v7, %v7935_v26  ;;  %v7936_v47 = vadd.f32 %v7693_v49, %v13755_v4 }
 0x44e   : > { %9641 = vst [vmem:[%s14475_s5 + $0x90] sm:$0xff] %v9529_v55  ;;  %v9530_v13 = vadd.f32 %v9240_v0, %v16144_v63  ;;  %v7695_v41 = vpop.f32.mrf.mxu1  ;;  %v8537_v40 = vpop.f32.mrf.mxu0  ;;  %v16151_v55 = vld [vmem:[#allocation167_spill] sm:$0xff] }
 0x44f   : > { %v9242_v28 = vsel %vm9202_vm1, %v9237_v54, %v9241_v51  ;;  %v9533_v48 = vadd.f32 %v9241_v51, %v16145_v42  ;;  %v9243_v1 = vrot.slane %v8777_v35, 4  ;;  %v7937_v27 = vadd.f32 %v7695_v41, %v16147_v33  ;;  %v16153_v41 = vld [vmem:[#allocation194_spill] sm:$0xff] }
 0x450   : > { %9642 = vst [vmem:[%s14475_s5 + $0x98] sm:$0xff] %v9530_v13  ;;  %v9531_v2 = vadd.f32 %v9242_v28, %v16146_v52  ;;  %v7697_v6 = vpop.f32.mrf.mxu1  ;;  %v8539_v4 = vpop.f32.mrf.mxu0  ;;  %v8778_v9 = vadd.f32 %v8535_v61, %v7936_v47  ;;  %v16152_v61 = vld [vmem:[#allocation190_spill] sm:$0xff]  ;;  %v16154_v28 = vld [vmem:[#allocation193_spill] sm:$0xff] }
 0x451   : > { %9645 = vst [vmem:[%s14475_s5 + $0xb0] sm:$0xf] %v9533_v48  ;;  %v9244_v57 = vsel %vm9202_vm1, %v9239_v24, %v9243_v1  ;;  %v9534_v56 = vadd.f32 %v9243_v1, %v13773_v39  ;;  %v7938_v62 = vadd.f32 %v7697_v6, %v13779_v17  ;;  %v8779_v36 = vadd.f32 %v8537_v40, %v7937_v27  ;;  %v16150_v39 = vld [vmem:[#allocation192_spill] sm:$0xff] }
 0x452   : > { %9643 = vst [vmem:[%s14475_s5 + $0xa0] sm:$0xff] %v9531_v2  ;;  %v9532_v50 = vadd.f32 %v9244_v57, %v16148_v5  ;;  %v7699_v3 = vpop.f32.mrf.mxu1  ;;  %v8541_v59 = vpop.f32.mrf.mxu0  ;;  %v9245_v53 = vrot.slane %v8778_v9, 4 }
 0x453   : > { %9646 = vst [vmem:[%s14475_s5 + $0xb8] sm:$0xf] %v9534_v56  ;;  %v8780_v25 = vadd.f32 %v8539_v4, %v7938_v62  ;;  %v7939_v54 = vadd.f32 %v7699_v3, %v16149_v12  ;;  %v9248_v17 = vrot.slane %v8779_v36, 4 }
 0x454   : > { %9644 = vst [vmem:[%s14475_s5 + $0xa8] sm:$0xff] %v9532_v50  ;;  %v7703_v38 = vpop.f32.mrf.mxu1  ;;  %v8545_v31 = vpop.f32.mrf.mxu0  ;;  %v16155_v50 = vld [vmem:[#allocation195_spill] sm:$0xff] }
 0x455   : > { %v9246_v29 = vrot.slane %v8780_v25, 4  ;;  %v8781_v60 = vadd.f32 %v8541_v59, %v7939_v54  ;;  %v7940_v16 = vadd.f32 %v7703_v38, %v16150_v39  ;;  %v16156_v25 = vld [vmem:[#allocation171_spill] sm:$0xff]  ;;  %v16157_v54 = vld [vmem:[#allocation196_spill] sm:$0xff] }
 0x456   : > { %v7705_v7 = vpop.f32.mrf.mxu1  ;;  %v8547_v37 = vpop.f32.mrf.mxu0 }
 0x457   : > { %v9247_v24 = vsel %vm9202_vm1, %v9245_v53, %v9246_v29  ;;  %v9249_v46 = vrot.slane %v8781_v60, 4  ;;  %v8782_v26 = vadd.f32 %v8545_v31, %v7940_v16  ;;  %v7941_v49 = vadd.f32 %v7705_v7, %v16151_v55  ;;  %v16158_v31 = vld [vmem:[#allocation199_spill] sm:$0xff]  ;;  %v16159_v7 = vld [vmem:[#allocation33_spill] sm:$0xff] }
 0x458   : > { %v9535_v0 = vadd.f32 %v9247_v24, %v16152_v61  ;;  %v7707_v51 = vpop.f32.mrf.mxu1  ;;  %v8549_v35 = vpop.f32.mrf.mxu0 }
 0x459   : > { %v9250_v47 = vsel %vm9202_vm1, %v9248_v17, %v9249_v46  ;;  %v9251_v63 = vrot.slane %v8782_v26, 4  ;;  %v8783_v13 = vadd.f32 %v8547_v37, %v7941_v49  ;;  %v7942_v40 = vadd.f32 %v7707_v51, %v16153_v41  ;;  %v16160_v49 = vld [vmem:[#allocation197_spill] sm:$0xff] }
 0x45a   : > { %9647 = vst [vmem:[%s14475_s5 + $0xc0] sm:$0xff] %v9535_v0  ;;  %v9536_v42 = vadd.f32 %v9250_v47, %v16154_v28  ;;  %v7709_v48 = vpop.f32.mrf.mxu1  ;;  %v8551_v1 = vpop.f32.mrf.mxu0 }
 0x45b   : > { %v9252_v52 = vsel %vm9202_vm1, %v9246_v29, %v9251_v63  ;;  %v9253_v2 = vrot.slane %v8783_v13, 4  ;;  %v8784_v33 = vadd.f32 %v8549_v35, %v7942_v40  ;;  %v7943_v27 = vadd.f32 %v7709_v48, %v13810_v44 }
 0x45c   : > { %9648 = vst [vmem:[%s14475_s5 + $0xc8] sm:$0xff] %v9536_v42  ;;  %v9537_v6 = vadd.f32 %v9252_v52, %v13808_v43  ;;  %v7713_v4 = vpop.f32.mrf.mxu1  ;;  %v8555_v57 = vpop.f32.mrf.mxu0 }
 0x45d   : > { %v9254_v56 = vsel %vm9202_vm1, %v9249_v46, %v9253_v2  ;;  %v9255_v9 = vrot.slane %v8784_v33, 4  ;;  %v8785_v62 = vadd.f32 %v8551_v1, %v7943_v27  ;;  %v7944_v5 = vadd.f32 %v7713_v4, %v13817_v32  ;;  %v16162_v1 = vld [vmem:[#allocation35_spill] sm:$0xff] }
 0x45e   : > { %9649 = vst [vmem:[%s14475_s5 + $0xd0] sm:$0xff] %v9537_v6  ;;  %v9538_v36 = vadd.f32 %v9254_v56, %v16155_v50  ;;  %v7715_v3 = vpop.f32.mrf.mxu1  ;;  %v8557_v59 = vpop.f32.mrf.mxu0 }
 0x45f   : > { %v9256_v44 = vsel %vm9202_vm1, %v9251_v63, %v9255_v9  ;;  %v9541_v12 = vadd.f32 %v9255_v9, %v16156_v25  ;;  %v9257_v43 = vrot.slane %v8785_v62, 4  ;;  %v7945_v53 = vadd.f32 %v7715_v3, %v16158_v31  ;;  %v16164_v9 = vld [vmem:[#allocation43_spill] sm:$0xff] }
 0x460   : > { %9650 = vst [vmem:[%s14475_s5 + $0xd8] sm:$0xff] %v9538_v36  ;;  %v9539_v38 = vadd.f32 %v9256_v44, %v16157_v54  ;;  %v7717_v29 = vpop.f32.mrf.mxu1  ;;  %v8559_v32 = vpop.f32.mrf.mxu0  ;;  %v8786_v16 = vadd.f32 %v8555_v57, %v7944_v5  ;;  %v16165_v5 = vld [vmem:[#allocation129_spill] sm:$0xff] }
 0x461   : > { %9653 = vst [vmem:[%s14475_s5 + $0xf0] sm:$0xf] %v9541_v12  ;;  %v9258_v60 = vsel %vm9202_vm1, %v9253_v2, %v9257_v43  ;;  %v9542_v39 = vadd.f32 %v9257_v43, %v13835_v18  ;;  %v7946_v17 = vadd.f32 %v7717_v29, %v13841_v45  ;;  %v8787_v24 = vadd.f32 %v8557_v59, %v7945_v53  ;;  %v16161_v18 = vld [vmem:[#allocation200_spill] sm:$0xff]  ;;  %v16163_v2 = vld [vmem:[#allocation198_spill] sm:$0xff] }
 0x462   : > { %9651 = vst [vmem:[%s14475_s5 + $0xe0] sm:$0xff] %v9539_v38  ;;  %v9540_v37 = vadd.f32 %v9258_v60, %v16159_v7  ;;  %v7719_v46 = vpop.f32.mrf.mxu1  ;;  %v8561_v26 = vpop.f32.mrf.mxu0  ;;  %v9259_v35 = vrot.slane %v8786_v16, 4 }
 0x463   : > { %9654 = vst [vmem:[%s14475_s5 + $0xf8] sm:$0xf] %v9542_v39  ;;  %v8788_v55 = vadd.f32 %v8559_v32, %v7946_v17  ;;  %v7947_v61 = vadd.f32 %v7719_v46, %v16160_v49  ;;  %v9262_v45 = vrot.slane %v8787_v24, 4  ;;  %v16166_v32 = vld [vmem:[#allocation201_spill] sm:$0xff]  ;;  %v16167_v39 = vld [vmem:[#allocation18_spill] sm:$0xff] }
 0x464   : > { %9652 = vst [vmem:[%s14475_s5 + $0xe8] sm:$0xff] %v9540_v37  ;;  %v7723_v0 = vpop.f32.mrf.mxu1  ;;  %v8565_v51 = vpop.f32.mrf.mxu0  ;;  %v16168_v37 = vld [vmem:[#allocation94_spill] sm:$0xff] }
 0x465   : > { %v9260_v47 = vrot.slane %v8788_v55, 4  ;;  %v8789_v63 = vadd.f32 %v8561_v26, %v7947_v61  ;;  %v7948_v13 = vadd.f32 %v7723_v0, %v16161_v18  ;;  %v16169_v46 = vld [vmem:[#allocation202_spill] sm:$0xff]  ;;  %v16170_v55 = vld [vmem:[#allocation96_spill] sm:$0xff]  ;;  %v16171_v18 = vld [vmem:[#allocation203_spill] sm:$0xff] }
 0x466   : > { %v7725_v41 = vpop.f32.mrf.mxu1  ;;  %v8567_v40 = vpop.f32.mrf.mxu0 }
 0x467   : > { %v9261_v28 = vsel %vm9202_vm1, %v9259_v35, %v9260_v47  ;;  %v9263_v42 = vrot.slane %v8789_v63, 4  ;;  %v8790_v48 = vadd.f32 %v8565_v51, %v7948_v13  ;;  %v7949_v52 = vadd.f32 %v7725_v41, %v16162_v1 }
 0x468   : > { %v9543_v33 = vadd.f32 %v9261_v28, %v16163_v2  ;;  %v7727_v27 = vpop.f32.mrf.mxu1  ;;  %v8569_v6 = vpop.f32.mrf.mxu0 }
 0x469   : > { %v9264_v4 = vsel %vm9202_vm1, %v9262_v45, %v9263_v42  ;;  %v9265_v57 = vrot.slane %v8790_v48, 4  ;;  %v8791_v56 = vadd.f32 %v8567_v40, %v7949_v52  ;;  %v7950_v62 = vadd.f32 %v7727_v27, %v16164_v9 }
 0x46a   : > { %9655 = vst [vmem:[%s14475_s5 + $0x100] sm:$0xff] %v9543_v33  ;;  %v9544_v50 = vadd.f32 %v9264_v4, %v16165_v5  ;;  %v7729_v36 = vpop.f32.mrf.mxu1  ;;  %v8571_v3 = vpop.f32.mrf.mxu0  ;;  %v16174_v5 = vld [vmem:[#allocation10_spill] sm:$0xff] }
 0x46b   : > { %v9266_v59 = vsel %vm9202_vm1, %v9260_v47, %v9265_v57  ;;  %v9267_v44 = vrot.slane %v8791_v56, 4  ;;  %v8792_v25 = vadd.f32 %v8569_v6, %v7950_v62  ;;  %v7951_v12 = vadd.f32 %v7729_v36, %v13872_v30  ;;  %v16175_v36 = vld [vmem:[#allocation204_spill] sm:$0xff] }
 0x46c   : > { %9656 = vst [vmem:[%s14475_s5 + $0x108] sm:$0xff] %v9544_v50  ;;  %v9545_v43 = vadd.f32 %v9266_v59, %v13870_v34  ;;  %v7733_v54 = vpop.f32.mrf.mxu1  ;;  %v8575_v38 = vpop.f32.mrf.mxu0 }
 0x46d   : > { %v9268_v31 = vsel %vm9202_vm1, %v9263_v42, %v9267_v44  ;;  %v9269_v53 = vrot.slane %v8792_v25, 4  ;;  %v8793_v29 = vadd.f32 %v8571_v3, %v7951_v12  ;;  %v7952_v60 = vadd.f32 %v7733_v54, %v16166_v32  ;;  %v16172_v42 = vld [vmem:[#allocation100_spill] sm:$0xff] }
 0x46e   : > { %9657 = vst [vmem:[%s14475_s5 + $0x110] sm:$0xff] %v9545_v43  ;;  %v9546_v16 = vadd.f32 %v9268_v31, %v16167_v39  ;;  %v7735_v17 = vpop.f32.mrf.mxu1  ;;  %v8577_v7 = vpop.f32.mrf.mxu0  ;;  %v16176_v54 = vld [vmem:[#allocation20_spill] sm:$0xff]  ;;  %v16177_v31 = vld [vmem:[#allocation22_spill] sm:$0xff] }
 0x46f   : > { %v9270_v30 = vsel %vm9202_vm1, %v9265_v57, %v9269_v53  ;;  %v9549_v24 = vadd.f32 %v9269_v53, %v16168_v37  ;;  %v9271_v34 = vrot.slane %v8793_v29, 4  ;;  %v7953_v49 = vadd.f32 %v7735_v17, %v16170_v55  ;;  %v16178_v55 = vld [vmem:[#allocation205_spill] sm:$0xff] }
 0x470   : > { %9658 = vst [vmem:[%s14475_s5 + $0x118] sm:$0xff] %v9546_v16  ;;  %v9547_v26 = vadd.f32 %v9270_v30, %v16169_v46  ;;  %v7737_v61 = vpop.f32.mrf.mxu1  ;;  %v8579_v0 = vpop.f32.mrf.mxu0  ;;  %v8794_v47 = vadd.f32 %v8575_v38, %v7952_v60 }
 0x471   : > { %9661 = vst [vmem:[%s14475_s5 + $0x130] sm:$0xf] %v9549_v24  ;;  %v9272_v51 = vsel %vm9202_vm1, %v9267_v44, %v9271_v34  ;;  %v9550_v35 = vadd.f32 %v9271_v34, %v13897_v19  ;;  %v7954_v63 = vadd.f32 %v7737_v61, %v13903_v14  ;;  %v8795_v45 = vadd.f32 %v8577_v7, %v7953_v49  ;;  %v16173_v19 = vld [vmem:[#allocation102_spill] sm:$0xff] }
 0x472   : > { %9659 = vst [vmem:[%s14475_s5 + $0x120] sm:$0xff] %v9547_v26  ;;  %v9548_v13 = vadd.f32 %v9272_v51, %v16171_v18  ;;  %v7739_v41 = vpop.f32.mrf.mxu1  ;;  %v8581_v40 = vpop.f32.mrf.mxu0  ;;  %v9273_v2 = vrot.slane %v8794_v47, 4  ;;  %v16179_v51 = vld [vmem:[#allocation206_spill] sm:$0xff]  ;;  %v16180_v47 = vld [vmem:[#allocation207_spill] sm:$0xff] }
 0x473   : > { %9662 = vst [vmem:[%s14475_s5 + $0x138] sm:$0xf] %v9550_v35  ;;  %v8796_v28 = vadd.f32 %v8579_v0, %v7954_v63  ;;  %v7955_v48 = vadd.f32 %v7739_v41, %v16172_v42  ;;  %v9276_v14 = vrot.slane %v8795_v45, 4  ;;  %v16181_v18 = vld [vmem:[#allocation46_spill] sm:$0xff] }
 0x474   : > { %9660 = vst [vmem:[%s14475_s5 + $0x128] sm:$0xff] %v9548_v13  ;;  %v7743_v1 = vpop.f32.mrf.mxu1  ;;  %v8585_v52 = vpop.f32.mrf.mxu0 }
 0x475   : > { %v9274_v33 = vrot.slane %v8796_v28, 4  ;;  %v8797_v27 = vadd.f32 %v8581_v40, %v7955_v48  ;;  %v7956_v6 = vadd.f32 %v7743_v1, %v16173_v19  ;;  %v16182_v40 = vld [vmem:[#allocation104_spill] sm:$0xff]  ;;  %v16183_v48 = vld [vmem:[#allocation106_spill] sm:$0xff] }
 0x476   : > { %v7745_v4 = vpop.f32.mrf.mxu1  ;;  %v8587_v57 = vpop.f32.mrf.mxu0 }
 0x477   : > { %v9275_v56 = vsel %vm9202_vm1, %v9273_v2, %v9274_v33  ;;  %v9277_v9 = vrot.slane %v8797_v27, 4  ;;  %v8798_v62 = vadd.f32 %v8585_v52, %v7956_v6  ;;  %v7957_v50 = vadd.f32 %v7745_v4, %v16174_v5  ;;  %v16184_v52 = vld [vmem:[#allocation208_spill] sm:$0xff] }
 0x478   : > { %v9551_v3 = vadd.f32 %v9275_v56, %v16175_v36  ;;  %v7747_v59 = vpop.f32.mrf.mxu1  ;;  %v8589_v44 = vpop.f32.mrf.mxu0 }
 0x479   : > { %v9278_v25 = vsel %vm9202_vm1, %v9276_v14, %v9277_v9  ;;  %v9279_v12 = vrot.slane %v8798_v62, 4  ;;  %v8799_v43 = vadd.f32 %v8587_v57, %v7957_v50  ;;  %v7958_v38 = vadd.f32 %v7747_v59, %v16176_v54  ;;  %v16185_v14 = vld [vmem:[#allocation110_spill] sm:$0xff]  ;;  %v16186_v50 = vld [vmem:[#allocation209_spill] sm:$0xff]  ;;  %v16187_v54 = vld [vmem:[#allocation47_spill] sm:$0xff] }
 0x47a   : > { %9663 = vst [vmem:[%s14475_s5 + $0x140] sm:$0xff] %v9551_v3  ;;  %v9552_v53 = vadd.f32 %v9278_v25, %v16177_v31  ;;  %v7749_v29 = vpop.f32.mrf.mxu1  ;;  %v8591_v32 = vpop.f32.mrf.mxu0  ;;  %v16188_v31 = vld [vmem:[#allocation24_spill] sm:$0xff] }
 0x47b   : > { %v9280_v60 = vsel %vm9202_vm1, %v9274_v33, %v9279_v12  ;;  %v9281_v39 = vrot.slane %v8799_v43, 4  ;;  %v8800_v16 = vadd.f32 %v8589_v44, %v7958_v38  ;;  %v7959_v17 = vadd.f32 %v7749_v29, %v13934_v10 }
 0x47c   : > { %9664 = vst [vmem:[%s14475_s5 + $0x148] sm:$0xff] %v9552_v53  ;;  %v9553_v7 = vadd.f32 %v9280_v60, %v13932_v15  ;;  %v7753_v30 = vpop.f32.mrf.mxu1  ;;  %v8595_v37 = vpop.f32.mrf.mxu0 }
 0x47d   : > { %v9282_v24 = vsel %vm9202_vm1, %v9277_v9, %v9281_v39  ;;  %v9283_v34 = vrot.slane %v8800_v16, 4  ;;  %v8801_v46 = vadd.f32 %v8591_v32, %v7959_v17  ;;  %v7960_v26 = vadd.f32 %v7753_v30, %v13941_v58  ;;  %v16189_v17 = vld [vmem:[#allocation112_spill] sm:$0xff]  ;;  %v16190_v30 = vld [vmem:[#allocation114_spill] sm:$0xff] }
 0x47e   : > { %9665 = vst [vmem:[%s14475_s5 + $0x150] sm:$0xff] %v9553_v7  ;;  %v9554_v49 = vadd.f32 %v9282_v24, %v16178_v55  ;;  %v7755_v61 = vpop.f32.mrf.mxu1  ;;  %v8597_v0 = vpop.f32.mrf.mxu0 }
 0x47f   : > { %v9284_v10 = vsel %vm9202_vm1, %v9279_v12, %v9283_v34  ;;  %v9557_v35 = vadd.f32 %v9283_v34, %v16179_v51  ;;  %v9285_v15 = vrot.slane %v8801_v46, 4  ;;  %v7961_v13 = vadd.f32 %v7755_v61, %v16181_v18  ;;  %v16193_v18 = vld [vmem:[#allocation211_spill] sm:$0xff] }
 0x480   : > { %9666 = vst [vmem:[%s14475_s5 + $0x158] sm:$0xff] %v9554_v49  ;;  %v9555_v63 = vadd.f32 %v9284_v10, %v16180_v47  ;;  %v7757_v45 = vpop.f32.mrf.mxu1  ;;  %v8599_v58 = vpop.f32.mrf.mxu0  ;;  %v8802_v42 = vadd.f32 %v8595_v37, %v7960_v26  ;;  %v16191_v49 = vld [vmem:[#allocation210_spill] sm:$0xff] }
 0x481   : > { %9669 = vst [vmem:[%s14475_s5 + $0x170] sm:$0xf] %v9557_v35  ;;  %v9286_v41 = vsel %vm9202_vm1, %v9281_v39, %v9285_v15  ;;  %v9558_v28 = vadd.f32 %v9285_v15, %v16182_v40  ;;  %v7962_v1 = vadd.f32 %v7757_v45, %v16183_v48  ;;  %v8803_v33 = vadd.f32 %v8597_v0, %v7961_v13  ;;  %v16192_v0 = vld [vmem:[#allocation116_spill] sm:$0xff]  ;;  %v16194_v45 = vld [vmem:[#allocation26_spill] sm:$0xff] }
 0x482   : > { %9667 = vst [vmem:[%s14475_s5 + $0x160] sm:$0xff] %v9555_v63  ;;  %v9556_v2 = vadd.f32 %v9286_v41, %v16184_v52  ;;  %v7759_v27 = vpop.f32.mrf.mxu1  ;;  %v8601_v19 = vpop.f32.mrf.mxu0  ;;  %v9287_v9 = vrot.slane %v8802_v42, 4  ;;  %v16195_v42 = vld [vmem:[#allocation212_spill] sm:$0xff]  ;;  %v16196_v52 = vld [vmem:[#allocation49_spill] sm:$0xff] }
 0x483   : > { %9670 = vst [vmem:[%s14475_s5 + $0x178] sm:$0xf] %v9558_v28  ;;  %v8804_v6 = vadd.f32 %v8599_v58, %v7962_v1  ;;  %v7963_v4 = vadd.f32 %v7759_v27, %v16185_v14  ;;  %v9290_v3 = vrot.slane %v8803_v33, 4  ;;  %v16197_v33 = vld [vmem:[#allocation213_spill] sm:$0xff] }
 0x484   : > { %9668 = vst [vmem:[%s14475_s5 + $0x168] sm:$0xff] %v9556_v2  ;;  %v7763_v57 = vpop.f32.mrf.mxu1  ;;  %v8605_v56 = vpop.f32.mrf.mxu0 }
 0x485   : > { %v9288_v62 = vrot.slane %v8804_v6, 4  ;;  %v8805_v5 = vadd.f32 %v8601_v19, %v7963_v4  ;;  %v7964_v36 = vadd.f32 %v7763_v57, %v16186_v50  ;;  %v16198_v4 = vld [vmem:[#allocation50_spill] sm:$0xff] }
 0x486   : > { %v7765_v59 = vpop.f32.mrf.mxu1  ;;  %v8607_v44 = vpop.f32.mrf.mxu0 }
 0x487   : > { %v9289_v25 = vsel %vm9202_vm1, %v9287_v9, %v9288_v62  ;;  %v9291_v12 = vrot.slane %v8805_v5, 4  ;;  %v8806_v43 = vadd.f32 %v8605_v56, %v7964_v36  ;;  %v7965_v38 = vadd.f32 %v7765_v59, %v16187_v54  ;;  %v16199_v9 = vld [vmem:[#allocation28_spill] sm:$0xff] }
 0x488   : > { %v9559_v53 = vadd.f32 %v9289_v25, %v16188_v31  ;;  %v7767_v29 = vpop.f32.mrf.mxu1  ;;  %v8609_v32 = vpop.f32.mrf.mxu0  ;;  %v16200_v5 = vld [vmem:[#allocation120_spill] sm:$0xff]  ;;  %v16201_v25 = vld [vmem:[#allocation122_spill] sm:$0xff] }
 0x489   : > { %v9292_v60 = vsel %vm9202_vm1, %v9290_v3, %v9291_v12  ;;  %v9293_v39 = vrot.slane %v8806_v43, 4  ;;  %v8807_v16 = vadd.f32 %v8607_v44, %v7965_v38  ;;  %v7966_v7 = vadd.f32 %v7767_v29, %v16189_v17  ;;  %v16202_v29 = vld [vmem:[#allocation214_spill] sm:$0xff] }
 0x48a   : > { %9671 = vst [vmem:[%s14475_s5 + $0x180] sm:$0xff] %v9559_v53  ;;  %v9560_v37 = vadd.f32 %v9292_v60, %v16190_v30  ;;  %v7769_v24 = vpop.f32.mrf.mxu1  ;;  %v8611_v34 = vpop.f32.mrf.mxu0 }
 0x48b   : > { %v9294_v46 = vsel %vm9202_vm1, %v9288_v62, %v9293_v39  ;;  %v9295_v26 = vrot.slane %v8807_v16, 4  ;;  %v8808_v55 = vadd.f32 %v8609_v32, %v7966_v7  ;;  %v7967_v61 = vadd.f32 %v7769_v24, %v16191_v49 }
 0x48c   : > { %9672 = vst [vmem:[%s14475_s5 + $0x188] sm:$0xff] %v9560_v37  ;;  %v9561_v10 = vadd.f32 %v9294_v46, %v16192_v0  ;;  %v7773_v51 = vpop.f32.mrf.mxu1  ;;  %v8615_v35 = vpop.f32.mrf.mxu0  ;;  %v16203_v37 = vld [vmem:[#allocation51_spill] sm:$0xff] }
 0x48d   : > { %v9296_v15 = vsel %vm9202_vm1, %v9291_v12, %v9295_v26  ;;  %v9297_v47 = vrot.slane %v8808_v55, 4  ;;  %v8809_v63 = vadd.f32 %v8611_v34, %v7967_v61  ;;  %v7968_v13 = vadd.f32 %v7773_v51, %v16193_v18  ;;  %v16204_v34 = vld [vmem:[#allocation30_spill] sm:$0xff] }
 0x48e   : > { %9673 = vst [vmem:[%s14475_s5 + $0x190] sm:$0xff] %v9561_v10  ;;  %v9562_v58 = vadd.f32 %v9296_v15, %v16194_v45  ;;  %v7775_v41 = vpop.f32.mrf.mxu1  ;;  %v8617_v40 = vpop.f32.mrf.mxu0  ;;  %v16205_v10 = vld [vmem:[#allocation124_spill] sm:$0xff] }
 0x48f   : > { %v9298_v28 = vsel %vm9202_vm1, %v9293_v39, %v9297_v47  ;;  %v9565_v48 = vadd.f32 %v9297_v47, %v16195_v42  ;;  %v9299_v1 = vrot.slane %v8809_v63, 4  ;;  %v7969_v27 = vadd.f32 %v7775_v41, %v16197_v33  ;;  %v16209_v33 = vld [vmem:[#allocation216_spill] sm:$0xff] }
 0x490   : > { %9674 = vst [vmem:[%s14475_s5 + $0x198] sm:$0xff] %v9562_v58  ;;  %v9563_v2 = vadd.f32 %v9298_v28, %v16196_v52  ;;  %v7777_v19 = vpop.f32.mrf.mxu1  ;;  %v8619_v6 = vpop.f32.mrf.mxu0  ;;  %v8810_v56 = vadd.f32 %v8615_v35, %v7968_v13  ;;  %v16206_v35 = vld [vmem:[#allocation130_spill] sm:$0xff] }
 0x491   : > { %9677 = vst [vmem:[%s14475_s5 + $0x1b0] sm:$0xf] %v9565_v48  ;;  %v9300_v14 = vsel %vm9202_vm1, %v9295_v26, %v9299_v1  ;;  %v9566_v57 = vadd.f32 %v9299_v1, %v16198_v4  ;;  %v7970_v62 = vadd.f32 %v7777_v19, %v16199_v9  ;;  %v8811_v36 = vadd.f32 %v8617_v40, %v7969_v27  ;;  %v16207_v58 = vld [vmem:[#allocation126_spill] sm:$0xff]  ;;  %v16208_v40 = vld [vmem:[#allocation32_spill] sm:$0xff]  ;;  %v16210_v19 = vld [vmem:[#allocation215_spill] sm:$0xff] }
 0x492   : > { %9675 = vst [vmem:[%s14475_s5 + $0x1a0] sm:$0xff] %v9563_v2  ;;  %v9564_v50 = vadd.f32 %v9300_v14, %v16200_v5  ;;  %v7779_v3 = vpop.f32.mrf.mxu1  ;;  %v8621_v59 = vpop.f32.mrf.mxu0  ;;  %v9301_v38 = vrot.slane %v8810_v56, 4  ;;  %v16211_v56 = vld [vmem:[#allocation53_spill] sm:$0xff] }
 0x493   : > { %9678 = vst [vmem:[%s14475_s5 + $0x1b8] sm:$0xf] %v9566_v57  ;;  %v8812_v44 = vadd.f32 %v8619_v6, %v7970_v62  ;;  %v7971_v12 = vadd.f32 %v7779_v3, %v16201_v25  ;;  %v9304_v60 = vrot.slane %v8811_v36, 4  ;;  %v16212_v5 = vld [vmem:[#allocation217_spill] sm:$0xff]  ;;  %v16213_v36 = vld [vmem:[#allocation54_spill] sm:$0xff] }
 0x494   : > { %9676 = vst [vmem:[%s14475_s5 + $0x1a8] sm:$0xff] %v9564_v50  ;;  %v7783_v43 = vpop.f32.mrf.mxu1  ;;  %v8625_v54 = vpop.f32.mrf.mxu0 }
 0x495   : > { %v9302_v31 = vrot.slane %v8812_v44, 4  ;;  %v8813_v53 = vadd.f32 %v8621_v59, %v7971_v12  ;;  %v7972_v32 = vadd.f32 %v7783_v43, %v16202_v29  ;;  %v16214_v12 = vld [vmem:[#allocation132_spill] sm:$0xff] }
 0x496   : > { %v7785_v39 = vpop.f32.mrf.mxu1  ;;  %v8627_v16 = vpop.f32.mrf.mxu0 }
 0x497   : > { %v9303_v17 = vsel %vm9202_vm1, %v9301_v38, %v9302_v31  ;;  %v9305_v7 = vrot.slane %v8813_v53, 4  ;;  %v8814_v30 = vadd.f32 %v8625_v54, %v7972_v32  ;;  %v7973_v24 = vadd.f32 %v7785_v39, %v16203_v37  ;;  %v16215_v38 = vld [vmem:[#allocation34_spill] sm:$0xff] }
 0x498   : > { %v9567_v46 = vadd.f32 %v9303_v17, %v16204_v34  ;;  %v7787_v26 = vpop.f32.mrf.mxu1  ;;  %v8629_v55 = vpop.f32.mrf.mxu0  ;;  %v16216_v53 = vld [vmem:[#allocation218_spill] sm:$0xff]  ;;  %v16217_v17 = vld [vmem:[#allocation219_spill] sm:$0xff] }
 0x499   : > { %v9306_v49 = vsel %vm9202_vm1, %v9304_v60, %v9305_v7  ;;  %v9307_v61 = vrot.slane %v8814_v30, 4  ;;  %v8815_v0 = vadd.f32 %v8627_v16, %v7973_v24  ;;  %v7974_v51 = vadd.f32 %v7787_v26, %v16205_v10  ;;  %v16218_v26 = vld [vmem:[#allocation134_spill] sm:$0xff] }
 0x49a   : > { %9679 = vst [vmem:[%s14475_s5 + $0x1c0] sm:$0xff] %v9567_v46  ;;  %v9568_v15 = vadd.f32 %v9306_v49, %v16206_v35  ;;  %v7789_v47 = vpop.f32.mrf.mxu1  ;;  %v8631_v63 = vpop.f32.mrf.mxu0 }
 0x49b   : > { %v9308_v18 = vsel %vm9202_vm1, %v9302_v31, %v9307_v61  ;;  %v9309_v13 = vrot.slane %v8815_v0, 4  ;;  %v8816_v45 = vadd.f32 %v8629_v55, %v7974_v51  ;;  %v7975_v41 = vadd.f32 %v7789_v47, %v16207_v58 }
 0x49c   : > { %9680 = vst [vmem:[%s14475_s5 + $0x1c8] sm:$0xff] %v9568_v15  ;;  %v9569_v28 = vadd.f32 %v9308_v18, %v16208_v40  ;;  %v7793_v42 = vpop.f32.mrf.mxu1  ;;  %v8635_v48 = vpop.f32.mrf.mxu0  ;;  %v16219_v15 = vld [vmem:[#allocation136_spill] sm:$0xff] }
 0x49d   : > { %v9310_v1 = vsel %vm9202_vm1, %v9305_v7, %v9309_v13  ;;  %v9311_v52 = vrot.slane %v8816_v45, 4  ;;  %v8817_v2 = vadd.f32 %v8631_v63, %v7975_v41  ;;  %v7976_v27 = vadd.f32 %v7793_v42, %v16209_v33  ;;  %v16220_v63 = vld [vmem:[#allocation220_spill] sm:$0xff] }
 0x49e   : > { %9681 = vst [vmem:[%s14475_s5 + $0x1d0] sm:$0xff] %v9569_v28  ;;  %v9570_v6 = vadd.f32 %v9310_v1, %v16210_v19  ;;  %v7795_v14 = vpop.f32.mrf.mxu1  ;;  %v8637_v4 = vpop.f32.mrf.mxu0  ;;  %v16221_v28 = vld [vmem:[#allocation142_spill] sm:$0xff] }
 0x49f   : > { %v9312_v57 = vsel %vm9202_vm1, %v9307_v61, %v9311_v52  ;;  %v9573_v9 = vadd.f32 %v9311_v52, %v16211_v56  ;;  %v9313_v62 = vrot.slane %v8817_v2, 4  ;;  %v7977_v3 = vadd.f32 %v7795_v14, %v16213_v36  ;;  %v16225_v36 = vld [vmem:[#allocation38_spill] sm:$0xff] }
 0x4a0   : > { %9682 = vst [vmem:[%s14475_s5 + $0x1d8] sm:$0xff] %v9570_v6  ;;  %v9571_v50 = vadd.f32 %v9312_v57, %v16212_v5  ;;  %v7797_v59 = vpop.f32.mrf.mxu1  ;;  %v8639_v44 = vpop.f32.mrf.mxu0  ;;  %v8818_v54 = vadd.f32 %v8635_v48, %v7976_v27  ;;  %v16222_v48 = vld [vmem:[#allocation55_spill] sm:$0xff]  ;;  %v16223_v6 = vld [vmem:[#allocation56_spill] sm:$0xff] }
 0x4a1   : > { %9685 = vst [vmem:[%s14475_s5 + $0x1f0] sm:$0xf] %v9573_v9  ;;  %v9314_v25 = vsel %vm9202_vm1, %v9309_v13, %v9313_v62  ;;  %v9574_v43 = vadd.f32 %v9313_v62, %v16214_v12  ;;  %v7978_v31 = vadd.f32 %v7797_v59, %v16215_v38  ;;  %v8819_v32 = vadd.f32 %v8637_v4, %v7977_v3  ;;  %v16224_v4 = vld [vmem:[#allocation221_spill] sm:$0xff]  ;;  %v16226_v59 = vld [vmem:[#allocation140_spill] sm:$0xff] }
 0x4a2   : > { %9683 = vst [vmem:[%s14475_s5 + $0x1e0] sm:$0xff] %v9571_v50  ;;  %v9572_v29 = vadd.f32 %v9314_v25, %v16216_v53  ;;  %v7799_v60 = vpop.f32.mrf.mxu1  ;;  %v8641_v39 = vpop.f32.mrf.mxu0  ;;  %v9315_v24 = vrot.slane %v8818_v54, 4  ;;  %v16227_v54 = vld [vmem:[#allocation222_spill] sm:$0xff]  ;;  %v16228_v53 = vld [vmem:[#allocation36_spill] sm:$0xff] }
 0x4a3   : > { %9686 = vst [vmem:[%s14475_s5 + $0x1f8] sm:$0xf] %v9574_v43  ;;  %v8820_v16 = vadd.f32 %v8639_v44, %v7978_v31  ;;  %v7979_v7 = vadd.f32 %v7799_v60, %v16217_v17  ;;  %v9318_v49 = vrot.slane %v8819_v32, 4  ;;  %v16229_v32 = vld [vmem:[#allocation223_spill] sm:$0xff] }
 0x4a4   : > { %9684 = vst [vmem:[%s14475_s5 + $0x1e8] sm:$0xff] %v9572_v29  ;;  %v7803_v30 = vpop.f32.mrf.mxu1  ;;  %v8645_v37 = vpop.f32.mrf.mxu0 }
 0x4a5   : > { %v9316_v34 = vrot.slane %v8820_v16, 4  ;;  %v8821_v46 = vadd.f32 %v8641_v39, %v7979_v7  ;;  %v7980_v55 = vadd.f32 %v7803_v30, %v16218_v26  ;;  %v16230_v7 = vld [vmem:[#allocation224_spill] sm:$0xff] }
 0x4a6   : > { %v7805_v61 = vpop.f32.mrf.mxu1  ;;  %v8647_v0 = vpop.f32.mrf.mxu0 }
 0x4a7   : > { %v9317_v10 = vsel %vm9202_vm1, %v9315_v24, %v9316_v34  ;;  %v9319_v51 = vrot.slane %v8821_v46, 4  ;;  %v8822_v35 = vadd.f32 %v8645_v37, %v7980_v55  ;;  %v7981_v47 = vadd.f32 %v7805_v61, %v16219_v15  ;;  %v16231_v24 = vld [vmem:[#allocation225_spill] sm:$0xff]  ;;  %v16232_v46 = vld [vmem:[#allocation60_spill] sm:$0xff] }
 0x4a8   : > { %v9575_v18 = vadd.f32 %v9317_v10, %v16220_v63  ;;  %v7807_v13 = vpop.f32.mrf.mxu1  ;;  %v8649_v45 = vpop.f32.mrf.mxu0  ;;  %v16233_v10 = vld [vmem:[#allocation61_spill] sm:$0xff] }
 0x4a9   : > { %v9320_v58 = vsel %vm9202_vm1, %v9318_v49, %v9319_v51  ;;  %v9321_v41 = vrot.slane %v8822_v35, 4  ;;  %v8823_v40 = vadd.f32 %v8647_v0, %v7981_v47  ;;  %v7982_v42 = vadd.f32 %v7807_v13, %v16221_v28  ;;  %v16234_v13 = vld [vmem:[#allocation144_spill] sm:$0xff] }
 0x4aa   : > { %9687 = vst [vmem:[%s14475_s5 + $0x200] sm:$0xff] %v9575_v18  ;;  %v9576_v1 = vadd.f32 %v9320_v58, %v16222_v48  ;;  %v7809_v52 = vpop.f32.mrf.mxu1  ;;  %v8651_v2 = vpop.f32.mrf.mxu0 }
 0x4ab   : > { %v9322_v33 = vsel %vm9202_vm1, %v9316_v34, %v9321_v41  ;;  %v9323_v27 = vrot.slane %v8823_v40, 4  ;;  %v8824_v19 = vadd.f32 %v8649_v45, %v7982_v42  ;;  %v7983_v14 = vadd.f32 %v7809_v52, %v16223_v6 }
 0x4ac   : > { %9688 = vst [vmem:[%s14475_s5 + $0x208] sm:$0xff] %v9576_v1  ;;  %v9577_v57 = vadd.f32 %v9322_v33, %v16224_v4  ;;  %v7813_v56 = vpop.f32.mrf.mxu1  ;;  %v8655_v9 = vpop.f32.mrf.mxu0  ;;  %v16235_v1 = vld [vmem:[#allocation146_spill] sm:$0xff] }
 0x4ad   : > { %v9324_v62 = vsel %vm9202_vm1, %v9319_v51, %v9323_v27  ;;  %v9325_v5 = vrot.slane %v8824_v19, 4  ;;  %v8825_v50 = vadd.f32 %v8651_v2, %v7983_v14  ;;  %v7984_v3 = vadd.f32 %v7813_v56, %v16225_v36  ;;  %v16236_v2 = vld [vmem:[#allocation226_spill] sm:$0xff] }
 0x4ae   : > { %9689 = vst [vmem:[%s14475_s5 + $0x210] sm:$0xff] %v9577_v57  ;;  %v9578_v44 = vadd.f32 %v9324_v62, %v16226_v59  ;;  %v7815_v25 = vpop.f32.mrf.mxu1  ;;  %v8657_v12 = vpop.f32.mrf.mxu0  ;;  %v16237_v57 = vld [vmem:[#allocation150_spill] sm:$0xff] }
 0x4af   : > { %v9326_v43 = vsel %vm9202_vm1, %v9321_v41, %v9325_v5  ;;  %v9581_v38 = vadd.f32 %v9325_v5, %v16227_v54  ;;  %v9327_v31 = vrot.slane %v8825_v50, 4  ;;  %v7985_v60 = vadd.f32 %v7815_v25, %v16229_v32  ;;  %v16241_v32 = vld [vmem:[#allocation154_spill] sm:$0xff] }
 0x4b0   : > { %9690 = vst [vmem:[%s14475_s5 + $0x218] sm:$0xff] %v9578_v44  ;;  %v9579_v29 = vadd.f32 %v9326_v43, %v16228_v53  ;;  %v7817_v39 = vpop.f32.mrf.mxu1  ;;  %v8659_v16 = vpop.f32.mrf.mxu0  ;;  %v8826_v37 = vadd.f32 %v8655_v9, %v7984_v3  ;;  %v16238_v9 = vld [vmem:[#allocation227_spill] sm:$0xff]  ;;  %v16239_v44 = vld [vmem:[#allocation40_spill] sm:$0xff] }
 0x4b1   : > { %9693 = vst [vmem:[%s14475_s5 + $0x230] sm:$0xf] %v9581_v38  ;;  %v9328_v17 = vsel %vm9202_vm1, %v9323_v27, %v9327_v31  ;;  %v9582_v30 = vadd.f32 %v9327_v31, %v16230_v7  ;;  %v7986_v34 = vadd.f32 %v7817_v39, %v16231_v24  ;;  %v8827_v55 = vadd.f32 %v8657_v12, %v7985_v60  ;;  %v16240_v12 = vld [vmem:[#allocation228_spill] sm:$0xff]  ;;  %v16242_v39 = vld [vmem:[#allocation66_spill] sm:$0xff] }
 0x4b2   : > { %9691 = vst [vmem:[%s14475_s5 + $0x220] sm:$0xff] %v9579_v29  ;;  %v9580_v26 = vadd.f32 %v9328_v17, %v16232_v46  ;;  %v7819_v49 = vpop.f32.mrf.mxu1  ;;  %v8661_v61 = vpop.f32.mrf.mxu0  ;;  %v9329_v47 = vrot.slane %v8826_v37, 4  ;;  %v16243_v37 = vld [vmem:[#allocation229_spill] sm:$0xff]  ;;  %v16244_v46 = vld [vmem:[#allocation67_spill] sm:$0xff] }
 0x4b3   : > { %9694 = vst [vmem:[%s14475_s5 + $0x238] sm:$0xf] %v9582_v30  ;;  %v8828_v0 = vadd.f32 %v8659_v16, %v7986_v34  ;;  %v7987_v51 = vadd.f32 %v7819_v49, %v16233_v10  ;;  %v9332_v58 = vrot.slane %v8827_v55, 4  ;;  %v16245_v55 = vld [vmem:[#allocation152_spill] sm:$0xff] }
 0x4b4   : > { %9692 = vst [vmem:[%s14475_s5 + $0x228] sm:$0xff] %v9580_v26  ;;  %v7823_v35 = vpop.f32.mrf.mxu1  ;;  %v8665_v15 = vpop.f32.mrf.mxu0 }
 0x4b5   : > { %v9330_v63 = vrot.slane %v8828_v0, 4  ;;  %v8829_v18 = vadd.f32 %v8661_v61, %v7987_v51  ;;  %v7988_v45 = vadd.f32 %v7823_v35, %v16234_v13  ;;  %v16246_v51 = vld [vmem:[#allocation156_spill] sm:$0xff] }
 0x4b6   : > { %v7825_v41 = vpop.f32.mrf.mxu1  ;;  %v8667_v40 = vpop.f32.mrf.mxu0 }
 0x4b7   : > { %v9331_v28 = vsel %vm9202_vm1, %v9329_v47, %v9330_v63  ;;  %v9333_v42 = vrot.slane %v8829_v18, 4  ;;  %v8830_v48 = vadd.f32 %v8665_v15, %v7988_v45  ;;  %v7989_v52 = vadd.f32 %v7825_v41, %v16235_v1  ;;  %v16247_v47 = vld [vmem:[#allocation42_spill] sm:$0xff] }
 0x4b8   : > { %v9583_v33 = vadd.f32 %v9331_v28, %v16236_v2  ;;  %v7827_v27 = vpop.f32.mrf.mxu1  ;;  %v8669_v19 = vpop.f32.mrf.mxu0  ;;  %v16248_v18 = vld [vmem:[#allocation230_spill] sm:$0xff]  ;;  %v16249_v28 = vld [vmem:[#allocation231_spill] sm:$0xff] }
 0x4b9   : > { %v9334_v6 = vsel %vm9202_vm1, %v9332_v58, %v9333_v42  ;;  %v9335_v14 = vrot.slane %v8830_v48, 4  ;;  %v8831_v4 = vadd.f32 %v8667_v40, %v7989_v52  ;;  %v7990_v56 = vadd.f32 %v7827_v27, %v16237_v57  ;;  %v16250_v27 = vld [vmem:[#allocation232_spill] sm:$0xff] }
 0x4ba   : > { %9695 = vst [vmem:[%s14475_s5 + $0x240] sm:$0xff] %v9583_v33  ;;  %v9584_v62 = vadd.f32 %v9334_v6, %v16238_v9  ;;  %v7829_v5 = vpop.f32.mrf.mxu1  ;;  %v8671_v50 = vpop.f32.mrf.mxu0 }
 0x4bb   : > { %v9336_v36 = vsel %vm9202_vm1, %v9330_v63, %v9335_v14  ;;  %v9337_v3 = vrot.slane %v8831_v4, 4  ;;  %v8832_v59 = vadd.f32 %v8669_v19, %v7990_v56  ;;  %v7991_v25 = vadd.f32 %v7829_v5, %v16239_v44 }
 0x4bc   : > { %9696 = vst [vmem:[%s14475_s5 + $0x248] sm:$0xff] %v9584_v62  ;;  %v9585_v43 = vadd.f32 %v9336_v36, %v16240_v12  ;;  %v7833_v54 = vpop.f32.mrf.mxu1  ;;  %v8675_v38 = vpop.f32.mrf.mxu0  ;;  %v16251_v62 = vld [vmem:[#allocation233_spill] sm:$0xff] }
 0x4bd   : > { %v9338_v31 = vsel %vm9202_vm1, %v9333_v42, %v9337_v3  ;;  %v9339_v53 = vrot.slane %v8832_v59, 4  ;;  %v8833_v29 = vadd.f32 %v8671_v50, %v7991_v25  ;;  %v7992_v60 = vadd.f32 %v7833_v54, %v16241_v32  ;;  %v16252_v50 = vld [vmem:[#allocation72_spill] sm:$0xff] }
 0x4be   : > { %9697 = vst [vmem:[%s14475_s5 + $0x250] sm:$0xff] %v9585_v43  ;;  %v9586_v16 = vadd.f32 %v9338_v31, %v16242_v39  ;;  %v7835_v17 = vpop.f32.mrf.mxu1  ;;  %v8677_v7 = vpop.f32.mrf.mxu0  ;;  %v16253_v43 = vld [vmem:[#allocation160_spill] sm:$0xff] }
 0x4bf   : > { %v9340_v30 = vsel %vm9202_vm1, %v9335_v14, %v9339_v53  ;;  %v9589_v24 = vadd.f32 %v9339_v53, %v16243_v37  ;;  %v9341_v34 = vrot.slane %v8833_v29, 4  ;;  %v7993_v49 = vadd.f32 %v7835_v17, %v16245_v55  ;;  %v16257_v55 = vld [vmem:[#allocation162_spill] sm:$0xff] }
 0x4c0   : > { %9698 = vst [vmem:[%s14475_s5 + $0x258] sm:$0xff] %v9586_v16  ;;  %v9587_v26 = vadd.f32 %v9340_v30, %v16244_v46  ;;  %v7837_v61 = vpop.f32.mrf.mxu1  ;;  %v8679_v0 = vpop.f32.mrf.mxu0  ;;  %v8834_v15 = vadd.f32 %v8675_v38, %v7992_v60  ;;  %v16254_v38 = vld [vmem:[#allocation73_spill] sm:$0xff]  ;;  %v16255_v16 = vld [vmem:[#allocation44_spill] sm:$0xff] }
 0x4c1   : > { %9701 = vst [vmem:[%s14475_s5 + $0x270] sm:$0xf] %v9589_v24  ;;  %v9342_v10 = vsel %vm9202_vm1, %v9337_v3, %v9341_v34  ;;  %v9590_v35 = vadd.f32 %v9341_v34, %v16246_v51  ;;  %v7994_v63 = vadd.f32 %v7837_v61, %v16247_v47  ;;  %v8835_v45 = vadd.f32 %v8677_v7, %v7993_v49  ;;  %v16256_v7 = vld [vmem:[#allocation3_spill] sm:$0xff]  ;;  %v16258_v61 = vld [vmem:[#allocation234_spill] sm:$0xff] }
 0x4c2   : > { %9699 = vst [vmem:[%s14475_s5 + $0x260] sm:$0xff] %v9587_v26  ;;  %v9588_v13 = vadd.f32 %v9342_v10, %v16248_v18  ;;  %v7839_v58 = vpop.f32.mrf.mxu1  ;;  %v8681_v41 = vpop.f32.mrf.mxu0  ;;  %v9343_v52 = vrot.slane %v8834_v15, 4  ;;  %v16259_v15 = vld [vmem:[#allocation235_spill] sm:$0xff]  ;;  %v16260_v18 = vld [vmem:[#allocation164_spill] sm:$0xff] }
 0x4c3   : > { %9702 = vst [vmem:[%s14475_s5 + $0x278] sm:$0xf] %v9590_v35  ;;  %v8836_v40 = vadd.f32 %v8679_v0, %v7994_v63  ;;  %v7995_v42 = vadd.f32 %v7839_v58, %v16249_v28  ;;  %v9346_v6 = vrot.slane %v8835_v45, 4  ;;  %v16261_v45 = vld [vmem:[#allocation78_spill] sm:$0xff] }
 0x4c4   : > { %9700 = vst [vmem:[%s14475_s5 + $0x268] sm:$0xff] %v9588_v13  ;;  %v7843_v48 = vpop.f32.mrf.mxu1  ;;  %v8685_v1 = vpop.f32.mrf.mxu0 }
 0x4c5   : > { %v9344_v2 = vrot.slane %v8836_v40, 4  ;;  %v8837_v33 = vadd.f32 %v8681_v41, %v7995_v42  ;;  %v7996_v19 = vadd.f32 %v7843_v48, %v16250_v27 }
 0x4c6   : > { %v7845_v14 = vpop.f32.mrf.mxu1  ;;  %v8687_v4 = vpop.f32.mrf.mxu0 }
 0x4c7   : > { %v9345_v57 = vsel %vm9202_vm1, %v9343_v52, %v9344_v2  ;;  %v9347_v56 = vrot.slane %v8837_v33, 4  ;;  %v8838_v9 = vadd.f32 %v8685_v1, %v7996_v19  ;;  %v7997_v5 = vadd.f32 %v7845_v14, %v16251_v62  ;;  %v16262_v52 = vld [vmem:[#allocation57_spill] sm:$0xff]  ;;  %v16263_v14 = vld [vmem:[#allocation4_spill] sm:$0xff] }
 0x4c8   : > { %v9591_v36 = vadd.f32 %v9345_v57, %v16252_v50  ;;  %v7847_v3 = vpop.f32.mrf.mxu1  ;;  %v8689_v59 = vpop.f32.mrf.mxu0 }
 0x4c9   : > { %v9348_v44 = vsel %vm9202_vm1, %v9346_v6, %v9347_v56  ;;  %v9349_v25 = vrot.slane %v8838_v9, 4  ;;  %v8839_v12 = vadd.f32 %v8687_v4, %v7997_v5  ;;  %v7998_v54 = vadd.f32 %v7847_v3, %v16253_v43 }
 0x4ca   : > { %9703 = vst [vmem:[%s14475_s5 + $0x280] sm:$0xff] %v9591_v36  ;;  %v9592_v31 = vadd.f32 %v9348_v44, %v16254_v38  ;;  %v7849_v53 = vpop.f32.mrf.mxu1  ;;  %v8691_v29 = vpop.f32.mrf.mxu0 }
 0x4cb   : > { %v9350_v32 = vsel %vm9202_vm1, %v9344_v2, %v9349_v25  ;;  %v9351_v60 = vrot.slane %v8839_v12, 4  ;;  %v8840_v39 = vadd.f32 %v8689_v59, %v7998_v54  ;;  %v7999_v17 = vadd.f32 %v7849_v53, %v16255_v16  ;;  %v16265_v12 = vld [vmem:[#allocation48_spill] sm:$0xff]  ;;  %v16266_v54 = vld [vmem:[#allocation166_spill] sm:$0xff] }
 0x4cc   : > { %9704 = vst [vmem:[%s14475_s5 + $0x288] sm:$0xff] %v9592_v31  ;;  %v9593_v30 = vadd.f32 %v9350_v32, %v16256_v7  ;;  %v7853_v37 = vpop.f32.mrf.mxu1  ;;  %v8695_v24 = vpop.f32.mrf.mxu0 }
 0x4cd   : > { %v9352_v34 = vsel %vm9202_vm1, %v9347_v56, %v9351_v60  ;;  %v9353_v46 = vrot.slane %v8840_v39, 4  ;;  %v8841_v26 = vadd.f32 %v8691_v29, %v7999_v17  ;;  %v8000_v49 = vadd.f32 %v7853_v37, %v16257_v55  ;;  %v16267_v39 = vld [vmem:[#allocation170_spill] sm:$0xff]  ;;  %v16268_v17 = vld [vmem:[#allocation5_spill] sm:$0xff] }
 0x4ce   : > { %9705 = vst [vmem:[%s14475_s5 + $0x290] sm:$0xff] %v9593_v30  ;;  %v9594_v0 = vadd.f32 %v9352_v34, %v16258_v61  ;;  %v7855_v10 = vpop.f32.mrf.mxu1  ;;  %v8697_v51 = vpop.f32.mrf.mxu0 }
 0x4cf   : > { %v9354_v35 = vsel %vm9202_vm1, %v9349_v25, %v9353_v46  ;;  %v9597_v47 = vadd.f32 %v9353_v46, %v16259_v15  ;;  %v9355_v63 = vrot.slane %v8841_v26, 4  ;;  %v8001_v58 = vadd.f32 %v7855_v10, %v16261_v45  ;;  %v16271_v45 = vld [vmem:[#allocation84_spill] sm:$0xff] }
 0x4d0   : > { %9706 = vst [vmem:[%s14475_s5 + $0x298] sm:$0xff] %v9594_v0  ;;  %v9595_v13 = vadd.f32 %v9354_v35, %v16260_v18  ;;  %v7857_v41 = vpop.f32.mrf.mxu1  ;;  %v8699_v40 = vpop.f32.mrf.mxu0  ;;  %v8842_v48 = vadd.f32 %v8695_v24, %v8000_v49  ;;  %v16269_v35 = vld [vmem:[#allocation237_spill] sm:$0xff] }
 0x4d1   : > { %9709 = vst [vmem:[%s14475_s5 + $0x2b0] sm:$0xf] %v9597_v47  ;;  %v9356_v28 = vsel %vm9202_vm1, %v9351_v60, %v9355_v63  ;;  %v9598_v42 = vadd.f32 %v9355_v63, %v14269_v20  ;;  %v8002_v1 = vadd.f32 %v7857_v41, %v14275_v11  ;;  %v8843_v33 = vadd.f32 %v8697_v51, %v8001_v58  ;;  %v16264_v20 = vld [vmem:[#allocation79_spill] sm:$0xff]  ;;  %v16270_v47 = vld [vmem:[#allocation236_spill] sm:$0xff]  ;;  %v16272_v41 = vld [vmem:[#allocation6_spill] sm:$0xff] }
 0x4d2   : > { %9707 = vst [vmem:[%s14475_s5 + $0x2a0] sm:$0xff] %v9595_v13  ;;  %v9596_v2 = vadd.f32 %v9356_v28, %v16262_v52  ;;  %v7859_v27 = vpop.f32.mrf.mxu1  ;;  %v8701_v19 = vpop.f32.mrf.mxu0  ;;  %v9357_v9 = vrot.slane %v8842_v48, 4  ;;  %v16273_v28 = vld [vmem:[#allocation85_spill] sm:$0xff] }
 0x4d3   : > { %9710 = vst [vmem:[%s14475_s5 + $0x2b8] sm:$0xf] %v9598_v42  ;;  %v8844_v6 = vadd.f32 %v8699_v40, %v8002_v1  ;;  %v8003_v4 = vadd.f32 %v7859_v27, %v16263_v14  ;;  %v9360_v11 = vrot.slane %v8843_v33, 4  ;;  %v16274_v27 = vld [vmem:[#allocation7_spill] sm:$0xff] }
 0x4d4   : > { %9708 = vst [vmem:[%s14475_s5 + $0x2a8] sm:$0xff] %v9596_v2  ;;  %v7863_v57 = vpop.f32.mrf.mxu1  ;;  %v8705_v56 = vpop.f32.mrf.mxu0 }
 0x4d5   : > { %v9358_v62 = vrot.slane %v8844_v6, 4  ;;  %v8845_v5 = vadd.f32 %v8701_v19, %v8003_v4  ;;  %v8004_v50 = vadd.f32 %v7863_v57, %v16264_v20  ;;  %v16275_v6 = vld [vmem:[#allocation58_spill] sm:$0xff] }
 0x4d6   : > { %v7865_v36 = vpop.f32.mrf.mxu1  ;;  %v8707_v3 = vpop.f32.mrf.mxu0 }
 0x4d7   : > { %v9359_v59 = vsel %vm9202_vm1, %v9357_v9, %v9358_v62  ;;  %v9361_v44 = vrot.slane %v8845_v5, 4  ;;  %v8846_v25 = vadd.f32 %v8705_v56, %v8004_v50  ;;  %v8005_v43 = vadd.f32 %v7865_v36, %v16265_v12 }
 0x4d8   : > { %v9599_v38 = vadd.f32 %v9359_v59, %v16266_v54  ;;  %v7867_v31 = vpop.f32.mrf.mxu1  ;;  %v8709_v53 = vpop.f32.mrf.mxu0 }
 0x4d9   : > { %v9362_v29 = vsel %vm9202_vm1, %v9360_v11, %v9361_v44  ;;  %v9363_v32 = vrot.slane %v8846_v25, 4  ;;  %v8847_v60 = vadd.f32 %v8707_v3, %v8005_v43  ;;  %v8006_v16 = vadd.f32 %v7867_v31, %v16267_v39  ;;  %v16278_v31 = vld [vmem:[#allocation239_spill] sm:$0xff] }
 0x4da   : > { %9711 = vst [vmem:[%s14475_s5 + $0x2c0] sm:$0xff] %v9599_v38  ;;  %v9600_v7 = vadd.f32 %v9362_v29, %v16268_v17  ;;  %v7869_v30 = vpop.f32.mrf.mxu1  ;;  %v8711_v37 = vpop.f32.mrf.mxu0  ;;  %v16279_v29 = vld [vmem:[#allocation62_spill] sm:$0xff] }
 0x4db   : > { %v9364_v24 = vsel %vm9202_vm1, %v9358_v62, %v9363_v32  ;;  %v9365_v34 = vrot.slane %v8847_v60, 4  ;;  %v8848_v46 = vadd.f32 %v8709_v53, %v8006_v16  ;;  %v8007_v26 = vadd.f32 %v7869_v30, %v14306_v8  ;;  %v16276_v62 = vld [vmem:[#allocation59_spill] sm:$0xff]  ;;  %v16280_v30 = vld [vmem:[#allocation90_spill] sm:$0xff] }
 0x4dc   : > { %9712 = vst [vmem:[%s14475_s5 + $0x2c8] sm:$0xff] %v9600_v7  ;;  %v9601_v55 = vadd.f32 %v9364_v24, %v14304_v22  ;;  %v7873_v49 = vpop.f32.mrf.mxu1  ;;  %v8715_v61 = vpop.f32.mrf.mxu0  ;;  %v16281_v24 = vld [vmem:[#allocation63_spill] sm:$0xff] }
 0x4dd   : > { %v9366_v0 = vsel %vm9202_vm1, %v9361_v44, %v9365_v34  ;;  %v9367_v10 = vrot.slane %v8848_v46, 4  ;;  %v8849_v51 = vadd.f32 %v8711_v37, %v8007_v26  ;;  %v8008_v15 = vadd.f32 %v7873_v49, %v16269_v35 }
 0x4de   : > { %9713 = vst [vmem:[%s14475_s5 + $0x2d0] sm:$0xff] %v9601_v55  ;;  %v9602_v63 = vadd.f32 %v9366_v0, %v16270_v47  ;;  %v7875_v18 = vpop.f32.mrf.mxu1  ;;  %v8717_v13 = vpop.f32.mrf.mxu0  ;;  %v16282_v0 = vld [vmem:[#allocation8_spill] sm:$0xff] }
 0x4df   : > { %v9368_v8 = vsel %vm9202_vm1, %v9363_v32, %v9367_v10  ;;  %v9605_v58 = vadd.f32 %v9367_v10, %v16271_v45  ;;  %v9369_v22 = vrot.slane %v8849_v51, 4  ;;  %v8009_v42 = vadd.f32 %v7875_v18, %v16273_v28  ;;  %v16283_v51 = vld [vmem:[#allocation68_spill] sm:$0xff] }
 0x4e0   : > { %9714 = vst [vmem:[%s14475_s5 + $0x2d8] sm:$0xff] %v9602_v63  ;;  %v9603_v40 = vadd.f32 %v9368_v8, %v16272_v41  ;;  %v7877_v48 = vpop.f32.mrf.mxu1  ;;  %v8719_v1 = vpop.f32.mrf.mxu0  ;;  %v8850_v33 = vadd.f32 %v8715_v61, %v8008_v15  ;;  %v16284_v8 = vld [vmem:[#allocation64_spill] sm:$0xff] }
 0x4e1   : > { %9717 = vst [vmem:[%s14475_s5 + $0x2f0] sm:$0xf] %v9605_v58  ;;  %v9370_v52 = vsel %vm9202_vm1, %v9365_v34, %v9369_v22  ;;  %v9606_v2 = vadd.f32 %v9369_v22, %v14331_v23  ;;  %v8010_v19 = vadd.f32 %v7877_v48, %v16274_v27  ;;  %v8851_v4 = vadd.f32 %v8717_v13, %v8009_v42  ;;  %v16277_v23 = vld [vmem:[#allocation238_spill] sm:$0xff]  ;;  %v16285_v58 = vld [vmem:[#allocation91_spill] sm:$0xff]  ;;  %v16286_v42 = vld [vmem:[#allocation69_spill] sm:$0xff] }
 0x4e2   : > { %9715 = vst [vmem:[%s14475_s5 + $0x2e0] sm:$0xff] %v9603_v40  ;;  %v9604_v14 = vadd.f32 %v9370_v52, %v16275_v6  ;;  %v7879_v57 = vpop.f32.mrf.mxu1  ;;  %v8721_v56 = vpop.f32.mrf.mxu0  ;;  %v9371_v11 = vrot.slane %v8850_v33, 4  ;;  %v16287_v52 = vld [vmem:[#allocation9_spill] sm:$0xff] }
 0x4e3   : > { %9718 = vst [vmem:[%s14475_s5 + $0x2f8] sm:$0xf] %v9606_v2  ;;  %v8852_v9 = vadd.f32 %v8719_v1, %v8010_v19  ;;  %v8011_v5 = vadd.f32 %v7879_v57, %v16276_v62  ;;  %v9374_v44 = vrot.slane %v8851_v4, 4  ;;  %v16288_v33 = vld [vmem:[#allocation65_spill] sm:$0xff]  ;;  %v16290_v62 = vld [vmem:[#allocation240_spill] sm:$0xff] }
 0x4e4   : > { %9716 = vst [vmem:[%s14475_s5 + $0x2e8] sm:$0xff] %v9604_v14  ;;  %v7883_v20 = vpop.f32.mrf.mxu1  ;;  %v8725_v50 = vpop.f32.mrf.mxu0 }
 0x4e5   : > { %v9372_v36 = vrot.slane %v8852_v9, 4  ;;  %v8853_v3 = vadd.f32 %v8721_v56, %v8011_v5  ;;  %v8012_v59 = vadd.f32 %v7883_v20, %v16277_v23  ;;  %v16289_v56 = vld [vmem:[#allocation241_spill] sm:$0xff] }
 0x4e6   : > { %v7885_v25 = vpop.f32.mrf.mxu1  ;;  %v8727_v12 = vpop.f32.mrf.mxu0 }
 0x4e7   : > { %v9373_v43 = vsel %vm9202_vm1, %v9371_v11, %v9372_v36  ;;  %v9375_v54 = vrot.slane %v8853_v3, 4  ;;  %v8854_v38 = vadd.f32 %v8725_v50, %v8012_v59  ;;  %v8013_v53 = vadd.f32 %v7885_v25, %v16278_v31  ;;  %v16291_v3 = vld [vmem:[#allocation98_spill] sm:$0xff] }
 0x4e8   : > { %v9607_v32 = vadd.f32 %v9373_v43, %v16279_v29  ;;  %v7887_v60 = vpop.f32.mrf.mxu1  ;;  %v8729_v39 = vpop.f32.mrf.mxu0 }
 0x4e9   : > { %v9376_v16 = vsel %vm9202_vm1, %v9374_v44, %v9375_v54  ;;  %v9377_v17 = vrot.slane %v8854_v38, 4  ;;  %v8855_v7 = vadd.f32 %v8727_v12, %v8013_v53  ;;  %v8014_v37 = vadd.f32 %v7887_v60, %v16280_v30 }
 0x4ea   : > { %9719 = vst [vmem:[%s14475_s5 + $0x300] sm:$0xff] %v9607_v32  ;;  %v9608_v34 = vadd.f32 %v9376_v16, %v16281_v24  ;;  %v7889_v46 = vpop.f32.mrf.mxu1  ;;  %v8731_v26 = vpop.f32.mrf.mxu0 }
 0x4eb   : > { %v9378_v55 = vsel %vm9202_vm1, %v9372_v36, %v9377_v17  ;;  %v9379_v49 = vrot.slane %v8855_v7, 4  ;;  %v8856_v61 = vadd.f32 %v8729_v39, %v8014_v37  ;;  %v8015_v10 = vadd.f32 %v7889_v46, %v16282_v0  ;;  %v16293_v39 = vld [vmem:[#allocation52_spill] sm:$0xff] }
 0x4ec   : > { %9720 = vst [vmem:[%s14475_s5 + $0x308] sm:$0xff] %v9608_v34  ;;  %v9609_v35 = vadd.f32 %v9378_v55, %v16283_v51  ;;  %v7893_v15 = vpop.f32.mrf.mxu1  ;;  %v8735_v47 = vpop.f32.mrf.mxu0 }
 0x4ed   : > { %v9380_v63 = vsel %vm9202_vm1, %v9375_v54, %v9379_v49  ;;  %v9381_v18 = vrot.slane %v8856_v61, 4  ;;  %v8857_v13 = vadd.f32 %v8731_v26, %v8015_v10  ;;  %v8016_v45 = vadd.f32 %v7893_v15, %v16284_v8  ;;  %v16295_v26 = vld [vmem:[#allocation70_spill] sm:$0xff]  ;;  %v16297_v15 = vld [vmem:[#allocation71_spill] sm:$0xff] }
 0x4ee   : > { %9721 = vst [vmem:[%s14475_s5 + $0x310] sm:$0xff] %v9609_v35  ;;  %v9610_v22 = vadd.f32 %v9380_v63, %v16285_v58  ;;  %v7895_v41 = vpop.f32.mrf.mxu1  ;;  %v8737_v40 = vpop.f32.mrf.mxu0  ;;  %v16298_v63 = vld [vmem:[#allocation242_spill] sm:$0xff] }
 0x4ef   : > { %v9382_v28 = vsel %vm9202_vm1, %v9377_v17, %v9381_v18  ;;  %v9613_v48 = vadd.f32 %v9381_v18, %v16286_v42  ;;  %v9383_v1 = vrot.slane %v8857_v13, 4  ;;  %v8017_v27 = vadd.f32 %v7895_v41, %v16288_v33  ;;  %v16294_v17 = vld [vmem:[#allocation99_spill] sm:$0xff]  ;;  %v16302_v33 = vld [vmem:[#allocation77_spill] sm:$0xff] }
 0x4f0   : > { %9722 = vst [vmem:[%s14475_s5 + $0x318] sm:$0xff] %v9610_v22  ;;  %v9611_v2 = vadd.f32 %v9382_v28, %v16287_v52  ;;  %v7897_v19 = vpop.f32.mrf.mxu1  ;;  %v8739_v6 = vpop.f32.mrf.mxu0  ;;  %v8858_v57 = vadd.f32 %v8735_v47, %v8016_v45  ;;  %v16299_v22 = vld [vmem:[#allocation243_spill] sm:$0xff]  ;;  %v16300_v28 = vld [vmem:[#allocation74_spill] sm:$0xff] }
 0x4f1   : > { %9725 = vst [vmem:[%s14475_s5 + $0x330] sm:$0xf] %v9613_v48  ;;  %v9384_v14 = vsel %vm9202_vm1, %v9379_v49, %v9383_v1  ;;  %v9614_v4 = vadd.f32 %v9383_v1, %v14393_v21  ;;  %v8018_v9 = vadd.f32 %v7897_v19, %v16289_v56  ;;  %v8859_v20 = vadd.f32 %v8737_v40, %v8017_v27  ;;  %v16292_v21 = vld [vmem:[#allocation11_spill] sm:$0xff]  ;;  %v16296_v49 = vld [vmem:[#allocation12_spill] sm:$0xff]  ;;  %v16303_v19 = vld [vmem:[#allocation13_spill] sm:$0xff] }
 0x4f2   : > { %9723 = vst [vmem:[%s14475_s5 + $0x320] sm:$0xff] %v9611_v2  ;;  %v9612_v5 = vadd.f32 %v9384_v14, %v16290_v62  ;;  %v7899_v50 = vpop.f32.mrf.mxu1  ;;  %v8741_v11 = vpop.f32.mrf.mxu0  ;;  %v9385_v25 = vrot.slane %v8858_v57, 4  ;;  %v16301_v1 = vld [vmem:[#allocation108_spill] sm:$0xff] }
 0x4f3   : > { %9726 = vst [vmem:[%s14475_s5 + $0x338] sm:$0xf] %v9614_v4  ;;  %v8860_v36 = vadd.f32 %v8739_v6, %v8018_v9  ;;  %v8019_v23 = vadd.f32 %v7899_v50, %v16291_v3  ;;  %v9388_v38 = vrot.slane %v8859_v20, 4 }
 0x4f4   : > { %9724 = vst [vmem:[%s14475_s5 + $0x328] sm:$0xff] %v9612_v5  ;;  %v7903_v59 = vpop.f32.mrf.mxu1  ;;  %v8745_v44 = vpop.f32.mrf.mxu0 }
 0x4f5   : > { %v9386_v12 = vrot.slane %v8860_v36, 4  ;;  %v8861_v43 = vadd.f32 %v8741_v11, %v8019_v23  ;;  %v8020_v54 = vadd.f32 %v7903_v59, %v16292_v21 }
 0x4f6   : > { %v7905_v31 = vpop.f32.mrf.mxu1  ;;  %v8747_v53 = vpop.f32.mrf.mxu0 }
 0x4f7   : > { %v9387_v29 = vsel %vm9202_vm1, %v9385_v25, %v9386_v12  ;;  %v9389_v32 = vrot.slane %v8861_v43, 4  ;;  %v8862_v60 = vadd.f32 %v8745_v44, %v8020_v54  ;;  %v8021_v16 = vadd.f32 %v7905_v31, %v16293_v39 }
 0x4f8   : > { %v9615_v7 = vadd.f32 %v9387_v29, %v16294_v17  ;;  %v7907_v30 = vpop.f32.mrf.mxu1  ;;  %v8749_v37 = vpop.f32.mrf.mxu0 }
 0x4f9   : > { %v9390_v24 = vsel %vm9202_vm1, %v9388_v38, %v9389_v32  ;;  %v9391_v34 = vrot.slane %v8862_v60, 4  ;;  %v8863_v46 = vadd.f32 %v8747_v53, %v8021_v16  ;;  %v8022_v55 = vadd.f32 %v7907_v30, %v16295_v26 }
 0x4fa   : > { %9727 = vst [vmem:[%s14475_s5 + $0x340] sm:$0xff] %v9615_v7  ;;  %v9616_v61 = vadd.f32 %v9390_v24, %v16296_v49  ;;  %v7909_v0 = vpop.f32.mrf.mxu1  ;;  %v8751_v13 = vpop.f32.mrf.mxu0 }
 0x4fb   : > { %v9392_v10 = vsel %vm9202_vm1, %v9386_v12, %v9391_v34  ;;  %v9393_v51 = vrot.slane %v8863_v46, 4  ;;  %v8864_v35 = vadd.f32 %v8749_v37, %v8022_v55  ;;  %v8023_v47 = vadd.f32 %v7909_v0, %v16297_v15 }
 0x4fc   : > { %9728 = vst [vmem:[%s14475_s5 + $0x348] sm:$0xff] %v9616_v61  ;;  %v9617_v18 = vadd.f32 %v9392_v10, %v16298_v63 }
 0x4fd   : > { %v9394_v8 = vsel %vm9202_vm1, %v9389_v32, %v9393_v51  ;;  %v9395_v45 = vrot.slane %v8864_v35, 4  ;;  %v8865_v58 = vadd.f32 %v8751_v13, %v8023_v47 }
 0x4fe   : > { %9729 = vst [vmem:[%s14475_s5 + $0x350] sm:$0xff] %v9617_v18  ;;  %v9618_v41 = vadd.f32 %v9394_v8, %v16299_v22 }
 0x4ff   : > { %v9396_v40 = vsel %vm9202_vm1, %v9391_v34, %v9395_v45  ;;  %v9621_v42 = vadd.f32 %v9395_v45, %v16300_v28  ;;  %v9397_v48 = vrot.slane %v8865_v58, 4 }
 0x500   : > { %9730 = vst [vmem:[%s14475_s5 + $0x358] sm:$0xff] %v9618_v41  ;;  %v9619_v52 = vadd.f32 %v9396_v40, %v16301_v1 }
 0x501   : > { %9733 = vst [vmem:[%s14475_s5 + $0x370] sm:$0xf] %v9621_v42  ;;  %v9398_v2 = vsel %vm9202_vm1, %v9393_v51, %v9397_v48  ;;  %v9622_v27 = vadd.f32 %v9397_v48, %v16302_v33 }
 0x502   : > { %9731 = vst [vmem:[%s14475_s5 + $0x360] sm:$0xff] %v9619_v52  ;;  %v9620_v6 = vadd.f32 %v9398_v2, %v16303_v19 }
 0x503   : > { %9734 = vst [vmem:[%s14475_s5 + $0x378] sm:$0xf] %v9622_v27 }
 0x504   : > { %9732 = vst [vmem:[%s14475_s5 + $0x368] sm:$0xff] %v9620_v6 }
 0x505 PF: > { %s12_s9 = sadd.s32 1, %s11108_s9  }
 0x506   : > { %p9_p4 = scmp.ge.s32.totalorder %s12_s9, 4  }
 0x508   :  { %11 = sbr.rel (!%p9_p4) target bundleno = 1 (0x1), region = 66 }

</bundles_post_ra>
